<compile_context>
chip_gen: v6e
topology: v6e:2x2x1
jax: 0.10.0
libtpu: 0.0.40
codegen_flags: <defaults>
</compile_context>

<pallas_src>
import functools

import jax
import jax.numpy as jnp
from jax import lax
from jax.experimental import pallas as pl
from jax.experimental.pallas import tpu as pltpu

EPS = 1e-5
CG_PAD = 32   # per-tap K-slot (real rows: 24, zero rows: 8) -> aligned bf16 tiles


def _fused_bn_relu_gconv_kernel(x_ref, gamma_ref, beta_ref, w_ref, mask_ref,
                                o_ref, ypad_ref, xcol_ref, *,
                                gb, cg, h, w, kh, kw):
    """Fused BatchNorm (batch stats) + ReLU + grouped 3x3 conv for `gb` groups.

    x_ref     : (gb, cg, h*w)               f32  input activations, flat spatial
    gamma_ref : (gb, cg, 1)                 f32
    beta_ref  : (gb, cg, 1)                 f32
    w_ref     : (gb, cog, kh*kw*CG_PAD)     bf16 weights, k = t*CG_PAD + ci
    mask_ref  : (2, 1, h*w)                 bf16 column-validity masks
    o_ref     : (gb, cog, h*w)              f32
    ypad_ref  : (gb, CG_PAD, h*w + 2*pad)   bf16 scratch: zero-padded flat acts
    xcol_ref  : (gb, kh*kw*CG_PAD, h*w)     bf16 scratch: im2col matrix
    """
    hw = h * w
    pad = ((kh - 1) // 2) * w + (kw - 1) // 2   # max |flat shift| of a tap (=15)
    cg_pad = ypad_ref.shape[1]

    # ---- BatchNorm (biased batch stats over N*H*W), one pass, f32 + ReLU ----
    x = x_ref[...]
    inv_n = 1.0 / hw
    s1 = jnp.sum(x, axis=-1, keepdims=True)
    s2 = jnp.sum(x * x, axis=-1, keepdims=True)
    mean = s1 * inv_n
    var = jnp.maximum(s2 * inv_n - mean * mean, 0.0)
    scale = gamma_ref[...] * lax.rsqrt(var + EPS)
    shift = beta_ref[...] - mean * scale
    # single early bf16 cast (MXU operand dtype); all further traffic is bf16
    y = jnp.maximum(x * scale + shift, 0.0).astype(jnp.bfloat16)

    # ---- zero-padded flat layout: [pad zeros | y | pad zeros] along lanes ----
    # Rows cg..cg_pad-1 stay zero too (they feed the zero-weight K rows).
    # Fully rewritten every step -> no cross-step scratch dependence.
    ypad_ref[...] = jnp.zeros_like(ypad_ref)
    ypad_ref[:, 0:cg, pad:pad + hw] = y

    # ---- bf16 im2col: one aligned 32-row store per tap, for all groups ----
    # Row-boundary overflow lands in the zero pads; the horizontal wrap-around
    # of the flat layout is killed by the left/right column masks (3x3, pad 1).
    left = mask_ref[0]    # (1, hw): 0 where output col == 0     (dj == 0 taps)
    right = mask_ref[1]   # (1, hw): 0 where output col == w - 1 (dj == kw-1 taps)
    for t in range(kh * kw):
        di, dj = t // kw, t % kw
        s = (di - (kh - 1) // 2) * w + (dj - (kw - 1) // 2)
        blk = ypad_ref[:, :, pad + s:pad + s + hw]          # (gb, cg_pad, hw) bf16
        if dj == 0:
            blk = blk * left
        elif dj == kw - 1:
            blk = blk * right
        xcol_ref[:, t * cg_pad:(t + 1) * cg_pad, :] = blk   # offset multiple of 32

    # ---- single batched MXU contraction: bf16 operands, f32 accumulate ----
    o_ref[...] = lax.dot_general(
        w_ref[...], xcol_ref[...],
        dimension_numbers=(((2,), (1,)), ((0,), (0,))),
        preferred_element_type=jnp.float32)


def prepare_conv_weight(weight, groups, cg_pad=CG_PAD):
    """One-time relayout: OIHW (Co, Cg, KH, KW) -> (G, Cog, KH*KW*cg_pad) bf16,
    k = (di*KW + dj)*cg_pad + ci, with zero rows for ci in [Cg, cg_pad)."""
    co, cg, kh, kw = weight.shape
    g = groups
    cog = co // g
    w5 = weight.reshape(g, cog, cg, kh, kw).transpose(0, 1, 3, 4, 2)   # (g,cog,kh,kw,cg)
    w5 = w5.reshape(g, cog, kh * kw, cg)
    w5 = jnp.pad(w5, ((0, 0), (0, 0), (0, 0), (0, cg_pad - cg)))
    return w5.reshape(g, cog, kh * kw * cg_pad).astype(jnp.bfloat16)


@functools.partial(jax.jit, static_argnames=("groups", "kh", "kw"))
def bn_relu_groupconv(x, gamma, beta, w_packed, *, groups, kh=3, kw=3):
    n, c, h, w = x.shape
    assert n == 1, "kernel is specialized for the module's batch=1 input"
    assert kh == 3 and kw == 3, "mask construction assumes a 3x3 window, pad 1"
    g = groups
    cg = c // g
    cog = w_packed.shape[1]
    kdim = w_packed.shape[2]
    hw = h * w
    assert kdim == kh * kw * CG_PAD

    # Two grid steps (12 groups each); "parallel" lets v7x's two TensorCores
    # each take one step.  TODO(synk): sweep grid=(1,) on single-TC v5e/v6e.
    gb = g // 2 if g % 2 == 0 else g
    grid = g // gb
    pad = ((kh - 1) // 2) * w + (kw - 1) // 2

    x3 = x.reshape(g, cg, hw).astype(jnp.float32)          # contiguous: free
    gamma3 = gamma.reshape(g, cg, 1).astype(jnp.float32)
    beta3 = beta.reshape(g, cg, 1).astype(jnp.float32)

    # Small (2, 1, hw) column masks; broadcast over channels inside the kernel.
    col = jnp.arange(hw, dtype=jnp.int32) % w
    colmask = jnp.stack([col != 0, col != (w - 1)]).astype(jnp.bfloat16)
    colmask = colmask.reshape(2, 1, hw)

    kernel = functools.partial(_fused_bn_relu_gconv_kernel,
                               gb=gb, cg=cg, h=h, w=w, kh=kh, kw=kw)

    flops = 2 * (g * cog) * cg * kh * kw * hw            # ~4.9e7
    bytes_accessed = (x3.size + g * cog * hw) * 4 + w_packed.size * 2

    out = pl.pallas_call(
        kernel,
        out_shape=jax.ShapeDtypeStruct((g, cog, hw), jnp.float32),
        grid=(grid,),
        in_specs=[
            pl.BlockSpec((gb, cg, hw), lambda i: (i, 0, 0)),
            pl.BlockSpec((gb, cg, 1), lambda i: (i, 0, 0)),
            pl.BlockSpec((gb, cg, 1), lambda i: (i, 0, 0)),
            pl.BlockSpec((gb, cog, kdim), lambda i: (i, 0, 0)),
            pl.BlockSpec((2, 1, hw), lambda i: (0, 0, 0)),
        ],
        out_specs=pl.BlockSpec((gb, cog, hw), lambda i: (i, 0, 0)),
        scratch_shapes=[
            pltpu.VMEM((gb, CG_PAD, hw + 2 * pad), jnp.bfloat16),      # ypad
            pltpu.VMEM((gb, kh * kw * CG_PAD, hw), jnp.bfloat16),      # im2col
        ],
        compiler_params=pltpu.CompilerParams(
            dimension_semantics=("parallel",)),
        cost_estimate=pl.CostEstimate(flops=flops, transcendentals=c,
                                      bytes_accessed=bytes_accessed),
    )(x3, gamma3, beta3, w_packed, colmask)

    return out.reshape(1, g * cog, h, w)                   # contiguous: free


if __name__ == "__main__":
    key = jax.random.PRNGKey(0)
    k1, k2, k3, k4 = jax.random.split(key, 4)

    N, C, H, W = 1, 576, 14, 14
    G = 24
    Cg = C // G

    x = jax.random.normal(k1, (N, C, H, W), dtype=jnp.float32)
    gamma = jax.random.uniform(k2, (C,), dtype=jnp.float32, minval=0.5, maxval=1.5)
    beta = jax.random.normal(k3, (C,), dtype=jnp.float32) * 0.1
    weight = jax.random.normal(k4, (C, Cg, 3, 3), dtype=jnp.float32) * 0.05

    w_packed = prepare_conv_weight(weight, G)   # one-time weight relayout (static)
    out = bn_relu_groupconv(x, gamma, beta, w_packed, groups=G)
    out = jax.block_until_ready(out)
    assert out.shape == (1, C, H, W), out.shape

    # ---- pure-JAX references ----
    # TODO(synk): running_mean/running_var momentum updates are a training-time
    # buffer side effect (not part of the returned tensor) and are not modeled.
    mean = jnp.mean(x, axis=(0, 2, 3), keepdims=True)
    var = jnp.mean((x - mean) ** 2, axis=(0, 2, 3), keepdims=True)
    y = (x - mean) * jax.lax.rsqrt(var + EPS)
    y = y * gamma.reshape(1, C, 1, 1) + beta.reshape(1, C, 1, 1)
    y = jnp.maximum(y, 0.0)

    conv = functools.partial(
        jax.lax.conv_general_dilated, window_strides=(1, 1),
        padding=((1, 1), (1, 1)),
        dimension_numbers=("NCHW", "OIHW", "NCHW"), feature_group_count=G,
        precision=jax.lax.Precision.HIGHEST)

    ref_f32 = conv(y, weight)                                      # exact f32 module
    ref_bf16 = conv(y.astype(jnp.bfloat16).astype(jnp.float32),    # same bf16 MXU
                    weight.astype(jnp.bfloat16).astype(jnp.float32))  # quantization

    err_bf16 = float(jnp.max(jnp.abs(out - ref_bf16)))
    err_f32 = float(jnp.max(jnp.abs(out - ref_f32)))
    # Tight check against the reference computed with the same bf16 operand
    # quantization (validates the kernel), plus a loose check against the exact
    # f32 module output (bounds the bf16 input-rounding error).
    assert jnp.allclose(out, ref_bf16, rtol=5e-3, atol=5e-3), err_bf16
    assert jnp.allclose(out, ref_f32, rtol=3e-2, atol=3e-2), err_f32
    print("KERNEL_OK")
</pallas_src>

<mosaic_0001>
module attributes {stable_mosaic.version = 11 : i64} {
  func.func @_fused_bn_relu_gconv_kernel(%arg0: i32, %arg1: memref<12x24x196xf32, #tpu.memory_space<vmem>>, %arg2: memref<12x24x1xf32, #tpu.memory_space<vmem>>, %arg3: memref<12x24x1xf32, #tpu.memory_space<vmem>>, %arg4: memref<12x24x288xbf16, #tpu.memory_space<vmem>>, %arg5: memref<2x1x196xbf16, #tpu.memory_space<vmem>>, %arg6: memref<12x24x196xf32, #tpu.memory_space<vmem>>, %arg7: memref<12x32x226xbf16, #tpu.memory_space<vmem>>, %arg8: memref<12x288x196xbf16, #tpu.memory_space<vmem>>) attributes {dimension_semantics = [#tpu.dimension_semantics<parallel>], iteration_bounds = array<i64: 2>, scalar_prefetch = 0 : i64, scratch_operands = 2 : i64, tpu.core_type = #tpu.core_type<tc>, window_params = [{transform_indices = @transform_0, window_bounds = array<i64: 12, 24, 196>}, {transform_indices = @transform_1, window_bounds = array<i64: 12, 24, 1>}, {transform_indices = @transform_2, window_bounds = array<i64: 12, 24, 1>}, {transform_indices = @transform_3, window_bounds = array<i64: 12, 24, 288>}, {pipeline_mode = #tpu.pipeline_mode<synchronous>, transform_indices = @transform_4, window_bounds = array<i64: 2, 1, 196>}, {transform_indices = @transform_5, window_bounds = array<i64: 12, 24, 196>}]} {
    %c0 = arith.constant 0 : index
    %c0_0 = arith.constant 0 : index
    %c0_1 = arith.constant 0 : index
    %0 = vector.load %arg1[%c0, %c0_0, %c0_1] : memref<12x24x196xf32, #tpu.memory_space<vmem>>, vector<12x24x196xf32>
    %cst = arith.constant dense<0.000000e+00> : vector<12x24xf32>
    %1 = vector.multi_reduction <add>, %0, %cst [2] : vector<12x24x196xf32> to vector<12x24xf32>
    %2 = vector.shape_cast %1 : vector<12x24xf32> to vector<12x24x1xf32>
    %3 = arith.mulf %0, %0 : vector<12x24x196xf32>
    %cst_2 = arith.constant dense<0.000000e+00> : vector<12x24xf32>
    %4 = vector.multi_reduction <add>, %3, %cst_2 [2] : vector<12x24x196xf32> to vector<12x24xf32>
    %5 = vector.shape_cast %4 : vector<12x24xf32> to vector<12x24x1xf32>
    %cst_3 = arith.constant 0.00510204071 : f32
    %6 = vector.broadcast %cst_3 : f32 to vector<12x24x1xf32>
    %7 = arith.mulf %2, %6 : vector<12x24x1xf32>
    %cst_4 = arith.constant 0.00510204071 : f32
    %8 = vector.broadcast %cst_4 : f32 to vector<12x24x1xf32>
    %9 = arith.mulf %5, %8 : vector<12x24x1xf32>
    %10 = arith.mulf %7, %7 : vector<12x24x1xf32>
    %11 = arith.subf %9, %10 : vector<12x24x1xf32>
    %cst_5 = arith.constant 0.000000e+00 : f32
    %12 = vector.broadcast %cst_5 : f32 to vector<12x24x1xf32>
    %13 = arith.maximumf %11, %12 : vector<12x24x1xf32>
    %c0_6 = arith.constant 0 : index
    %c0_7 = arith.constant 0 : index
    %c0_8 = arith.constant 0 : index
    %14 = vector.load %arg2[%c0_6, %c0_7, %c0_8] : memref<12x24x1xf32, #tpu.memory_space<vmem>>, vector<12x24x1xf32>
    %cst_9 = arith.constant 9.99999974E-6 : f32
    %15 = vector.broadcast %cst_9 : f32 to vector<12x24x1xf32>
    %16 = arith.addf %13, %15 : vector<12x24x1xf32>
    %17 = math.rsqrt %16 : vector<12x24x1xf32>
    %18 = arith.mulf %14, %17 : vector<12x24x1xf32>
    %c0_10 = arith.constant 0 : index
    %c0_11 = arith.constant 0 : index
    %c0_12 = arith.constant 0 : index
    %19 = vector.load %arg3[%c0_10, %c0_11, %c0_12] : memref<12x24x1xf32, #tpu.memory_space<vmem>>, vector<12x24x1xf32>
    %20 = arith.mulf %7, %18 : vector<12x24x1xf32>
    %21 = arith.subf %19, %20 : vector<12x24x1xf32>
    %22 = vector.broadcast %18 : vector<12x24x1xf32> to vector<12x24x196xf32>
    %23 = arith.mulf %0, %22 : vector<12x24x196xf32>
    %24 = vector.broadcast %21 : vector<12x24x1xf32> to vector<12x24x196xf32>
    %25 = arith.addf %23, %24 : vector<12x24x196xf32>
    %cst_13 = arith.constant 0.000000e+00 : f32
    %26 = vector.broadcast %cst_13 : f32 to vector<12x24x196xf32>
    %27 = arith.maximumf %25, %26 : vector<12x24x196xf32>
    %28 = arith.truncf %27 : vector<12x24x196xf32> to vector<12x24x196xbf16>
    %cst_14 = arith.constant 0.000000e+00 : bf16
    %29 = vector.broadcast %cst_14 : bf16 to vector<12x32x226xbf16>
    %c0_15 = arith.constant 0 : index
    %c0_16 = arith.constant 0 : index
    %c0_17 = arith.constant 0 : index
    %30 = vector.load %arg7[%c0_15, %c0_16, %c0_17] : memref<12x32x226xbf16, #tpu.memory_space<vmem>>, vector<12x32x226xbf16>
    tpu.vector_store %arg7[%c0_15, %c0_16, %c0_17], %29 {strides = array<i32>} : memref<12x32x226xbf16, #tpu.memory_space<vmem>>, vector<12x32x226xbf16>,
    %c0_18 = arith.constant 0 : index
    %c0_19 = arith.constant 0 : index
    %c15 = arith.constant 15 : index
    %31 = vector.load %arg7[%c0_18, %c0_19, %c15] : memref<12x32x226xbf16, #tpu.memory_space<vmem>>, vector<12x24x196xbf16>
    tpu.vector_store %arg7[%c0_18, %c0_19, %c15], %28 {strides = array<i32>} : memref<12x32x226xbf16, #tpu.memory_space<vmem>>, vector<12x24x196xbf16>,
    %c0_20 = arith.constant 0 : index
    %c0_21 = arith.constant 0 : index
    %c0_22 = arith.constant 0 : index
    %32 = vector.load %arg5[%c0_20, %c0_21, %c0_22] : memref<2x1x196xbf16, #tpu.memory_space<vmem>>, vector<1x1x196xbf16>
    %33 = vector.shape_cast %32 : vector<1x1x196xbf16> to vector<1x196xbf16>
    %c1 = arith.constant 1 : index
    %c0_23 = arith.constant 0 : index
    %c0_24 = arith.constant 0 : index
    %34 = vector.load %arg5[%c1, %c0_23, %c0_24] : memref<2x1x196xbf16, #tpu.memory_space<vmem>>, vector<1x1x196xbf16>
    %35 = vector.shape_cast %34 : vector<1x1x196xbf16> to vector<1x196xbf16>
    %c0_25 = arith.constant 0 : index
    %c0_26 = arith.constant 0 : index
    %c0_27 = arith.constant 0 : index
    %36 = vector.load %arg7[%c0_25, %c0_26, %c0_27] : memref<12x32x226xbf16, #tpu.memory_space<vmem>>, vector<12x32x196xbf16>
    %37 = vector.shape_cast %33 : vector<1x196xbf16> to vector<1x1x196xbf16>
    %38 = vector.broadcast %37 : vector<1x1x196xbf16> to vector<12x32x196xbf16>
    %39 = arith.mulf %36, %38 : vector<12x32x196xbf16>
    %c0_28 = arith.constant 0 : index
    %c0_29 = arith.constant 0 : index
    %c0_30 = arith.constant 0 : index
    %40 = vector.load %arg8[%c0_28, %c0_29, %c0_30] : memref<12x288x196xbf16, #tpu.memory_space<vmem>>, vector<12x32x196xbf16>
    tpu.vector_store %arg8[%c0_28, %c0_29, %c0_30], %39 {strides = array<i32>} : memref<12x288x196xbf16, #tpu.memory_space<vmem>>, vector<12x32x196xbf16>,
    %c0_31 = arith.constant 0 : index
    %c0_32 = arith.constant 0 : index
    %c1_33 = arith.constant 1 : index
    %41 = vector.load %arg7[%c0_31, %c0_32, %c1_33] : memref<12x32x226xbf16, #tpu.memory_space<vmem>>, vector<12x32x196xbf16>
    %c0_34 = arith.constant 0 : index
    %c32 = arith.constant 32 : index
    %c0_35 = arith.constant 0 : index
    %42 = vector.load %arg8[%c0_34, %c32, %c0_35] : memref<12x288x196xbf16, #tpu.memory_space<vmem>>, vector<12x32x196xbf16>
    tpu.vector_store %arg8[%c0_34, %c32, %c0_35], %41 {strides = array<i32>} : memref<12x288x196xbf16, #tpu.memory_space<vmem>>, vector<12x32x196xbf16>,
    %c0_36 = arith.constant 0 : index
    %c0_37 = arith.constant 0 : index
    %c2 = arith.constant 2 : index
    %43 = vector.load %arg7[%c0_36, %c0_37, %c2] : memref<12x32x226xbf16, #tpu.memory_space<vmem>>, vector<12x32x196xbf16>
    %44 = vector.shape_cast %35 : vector<1x196xbf16> to vector<1x1x196xbf16>
    %45 = vector.broadcast %44 : vector<1x1x196xbf16> to vector<12x32x196xbf16>
    %46 = arith.mulf %43, %45 : vector<12x32x196xbf16>
    %c0_38 = arith.constant 0 : index
    %c64 = arith.constant 64 : index
    %c0_39 = arith.constant 0 : index
    %47 = vector.load %arg8[%c0_38, %c64, %c0_39] : memref<12x288x196xbf16, #tpu.memory_space<vmem>>, vector<12x32x196xbf16>
    tpu.vector_store %arg8[%c0_38, %c64, %c0_39], %46 {strides = array<i32>} : memref<12x288x196xbf16, #tpu.memory_space<vmem>>, vector<12x32x196xbf16>,
    %c0_40 = arith.constant 0 : index
    %c0_41 = arith.constant 0 : index
    %c14 = arith.constant 14 : index
    %48 = vector.load %arg7[%c0_40, %c0_41, %c14] : memref<12x32x226xbf16, #tpu.memory_space<vmem>>, vector<12x32x196xbf16>
    %49 = vector.shape_cast %33 : vector<1x196xbf16> to vector<1x1x196xbf16>
    %50 = vector.broadcast %49 : vector<1x1x196xbf16> to vector<12x32x196xbf16>
    %51 = arith.mulf %48, %50 : vector<12x32x196xbf16>
    %c0_42 = arith.constant 0 : index
    %c96 = arith.constant 96 : index
    %c0_43 = arith.constant 0 : index
    %52 = vector.load %arg8[%c0_42, %c96, %c0_43] : memref<12x288x196xbf16, #tpu.memory_space<vmem>>, vector<12x32x196xbf16>
    tpu.vector_store %arg8[%c0_42, %c96, %c0_43], %51 {strides = array<i32>} : memref<12x288x196xbf16, #tpu.memory_space<vmem>>, vector<12x32x196xbf16>,
    %c0_44 = arith.constant 0 : index
    %c0_45 = arith.constant 0 : index
    %c15_46 = arith.constant 15 : index
    %53 = vector.load %arg7[%c0_44, %c0_45, %c15_46] : memref<12x32x226xbf16, #tpu.memory_space<vmem>>, vector<12x32x196xbf16>
    %c0_47 = arith.constant 0 : index
    %c128 = arith.constant 128 : index
    %c0_48 = arith.constant 0 : index
    %54 = vector.load %arg8[%c0_47, %c128, %c0_48] : memref<12x288x196xbf16, #tpu.memory_space<vmem>>, vector<12x32x196xbf16>
    tpu.vector_store %arg8[%c0_47, %c128, %c0_48], %53 {strides = array<i32>} : memref<12x288x196xbf16, #tpu.memory_space<vmem>>, vector<12x32x196xbf16>,
    %c0_49 = arith.constant 0 : index
    %c0_50 = arith.constant 0 : index
    %c16 = arith.constant 16 : index
    %55 = vector.load %arg7[%c0_49, %c0_50, %c16] : memref<12x32x226xbf16, #tpu.memory_space<vmem>>, vector<12x32x196xbf16>
    %56 = vector.shape_cast %35 : vector<1x196xbf16> to vector<1x1x196xbf16>
    %57 = vector.broadcast %56 : vector<1x1x196xbf16> to vector<12x32x196xbf16>
    %58 = arith.mulf %55, %57 : vector<12x32x196xbf16>
    %c0_51 = arith.constant 0 : index
    %c160 = arith.constant 160 : index
    %c0_52 = arith.constant 0 : index
    %59 = vector.load %arg8[%c0_51, %c160, %c0_52] : memref<12x288x196xbf16, #tpu.memory_space<vmem>>, vector<12x32x196xbf16>
    tpu.vector_store %arg8[%c0_51, %c160, %c0_52], %58 {strides = array<i32>} : memref<12x288x196xbf16, #tpu.memory_space<vmem>>, vector<12x32x196xbf16>,
    %c0_53 = arith.constant 0 : index
    %c0_54 = arith.constant 0 : index
    %c28 = arith.constant 28 : index
    %60 = vector.load %arg7[%c0_53, %c0_54, %c28] : memref<12x32x226xbf16, #tpu.memory_space<vmem>>, vector<12x32x196xbf16>
    %61 = vector.shape_cast %33 : vector<1x196xbf16> to vector<1x1x196xbf16>
    %62 = vector.broadcast %61 : vector<1x1x196xbf16> to vector<12x32x196xbf16>
    %63 = arith.mulf %60, %62 : vector<12x32x196xbf16>
    %c0_55 = arith.constant 0 : index
    %c192 = arith.constant 192 : index
    %c0_56 = arith.constant 0 : index
    %64 = vector.load %arg8[%c0_55, %c192, %c0_56] : memref<12x288x196xbf16, #tpu.memory_space<vmem>>, vector<12x32x196xbf16>
    tpu.vector_store %arg8[%c0_55, %c192, %c0_56], %63 {strides = array<i32>} : memref<12x288x196xbf16, #tpu.memory_space<vmem>>, vector<12x32x196xbf16>,
    %c0_57 = arith.constant 0 : index
    %c0_58 = arith.constant 0 : index
    %c29 = arith.constant 29 : index
    %65 = vector.load %arg7[%c0_57, %c0_58, %c29] : memref<12x32x226xbf16, #tpu.memory_space<vmem>>, vector<12x32x196xbf16>
    %c0_59 = arith.constant 0 : index
    %c224 = arith.constant 224 : index
    %c0_60 = arith.constant 0 : index
    %66 = vector.load %arg8[%c0_59, %c224, %c0_60] : memref<12x288x196xbf16, #tpu.memory_space<vmem>>, vector<12x32x196xbf16>
    tpu.vector_store %arg8[%c0_59, %c224, %c0_60], %65 {strides = array<i32>} : memref<12x288x196xbf16, #tpu.memory_space<vmem>>, vector<12x32x196xbf16>,
    %c0_61 = arith.constant 0 : index
    %c0_62 = arith.constant 0 : index
    %c30 = arith.constant 30 : index
    %67 = vector.load %arg7[%c0_61, %c0_62, %c30] : memref<12x32x226xbf16, #tpu.memory_space<vmem>>, vector<12x32x196xbf16>
    %68 = vector.shape_cast %35 : vector<1x196xbf16> to vector<1x1x196xbf16>
    %69 = vector.broadcast %68 : vector<1x1x196xbf16> to vector<12x32x196xbf16>
    %70 = arith.mulf %67, %69 : vector<12x32x196xbf16>
    %c0_63 = arith.constant 0 : index
    %c256 = arith.constant 256 : index
    %c0_64 = arith.constant 0 : index
    %71 = vector.load %arg8[%c0_63, %c256, %c0_64] : memref<12x288x196xbf16, #tpu.memory_space<vmem>>, vector<12x32x196xbf16>
    tpu.vector_store %arg8[%c0_63, %c256, %c0_64], %70 {strides = array<i32>} : memref<12x288x196xbf16, #tpu.memory_space<vmem>>, vector<12x32x196xbf16>,
    %c0_65 = arith.constant 0 : index
    %c0_66 = arith.constant 0 : index
    %c0_67 = arith.constant 0 : index
    %72 = vector.load %arg4[%c0_65, %c0_66, %c0_67] : memref<12x24x288xbf16, #tpu.memory_space<vmem>>, vector<12x24x288xbf16>
    %c0_68 = arith.constant 0 : index
    %c0_69 = arith.constant 0 : index
    %c0_70 = arith.constant 0 : index
    %73 = vector.load %arg8[%c0_68, %c0_69, %c0_70] : memref<12x288x196xbf16, #tpu.memory_space<vmem>>, vector<12x288x196xbf16>
    %cst_71 = arith.constant dense<0.000000e+00> : vector<12x24x196xf32>
    %74 = tpu.matmul %72, %73, %cst_71 {dimension_numbers = #tpu.dot_dimension_numbers<[2], [1], [1], [2], [0, 0, 0, 1, 1, 2], [0], [0]>} : vector<12x24x288xbf16>, vector<12x288x196xbf16>, vector<12x24x196xf32> -> vector<12x24x196xf32>
    %c0_72 = arith.constant 0 : index
    %c0_73 = arith.constant 0 : index
    %c0_74 = arith.constant 0 : index
    %75 = vector.load %arg6[%c0_72, %c0_73, %c0_74] : memref<12x24x196xf32, #tpu.memory_space<vmem>>, vector<12x24x196xf32>
    tpu.vector_store %arg6[%c0_72, %c0_73, %c0_74], %74 {strides = array<i32>} : memref<12x24x196xf32, #tpu.memory_space<vmem>>, vector<12x24x196xf32>,
    return
  }
  func.func @transform_0(%arg0: i32) -> (i32, i32, i32) {
    %c0_i32 = arith.constant 0 : i32
    %c0_i32_0 = arith.constant 0 : i32
    %c0_i32_1 = arith.constant 0 : i32
    return %arg0, %c0_i32, %c0_i32_0 : i32, i32, i32
  }
  func.func @transform_1(%arg0: i32) -> (i32, i32, i32) {
    %c0_i32 = arith.constant 0 : i32
    %c0_i32_0 = arith.constant 0 : i32
    %c0_i32_1 = arith.constant 0 : i32
    return %arg0, %c0_i32, %c0_i32_0 : i32, i32, i32
  }
  func.func @transform_2(%arg0: i32) -> (i32, i32, i32) {
    %c0_i32 = arith.constant 0 : i32
    %c0_i32_0 = arith.constant 0 : i32
    %c0_i32_1 = arith.constant 0 : i32
    return %arg0, %c0_i32, %c0_i32_0 : i32, i32, i32
  }
  func.func @transform_3(%arg0: i32) -> (i32, i32, i32) {
    %c0_i32 = arith.constant 0 : i32
    %c0_i32_0 = arith.constant 0 : i32
    %c0_i32_1 = arith.constant 0 : i32
    return %arg0, %c0_i32, %c0_i32_0 : i32, i32, i32
  }
  func.func @transform_4(%arg0: i32) -> (i32, i32, i32) {
    %c0_i32 = arith.constant 0 : i32
    %c0_i32_0 = arith.constant 0 : i32
    %c0_i32_1 = arith.constant 0 : i32
    %c0_i32_2 = arith.constant 0 : i32
    return %c0_i32, %c0_i32_0, %c0_i32_1 : i32, i32, i32
  }
  func.func @transform_5(%arg0: i32) -> (i32, i32, i32) {
    %c0_i32 = arith.constant 0 : i32
    %c0_i32_0 = arith.constant 0 : i32
    %c0_i32_1 = arith.constant 0 : i32
    return %arg0, %c0_i32, %c0_i32_0 : i32, i32, i32
  }
}

</mosaic_0001>

<bundles_post_ra>
// kernel: bn_relu_groupconv.1
= control target key start
LH: loop header
LB: loop body
LE: loop exit
PB: predicated region body
PF: predicated region fallthrough
CT: control target
= control target key end

     0   :  { %s11807_s18 = smov 0   ;;  %s16108_s0 = inlined_call_operand.vmem [shape: f32[24,24,196], index: 0, kind: input, shape index: {}]   ;;  %s16109_s1 = inlined_call_operand.vmem [shape: f32[24,24,1], index: 1, kind: input, shape index: {}]   ;;  %s16110_s2 = inlined_call_operand.vmem [shape: f32[24,24,1], index: 2, kind: input, shape index: {}]   ;;  %s16111_s3 = inlined_call_operand.vmem [shape: bf16[24,24,288], index: 3, kind: input, shape index: {}]   ;;  %s16112_s4 = inlined_call_operand.vmem [shape: bf16[2,1,196], index: 4, kind: input, shape index: {}]   ;;  %s16113_s5 = inlined_call_operand.vmem [shape: f32[24,24,196], index: 5, kind: output, shape index: {}]  }
   0x1 LB: > { %s10236_s19 = sadd.s32 4294967295, %s11759_s18   ;;  %p10240_p0 = scmp.ge.s32.totalorder %s11759_s18, 1  ;;  %s11759_s18 = sphi %s11807_s18, %s15_s18  }
   0x2   : > { %p225_p1 = scmp.lt.s32.totalorder %s11759_s18, 3 }
   0x4   : > { %p226_p2 = pnand %p10240_p0, %p225_p1 }
   0x6   : > { %229 = sbr.rel (%p226_p2) target bundleno = 1721 (0x6b9), region = 40 }
   0xb   : > { %s273_s20 = smul.u32 12, %s10236_s19  ;;  %vm381_vm0 = vcmask 556032   ;;  %vm1798_vm1 = vcmask 1043456   ;;  %vm1799_vm2 = vcmask 801796   ;;  %s11763_s9 = smov 15   ;;  %vm2367_vm4 = vcmask 556036  }
   0xc   : > { %vm12873_vm3 = vmor %vm1799_vm2, %vm1798_vm1  ;;  %s11764_s12 = smov 14   ;;  %s11765_s13 = smov 30   ;;  %vm2186_vm6 = vcmask 1043576   ;;  %vm2187_vm7 = vcmask 678916   ;;  %vm2113_vm8 = vcmask 121856   ;;  %vm3334_vm10 = vcmask 113664  }
   0xd   : > { %p274_p3 = scmp.lt.s32.totalorder %s273_s20, 23  ;;  %vm13133_vm5 = vmor %vm2367_vm4, %vm1798_vm1  ;;  %s11766_s14 = smov 2   ;;  %vm5421_vm11 = vcmask 244736   ;;  %vm2895_vm12 = vcmask 15360   ;;  %vm4597_vm13 = vcmask 228352   ;;  %vm2657_vm14 = vcmask 1039360  }
   0xe   : > { %s11767_s15 = smov 28   ;;  %s11768_s16 = smov 16   ;;  %vm13306_vm9 = vmor %vm2187_vm7, %vm2186_vm6  ;;  %vm4158_vm15 = vcmask 130048   ;;  %vm3577_vm1 = vcmask 932864   ;;  %vm5664_vm2 = vcmask 801792   ;;  %vm5225_vm4 = vcmask 809984  }
   0xf   : > { %s16238_s20 = smov (!%p274_p3, %s273_s20), 23  ;;  %s11769_s17 = smov 127   ;;  %vm6518_vm6 = vcmask 261120   ;;  %vm4840_vm7 = vcmask 818176  }
  0x10   : > { %s10853_s21 = smul.u32 48, %s16238_s20  ;;  %s11770_s19 = smov 114  }
  0x11   : > { %s10854_s25 = smul.u32 24, %s16238_s20  ;;  %s11771_s22 = smov 98  }
  0x12   : > { %s11823_s24 = scalar_lea.vmem %s16108_s0, %s10853_s21  ;;  %s11772_s23 = smov 126  }
  0x13   : > { %v11826_v0 = vld [vmem:[%s11823_s24 + $0x20] sm:$0xff]  ;;  %v11829_v1 = vld [vmem:[%s11823_s24 + $0x28] sm:$0xff]  ;;  %v11840_v5 = vld [vmem:[%s11823_s24 + $0x30] sm:$0xff]  ;;  %s12437_s28 = scalar_lea.vmem %s16109_s1, %s10854_s25  ;;  %s12701_s6 = scalar_lea.vmem %s16110_s2, %s10854_s25 }
  0x14   : > { %v11832_v2 = vld [vmem:[%s11823_s24] sm:$0xff]  ;;  %v390_v3 = vsel %vm381_vm0, %v11829_v1, 0.0  ;;  %v11837_v4 = vld [vmem:[%s11823_s24 + $0x8] sm:$0xff]  ;;  %v11843_v6 = vld [vmem:[%s11823_s24 + $0x38] sm:$0xff]  ;;  %s11774_s29 = smov 100   ;;  %s11775_s30 = smov 112  }
  0x15   : > { %v391_v7 = vadd.f32 %v390_v3, %v11826_v0  ;;  %v382_v8 = vsel %vm381_vm0, %v11837_v4, 0.0  ;;  %v394_v9 = vsel %vm381_vm0, %v11843_v6, 0.0  ;;  %v11851_v10 = vld [vmem:[%s11823_s24 + $0x10] sm:$0xff]  ;;  %v11854_v11 = vld [vmem:[%s11823_s24 + $0x18] sm:$0xff]  ;;  %v11863_v15 = vld [vmem:[%s11823_s24 + $0x48] sm:$0xff] }
  0x16   : > { %v383_v12 = vadd.f32 %v382_v8, %v11832_v2  ;;  %v386_v13 = vsel %vm381_vm0, %v11854_v11, 0.0  ;;  %v11860_v14 = vld [vmem:[%s11823_s24 + $0x58] sm:$0xff]  ;;  %v395_v16 = vadd.f32 %v394_v9, %v11840_v5  ;;  %v11868_v18 = vld [vmem:[%s11823_s24 + $0x50] sm:$0xff]  ;;  %v11873_v20 = vld [vmem:[%s11823_s24 + $0x40] sm:$0xff]  ;;  %v398_v21 = vsel %vm381_vm0, %v11863_v15, 0.0 }
  0x17   : > { %392 = vadd.xlane.f32.xlu1 %v391_v7  ;;  %v387_v17 = vadd.f32 %v386_v13, %v11851_v10  ;;  %v402_v19 = vsel %vm381_vm0, %v11860_v14, 0.0  ;;  %v11878_v22 = vld [vmem:[%s11823_s24 + $0x78] sm:$0xff]  ;;  %v11881_v23 = vld [vmem:[%s11823_s24 + $0x68] sm:$0xff]  ;;  %v399_v25 = vadd.f32 %v398_v21, %v11873_v20  ;;  %v11886_v26 = vld [vmem:[%s11823_s24 + $0x70] sm:$0xff] }
  0x18   : > { %384 = vadd.xlane.f32.xlu0 %v383_v12  ;;  %v403_v24 = vadd.f32 %v402_v19, %v11868_v18  ;;  %v410_v27 = vsel %vm381_vm0, %v11878_v22, 0.0  ;;  %v11891_v28 = vld [vmem:[%s11823_s24 + $0x60] sm:$0xff]  ;;  %v406_v29 = vsel %vm381_vm0, %v11881_v23, 0.0  ;;  %v11896_v30 = vld [vmem:[%s11823_s24 + $0x98] sm:$0xff]  ;;  %v11899_v31 = vld [vmem:[%s11823_s24 + $0x88] sm:$0xff] }
  0x19   : > { %v411_v32 = vadd.f32 %v410_v27, %v11886_v26  ;;  %v407_v33 = vadd.f32 %v406_v29, %v11891_v28  ;;  %v11904_v34 = vld [vmem:[%s11823_s24 + $0x90] sm:$0xff]  ;;  %v418_v35 = vsel %vm381_vm0, %v11896_v30, 0.0  ;;  %v11909_v36 = vld [vmem:[%s11823_s24 + $0x80] sm:$0xff]  ;;  %v414_v37 = vsel %vm381_vm0, %v11899_v31, 0.0  ;;  %v11914_v38 = vld [vmem:[%s11823_s24 + $0xb8] sm:$0xff] }
  0x1a   : > { %v11917_v39 = vld [vmem:[%s11823_s24 + $0xa8] sm:$0xff]  ;;  %v419_v40 = vadd.f32 %v418_v35, %v11904_v34  ;;  %v415_v41 = vadd.f32 %v414_v37, %v11909_v36  ;;  %v11922_v42 = vld [vmem:[%s11823_s24 + $0xb0] sm:$0xff]  ;;  %v426_v43 = vsel %vm381_vm0, %v11914_v38, 0.0  ;;  %v11927_v44 = vld [vmem:[%s11823_s24 + $0xa0] sm:$0xff] }
  0x1b   : > { %396 = vadd.xlane.f32.xlu1 %v395_v16  ;;  %v422_v45 = vsel %vm381_vm0, %v11917_v39, 0.0  ;;  %v11932_v46 = vld [vmem:[%s11823_s24 + $0xd8] sm:$0xff]  ;;  %v11935_v47 = vld [vmem:[%s11823_s24 + $0xc8] sm:$0xff]  ;;  %v427_v48 = vadd.f32 %v426_v43, %v11922_v42  ;;  %v11940_v50 = vld [vmem:[%s11823_s24 + $0xd0] sm:$0xff] }
  0x1c   : > { %388 = vadd.xlane.f32.xlu0 %v387_v17  ;;  %v423_v49 = vadd.f32 %v422_v45, %v11927_v44  ;;  %v434_v51 = vsel %vm381_vm0, %v11932_v46, 0.0  ;;  %v11945_v52 = vld [vmem:[%s11823_s24 + $0xc0] sm:$0xff]  ;;  %v430_v53 = vsel %vm381_vm0, %v11935_v47, 0.0  ;;  %v11950_v54 = vld [vmem:[%s11823_s24 + $0xf8] sm:$0xff]  ;;  %v11953_v55 = vld [vmem:[%s11823_s24 + $0xe8] sm:$0xff] }
  0x1d   : > { %v435_v56 = vadd.f32 %v434_v51, %v11940_v50  ;;  %v431_v57 = vadd.f32 %v430_v53, %v11945_v52  ;;  %v11958_v58 = vld [vmem:[%s11823_s24 + $0xf0] sm:$0xff]  ;;  %v442_v59 = vsel %vm381_vm0, %v11950_v54, 0.0  ;;  %v11963_v60 = vld [vmem:[%s11823_s24 + $0xe0] sm:$0xff]  ;;  %v438_v61 = vsel %vm381_vm0, %v11953_v55, 0.0  ;;  %v11968_v62 = vld [vmem:[%s11823_s24 + $0x118] sm:$0xff] }
  0x1e   : > { %v11971_v63 = vld [vmem:[%s11823_s24 + $0x108] sm:$0xff]  ;;  %v443_v3 = vadd.f32 %v442_v59, %v11958_v58  ;;  %v439_v7 = vadd.f32 %v438_v61, %v11963_v60  ;;  %v11976_v8 = vld [vmem:[%s11823_s24 + $0x110] sm:$0xff]  ;;  %v450_v9 = vsel %vm381_vm0, %v11968_v62, 0.0  ;;  %v11981_v12 = vld [vmem:[%s11823_s24 + $0x100] sm:$0xff] }
  0x1f   : > { %404 = vadd.xlane.f32.xlu1 %v403_v24  ;;  %v446_v13 = vsel %vm381_vm0, %v11971_v63, 0.0  ;;  %v11986_v16 = vld [vmem:[%s11823_s24 + $0x138] sm:$0xff]  ;;  %v11989_v17 = vld [vmem:[%s11823_s24 + $0x128] sm:$0xff]  ;;  %v451_v19 = vadd.f32 %v450_v9, %v11976_v8  ;;  %v11994_v24 = vld [vmem:[%s11823_s24 + $0x130] sm:$0xff] }
  0x20   : > { %400 = vadd.xlane.f32.xlu0 %v399_v25  ;;  %v447_v21 = vadd.f32 %v446_v13, %v11981_v12  ;;  %v458_v25 = vsel %vm381_vm0, %v11986_v16, 0.0  ;;  %v11999_v27 = vld [vmem:[%s11823_s24 + $0x120] sm:$0xff]  ;;  %v454_v29 = vsel %vm381_vm0, %v11989_v17, 0.0 }
  0x21   : > { %v459_v35 = vadd.f32 %v458_v25, %v11994_v24  ;;  %v455_v37 = vadd.f32 %v454_v29, %v11999_v27  ;;  %v12017_v43 = vld [vmem:[%s11823_s24 + $0x140] sm:$0xff] }
  0x22   : > { %v12035_v59 = vld [vmem:[%s11823_s24 + $0x160] sm:$0xff] }
  0x23   : > { %412 = vadd.xlane.f32.xlu1 %v411_v32  ;;  %v12004_v32 = vld [vmem:[%s11823_s24 + $0x158] sm:$0xff]  ;;  %v12053_v25 = vld [vmem:[%s11823_s24 + $0x180] sm:$0xff] }
  0x24   : > { %408 = vadd.xlane.f32.xlu0 %v407_v33  ;;  %v12007_v33 = vld [vmem:[%s11823_s24 + $0x148] sm:$0xff]  ;;  %16157 = vst [vmem:[#allocation7_spill] sm:$0xff] %v12053_v25 }
  0x25   : > { %v462_v45 = vsel %vm381_vm0, %v12007_v33, 0.0 }
  0x26   : > { %v463_v53 = vadd.f32 %v462_v45, %v12017_v43 }
  0x27   : > { %420 = vadd.xlane.f32.xlu1 %v419_v40  ;;  %v12012_v40 = vld [vmem:[%s11823_s24 + $0x150] sm:$0xff] }
  0x28   : > { %416 = vadd.xlane.f32.xlu0 %v415_v41  ;;  %v466_v41 = vsel %vm381_vm0, %v12004_v32, 0.0 }
  0x29   : > { %v467_v51 = vadd.f32 %v466_v41, %v12012_v40 }
  0x2b   : > { %428 = vadd.xlane.f32.xlu1 %v427_v48  ;;  %v12022_v48 = vld [vmem:[%s11823_s24 + $0x178] sm:$0xff] }
  0x2c   : > { %424 = vadd.xlane.f32.xlu0 %v423_v49  ;;  %v12025_v49 = vld [vmem:[%s11823_s24 + $0x168] sm:$0xff] }
  0x2d   : > { %v470_v61 = vsel %vm381_vm0, %v12025_v49, 0.0 }
  0x2e   : > { %v471_v13 = vadd.f32 %v470_v61, %v12035_v59 }
  0x2f   : > { %436 = vadd.xlane.f32.xlu1 %v435_v56  ;;  %v12030_v56 = vld [vmem:[%s11823_s24 + $0x170] sm:$0xff] }
  0x30   : > { %432 = vadd.xlane.f32.xlu0 %v431_v57  ;;  %v474_v57 = vsel %vm381_vm0, %v12022_v48, 0.0 }
  0x31   : > { %v475_v9 = vadd.f32 %v474_v57, %v12030_v56  ;;  %v12071_v57 = vld [vmem:[%s11823_s24 + $0x1a0] sm:$0xff] }
  0x32   : > { %16161 = vst [vmem:[#allocation11_spill] sm:$0xff] %v12071_v57 }
  0x33   : > { %444 = vadd.xlane.f32.xlu1 %v443_v3  ;;  %v12040_v3 = vld [vmem:[%s11823_s24 + $0x198] sm:$0xff] }
  0x34   : > { %440 = vadd.xlane.f32.xlu0 %v439_v7  ;;  %16154 = vst [vmem:[#allocation4_spill] sm:$0xff] %v12040_v3  ;;  %v12043_v7 = vld [vmem:[%s11823_s24 + $0x188] sm:$0xff] }
  0x35   : > { %16155 = vst [vmem:[#allocation5_spill] sm:$0xff] %v12043_v7  ;;  %v478_v29 = vsel %vm381_vm0, %v12043_v7, 0.0  ;;  %v12076_v7 = vld [vmem:[%s11823_s24 + $0x1d8] sm:$0xff] }
  0x36   : > { %v479_v45 = vadd.f32 %v478_v29, %v12053_v25  ;;  %16162 = vst [vmem:[#allocation12_spill] sm:$0xff] %v12076_v7  ;;  %v12084_v29 = vld [vmem:[%s11823_s24 + $0x1d0] sm:$0xff] }
  0x37   : > { %452 = vadd.xlane.f32.xlu1 %v451_v19  ;;  %v12048_v19 = vld [vmem:[%s11823_s24 + $0x190] sm:$0xff]  ;;  %16164 = vst [vmem:[#allocation14_spill] sm:$0xff] %v12084_v29 }
  0x38   : > { %448 = vadd.xlane.f32.xlu0 %v447_v21  ;;  %16156 = vst [vmem:[#allocation6_spill] sm:$0xff] %v12048_v19  ;;  %v482_v21 = vsel %vm381_vm0, %v12040_v3, 0.0  ;;  %v12133_v3 = vld [vmem:[%s11823_s24 + $0x228] sm:$0xff] }
  0x39   : > { %v483_v41 = vadd.f32 %v482_v21, %v12048_v19  ;;  %v12094_v19 = vld [vmem:[%s11823_s24 + $0x1f8] sm:$0xff]  ;;  %16173 = vst [vmem:[#allocation23_spill] sm:$0xff] %v12133_v3 }
  0x3a   : > { %16166 = vst [vmem:[#allocation16_spill] sm:$0xff] %v12094_v19 }
  0x3b   : > { %460 = vadd.xlane.f32.xlu1 %v459_v35  ;;  %v12058_v35 = vld [vmem:[%s11823_s24 + $0x1b8] sm:$0xff] }
  0x3c   : > { %456 = vadd.xlane.f32.xlu0 %v455_v37  ;;  %16158 = vst [vmem:[#allocation8_spill] sm:$0xff] %v12058_v35  ;;  %v12061_v37 = vld [vmem:[%s11823_s24 + $0x1a8] sm:$0xff] }
  0x3d   : > { %16159 = vst [vmem:[#allocation9_spill] sm:$0xff] %v12061_v37  ;;  %v486_v61 = vsel %vm381_vm0, %v12061_v37, 0.0  ;;  %v12089_v37 = vld [vmem:[%s11823_s24 + $0x1c0] sm:$0xff] }
  0x3e   : > { %v487_v21 = vadd.f32 %v486_v61, %v12071_v57  ;;  %16165 = vst [vmem:[#allocation15_spill] sm:$0xff] %v12089_v37  ;;  %v12102_v61 = vld [vmem:[%s11823_s24 + $0x1f0] sm:$0xff] }
  0x3f   : > { %468 = vadd.xlane.f32.xlu1 %v467_v51  ;;  %v12066_v51 = vld [vmem:[%s11823_s24 + $0x1b0] sm:$0xff] }
  0x40   : > { %464 = vadd.xlane.f32.xlu0 %v463_v53  ;;  %16160 = vst [vmem:[#allocation10_spill] sm:$0xff] %v12066_v51  ;;  %v490_v53 = vsel %vm381_vm0, %v12058_v35, 0.0  ;;  %v498_v35 = vsel %vm381_vm0, %v12076_v7, 0.0  ;;  %v506_v7 = vsel %vm381_vm0, %v12094_v19, 0.0 }
  0x43   : > { %476 = vadd.xlane.f32.xlu1 %v475_v9  ;;  %v12079_v9 = vld [vmem:[%s11823_s24 + $0x1c8] sm:$0xff] }
  0x44   : > { %472 = vadd.xlane.f32.xlu0 %v471_v13  ;;  %16163 = vst [vmem:[#allocation13_spill] sm:$0xff] %v12079_v9  ;;  %v491_v13 = vadd.f32 %v490_v53, %v12066_v51  ;;  %v494_v25 = vsel %vm381_vm0, %v12079_v9, 0.0  ;;  %v12107_v9 = vld [vmem:[%s11823_s24 + $0x1e0] sm:$0xff]  ;;  %v12112_v51 = vld [vmem:[%s11823_s24 + $0x218] sm:$0xff] }
  0x45   : > { %v495_v53 = vadd.f32 %v494_v25, %v12089_v37  ;;  %16168 = vst [vmem:[#allocation18_spill] sm:$0xff] %v12107_v9  ;;  %16169 = vst [vmem:[#allocation19_spill] sm:$0xff] %v12112_v51  ;;  %v514_v19 = vsel %vm381_vm0, %v12112_v51, 0.0  ;;  %v12125_v37 = vld [vmem:[%s11823_s24 + $0x200] sm:$0xff]  ;;  %v529_v51 = vmul.f32 %v11854_v11, %v11854_v11  ;;  %v526_v11 = vmul.f32 %v11832_v2, %v11832_v2 }
  0x46   : > { %16171 = vst [vmem:[#allocation21_spill] sm:$0xff] %v12125_v37  ;;  %v530_v2 = vmul.f32 %v11826_v0, %v11826_v0  ;;  %v534_v0 = vmul.f32 %v11873_v20, %v11873_v20  ;;  %v538_v20 = vmul.f32 %v11891_v28, %v11891_v28  ;;  %v542_v28 = vmul.f32 %v11909_v36, %v11909_v36 }
  0x47   : > { %484 = vadd.xlane.f32.xlu1 %v483_v41  ;;  %v12097_v41 = vld [vmem:[%s11823_s24 + $0x1e8] sm:$0xff]  ;;  %v546_v36 = vmul.f32 %v11927_v44, %v11927_v44  ;;  %v550_v44 = vmul.f32 %v11945_v52, %v11945_v52  ;;  %v554_v52 = vmul.f32 %v11963_v60, %v11963_v60  ;;  %v558_v60 = vmul.f32 %v11981_v12, %v11981_v12 }
  0x48   : > { %480 = vadd.xlane.f32.xlu0 %v479_v45  ;;  %16167 = vst [vmem:[#allocation17_spill] sm:$0xff] %v12097_v41  ;;  %v499_v45 = vadd.f32 %v498_v35, %v12084_v29  ;;  %v502_v57 = vsel %vm381_vm0, %v12097_v41, 0.0  ;;  %v507_v35 = vadd.f32 %v506_v7, %v12102_v61  ;;  %v12130_v29 = vld [vmem:[%s11823_s24 + $0x238] sm:$0xff]  ;;  %v562_v12 = vmul.f32 %v11999_v27, %v11999_v27 }
  0x49   : > { %v503_v25 = vadd.f32 %v502_v57, %v12107_v9  ;;  %16172 = vst [vmem:[#allocation22_spill] sm:$0xff] %v12130_v29  ;;  %v12145_v9 = vld [vmem:[%s11823_s24 + $0x220] sm:$0xff] }
  0x4b   : > { %492 = vadd.xlane.f32.xlu1 %v491_v13  ;;  %v12115_v13 = vld [vmem:[%s11823_s24 + $0x208] sm:$0xff] }
  0x4c   : > { %488 = vadd.xlane.f32.xlu0 %v487_v21  ;;  %16170 = vst [vmem:[#allocation20_spill] sm:$0xff] %v12115_v13  ;;  %v12120_v21 = vld [vmem:[%s11823_s24 + $0x210] sm:$0xff]  ;;  %v510_v41 = vsel %vm381_vm0, %v12115_v13, 0.0  ;;  %v518_v13 = vsel %vm381_vm0, %v12133_v3, 0.0  ;;  %v533_v3 = vmul.f32 %v11843_v6, %v11843_v6  ;;  %v537_v6 = vmul.f32 %v11860_v14, %v11860_v14 }
  0x4d   : > { %v515_v7 = vadd.f32 %v514_v19, %v12120_v21  ;;  %v511_v57 = vadd.f32 %v510_v41, %v12125_v37  ;;  %v528_v41 = vmul.f32 %v11851_v10, %v11851_v10  ;;  %v532_v10 = vmul.f32 %v11840_v5, %v11840_v5 }
  0x4e   : > { %v536_v5 = vmul.f32 %v11868_v18, %v11868_v18  ;;  %v541_v14 = vmul.f32 %v11878_v22, %v11878_v22  ;;  %v540_v18 = vmul.f32 %v11886_v26, %v11886_v26  ;;  %v545_v22 = vmul.f32 %v11896_v30, %v11896_v30 }
  0x4f   : > { %500 = vadd.xlane.f32.xlu1 %v499_v45  ;;  %v12138_v45 = vld [vmem:[%s11823_s24 + $0x230] sm:$0xff]  ;;  %v544_v26 = vmul.f32 %v11904_v34, %v11904_v34  ;;  %v549_v30 = vmul.f32 %v11914_v38, %v11914_v38  ;;  %v548_v34 = vmul.f32 %v11922_v42, %v11922_v42  ;;  %v553_v38 = vmul.f32 %v11932_v46, %v11932_v46 }
  0x50   : > { %496 = vadd.xlane.f32.xlu0 %v495_v53  ;;  %v522_v53 = vsel %vm381_vm0, %v12130_v29, 0.0  ;;  %v602_v29 = vsel %vm381_vm0, %v529_v51, 0.0  ;;  %v610_v51 = vsel %vm381_vm0, %v533_v3, 0.0  ;;  %v618_v3 = vsel %vm381_vm0, %v537_v6, 0.0 }
  0x51   : > { %v523_v19 = vadd.f32 %v522_v53, %v12138_v45  ;;  %v552_v42 = vmul.f32 %v11940_v50, %v11940_v50  ;;  %v557_v46 = vmul.f32 %v11950_v54, %v11950_v54  ;;  %v556_v50 = vmul.f32 %v11958_v58, %v11958_v58 }
  0x52   : > { %v561_v54 = vmul.f32 %v11968_v62, %v11968_v62  ;;  %v560_v58 = vmul.f32 %v11976_v8, %v11976_v8  ;;  %v565_v62 = vmul.f32 %v11986_v16, %v11986_v16  ;;  %v564_v8 = vmul.f32 %v11994_v24, %v11994_v24 }
  0x53   : > { %508 = vadd.xlane.f32.xlu1 %v507_v35  ;;  %v527_v35 = vmul.f32 %v11837_v4, %v11837_v4  ;;  %v531_v4 = vmul.f32 %v11829_v1, %v11829_v1  ;;  %v535_v1 = vmul.f32 %v11863_v15, %v11863_v15  ;;  %v539_v15 = vmul.f32 %v11881_v23, %v11881_v23 }
  0x54   : > { %504 = vadd.xlane.f32.xlu0 %v503_v25  ;;  %v519_v25 = vadd.f32 %v518_v13, %v12145_v9  ;;  %v543_v23 = vmul.f32 %v11899_v31, %v11899_v31  ;;  %v547_v31 = vmul.f32 %v11917_v39, %v11917_v39  ;;  %v551_v39 = vmul.f32 %v11935_v47, %v11935_v47 }
  0x55   : > { %v598_v37 = vsel %vm381_vm0, %v527_v35, 0.0  ;;  %v614_v53 = vsel %vm381_vm0, %v535_v1, 0.0  ;;  %v619_v35 = vadd.f32 %v618_v3, %v536_v5  ;;  %v555_v47 = vmul.f32 %v11953_v55, %v11953_v55 }
  0x56   : > { %v599_v13 = vadd.f32 %v598_v37, %v526_v11  ;;  %v638_v6 = vsel %vm381_vm0, %v547_v31, 0.0  ;;  %v646_v5 = vsel %vm381_vm0, %v551_v39, 0.0  ;;  %v559_v55 = vmul.f32 %v11971_v63, %v11971_v63  ;;  %v16175_v31 = vld [vmem:[#allocation5_spill] sm:$0xff] }
  0x57   : > { %516 = vadd.xlane.f32.xlu1 %v515_v7  ;;  %v603_v7 = vadd.f32 %v602_v29, %v528_v41  ;;  %v611_v29 = vadd.f32 %v610_v51, %v532_v10  ;;  %v626_v41 = vsel %vm381_vm0, %v541_v14, 0.0  ;;  %v630_v10 = vsel %vm381_vm0, %v543_v23, 0.0 }
  0x58   : > { %512 = vadd.xlane.f32.xlu0 %v511_v57  ;;  %v606_v57 = vsel %vm381_vm0, %v531_v4, 0.0  ;;  %v627_v11 = vadd.f32 %v626_v41, %v540_v18  ;;  %v631_v51 = vadd.f32 %v630_v10, %v542_v28  ;;  %v639_v1 = vadd.f32 %v638_v6, %v546_v36  ;;  %v16178_v6 = vld [vmem:[#allocation8_spill] sm:$0xff] }
  0x59   : > { %v607_v37 = vadd.f32 %v606_v57, %v530_v2  ;;  %v642_v2 = vsel %vm381_vm0, %v549_v30, 0.0  ;;  %v647_v3 = vadd.f32 %v646_v5, %v550_v44  ;;  %v654_v14 = vsel %vm381_vm0, %v555_v47, 0.0  ;;  %v16180_v44 = vld [vmem:[#allocation10_spill] sm:$0xff] }
  0x5a   : > { %v643_v57 = vadd.f32 %v642_v2, %v548_v34  ;;  %v662_v18 = vsel %vm381_vm0, %v559_v55, 0.0  ;;  %v563_v63 = vmul.f32 %v11989_v17, %v11989_v17  ;;  %v569_v16 = vmul.f32 %v12004_v32, %v12004_v32 }
  0x5b   : > { %524 = vadd.xlane.f32.xlu1 %v523_v19  ;;  %v615_v19 = vadd.f32 %v614_v53, %v534_v0  ;;  %v658_v0 = vsel %vm381_vm0, %v557_v46, 0.0  ;;  %v663_v41 = vadd.f32 %v662_v18, %v558_v60  ;;  %v567_v17 = vmul.f32 %v12007_v33, %v12007_v33  ;;  %v16185_v60 = vld [vmem:[#allocation15_spill] sm:$0xff]  ;;  %v16186_v18 = vld [vmem:[#allocation16_spill] sm:$0xff] }
  0x5c   : > { %520 = vadd.xlane.f32.xlu0 %v519_v25  ;;  %v622_v25 = vsel %vm381_vm0, %v539_v15, 0.0  ;;  %v659_v53 = vadd.f32 %v658_v0, %v556_v50  ;;  %v655_v15 = vadd.f32 %v654_v14, %v554_v52  ;;  %v568_v24 = vmul.f32 %v12012_v40, %v12012_v40 }
  0x5d   : > { %v623_v4 = vadd.f32 %v622_v25, %v538_v20  ;;  %v674_v20 = vsel %vm381_vm0, %v565_v62, 0.0  ;;  %v566_v23 = vmul.f32 %v12017_v43, %v12017_v43  ;;  %v682_v27 = vsel %vm381_vm0, %v569_v16, 0.0 }
  0x5e   : > { %v675_v25 = vadd.f32 %v674_v20, %v564_v8  ;;  %v573_v32 = vmul.f32 %v12022_v48, %v12022_v48  ;;  %v571_v33 = vmul.f32 %v12025_v49, %v12025_v49  ;;  %v683_v40 = vadd.f32 %v682_v27, %v568_v24  ;;  %v16174_v49 = vld [vmem:[#allocation4_spill] sm:$0xff]  ;;  %v16187_v8 = vld [vmem:[#allocation17_spill] sm:$0xff]  ;;  %v16189_v24 = vld [vmem:[#allocation19_spill] sm:$0xff] }
  0x5f   : > { %604 = vadd.xlane.f32.xlu1 %v603_v7  ;;  %v634_v7 = vsel %vm381_vm0, %v545_v22, 0.0  ;;  %v670_v22 = vsel %vm381_vm0, %v563_v63, 0.0  ;;  %v572_v43 = vmul.f32 %v12030_v56, %v12030_v56  ;;  %v570_v28 = vmul.f32 %v12035_v59, %v12035_v59  ;;  %v16190_v27 = vld [vmem:[#allocation20_spill] sm:$0xff] }
  0x60   : > { %600 = vadd.xlane.f32.xlu0 %v599_v13  ;;  %v635_v13 = vadd.f32 %v634_v7, %v544_v26  ;;  %v678_v26 = vsel %vm381_vm0, %v567_v17, 0.0  ;;  %v690_v48 = vsel %vm381_vm0, %v573_v32, 0.0  ;;  %v577_v30 = vmul.f32 %v16174_v49, %v16174_v49  ;;  %v16188_v17 = vld [vmem:[#allocation18_spill] sm:$0xff] }
  0x61   : > { %v679_v7 = vadd.f32 %v678_v26, %v566_v23  ;;  %v686_v10 = vsel %vm381_vm0, %v571_v33, 0.0  ;;  %v691_v34 = vadd.f32 %v690_v48, %v572_v43  ;;  %v581_v39 = vmul.f32 %v16178_v6, %v16178_v6  ;;  %v16191_v43 = vld [vmem:[#allocation21_spill] sm:$0xff]  ;;  %v16192_v48 = vld [vmem:[#allocation22_spill] sm:$0xff] }
  0x62   : > { %v687_v2 = vadd.f32 %v686_v10, %v570_v28  ;;  %v698_v36 = vsel %vm381_vm0, %v577_v30, 0.0  ;;  %v580_v46 = vmul.f32 %v16180_v44, %v16180_v44  ;;  %v582_v62 = vmul.f32 %v16185_v60, %v16185_v60  ;;  %v16193_v30 = vld [vmem:[#allocation23_spill] sm:$0xff] }
  0x63   : > { %612 = vadd.xlane.f32.xlu1 %v611_v29  ;;  %v650_v29 = vsel %vm381_vm0, %v553_v38, 0.0  ;;  %v16177_v38 = vld [vmem:[#allocation7_spill] sm:$0xff]  ;;  %v706_v47 = vsel %vm381_vm0, %v581_v39, 0.0  ;;  %v589_v63 = vmul.f32 %v16186_v18, %v16186_v18  ;;  %v593_v23 = vmul.f32 %v16189_v24, %v16189_v24 }
  0x64   : > { %608 = vadd.xlane.f32.xlu0 %v607_v37  ;;  %v651_v37 = vadd.f32 %v650_v29, %v552_v42  ;;  %v574_v59 = vmul.f32 %v16177_v38, %v16177_v38  ;;  %v16179_v42 = vld [vmem:[#allocation9_spill] sm:$0xff]  ;;  %v707_v55 = vadd.f32 %v706_v47, %v580_v46  ;;  %v591_v32 = vmul.f32 %v16190_v27, %v16190_v27 }
  0x65   : > { %v597_v28 = vmul.f32 %v16192_v48, %v16192_v48  ;;  %v595_v10 = vmul.f32 %v16193_v30, %v16193_v30 }
  0x66   : > { %v726_v49 = vsel %vm381_vm0, %v591_v32, 0.0 }
  0x67   : > { %620 = vadd.xlane.f32.xlu1 %v619_v35  ;;  %v666_v35 = vsel %vm381_vm0, %v561_v54, 0.0  ;;  %v16183_v54 = vld [vmem:[#allocation13_spill] sm:$0xff] }
  0x68   : > { %616 = vadd.xlane.f32.xlu0 %v615_v19  ;;  %v667_v19 = vadd.f32 %v666_v35, %v560_v58  ;;  %v583_v14 = vmul.f32 %v16183_v54, %v16183_v54 }
  0x6b   : > { %628 = vadd.xlane.f32.xlu1 %v627_v11  ;;  %v671_v11 = vadd.f32 %v670_v22, %v562_v12  ;;  %v588_v12 = vmul.f32 %v12102_v61, %v12102_v61  ;;  %v722_v22 = vsel %vm381_vm0, %v589_v63, 0.0  ;;  %v592_v61 = vmul.f32 %v12120_v21, %v12120_v21 }
  0x6c   : > { %624 = vadd.xlane.f32.xlu0 %v623_v4  ;;  %v16134_v4 = vmov 0   ;;  %v596_v21 = vmul.f32 %v12138_v45, %v12138_v45 }
  0x6d   : > { %10881 = vset.pattern.permute.xlu1 %v16134_v4  ;;  %10880 = vset.pattern.permute.xlu0 %v16134_v4  ;;  %v723_v26 = vadd.f32 %v722_v22, %v588_v12 }
  0x6e   : > { %6608 = vmatprep.mubr.bf16.mxu1 %v16134_v4 }
  0x6f   : > { %636 = vadd.xlane.f32.xlu1 %v635_v13  ;;  %v575_v13 = vmul.f32 %v16175_v31, %v16175_v31 }
  0x70   : > { %632 = vadd.xlane.f32.xlu0 %v631_v51  ;;  %v16176_v51 = vld [vmem:[#allocation6_spill] sm:$0xff] }
  0x71   : > { %v576_v56 = vmul.f32 %v16176_v51, %v16176_v51  ;;  %v594_v51 = vmul.f32 %v12145_v9, %v12145_v9 }
  0x73   : > { %644 = vadd.xlane.f32.xlu1 %v643_v57  ;;  %v694_v57 = vsel %vm381_vm0, %v575_v13, 0.0  ;;  %v699_v29 = vadd.f32 %v698_v36, %v576_v56  ;;  %v734_v56 = vsel %vm381_vm0, %v595_v10, 0.0 }
  0x74   : > { %640 = vadd.xlane.f32.xlu0 %v639_v1  ;;  %v579_v1 = vmul.f32 %v16179_v42, %v16179_v42  ;;  %v695_v5 = vadd.f32 %v694_v57, %v574_v59  ;;  %v735_v38 = vadd.f32 %v734_v56, %v594_v51 }
  0x76   : > { %v702_v52 = vsel %vm381_vm0, %v579_v1, 0.0 }
  0x77   : > { %652 = vadd.xlane.f32.xlu1 %v651_v37  ;;  %v16181_v37 = vld [vmem:[#allocation11_spill] sm:$0xff] }
  0x78   : > { %648 = vadd.xlane.f32.xlu0 %v647_v3  ;;  %v578_v50 = vmul.f32 %v16181_v37, %v16181_v37  ;;  %v16182_v3 = vld [vmem:[#allocation12_spill] sm:$0xff] }
  0x79   : > { %v585_v0 = vmul.f32 %v16182_v3, %v16182_v3 }
  0x7b   : > { %660 = vadd.xlane.f32.xlu1 %v659_v53  ;;  %v16184_v53 = vld [vmem:[#allocation14_spill] sm:$0xff]  ;;  %v714_v35 = vsel %vm381_vm0, %v585_v0, 0.0 }
  0x7c   : > { %656 = vadd.xlane.f32.xlu0 %v655_v15  ;;  %v584_v58 = vmul.f32 %v16184_v53, %v16184_v53  ;;  %v703_v15 = vadd.f32 %v702_v52, %v578_v50 }
  0x7e   : > { %v715_v20 = vadd.f32 %v714_v35, %v584_v58 }
  0x7f   : > { %668 = vadd.xlane.f32.xlu1 %v667_v19  ;;  %v710_v19 = vsel %vm381_vm0, %v583_v14, 0.0 }
  0x80   : > { %664 = vadd.xlane.f32.xlu0 %v663_v41  ;;  %v587_v41 = vmul.f32 %v16187_v8, %v16187_v8  ;;  %v711_v16 = vadd.f32 %v710_v19, %v582_v62 }
  0x83   : > { %676 = vadd.xlane.f32.xlu1 %v675_v25  ;;  %v586_v25 = vmul.f32 %v16188_v17, %v16188_v17 }
  0x84   : > { %672 = vadd.xlane.f32.xlu0 %v671_v11  ;;  %v718_v11 = vsel %vm381_vm0, %v587_v41, 0.0 }
  0x85   : > { %v719_v33 = vadd.f32 %v718_v11, %v586_v25 }
  0x87   : > { %684 = vadd.xlane.f32.xlu1 %v683_v40  ;;  %v730_v40 = vsel %vm381_vm0, %v593_v23, 0.0 }
  0x88   : > { %680 = vadd.xlane.f32.xlu0 %v679_v7  ;;  %v590_v7 = vmul.f32 %v16191_v43, %v16191_v43  ;;  %v731_v31 = vadd.f32 %v730_v40, %v592_v61 }
  0x8a   : > { %v727_v13 = vadd.f32 %v726_v49, %v590_v7 }
  0x8b   : > { %692 = vadd.xlane.f32.xlu1 %v691_v34  ;;  %v738_v34 = vsel %vm381_vm0, %v597_v28, 0.0 }
  0x8c   : > { %688 = vadd.xlane.f32.xlu0 %v687_v2  ;;  %v739_v2 = vadd.f32 %v738_v34, %v596_v21 }
  0x8f   : > { %700 = vadd.xlane.f32.xlu1 %v699_v29 }
  0x90   : > { %696 = vadd.xlane.f32.xlu0 %v695_v5 }
  0x93   : > { %708 = vadd.xlane.f32.xlu1 %v707_v55 }
  0x94   : > { %704 = vadd.xlane.f32.xlu0 %v703_v15 }
  0x97   : > { %716 = vadd.xlane.f32.xlu1 %v715_v20 }
  0x98   : > { %712 = vadd.xlane.f32.xlu0 %v711_v16 }
  0x9b   : > { %724 = vadd.xlane.f32.xlu1 %v723_v26 }
  0x9c   : > { %720 = vadd.xlane.f32.xlu0 %v719_v33 }
  0x9f   : > { %732 = vadd.xlane.f32.xlu1 %v731_v31 }
  0xa0   : > { %728 = vadd.xlane.f32.xlu0 %v727_v13  ;;  %v393_v36 = vpop.xlane.xlu1 %392 }
  0xa1   : > { %v385_v59 = vpop.xlane.xlu0 %384  ;;  %v12398_v32 = vmul.f32 0.0051020407, %v393_v36 }
  0xa2   : > { %v12392_v17 = vmul.f32 0.0051020407, %v385_v59 }
  0xa3   : > { %740 = vadd.xlane.f32.xlu1 %v739_v2  ;;  %v816_v10 = vmul.f32 %v12398_v32, %v12398_v32 }
  0xa4   : > { %736 = vadd.xlane.f32.xlu0 %v735_v38  ;;  %v397_v6 = vpop.xlane.xlu1 %396  ;;  %v814_v26 = vmul.f32 %v12392_v17, %v12392_v17 }
  0xa5   : > { %v389_v39 = vpop.xlane.xlu0 %388  ;;  %v12394_v24 = vmul.f32 0.0051020407, %v397_v6 }
  0xa6   : > { %v12388_v16 = vmul.f32 0.0051020407, %v389_v39 }
  0xa7   : > { %v817_v48 = vmul.f32 %v12394_v24, %v12394_v24 }
  0xa8   : > { %v405_v45 = vpop.xlane.xlu1 %404  ;;  %v815_v23 = vmul.f32 %v12388_v16, %v12388_v16 }
  0xa9   : > { %v401_v57 = vpop.xlane.xlu0 %400  ;;  %v12402_v40 = vmul.f32 0.0051020407, %v405_v45 }
  0xaa   : > { %v12408_v31 = vmul.f32 0.0051020407, %v401_v57 }
  0xab   : > { %v819_v56 = vmul.f32 %v12402_v40, %v12402_v40 }
  0xac   : > { %v12332_v42 = vpop.xlane.xlu1 %412  ;;  %v818_v57 = vmul.f32 %v12408_v31, %v12408_v31 }
  0xad   : > { %v409_v1 = vpop.xlane.xlu0 %408 }
  0xae   : > { %v12412_v59 = vmul.f32 0.0051020407, %v409_v1 }
  0xb0   : > { %v12334_v29 = vpop.xlane.xlu1 %420 }
  0xb1   : > { %v12336_v9 = vpop.xlane.xlu0 %416 }
  0xb4   : > { %v12338_v44 = vpop.xlane.xlu1 %428 }
  0xb5   : > { %v12340_v46 = vpop.xlane.xlu0 %424 }
  0xb8   : > { %v12342_v5 = vpop.xlane.xlu1 %436 }
  0xb9   : > { %v12344_v47 = vpop.xlane.xlu0 %432 }
  0xbc   : > { %v12346_v37 = vpop.xlane.xlu1 %444 }
  0xbd   : > { %v12348_v50 = vpop.xlane.xlu0 %440 }
  0xc0   : > { %v12350_v3 = vpop.xlane.xlu1 %452 }
  0xc1   : > { %v12352_v0 = vpop.xlane.xlu0 %448 }
  0xc4   : > { %v12354_v52 = vpop.xlane.xlu1 %460 }
  0xc5   : > { %v12356_v54 = vpop.xlane.xlu0 %456 }
  0xc8   : > { %v12358_v14 = vpop.xlane.xlu1 %468 }
  0xc9   : > { %v12360_v55 = vpop.xlane.xlu0 %464 }
  0xcc   : > { %v12362_v53 = vpop.xlane.xlu1 %476 }
  0xcd   : > { %v12364_v58 = vpop.xlane.xlu0 %472 }
  0xd0   : > { %v12366_v15 = vpop.xlane.xlu1 %484 }
  0xd1   : > { %v12368_v35 = vpop.xlane.xlu0 %480 }
  0xd4   : > { %v12370_v60 = vpop.xlane.xlu1 %492 }
  0xd5   : > { %v12372_v62 = vpop.xlane.xlu0 %488 }
  0xd8   : > { %v12374_v18 = vpop.xlane.xlu1 %500 }
  0xd9   : > { %v12376_v63 = vpop.xlane.xlu0 %496 }
  0xdc   : > { %v12378_v19 = vpop.xlane.xlu1 %508 }
  0xdd   : > { %v12380_v8 = vpop.xlane.xlu0 %504 }
  0xe0   : > { %v12382_v41 = vpop.xlane.xlu1 %516 }
  0xe1   : > { %v12384_v20 = vpop.xlane.xlu0 %512 }
  0xe4   : > { %v12386_v12 = vpop.xlane.xlu1 %524 }
  0xe5   : > { %v12390_v22 = vpop.xlane.xlu0 %520 }
  0xe8   : > { %v605_v25 = vpop.xlane.xlu1 %604 }
  0xe9   : > { %v779_v11 = vmul.f32 0.0051020407, %v605_v25  ;;  %v601_v27 = vpop.xlane.xlu0 %600 }
  0xea   : > { %v778_v61 = vmul.f32 0.0051020407, %v601_v27 }
  0xeb   : > { %v851_v33 = vsub.f32 %v779_v11, %v815_v23  ;;  %v12417_v11 = vmul.f32 0.0051020407, %v12332_v42 }
  0xec   : > { %v850_v43 = vsub.f32 %v778_v61, %v814_v26  ;;  %v613_v7 = vpop.xlane.xlu1 %612 }
  0xed   : > { %v887_v28 = vmax.f32 %v851_v33, 0.0  ;;  %v781_v49 = vmul.f32 0.0051020407, %v613_v7  ;;  %v609_v30 = vpop.xlane.xlu0 %608  ;;  %v12422_v7 = vmul.f32 0.0051020407, %v12334_v29  ;;  %v821_v42 = vmul.f32 %v12417_v11, %v12417_v11 }
  0xee   : > { %v886_v21 = vmax.f32 %v850_v43, 0.0  ;;  %v780_v13 = vmul.f32 0.0051020407, %v609_v30  ;;  %v820_v43 = vmul.f32 %v12412_v59, %v12412_v59  ;;  %v12430_v29 = vmul.f32 0.0051020407, %v12338_v44 }
  0xef   : > { %v959_v34 = vadd.f32 1e-05, %v887_v28  ;;  %v853_v51 = vsub.f32 %v781_v49, %v817_v48 }
  0xf0   : > { %v958_v2 = vadd.f32 1e-05, %v886_v21  ;;  %v852_v36 = vsub.f32 %v780_v13, %v816_v10  ;;  %v621_v38 = vpop.xlane.xlu1 %620 }
  0xf1   : > { %11604 = vrsqrt.f32 %v959_v34  ;;  %v889_v6 = vmax.f32 %v853_v51, 0.0  ;;  %v783_v39 = vmul.f32 0.0051020407, %v621_v38  ;;  %v617_v45 = vpop.xlane.xlu0 %616  ;;  %v823_v51 = vmul.f32 %v12422_v7, %v12422_v7 }
  0xf2   : > { %11606 = vrsqrt.f32 %v958_v2  ;;  %v888_v25 = vmax.f32 %v852_v36, 0.0  ;;  %v782_v23 = vmul.f32 0.0051020407, %v617_v45  ;;  %v12440_v36 = vmul.f32 0.0051020407, %v12336_v9 }
  0xf3   : > { %v961_v27 = vadd.f32 1e-05, %v889_v6  ;;  %v855_v61 = vsub.f32 %v783_v39, %v819_v56  ;;  %v12443_v38 = vmul.f32 0.0051020407, %v12342_v5 }
  0xf4   : > { %v960_v26 = vadd.f32 1e-05, %v888_v25  ;;  %v854_v33 = vsub.f32 %v782_v23, %v818_v57  ;;  %v629_v1 = vpop.xlane.xlu1 %628  ;;  %v923_v23 = vld [vmem:[%s12437_s28 + $0x8] sm:$0xff]  ;;  %v822_v5 = vmul.f32 %v12440_v36, %v12440_v36 }
  0xf5   : > { %v625_v48 = vpop.xlane.xlu0 %624  ;;  %v785_v49 = vmul.f32 0.0051020407, %v629_v1  ;;  %v891_v10 = vmax.f32 %v855_v61, 0.0  ;;  %v922_v1 = vld [vmem:[%s12437_s28] sm:$0xff] }
  0xf6   : > { %11608 = vrsqrt.f32 %v960_v26  ;;  %v890_v28 = vmax.f32 %v854_v33, 0.0  ;;  %v784_v30 = vmul.f32 0.0051020407, %v625_v48  ;;  %v827_v48 = vmul.f32 %v12443_v38, %v12443_v38 }
  0xf7   : > { %11610 = vrsqrt.f32 %v961_v27  ;;  %v857_v6 = vsub.f32 %v785_v49, %v821_v42  ;;  %v963_v45 = vadd.f32 1e-05, %v891_v10  ;;  %v825_v27 = vmul.f32 %v12430_v29, %v12430_v29 }
  0xf8   : > { %v962_v21 = vadd.f32 1e-05, %v890_v28  ;;  %v856_v13 = vsub.f32 %v784_v30, %v820_v43  ;;  %v637_v34 = vpop.xlane.xlu1 %636  ;;  %v12452_v43 = vmul.f32 0.0051020407, %v12340_v46  ;;  %v12461_v46 = vmul.f32 0.0051020407, %v12346_v37 }
  0xf9   : > { %v787_v56 = vmul.f32 0.0051020407, %v637_v34  ;;  %v633_v2 = vpop.xlane.xlu0 %632  ;;  %v893_v28 = vmax.f32 %v857_v6, 0.0 }
  0xfa   : > { %v892_v39 = vmax.f32 %v856_v13, 0.0  ;;  %11612 = vrsqrt.f32 %v962_v21  ;;  %v786_v57 = vmul.f32 0.0051020407, %v633_v2 }
  0xfb   : > { %v859_v44 = vsub.f32 %v787_v56, %v823_v51  ;;  %11614 = vrsqrt.f32 %v963_v45  ;;  %v12468_v45 = vmul.f32 0.0051020407, %v12344_v47 }
  0xfc   : > { %v645_v25 = vpop.xlane.xlu1 %644  ;;  %v964_v30 = vadd.f32 1e-05, %v892_v39  ;;  %v858_v13 = vsub.f32 %v786_v57, %v822_v5  ;;  %v924_v39 = vld [vmem:[%s12437_s28 + $0x10] sm:$0xff]  ;;  %v12471_v57 = vmul.f32 0.0051020407, %v12348_v50  ;;  %v829_v50 = vmul.f32 %v12461_v46, %v12461_v46 }
  0xfd   : > { %v895_v26 = vmax.f32 %v859_v44, 0.0  ;;  %v789_v61 = vmul.f32 0.0051020407, %v645_v25  ;;  %v641_v33 = vpop.xlane.xlu0 %640  ;;  %v824_v25 = vmul.f32 %v12452_v43, %v12452_v43  ;;  %16194 = vst [vmem:[#allocation4_spill] sm:$0xff] %v12468_v45 }
  0xfe   : > { %v11605_v9 = vpop.eup %11604  ;;  %v788_v34 = vmul.f32 0.0051020407, %v641_v33  ;;  %16195 = vst [vmem:[#allocation5_spill] sm:$0xff] %v12471_v57  ;;  %v894_v33 = vmax.f32 %v858_v13, 0.0 }
  0xff   : > { %v11607_v49 = vpop.eup %11606  ;;  %v967_v42 = vadd.f32 1e-05, %v895_v26  ;;  %v861_v10 = vsub.f32 %v789_v61, %v825_v27  ;;  %v12456_v21 = vmul.f32 %v11605_v9, %v923_v23  ;;  %v12474_v23 = vmul.f32 0.0051020407, %v12350_v3 }
 0x100   : > { %v653_v51 = vpop.xlane.xlu1 %652  ;;  %v12458_v56 = vmul.f32 %v11607_v49, %v922_v1  ;;  %v965_v27 = vadd.f32 1e-05, %v893_v28  ;;  %v860_v1 = vsub.f32 %v788_v34, %v824_v25  ;;  %v826_v28 = vmul.f32 %v12468_v45, %v12468_v45 }
 0x101   : > { %11616 = vrsqrt.f32 %v967_v42  ;;  %v897_v2 = vmax.f32 %v861_v10, 0.0  ;;  %v791_v44 = vmul.f32 0.0051020407, %v653_v51  ;;  %v649_v6 = vpop.xlane.xlu0 %648  ;;  %1181 = vperm.xlu1 %10881, %v12456_v21   ;;  %v925_v51 = vld [vmem:[%s12437_s28 + $0x18] sm:$0xff]  ;;  %v831_v34 = vmul.f32 %v12474_v23, %v12474_v23 }
 0x102   : > { %1176 = vperm.xlu0 %10880, %v12458_v56   ;;  %11618 = vrsqrt.f32 %v964_v30  ;;  %v790_v9 = vmul.f32 0.0051020407, %v649_v6  ;;  %v12487_v30 = vmul.f32 0.0051020407, %v12352_v0  ;;  %v966_v6 = vadd.f32 1e-05, %v894_v33 }
 0x103   : > { %v11609_v37 = vpop.eup %11608  ;;  %v969_v26 = vadd.f32 1e-05, %v897_v2  ;;  %v863_v61 = vsub.f32 %v791_v44, %v827_v48  ;;  %v828_v48 = vmul.f32 %v12471_v57, %v12471_v57  ;;  %v12495_v0 = vmul.f32 0.0051020407, %v12354_v52  ;;  %v926_v57 = vld [vmem:[%s12437_s28 + $0x20] sm:$0xff] }
 0x104   : > { %v661_v5 = vpop.xlane.xlu1 %660  ;;  %v12477_v47 = vmul.f32 %v11609_v37, %v924_v39  ;;  %v11611_v49 = vpop.eup %11610  ;;  %16196 = vst [vmem:[#allocation6_spill] sm:$0xff] %v12487_v30  ;;  %v896_v39 = vmax.f32 %v860_v1, 0.0  ;;  %v862_v25 = vsub.f32 %v790_v9, %v826_v28  ;;  %v830_v1 = vmul.f32 %v12487_v30, %v12487_v30 }
 0x105   : > { %11620 = vrsqrt.f32 %v969_v26  ;;  %v899_v3 = vmax.f32 %v863_v61, 0.0  ;;  %v793_v42 = vmul.f32 0.0051020407, %v661_v5  ;;  %v657_v10 = vpop.xlane.xlu0 %656  ;;  %v12492_v26 = vmul.f32 %v11611_v49, %v925_v51  ;;  %16197 = vst [vmem:[#allocation7_spill] sm:$0xff] %v12495_v0 }
 0x106   : > { %v792_v13 = vmul.f32 0.0051020407, %v657_v10  ;;  %1186 = vperm.xlu1 %10881, %v12477_v47   ;;  %11622 = vrsqrt.f32 %v965_v27  ;;  %v12499_v27 = vmul.f32 0.0051020407, %v12356_v54  ;;  %v12505_v52 = vmul.f32 0.0051020407, %v12358_v14 }
 0x107   : > { %v971_v2 = vadd.f32 1e-05, %v899_v3  ;;  %v865_v44 = vsub.f32 %v793_v42, %v829_v50  ;;  %v11613_v61 = vpop.eup %11612  ;;  %v968_v3 = vadd.f32 1e-05, %v896_v39  ;;  %v898_v42 = vmax.f32 %v862_v25, 0.0  ;;  %v931_v54 = vld [vmem:[%s12437_s28 + $0x48] sm:$0xff] }
 0x108   : > { %v669_v37 = vpop.xlane.xlu1 %668  ;;  %16198 = vst [vmem:[#allocation8_spill] sm:$0xff] %v12499_v27  ;;  %v864_v50 = vsub.f32 %v792_v13, %v828_v48  ;;  %16199 = vst [vmem:[#allocation9_spill] sm:$0xff] %v12505_v52  ;;  %v12507_v28 = vmul.f32 %v11613_v61, %v926_v57  ;;  %v11615_v48 = vpop.eup %11614  ;;  %v12517_v57 = vmul.f32 0.0051020407, %v12360_v55  ;;  %v12540_v30 = vmul.f32 0.0051020407, %v12366_v15 }
 0x109   : > { %11624 = vrsqrt.f32 %v971_v2  ;;  %v901_v5 = vmax.f32 %v865_v44, 0.0  ;;  %v795_v10 = vmul.f32 0.0051020407, %v669_v37  ;;  %v665_v4 = vpop.xlane.xlu0 %664  ;;  %v927_v37 = vld [vmem:[%s12437_s28 + $0x28] sm:$0xff] }
 0x10a   : > { %v794_v33 = vmul.f32 0.0051020407, %v665_v4  ;;  %1191 = vperm.xlu1 %10881, %v12492_v26   ;;  %11626 = vrsqrt.f32 %v966_v6  ;;  %v833_v4 = vmul.f32 %v12495_v0, %v12495_v0  ;;  %v900_v6 = vmax.f32 %v864_v50, 0.0  ;;  %16200 = vst [vmem:[#allocation10_spill] sm:$0xff] %v12517_v57  ;;  %16203 = vst [vmem:[#allocation13_spill] sm:$0xff] %v12540_v30 }
 0x10b   : > { %v973_v9 = vadd.f32 1e-05, %v901_v5  ;;  %v867_v49 = vsub.f32 %v795_v10, %v831_v34  ;;  %v832_v34 = vmul.f32 %v12499_v27, %v12499_v27  ;;  %v12523_v50 = vmul.f32 %v11615_v48, %v927_v37 }
 0x10c   : > { %v677_v51 = vpop.xlane.xlu1 %676  ;;  %v866_v39 = vsub.f32 %v794_v33, %v830_v1  ;;  %v933_v33 = vld [vmem:[%s12437_s28 + $0x58] sm:$0xff]  ;;  %v12527_v1 = vmul.f32 0.0051020407, %v12362_v53  ;;  %v12533_v48 = vmul.f32 0.0051020407, %v12364_v58 }
 0x10d   : > { %11628 = vrsqrt.f32 %v973_v9  ;;  %v903_v13 = vmax.f32 %v867_v49, 0.0  ;;  %v797_v2 = vmul.f32 0.0051020407, %v677_v51  ;;  %v673_v44 = vpop.xlane.xlu0 %672  ;;  %v835_v49 = vmul.f32 %v12505_v52, %v12505_v52 }
 0x10e   : > { %v11617_v14 = vpop.eup %11616  ;;  %v796_v25 = vmul.f32 0.0051020407, %v673_v44  ;;  %1196 = vperm.xlu1 %10881, %v12507_v28   ;;  %11630 = vrsqrt.f32 %v968_v3  ;;  %v970_v51 = vadd.f32 1e-05, %v898_v42  ;;  %16201 = vst [vmem:[#allocation11_spill] sm:$0xff] %v12527_v1  ;;  %16202 = vst [vmem:[#allocation12_spill] sm:$0xff] %v12533_v48  ;;  %v837_v58 = vmul.f32 %v12527_v1, %v12527_v1 }
 0x10f   : > { %v975_v61 = vadd.f32 1e-05, %v903_v13  ;;  %v869_v5 = vsub.f32 %v797_v2, %v833_v4  ;;  %v12519_v10 = vmul.f32 %v11617_v14, %v931_v54  ;;  %v11619_v9 = vpop.eup %11618  ;;  %v928_v54 = vld [vmem:[%s12437_s28 + $0x30] sm:$0xff]  ;;  %v972_v2 = vadd.f32 1e-05, %v900_v6 }
 0x110   : > { %v685_v27 = vpop.xlane.xlu1 %684  ;;  %v902_v14 = vmax.f32 %v866_v39, 0.0  ;;  %v868_v3 = vsub.f32 %v796_v25, %v832_v34  ;;  %v12542_v6 = vmul.f32 %v11619_v9, %v928_v54  ;;  %v935_v39 = vld [vmem:[%s12437_s28 + $0x68] sm:$0xff]  ;;  %v836_v9 = vmul.f32 %v12533_v48, %v12533_v48 }
 0x111   : > { %11632 = vrsqrt.f32 %v975_v61  ;;  %v905_v55 = vmax.f32 %v869_v5, 0.0  ;;  %v799_v13 = vmul.f32 0.0051020407, %v685_v27  ;;  %v681_v44 = vpop.xlane.xlu0 %680  ;;  %1221 = vperm.xlu0 %10880, %v12519_v10   ;;  %v834_v5 = vmul.f32 %v12517_v57, %v12517_v57 }
 0x112   : > { %v11621_v4 = vpop.eup %11620  ;;  %v798_v42 = vmul.f32 0.0051020407, %v681_v44  ;;  %1201 = vperm.xlu1 %10881, %v12523_v50   ;;  %11634 = vrsqrt.f32 %v970_v51  ;;  %v974_v15 = vadd.f32 1e-05, %v902_v14  ;;  %v904_v44 = vmax.f32 %v868_v3, 0.0 }
 0x113   : > { %v977_v53 = vadd.f32 1e-05, %v905_v55  ;;  %v871_v37 = vsub.f32 %v799_v13, %v835_v49  ;;  %v12535_v61 = vmul.f32 %v11621_v4, %v933_v33  ;;  %v11623_v27 = vpop.eup %11622  ;;  %v929_v55 = vld [vmem:[%s12437_s28 + $0x38] sm:$0xff]  ;;  %v12563_v57 = vmul.f32 0.0051020407, %v12370_v60 }
 0x114   : > { %v693_v34 = vpop.xlane.xlu1 %692  ;;  %v870_v51 = vsub.f32 %v798_v42, %v834_v5  ;;  %v12559_v3 = vmul.f32 %v11623_v27, %v929_v55  ;;  %v937_v42 = vld [vmem:[%s12437_s28 + $0x78] sm:$0xff]  ;;  %v976_v27 = vadd.f32 1e-05, %v904_v44 }
 0x115   : > { %11636 = vrsqrt.f32 %v977_v53  ;;  %v907_v25 = vmax.f32 %v871_v37, 0.0  ;;  %v801_v49 = vmul.f32 0.0051020407, %v693_v34  ;;  %v689_v33 = vpop.xlane.xlu0 %688  ;;  %1231 = vperm.xlu0 %10880, %v12535_v61   ;;  %v839_v37 = vmul.f32 %v12540_v30, %v12540_v30  ;;  %16205 = vst [vmem:[#allocation15_spill] sm:$0xff] %v12563_v57 }
 0x116   : > { %v11625_v13 = vpop.eup %11624  ;;  %11638 = vrsqrt.f32 %v972_v2  ;;  %1206 = vperm.xlu1 %10881, %v12542_v6   ;;  %v12557_v34 = vmul.f32 0.0051020407, %v12368_v35  ;;  %v800_v2 = vmul.f32 0.0051020407, %v689_v33  ;;  %v12568_v35 = vmul.f32 0.0051020407, %v12372_v62 }
 0x117   : > { %v979_v54 = vadd.f32 1e-05, %v907_v25  ;;  %v873_v4 = vsub.f32 %v801_v49, %v837_v58  ;;  %v12552_v53 = vmul.f32 %v11625_v13, %v935_v39  ;;  %v11627_v5 = vpop.eup %11626  ;;  %v930_v49 = vld [vmem:[%s12437_s28 + $0x40] sm:$0xff]  ;;  %v906_v33 = vmax.f32 %v870_v51, 0.0  ;;  %v939_v62 = vld [vmem:[%s12437_s28 + $0x88] sm:$0xff] }
 0x118   : > { %16204 = vst [vmem:[#allocation14_spill] sm:$0xff] %v12557_v34  ;;  %v701_v14 = vpop.xlane.xlu1 %700  ;;  %16206 = vst [vmem:[#allocation16_spill] sm:$0xff] %v12568_v35  ;;  %v12576_v1 = vmul.f32 %v11627_v5, %v930_v49 }
 0x119   : > { %11640 = vrsqrt.f32 %v979_v54  ;;  %v909_v25 = vmax.f32 %v873_v4, 0.0  ;;  %v803_v58 = vmul.f32 0.0051020407, %v701_v14  ;;  %v697_v39 = vpop.xlane.xlu0 %696  ;;  %1241 = vperm.xlu0 %10880, %v12552_v53   ;;  %v12574_v4 = vmul.f32 0.0051020407, %v12374_v18 }
 0x11a   : > { %v11629_v13 = vpop.eup %11628  ;;  %11642 = vrsqrt.f32 %v974_v15  ;;  %1211 = vperm.xlu1 %10881, %v12559_v3   ;;  %v872_v14 = vsub.f32 %v800_v2, %v836_v9  ;;  %v802_v48 = vmul.f32 0.0051020407, %v697_v39  ;;  %v841_v15 = vmul.f32 %v12563_v57, %v12563_v57  ;;  %v941_v57 = vld [vmem:[%s12437_s28 + $0x98] sm:$0xff] }
 0x11b   : > { %v981_v55 = vadd.f32 1e-05, %v909_v25  ;;  %v875_v60 = vsub.f32 %v803_v58, %v839_v37  ;;  %v12571_v54 = vmul.f32 %v11629_v13, %v937_v42  ;;  %16207 = vst [vmem:[#allocation17_spill] sm:$0xff] %v12574_v4  ;;  %v11631_v52 = vpop.eup %11630  ;;  %v932_v37 = vld [vmem:[%s12437_s28 + $0x50] sm:$0xff]  ;;  %v838_v9 = vmul.f32 %v12557_v34, %v12557_v34 }
 0x11c   : > { %v709_v30 = vpop.xlane.xlu1 %708  ;;  %v840_v2 = vmul.f32 %v12568_v35, %v12568_v35  ;;  %v978_v42 = vadd.f32 1e-05, %v906_v33  ;;  %v843_v49 = vmul.f32 %v12574_v4, %v12574_v4  ;;  %v908_v13 = vmax.f32 %v872_v14, 0.0 }
 0x11d   : > { %11644 = vrsqrt.f32 %v981_v55  ;;  %v911_v44 = vmax.f32 %v875_v60, 0.0  ;;  %v805_v51 = vmul.f32 0.0051020407, %v709_v30  ;;  %v705_v25 = vpop.xlane.xlu0 %704  ;;  %1251 = vperm.xlu0 %10880, %v12571_v54   ;;  %v874_v55 = vsub.f32 %v802_v48, %v838_v9  ;;  %v936_v9 = vld [vmem:[%s12437_s28 + $0x70] sm:$0xff] }
 0x11e   : > { %v11633_v18 = vpop.eup %11632  ;;  %11646 = vrsqrt.f32 %v976_v27  ;;  %1216 = vperm.xlu1 %10881, %v12576_v1   ;;  %v804_v30 = vmul.f32 0.0051020407, %v705_v25  ;;  %v12592_v34 = vmul.f32 %v11631_v52, %v932_v37  ;;  %v12596_v27 = vmul.f32 0.0051020407, %v12378_v19 }
 0x11f   : > { %v983_v5 = vadd.f32 1e-05, %v911_v44  ;;  %v877_v58 = vsub.f32 %v805_v51, %v841_v15  ;;  %v12588_v39 = vmul.f32 %v11633_v18, %v939_v62  ;;  %v11635_v35 = vpop.eup %11634  ;;  %v934_v62 = vld [vmem:[%s12437_s28 + $0x60] sm:$0xff]  ;;  %v12601_v48 = vmul.f32 0.0051020407, %v12376_v63  ;;  %v943_v63 = vld [vmem:[%s12437_s28 + $0xa8] sm:$0xff] }
 0x120   : > { %v717_v60 = vpop.xlane.xlu1 %716  ;;  %16208 = vst [vmem:[#allocation18_spill] sm:$0xff] %v12596_v27  ;;  %v12604_v52 = vmul.f32 0.0051020407, %v12382_v41  ;;  %v876_v25 = vsub.f32 %v804_v30, %v840_v2  ;;  %v12610_v45 = vmul.f32 %v11635_v35, %v934_v62  ;;  %v845_v41 = vmul.f32 %v12596_v27, %v12596_v27  ;;  %v938_v62 = vld [vmem:[%s12437_s28 + $0x80] sm:$0xff] }
 0x121   : > { %11648 = vrsqrt.f32 %v983_v5  ;;  %v913_v33 = vmax.f32 %v877_v58, 0.0  ;;  %v807_v15 = vmul.f32 0.0051020407, %v717_v60  ;;  %v713_v44 = vpop.xlane.xlu0 %712  ;;  %1261 = vperm.xlu0 %10880, %v12588_v39   ;;  %16209 = vst [vmem:[#allocation19_spill] sm:$0xff] %v12601_v48  ;;  %v980_v5 = vadd.f32 1e-05, %v908_v13 }
 0x122   : > { %v11637_v51 = vpop.eup %11636  ;;  %16210 = vst [vmem:[#allocation20_spill] sm:$0xff] %v12604_v52  ;;  %11650 = vrsqrt.f32 %v978_v42  ;;  %1226 = vperm.xlu1 %10881, %v12592_v34   ;;  %v910_v58 = vmax.f32 %v874_v55, 0.0  ;;  %v806_v60 = vmul.f32 0.0051020407, %v713_v44  ;;  %v842_v2 = vmul.f32 %v12601_v48, %v12601_v48  ;;  %v945_v48 = vld [vmem:[%s12437_s28 + $0xb8] sm:$0xff] }
 0x123   : > { %v11639_v19 = vpop.eup %11638  ;;  %v985_v14 = vadd.f32 1e-05, %v913_v33  ;;  %v879_v37 = vsub.f32 %v807_v15, %v843_v49  ;;  %v12607_v18 = vmul.f32 %v11637_v51, %v941_v57  ;;  %v12619_v30 = vmul.f32 0.0051020407, %v12380_v8 }
 0x124   : > { %v725_v4 = vpop.xlane.xlu1 %724  ;;  %v847_v35 = vmul.f32 %v12604_v52, %v12604_v52  ;;  %v12624_v49 = vmul.f32 %v11639_v19, %v936_v9  ;;  %v982_v51 = vadd.f32 1e-05, %v910_v58  ;;  %v12631_v27 = vmul.f32 0.0051020407, %v12386_v12 }
 0x125   : > { %11652 = vrsqrt.f32 %v985_v14  ;;  %v915_v42 = vmax.f32 %v879_v37, 0.0  ;;  %v809_v0 = vmul.f32 0.0051020407, %v725_v4  ;;  %v721_v33 = vpop.xlane.xlu0 %720  ;;  %1271 = vperm.xlu0 %10880, %v12607_v18   ;;  %16211 = vst [vmem:[#allocation21_spill] sm:$0xff] %v12619_v30  ;;  %v912_v4 = vmax.f32 %v876_v25, 0.0 }
 0x126   : > { %v11641_v57 = vpop.eup %11640  ;;  %1236 = vperm.xlu1 %10881, %v12610_v45   ;;  %11654 = vrsqrt.f32 %v980_v5  ;;  %v878_v14 = vsub.f32 %v806_v60, %v842_v2  ;;  %v808_v37 = vmul.f32 0.0051020407, %v721_v33  ;;  %v844_v25 = vmul.f32 %v12619_v30, %v12619_v30  ;;  %v940_v33 = vld [vmem:[%s12437_s28 + $0x90] sm:$0xff] }
 0x127   : > { %v11643_v13 = vpop.eup %11642  ;;  %v987_v55 = vadd.f32 1e-05, %v915_v42  ;;  %v881_v15 = vsub.f32 %v809_v0, %v845_v41  ;;  %v12626_v44 = vmul.f32 %v11641_v57, %v943_v63  ;;  %v12637_v5 = vmul.f32 0.0051020407, %v12384_v20 }
 0x128   : > { %v733_v8 = vpop.xlane.xlu1 %732  ;;  %v12640_v58 = vmul.f32 %v11643_v13, %v938_v62  ;;  %v984_v60 = vadd.f32 1e-05, %v912_v4  ;;  %v914_v57 = vmax.f32 %v878_v14, 0.0  ;;  %v880_v2 = vsub.f32 %v808_v37, %v844_v25 }
 0x129   : > { %11656 = vrsqrt.f32 %v987_v55  ;;  %v917_v19 = vmax.f32 %v881_v15, 0.0  ;;  %v811_v9 = vmul.f32 0.0051020407, %v733_v8  ;;  %v729_v52 = vpop.xlane.xlu0 %728  ;;  %1281 = vperm.xlu0 %10880, %v12626_v44   ;;  %v947_v8 = vld [vmem:[%s12437_s28 + $0xc8] sm:$0xff]  ;;  %v849_v20 = vmul.f32 %v12631_v27, %v12631_v27 }
 0x12a   : > { %v11645_v0 = vpop.eup %11644  ;;  %1246 = vperm.xlu1 %10881, %v12624_v49   ;;  %11658 = vrsqrt.f32 %v982_v51  ;;  %v810_v55 = vmul.f32 0.0051020407, %v729_v52  ;;  %v12652_v4 = vmul.f32 0.0051020407, %v12390_v22  ;;  %v916_v25 = vmax.f32 %v880_v2, 0.0 }
 0x12b   : > { %v11647_v12 = vpop.eup %11646  ;;  %v989_v63 = vadd.f32 1e-05, %v917_v19  ;;  %v883_v41 = vsub.f32 %v811_v9, %v847_v35  ;;  %v12642_v42 = vmul.f32 %v11645_v0, %v945_v48  ;;  %v846_v35 = vmul.f32 %v12637_v5, %v12637_v5  ;;  %v942_v9 = vld [vmem:[%s12437_s28 + $0xa0] sm:$0xff] }
 0x12c   : > { %v741_v15 = vpop.xlane.xlu1 %740  ;;  %v12655_v52 = vmul.f32 %v11647_v12, %v940_v33  ;;  %v986_v0 = vadd.f32 1e-05, %v914_v57 }
 0x12d   : > { %11660 = vrsqrt.f32 %v989_v63  ;;  %v919_v13 = vmax.f32 %v883_v41, 0.0  ;;  %v813_v62 = vmul.f32 0.0051020407, %v741_v15  ;;  %v737_v30 = vpop.xlane.xlu0 %736  ;;  %1291 = vperm.xlu0 %10880, %v12642_v42   ;;  %v882_v63 = vsub.f32 %v810_v55, %v846_v35  ;;  %v949_v15 = vld [vmem:[%s12437_s28 + $0xd8] sm:$0xff] }
 0x12e   : > { %v11649_v48 = vpop.eup %11648  ;;  %1256 = vperm.xlu1 %10881, %v12640_v58   ;;  %11662 = vrsqrt.f32 %v984_v60  ;;  %v812_v41 = vmul.f32 0.0051020407, %v737_v30  ;;  %v848_v60 = vmul.f32 %v12652_v4, %v12652_v4  ;;  %v988_v30 = vadd.f32 1e-05, %v916_v25  ;;  %v946_v25 = vld [vmem:[%s12437_s28 + $0xc0] sm:$0xff] }
 0x12f   : > { %v11651_v51 = vpop.eup %11650  ;;  %v991_v14 = vadd.f32 1e-05, %v919_v13  ;;  %v885_v37 = vsub.f32 %v813_v62, %v849_v20  ;;  %v12657_v19 = vmul.f32 %v11649_v48, %v947_v8  ;;  %v918_v2 = vmax.f32 %v882_v63, 0.0  ;;  %v951_v20 = vld [vmem:[%s12437_s28 + $0xe8] sm:$0xff]  ;;  %v944_v62 = vld [vmem:[%s12437_s28 + $0xb0] sm:$0xff] }
 0x130   : > { %v12667_v57 = vmul.f32 %v11651_v51, %v942_v9  ;;  %v884_v55 = vsub.f32 %v812_v41, %v848_v60  ;;  %v953_v9 = vld [vmem:[%s12437_s28 + $0xf8] sm:$0xff]  ;;  %v955_v60 = vld [vmem:[%s12437_s28 + $0x108] sm:$0xff] }
 0x131   : > { %11664 = vrsqrt.f32 %v991_v14  ;;  %v921_v22 = vmax.f32 %v885_v37, 0.0  ;;  %1301 = vperm.xlu0 %10880, %v12657_v19   ;;  %v990_v51 = vadd.f32 1e-05, %v918_v2 }
 0x132   : > { %v11653_v12 = vpop.eup %11652  ;;  %1266 = vperm.xlu1 %10881, %v12655_v52   ;;  %11666 = vrsqrt.f32 %v986_v0  ;;  %v920_v14 = vmax.f32 %v884_v55, 0.0 }
 0x133   : > { %v993_v33 = vadd.f32 1e-05, %v921_v22  ;;  %v12665_v8 = vmul.f32 %v11653_v12, %v949_v15  ;;  %v11655_v13 = vpop.eup %11654 }
 0x134   : > { %v12675_v37 = vmul.f32 %v11655_v13, %v944_v62  ;;  %v992_v22 = vadd.f32 1e-05, %v920_v14  ;;  %v950_v62 = vld [vmem:[%s12437_s28 + $0xe0] sm:$0xff] }
 0x135   : > { %11668 = vrsqrt.f32 %v993_v33  ;;  %1311 = vperm.xlu0 %10880, %v12665_v8   ;;  %v948_v33 = vld [vmem:[%s12437_s28 + $0xd0] sm:$0xff] }
 0x136   : > { %v11657_v48 = vpop.eup %11656  ;;  %1276 = vperm.xlu1 %10881, %v12667_v57   ;;  %11670 = vrsqrt.f32 %v988_v30 }
 0x137   : > { %v12673_v35 = vmul.f32 %v11657_v48, %v951_v20  ;;  %v11659_v0 = vpop.eup %11658  ;;  %11672 = vrsqrt.f32 %v990_v51  ;;  %v957_v20 = vld [vmem:[%s12437_s28 + $0x118] sm:$0xff]  ;;  %v1103_v51 = vmul.f32 %v12456_v21, %v12388_v16 }
 0x138   : > { %v12683_v12 = vmul.f32 %v11659_v0, %v946_v25  ;;  %11674 = vrsqrt.f32 %v992_v22  ;;  %v1067_v0 = vld [vmem:[%s12701_s6 + $0x8] sm:$0xff]  ;;  %v1069_v16 = vld [vmem:[%s12701_s6 + $0x18] sm:$0xff] }
 0x139   : > { %1321 = vperm.xlu0 %10880, %v12673_v35   ;;  %v1139_v22 = vsub.f32 %v1067_v0, %v1103_v51  ;;  %v1102_v0 = vmul.f32 %v12458_v56, %v12392_v17  ;;  %v1068_v17 = vld [vmem:[%s12701_s6 + $0x10] sm:$0xff]  ;;  %v1113_v56 = vmul.f32 %v12535_v61, %v12430_v29  ;;  %v1079_v29 = vld [vmem:[%s12701_s6 + $0x68] sm:$0xff] }
 0x13a   : > { %v11661_v63 = vpop.eup %11660  ;;  %1286 = vperm.xlu1 %10881, %v12675_v37   ;;  %v1072_v61 = vld [vmem:[%s12701_s6 + $0x30] sm:$0xff] }
 0x13b   : > { %v12681_v41 = vmul.f32 %v11661_v63, %v953_v9  ;;  %v11663_v15 = vpop.eup %11662  ;;  %v952_v63 = vld [vmem:[%s12437_s28 + $0xf0] sm:$0xff] }
 0x13c   : > { %v12691_v55 = vmul.f32 %v11663_v15, %v948_v33  ;;  %v1105_v15 = vmul.f32 %v12492_v26, %v12394_v24  ;;  %v954_v33 = vld [vmem:[%s12437_s28 + $0x100] sm:$0xff]  ;;  %v956_v24 = vld [vmem:[%s12437_s28 + $0x110] sm:$0xff]  ;;  %v1109_v26 = vmul.f32 %v12559_v3, %v12417_v11  ;;  %v1104_v11 = vmul.f32 %v12477_v47, %v12398_v32  ;;  %s11773_s28 = smov 99  }
 0x13d   : > { %1331 = vperm.xlu0 %10880, %v12681_v41   ;;  %v1115_v32 = vmul.f32 %v12552_v53, %v12443_v38  ;;  %v1081_v38 = vld [vmem:[%s12701_s6 + $0x78] sm:$0xff]  ;;  %v1074_v53 = vld [vmem:[%s12701_s6 + $0x40] sm:$0xff] }
 0x13e   : > { %v11665_v30 = vpop.eup %11664  ;;  %1296 = vperm.xlu1 %10881, %v12683_v12  }
 0x13f   : > { %v12689_v2 = vmul.f32 %v11665_v30, %v955_v60  ;;  %v11667_v13 = vpop.eup %11666  ;;  %v1107_v30 = vmul.f32 %v12523_v50, %v12402_v40  ;;  %v1073_v40 = vld [vmem:[%s12701_s6 + $0x38] sm:$0xff]  ;;  %v1066_v50 = vld [vmem:[%s12701_s6] sm:$0xff] }
 0x140   : > { %v12708_v9 = vmul.f32 %v11667_v13, %v950_v62  ;;  %v1071_v62 = vld [vmem:[%s12701_s6 + $0x28] sm:$0xff]  ;;  %v1138_v3 = vsub.f32 %v1066_v50, %v1102_v0  ;;  %v16213_v0 = vld [vmem:[#allocation4_spill] sm:$0xff] }
 0x141   : > { %1341 = vperm.xlu0 %10880, %v12689_v2   ;;  %v1143_v51 = vsub.f32 %v1071_v62, %v1107_v30  ;;  %v1108_v30 = vmul.f32 %v12542_v6, %v12412_v59  ;;  %v1110_v62 = vmul.f32 %v12576_v1, %v12440_v36  ;;  %v1119_v59 = vmul.f32 %v12588_v39, %v12474_v23  ;;  %v16212_v36 = vld [vmem:[#allocation7_spill] sm:$0xff]  ;;  %v1078_v39 = vld [vmem:[%s12701_s6 + $0x60] sm:$0xff] }
 0x142   : > { %v11669_v48 = vpop.eup %11668  ;;  %1306 = vperm.xlu1 %10881, %v12691_v55   ;;  %v1121_v1 = vmul.f32 %v12607_v18, %v16212_v36  ;;  %v1085_v23 = vld [vmem:[%s12701_s6 + $0x98] sm:$0xff]  ;;  %v1087_v18 = vld [vmem:[%s12701_s6 + $0xa8] sm:$0xff] }
 0x143   : > { %v12706_v14 = vmul.f32 %v11669_v48, %v957_v20  ;;  %v11671_v25 = vpop.eup %11670  ;;  %v1141_v20 = vsub.f32 %v1069_v16, %v1105_v15  ;;  %v1145_v15 = vsub.f32 %v1073_v40, %v1109_v26  ;;  %v1146_v26 = vsub.f32 %v1074_v53, %v1110_v62  ;;  %v1093_v62 = vld [vmem:[%s12701_s6 + $0xd8] sm:$0xff] }
 0x144   : > { %v12716_v60 = vmul.f32 %v11671_v25, %v952_v63  ;;  %v11673_v21 = vpop.eup %11672  ;;  %v1111_v63 = vmul.f32 %v12519_v10, %v12422_v7  ;;  %v1077_v7 = vld [vmem:[%s12701_s6 + $0x58] sm:$0xff]  ;;  %v1070_v10 = vld [vmem:[%s12701_s6 + $0x20] sm:$0xff]  ;;  %v1114_v40 = vmul.f32 %v12610_v45, %v16213_v0  ;;  %v16225_v0 = vld [vmem:[#allocation14_spill] sm:$0xff] }
 0x145   : > { %1351 = vperm.xlu0 %10880, %v12706_v14   ;;  %v12723_v13 = vmul.f32 %v11673_v21, %v954_v33  ;;  %v11675_v48 = vpop.eup %11674  ;;  %v1106_v21 = vmul.f32 %v12507_v28, %v12408_v31  ;;  %v1140_v33 = vsub.f32 %v1068_v17, %v1104_v11  ;;  %v1149_v47 = vsub.f32 %v1077_v7, %v1113_v56  ;;  %v16216_v45 = vld [vmem:[#allocation11_spill] sm:$0xff]  ;;  %v1082_v7 = vld [vmem:[%s12701_s6 + $0x80] sm:$0xff] }
 0x146   : > { %1316 = vperm.xlu1 %10881, %v12708_v9   ;;  %v12732_v25 = vmul.f32 %v11675_v48, %v956_v24  ;;  %v1117_v31 = vmul.f32 %v12571_v54, %v12461_v46  ;;  %v1151_v28 = vsub.f32 %v1079_v29, %v1115_v32  ;;  %v1144_v48 = vsub.f32 %v1072_v61, %v1108_v30  ;;  %v1083_v46 = vld [vmem:[%s12701_s6 + $0x88] sm:$0xff]  ;;  %v1076_v54 = vld [vmem:[%s12701_s6 + $0x50] sm:$0xff] }
 0x147   : > { %v1112_v24 = vmul.f32 %v12592_v34, %v12452_v43  ;;  %v16214_v43 = vld [vmem:[#allocation9_spill] sm:$0xff]  ;;  %v1125_v17 = vmul.f32 %v12642_v42, %v16216_v45  ;;  %v1084_v29 = vld [vmem:[%s12701_s6 + $0x90] sm:$0xff] }
 0x148   : > { %v1153_v6 = vsub.f32 %v1081_v38, %v1117_v31  ;;  %v1123_v34 = vmul.f32 %v12626_v44, %v16214_v43  ;;  %v1089_v44 = vld [vmem:[%s12701_s6 + $0xb8] sm:$0xff]  ;;  %v1091_v42 = vld [vmem:[%s12701_s6 + $0xc8] sm:$0xff]  ;;  %v1086_v38 = vld [vmem:[%s12701_s6 + $0xa0] sm:$0xff] }
 0x149   : > { %1433 = vperm.xlu0 %10880, %v1139_v22   ;;  %v1075_v22 = vld [vmem:[%s12701_s6 + $0x48] sm:$0xff]  ;;  %v1148_v50 = vsub.f32 %v1076_v54, %v1112_v24  ;;  %v1161_v32 = vsub.f32 %v1089_v44, %v1125_v17  ;;  %v1088_v54 = vld [vmem:[%s12701_s6 + $0xb0] sm:$0xff]  ;;  %v16228_v17 = vld [vmem:[#allocation19_spill] sm:$0xff] }
 0x14a   : > { %1326 = vperm.xlu1 %10881, %v12716_v60   ;;  %v1147_v16 = vsub.f32 %v1075_v22, %v1111_v63  ;;  %v1157_v63 = vsub.f32 %v1085_v23, %v1121_v1  ;;  %v1080_v22 = vld [vmem:[%s12701_s6 + $0x70] sm:$0xff]  ;;  %v1159_v56 = vsub.f32 %v1087_v18, %v1123_v34  ;;  %v1090_v23 = vld [vmem:[%s12701_s6 + $0xc0] sm:$0xff]  ;;  %v1137_v18 = vmul.f32 %v12706_v14, %v12631_v27 }
 0x14d   : > { %1443 = vperm.xlu0 %10880, %v1141_v20   ;;  %v1142_v20 = vsub.f32 %v1070_v10, %v1106_v21 }
 0x14e   : > { %1336 = vperm.xlu1 %10881, %v12723_v13  }
 0x151   : > { %1453 = vperm.xlu0 %10880, %v1143_v51   ;;  %v1155_v51 = vsub.f32 %v1083_v46, %v1119_v59 }
 0x152   : > { %1346 = vperm.xlu1 %10881, %v12732_v25  }
 0x155   : > { %1463 = vperm.xlu0 %10880, %v1145_v15   ;;  %v16215_v15 = vld [vmem:[#allocation5_spill] sm:$0xff] }
 0x156   : > { %1428 = vperm.xlu1 %10881, %v1138_v3   ;;  %v1116_v11 = vmul.f32 %v12624_v49, %v16215_v15  ;;  %v1150_v3 = vsub.f32 %v1078_v39, %v1114_v40  ;;  %v16218_v49 = vld [vmem:[#allocation13_spill] sm:$0xff]  ;;  %v1126_v40 = vmul.f32 %v12683_v12, %v16225_v0  ;;  %v16226_v39 = vld [vmem:[#allocation20_spill] sm:$0xff]  ;;  %v1092_v12 = vld [vmem:[%s12701_s6 + $0xd0] sm:$0xff] }
 0x157   : > { %v1127_v10 = vmul.f32 %v12657_v19, %v16218_v49  ;;  %v1135_v43 = vmul.f32 %v12689_v2, %v16226_v39  ;;  %v1101_v2 = vld [vmem:[%s12701_s6 + $0x118] sm:$0xff]  ;;  %v1096_v49 = vld [vmem:[%s12701_s6 + $0xf0] sm:$0xff] }
 0x158   : > { %v1162_v34 = vsub.f32 %v1090_v23, %v1126_v40  ;;  %v11762_v40 = vmov 1966171168   ;;  %v11676_v39 = vld [vmem:[%s11823_s24 + $0x10] sm:$0xff] }
 0x159   : > { %1473 = vperm.xlu0 %10880, %v1147_v16   ;;  %v16217_v16 = vld [vmem:[#allocation6_spill] sm:$0xff]  ;;  %v1163_v31 = vsub.f32 %v1091_v42, %v1127_v10  ;;  %v2286_v23 = vunpack.c.l.s4 %v11762_v40 }
 0x15a   : > { %1438 = vperm.xlu1 %10881, %v1140_v33   ;;  %v1118_v21 = vmul.f32 %v12640_v58, %v16217_v16  ;;  %v1152_v33 = vsub.f32 %v1080_v22, %v1116_v11  ;;  %v16220_v58 = vld [vmem:[#allocation15_spill] sm:$0xff] }
 0x15b   : > { %v1129_v61 = vmul.f32 %v12665_v8, %v16220_v58  ;;  %v16223_v8 = vld [vmem:[#allocation12_spill] sm:$0xff]  ;;  %v1100_v58 = vld [vmem:[%s12701_s6 + $0x110] sm:$0xff] }
 0x15c   : > { %v1124_v46 = vmul.f32 %v12675_v37, %v16223_v8 }
 0x15d   : > { %1483 = vperm.xlu0 %10880, %v1149_v47   ;;  %v16219_v47 = vld [vmem:[#allocation8_spill] sm:$0xff]  ;;  %v1165_v59 = vsub.f32 %v1093_v62, %v1129_v61 }
 0x15e   : > { %1448 = vperm.xlu1 %10881, %v1142_v20   ;;  %v1120_v30 = vmul.f32 %v12655_v52, %v16219_v47  ;;  %v1154_v20 = vsub.f32 %v1082_v7, %v1118_v21  ;;  %v16222_v52 = vld [vmem:[#allocation17_spill] sm:$0xff]  ;;  %v1173_v21 = vsub.f32 %v1101_v2, %v1137_v18  ;;  %v2287_v18 = vunpack.c.0.s8 %v2286_v23  ;;  %v11678_v2 = vld [vmem:[%s11823_s24 + $0x30] sm:$0xff] }
 0x15f   : > { %v1131_v53 = vmul.f32 %v12673_v35, %v16222_v52  ;;  %v1097_v35 = vld [vmem:[%s12701_s6 + $0xf8] sm:$0xff]  ;;  %v16229_v7 = vld [vmem:[#allocation21_spill] sm:$0xff] }
 0x160   : > { %v1132_v27 = vmul.f32 %v12716_v60, %v16229_v7  ;;  %v1136_v60 = vmul.f32 %v12732_v25, %v12652_v4 }
 0x161   : > { %1493 = vperm.xlu0 %10880, %v1151_v28   ;;  %v1156_v28 = vsub.f32 %v1084_v29, %v1120_v30  ;;  %v1098_v30 = vld [vmem:[%s12701_s6 + $0x100] sm:$0xff] }
 0x162   : > { %1458 = vperm.xlu1 %10881, %v1144_v48   ;;  %v16221_v48 = vld [vmem:[#allocation10_spill] sm:$0xff]  ;;  %v1168_v10 = vsub.f32 %v1096_v49, %v1132_v27 }
 0x163   : > { %v1122_v19 = vmul.f32 %v12667_v57, %v16221_v48  ;;  %v16224_v57 = vld [vmem:[#allocation18_spill] sm:$0xff] }
 0x164   : > { %v1133_v36 = vmul.f32 %v12681_v41, %v16224_v57  ;;  %v1099_v41 = vld [vmem:[%s12701_s6 + $0x108] sm:$0xff] }
 0x165   : > { %1503 = vperm.xlu0 %10880, %v1153_v6   ;;  %v1158_v24 = vsub.f32 %v1086_v38, %v1122_v19 }
 0x166   : > { %1468 = vperm.xlu1 %10881, %v1146_v26   ;;  %v1095_v26 = vld [vmem:[%s12701_s6 + $0xe8] sm:$0xff]  ;;  %v1169_v37 = vsub.f32 %v1097_v35, %v1133_v36 }
 0x167   : > { %v1167_v1 = vsub.f32 %v1095_v26, %v1131_v53  ;;  %v16232_v53 = vmov 0  }
 0x168   : > { %1802 = vst.msk [vmem:[#allocation2 + $0x8] sm:$0xff] %vm12873_vm3, %v16232_v53  ;;  %1801 = vst.msk [vmem:[#allocation2] sm:$0xff] %vm12873_vm3, %v16232_v53 }
 0x169   : > { %1513 = vperm.xlu0 %10880, %v1155_v51   ;;  %v1160_v51 = vsub.f32 %v1088_v54, %v1124_v46  ;;  %1803 = vst.msk [vmem:[#allocation2 + $0x10] sm:$0xff] %vm12873_vm3, %v16232_v53  ;;  %1804 = vst.msk [vmem:[#allocation2 + $0x18] sm:$0xff] %vm12873_vm3, %v16232_v53 }
 0x16a   : > { %1478 = vperm.xlu1 %10881, %v1148_v50   ;;  %1805 = vst.msk [vmem:[#allocation2 + $0x20] sm:$0xff] %vm12873_vm3, %v16232_v53  ;;  %1806 = vst.msk [vmem:[#allocation2 + $0x28] sm:$0xff] %vm12873_vm3, %v16232_v53 }
 0x16b   : > { %1807 = vst.msk [vmem:[#allocation2 + $0x30] sm:$0xff] %vm12873_vm3, %v16232_v53  ;;  %1808 = vst.msk [vmem:[#allocation2 + $0x38] sm:$0xff] %vm12873_vm3, %v16232_v53 }
 0x16c   : > { %1809 = vst.msk [vmem:[#allocation2 + $0x40] sm:$0xff] %vm12873_vm3, %v16232_v53  ;;  %1810 = vst.msk [vmem:[#allocation2 + $0x48] sm:$0xff] %vm12873_vm3, %v16232_v53 }
 0x16d   : > { %1523 = vperm.xlu0 %10880, %v1157_v63   ;;  %v16227_v63 = vld [vmem:[#allocation16_spill] sm:$0xff]  ;;  %1811 = vst.msk [vmem:[#allocation2 + $0x50] sm:$0xff] %vm12873_vm3, %v16232_v53  ;;  %1812 = vst.msk [vmem:[#allocation2 + $0x58] sm:$0xff] %vm12873_vm3, %v16232_v53 }
 0x16e   : > { %1488 = vperm.xlu1 %10881, %v1150_v3   ;;  %v1128_v15 = vmul.f32 %v12691_v55, %v16227_v63  ;;  %v1171_v3 = vsub.f32 %v1099_v41, %v1135_v43  ;;  %v1094_v55 = vld [vmem:[%s12701_s6 + $0xe0] sm:$0xff]  ;;  %1813 = vst.msk [vmem:[#allocation2 + $0x60] sm:$0xff] %vm12873_vm3, %v16232_v53  ;;  %1814 = vst.msk [vmem:[#allocation2 + $0x68] sm:$0xff] %vm12873_vm3, %v16232_v53  ;;  %s11776_s6 = smov 113  }
 0x16f   : > { %1815 = vst.msk [vmem:[#allocation2 + $0x70] sm:$0xff] %vm12873_vm3, %v16232_v53  ;;  %1816 = vst.msk [vmem:[#allocation2 + $0x78] sm:$0xff] %vm12873_vm3, %v16232_v53 }
 0x170   : > { %v1164_v45 = vsub.f32 %v1092_v12, %v1128_v15  ;;  %1817 = vst.msk [vmem:[#allocation2 + $0x80] sm:$0xff] %vm12873_vm3, %v16232_v53  ;;  %1818 = vst.msk [vmem:[#allocation2 + $0x88] sm:$0xff] %vm12873_vm3, %v16232_v53 }
 0x171   : > { %1533 = vperm.xlu0 %10880, %v1159_v56   ;;  %v1130_v56 = vmul.f32 %v12708_v9, %v16228_v17  ;;  %1819 = vst.msk [vmem:[#allocation2 + $0x90] sm:$0xff] %vm12873_vm3, %v16232_v53  ;;  %1820 = vst.msk [vmem:[#allocation2 + $0x98] sm:$0xff] %vm12873_vm3, %v16232_v53 }
 0x172   : > { %1498 = vperm.xlu1 %10881, %v1152_v33   ;;  %1821 = vst.msk [vmem:[#allocation2 + $0xa0] sm:$0xff] %vm12873_vm3, %v16232_v53  ;;  %1822 = vst.msk [vmem:[#allocation2 + $0xa8] sm:$0xff] %vm12873_vm3, %v16232_v53 }
 0x173   : > { %v1166_v44 = vsub.f32 %v1094_v55, %v1130_v56  ;;  %1823 = vst.msk [vmem:[#allocation2 + $0xb0] sm:$0xff] %vm12873_vm3, %v16232_v53  ;;  %1824 = vst.msk [vmem:[#allocation2 + $0xb8] sm:$0xff] %vm12873_vm3, %v16232_v53  ;;  %v11679_v56 = vld [vmem:[%s11823_s24 + $0x38] sm:$0xff] }
 0x174   : > { %1825 = vst.msk [vmem:[#allocation2 + $0xc0] sm:$0xff] %vm12873_vm3, %v16232_v53  ;;  %1826 = vst.msk [vmem:[#allocation2 + $0xc8] sm:$0xff] %vm12873_vm3, %v16232_v53 }
 0x175   : > { %1543 = vperm.xlu0 %10880, %v1161_v32   ;;  %v1134_v32 = vmul.f32 %v12723_v13, %v12637_v5  ;;  %1827 = vst.msk [vmem:[#allocation2 + $0xd0] sm:$0xff] %vm12873_vm3, %v16232_v53  ;;  %1828 = vst.msk [vmem:[#allocation2 + $0xd8] sm:$0xff] %vm12873_vm3, %v16232_v53 }
 0x176   : > { %1508 = vperm.xlu1 %10881, %v1154_v20   ;;  %1829 = vst.msk [vmem:[#allocation2 + $0xe0] sm:$0xff] %vm12873_vm3, %v16232_v53  ;;  %1830 = vst.msk [vmem:[#allocation2 + $0xe8] sm:$0xff] %vm12873_vm3, %v16232_v53 }
 0x177   : > { %v1170_v42 = vsub.f32 %v1098_v30, %v1134_v32  ;;  %1831 = vst.msk [vmem:[#allocation2 + $0xf0] sm:$0xff] %vm12873_vm3, %v16232_v53  ;;  %1832 = vst.msk [vmem:[#allocation2 + $0xf8] sm:$0xff] %vm12873_vm3, %v16232_v53  ;;  %v10283_v32 = vld.sshfl [vmem:[%s16112_s4] sm:$0x11 pattern:$0x75316420] }
 0x178   : > { %1833 = vst.msk [vmem:[#allocation2 + $0x100] sm:$0xff] %vm12873_vm3, %v16232_v53  ;;  %1834 = vst.msk [vmem:[#allocation2 + $0x108] sm:$0xff] %vm12873_vm3, %v16232_v53 }
 0x179   : > { %1553 = vperm.xlu0 %10880, %v1163_v31   ;;  %v1172_v31 = vsub.f32 %v1100_v58, %v1136_v60  ;;  %1835 = vst.msk [vmem:[#allocation2 + $0x110] sm:$0xff] %vm12873_vm3, %v16232_v53  ;;  %1836 = vst.msk [vmem:[#allocation2 + $0x118] sm:$0xff] %vm12873_vm3, %v16232_v53 }
 0x17a   : > { %1518 = vperm.xlu1 %10881, %v1156_v28   ;;  %1837 = vst.msk [vmem:[#allocation2 + $0x120] sm:$0xff] %vm12873_vm3, %v16232_v53  ;;  %1838 = vst.msk [vmem:[#allocation2 + $0x128] sm:$0xff] %vm12873_vm3, %v16232_v53 }
 0x17b   : > { %1839 = vst.msk [vmem:[#allocation2 + $0x130] sm:$0xff] %vm12873_vm3, %v16232_v53  ;;  %1840 = vst.msk [vmem:[#allocation2 + $0x138] sm:$0xff] %vm12873_vm3, %v16232_v53 }
 0x17c   : > { %v12799_v6 = vpop.permute.xlu1 %1181  ;;  %1841 = vst.msk [vmem:[#allocation2 + $0x140] sm:$0xff] %vm12873_vm3, %v16232_v53  ;;  %1842 = vst.msk [vmem:[#allocation2 + $0x148] sm:$0xff] %vm12873_vm3, %v16232_v53 }
 0x17d   : > { %1563 = vperm.xlu0 %10880, %v1165_v59   ;;  %v12823_v22 = vpop.permute.xlu0 %1176  ;;  %1843 = vst.msk [vmem:[#allocation2 + $0x150] sm:$0xff] %vm12873_vm3, %v16232_v53  ;;  %1844 = vst.msk [vmem:[#allocation2 + $0x158] sm:$0xff] %vm12873_vm3, %v16232_v53  ;;  %v1356_v43 = vmul.f32 %v11676_v39, %v12799_v6 }
 0x17e   : > { %1528 = vperm.xlu1 %10881, %v1158_v24   ;;  %1845 = vst.msk [vmem:[#allocation2 + $0x160] sm:$0xff] %vm12873_vm3, %v16232_v53  ;;  %1846 = vst.msk [vmem:[#allocation2 + $0x168] sm:$0xff] %vm12873_vm3, %v16232_v53 }
 0x17f   : > { %1847 = vst.msk [vmem:[#allocation2 + $0x170] sm:$0xff] %vm12873_vm3, %v16232_v53  ;;  %1848 = vst.msk [vmem:[#allocation2 + $0x178] sm:$0xff] %vm12873_vm3, %v16232_v53  ;;  %vm3138_vm3 = vcmask 1031168  }
 0x181   : > { %v12810_v50 = vpop.permute.xlu1 %1186  ;;  %1573 = vperm.xlu0 %10880, %v1167_v1  }
 0x182   : > { %1538 = vperm.xlu1 %10881, %v1160_v51  }
 0x185   : > { %v12818_v11 = vpop.permute.xlu1 %1191  ;;  %1583 = vperm.xlu0 %10880, %v1169_v37   ;;  %v2288_v37 = vlaneseq }
 0x186   : > { %1548 = vperm.xlu1 %10881, %v1162_v34   ;;  %v11677_v34 = vld [vmem:[%s11823_s24 + $0x18] sm:$0xff]  ;;  %v1360_v17 = vmul.f32 %v11678_v2, %v12818_v11  ;;  %v1361_v55 = vmul.f32 %v11679_v56, %v12818_v11 }
 0x187   : > { %v1357_v41 = vmul.f32 %v11677_v34, %v12799_v6  ;;  %v11681_v11 = vld [vmem:[%s11823_s24 + $0x58] sm:$0xff]  ;;  %v2284_v34 = vcombine.high %v10283_v32, %v10283_v32 }
 0x189   : > { %v12828_v16 = vpop.permute.xlu1 %1196  ;;  %1593 = vperm.xlu0 %10880, %v1171_v3  }
 0x18a   : > { %1558 = vperm.xlu1 %10881, %v1164_v45   ;;  %v2289_v45 = vshrl.u32 %v2288_v37, 7 }
 0x18c   : > { %v12831_v33 = vpop.permute.xlu0 %1221  ;;  %v13060_v30 = vsub.s32 %v2287_v18, %v2289_v45 }
 0x18d   : > { %v12835_v14 = vpop.permute.xlu1 %1201  ;;  %1603 = vperm.xlu0 %10880, %v1173_v21  }
 0x18e   : > { %1568 = vperm.xlu1 %10881, %v1166_v44   ;;  %v1365_v58 = vmul.f32 %v11681_v11, %v12835_v14  ;;  %v13080_v11 = vsub.s32 0, %v2289_v45 }
 0x190   : > { %v12838_v9 = vpop.permute.xlu0 %1231 }
 0x191   : > { %v12842_v47 = vpop.permute.xlu1 %1206 }
 0x192   : > { %1578 = vperm.xlu1 %10881, %v1168_v10  }
 0x194   : > { %v12845_v20 = vpop.permute.xlu0 %1241 }
 0x195   : > { %v12849_v29 = vpop.permute.xlu1 %1211 }
 0x196   : > { %1588 = vperm.xlu1 %10881, %v1170_v42   ;;  %v11680_v42 = vld [vmem:[%s11823_s24 + $0x50] sm:$0xff] }
 0x197   : > { %v1364_v60 = vmul.f32 %v11680_v42, %v12835_v14  ;;  %v11683_v14 = vld [vmem:[%s11823_s24 + $0x78] sm:$0xff] }
 0x198   : > { %v12852_v61 = vpop.permute.xlu0 %1251 }
 0x199   : > { %v12854_v28 = vpop.permute.xlu1 %1216 }
 0x19a   : > { %1598 = vperm.xlu1 %10881, %v1172_v31  }
 0x19c   : > { %v12856_v5 = vpop.permute.xlu0 %1261 }
 0x19d   : > { %v12858_v13 = vpop.permute.xlu1 %1226 }
 0x1a0   : > { %v12860_v62 = vpop.permute.xlu0 %1271 }
 0x1a1   : > { %v12862_v48 = vpop.permute.xlu1 %1236 }
 0x1a4   : > { %v12864_v19 = vpop.permute.xlu0 %1281 }
 0x1a5   : > { %v12866_v4 = vpop.permute.xlu1 %1246 }
 0x1a8   : > { %v12868_v25 = vpop.permute.xlu0 %1291 }
 0x1a9   : > { %v12870_v38 = vpop.permute.xlu1 %1256 }
 0x1ac   : > { %v13021_v59 = vpop.permute.xlu0 %1301 }
 0x1ad   : > { %v13023_v24 = vpop.permute.xlu1 %1266 }
 0x1b0   : > { %v13025_v26 = vpop.permute.xlu0 %1311 }
 0x1b1   : > { %v13027_v8 = vpop.permute.xlu1 %1276 }
 0x1b4   : > { %v13029_v46 = vpop.permute.xlu0 %1321 }
 0x1b5   : > { %v13031_v54 = vpop.permute.xlu1 %1286 }
 0x1b8   : > { %v13033_v57 = vpop.permute.xlu0 %1331 }
 0x1b9   : > { %v13035_v36 = vpop.permute.xlu1 %1296 }
 0x1bc   : > { %v13037_v1 = vpop.permute.xlu0 %1341 }
 0x1bd   : > { %v13039_v51 = vpop.permute.xlu1 %1306 }
 0x1c0   : > { %v13041_v35 = vpop.permute.xlu0 %1351 }
 0x1c1   : > { %v13043_v0 = vpop.permute.xlu1 %1316 }
 0x1c4   : > { %v1434_v63 = vpop.permute.xlu0 %1433 }
 0x1c5   : > { %v13049_v15 = vpop.permute.xlu1 %1326  ;;  %v1608_v12 = vadd.f32 %v1434_v63, %v1356_v43  ;;  %v1609_v3 = vadd.f32 %v1434_v63, %v1357_v41  ;;  %v2291_v41 = vrot.slane %v10283_v32, %v13060_v30  ;;  %v11682_v63 = vld [vmem:[%s11823_s24 + $0x70] sm:$0xff] }
 0x1c7   : > { %v1680_v21 = vmax.f32 %v1608_v12, 0.0  ;;  %v1681_v44 = vmax.f32 %v1609_v3, 0.0  ;;  %v1368_v12 = vmul.f32 %v11682_v63, %v12849_v29  ;;  %v1369_v3 = vmul.f32 %v11683_v14, %v12849_v29 }
 0x1c8   : > { %v1444_v7 = vpop.permute.xlu0 %1443  ;;  %v2298_v29 = vrot.slane %v2284_v34, %v13060_v30  ;;  %v11689_v34 = vld [vmem:[%s11823_s24 + $0x28] sm:$0xff] }
 0x1c9   : > { %v10818_v27 = vpack.c.bf16 %v1681_v44, %v1680_v21  ;;  %v13055_v6 = vpop.permute.xlu1 %1336  ;;  %v1612_v49 = vadd.f32 %v1444_v7, %v1360_v17  ;;  %v1613_v10 = vadd.f32 %v1444_v7, %v1361_v55  ;;  %v11684_v17 = vld [vmem:[%s11823_s24] sm:$0xff]  ;;  %v11685_v55 = vld [vmem:[%s11823_s24 + $0x8] sm:$0xff] }
 0x1ca   : > { %v1354_v56 = vmul.f32 %v11684_v17, %v12823_v22  ;;  %v1355_v21 = vmul.f32 %v11685_v55, %v12823_v22 }
 0x1cb   : > { %v1684_v31 = vmax.f32 %v1612_v49, 0.0  ;;  %v1685_v52 = vmax.f32 %v1613_v10, 0.0  ;;  %2007 = vrot.lane.b32.xlu0 %v10818_v27, %s11763_s9 }
 0x1cc   : > { %v1454_v40 = vpop.permute.xlu0 %1453 }
 0x1cd   : > { %v10820_v23 = vpack.c.bf16 %v1685_v52, %v1684_v31  ;;  %v13067_v37 = vpop.permute.xlu1 %1346  ;;  %v1616_v39 = vadd.f32 %v1454_v40, %v1364_v60  ;;  %v1617_v43 = vadd.f32 %v1454_v40, %v1365_v58  ;;  %v2300_v60 = vpack.i.b16 %v2291_v41, %v2291_v41  ;;  %v11686_v58 = vld [vmem:[%s11823_s24 + $0x90] sm:$0xff]  ;;  %v11687_v52 = vld [vmem:[%s11823_s24 + $0x98] sm:$0xff] }
 0x1ce   : > { %v1372_v31 = vmul.f32 %v11686_v58, %v12831_v33  ;;  %v1373_v22 = vmul.f32 %v11687_v52, %v12831_v33  ;;  %v1359_v41 = vmul.f32 %v11689_v34, %v12810_v50 }
 0x1cf   : > { %v1688_v18 = vmax.f32 %v1616_v39, 0.0  ;;  %v1689_v2 = vmax.f32 %v1617_v43, 0.0  ;;  %2011 = vrot.lane.b32.xlu0 %v10820_v23, %s11763_s9  ;;  %v11688_v39 = vld [vmem:[%s11823_s24 + $0x20] sm:$0xff] }
 0x1d0   : > { %v1464_v44 = vpop.permute.xlu0 %1463  ;;  %v1358_v43 = vmul.f32 %v11688_v39, %v12810_v50 }
 0x1d1   : > { %v10822_v7 = vpack.c.bf16 %v1689_v2, %v1688_v18  ;;  %v1429_v27 = vpop.permute.xlu1 %1428  ;;  %v1620_v49 = vadd.f32 %v1464_v44, %v1368_v12  ;;  %v1621_v10 = vadd.f32 %v1464_v44, %v1369_v3  ;;  %v2307_v2 = vpack.i.b16 %v2298_v29, %v2298_v29  ;;  %v11690_v44 = vld [vmem:[%s11823_s24 + $0xb0] sm:$0xff]  ;;  %v11693_v29 = vld [vmem:[%s11823_s24 + $0x48] sm:$0xff] }
 0x1d2   : > { %v1606_v32 = vadd.f32 %v1429_v27, %v1354_v56  ;;  %v1607_v42 = vadd.f32 %v1429_v27, %v1355_v21  ;;  %v2305_v21 = vrot.slane %v2300_v60, %v13080_v11  ;;  %v11691_v27 = vld [vmem:[%s11823_s24 + $0xb8] sm:$0xff]  ;;  %v1363_v58 = vmul.f32 %v11693_v29, %v12828_v16 }
 0x1d3   : > { %v1692_v40 = vmax.f32 %v1620_v49, 0.0  ;;  %v1693_v23 = vmax.f32 %v1621_v10, 0.0  ;;  %2015 = vrot.lane.b32.xlu0 %v10822_v7, %s11763_s9  ;;  %v1376_v7 = vmul.f32 %v11690_v44, %v12838_v9  ;;  %v1377_v50 = vmul.f32 %v11691_v27, %v12838_v9 }
 0x1d4   : > { %v1678_v45 = vmax.f32 %v1606_v32, 0.0  ;;  %v1679_v63 = vmax.f32 %v1607_v42, 0.0  ;;  %v1474_v12 = vpop.permute.xlu0 %1473  ;;  %v11692_v32 = vld [vmem:[%s11823_s24 + $0x40] sm:$0xff]  ;;  %v2312_v39 = vrot.slane %v2307_v2, %v13080_v11 }
 0x1d5   : > { %v10824_v14 = vpack.c.bf16 %v1693_v23, %v1692_v40  ;;  %v1439_v3 = vpop.permute.xlu1 %1438  ;;  %v1624_v18 = vadd.f32 %v1474_v12, %v1372_v31  ;;  %v1625_v33 = vadd.f32 %v1474_v12, %v1373_v22  ;;  %v1362_v42 = vmul.f32 %v11692_v32, %v12828_v16  ;;  %v11695_v16 = vld [vmem:[%s11823_s24 + $0xd8] sm:$0xff] }
 0x1d6   : > { %v10817_v17 = vpack.c.bf16 %v1679_v63, %v1678_v45  ;;  %v1610_v56 = vadd.f32 %v1439_v3, %v1358_v43  ;;  %v1611_v55 = vadd.f32 %v1439_v3, %v1359_v41  ;;  %v11694_v45 = vld [vmem:[%s11823_s24 + $0xd0] sm:$0xff]  ;;  %v1381_v12 = vmul.f32 %v11695_v16, %v12845_v20 }
 0x1d7   : > { %v1696_v49 = vmax.f32 %v1624_v18, 0.0  ;;  %v1697_v10 = vmax.f32 %v1625_v33, 0.0  ;;  %2019 = vrot.lane.b32.xlu0 %v10824_v14, %s11763_s9  ;;  %v1380_v63 = vmul.f32 %v11694_v45, %v12845_v20  ;;  %v11696_v18 = vld [vmem:[%s11823_s24 + $0x60] sm:$0xff] }
 0x1d8   : > { %v1682_v31 = vmax.f32 %v1610_v56, 0.0  ;;  %v1683_v60 = vmax.f32 %v1611_v55, 0.0  ;;  %2005 = vrot.lane.b32.xlu1 %v10817_v17, %s11763_s9  ;;  %v1484_v52 = vpop.permute.xlu0 %1483  ;;  %v1366_v33 = vmul.f32 %v11696_v18, %v12842_v47  ;;  %v11697_v17 = vld [vmem:[%s11823_s24 + $0x68] sm:$0xff] }
 0x1d9   : > { %v10826_v22 = vpack.c.bf16 %v1697_v10, %v1696_v49  ;;  %v1449_v9 = vpop.permute.xlu1 %1448  ;;  %v1628_v40 = vadd.f32 %v1484_v52, %v1376_v7  ;;  %v1629_v23 = vadd.f32 %v1484_v52, %v1377_v50  ;;  %v1367_v2 = vmul.f32 %v11697_v17, %v12842_v47  ;;  %v11698_v10 = vld [vmem:[%s11823_s24 + $0xf0] sm:$0xff]  ;;  %v11699_v47 = vld [vmem:[%s11823_s24 + $0x80] sm:$0xff] }
 0x1da   : > { %v10819_v43 = vpack.c.bf16 %v1683_v60, %v1682_v31  ;;  %v1614_v34 = vadd.f32 %v1449_v9, %v1362_v42  ;;  %v1615_v41 = vadd.f32 %v1449_v9, %v1363_v58  ;;  %v13113_v49 = vcombine.low %v2305_v21, %v2312_v39  ;;  %v11700_v60 = vld [vmem:[%s11823_s24 + $0xf8] sm:$0xff] }
 0x1db   : > { %v1700_v14 = vmax.f32 %v1628_v40, 0.0  ;;  %v1701_v3 = vmax.f32 %v1629_v23, 0.0  ;;  %2023 = vrot.lane.b32.xlu0 %v10826_v22, %s11763_s9  ;;  %v1384_v32 = vmul.f32 %v11698_v10, %v12852_v61  ;;  %v1370_v31 = vmul.f32 %v11699_v47, %v12854_v28  ;;  %v11701_v40 = vld [vmem:[%s11823_s24 + $0x88] sm:$0xff] }
 0x1dc   : > { %v1686_v56 = vmax.f32 %v1614_v34, 0.0  ;;  %v1687_v55 = vmax.f32 %v1615_v41, 0.0  ;;  %2009 = vrot.lane.b32.xlu1 %v10819_v43, %s11763_s9  ;;  %v1494_v44 = vpop.permute.xlu0 %1493  ;;  %v1385_v52 = vmul.f32 %v11700_v60, %v12852_v61  ;;  %v1371_v21 = vmul.f32 %v11701_v40, %v12854_v28  ;;  %v11702_v28 = vld [vmem:[%s11823_s24 + $0x110] sm:$0xff]  ;;  %v11707_v40 = vld [vmem:[%s11823_s24 + $0xc8] sm:$0xff] }
 0x1dd   : > { %v10828_v7 = vpack.c.bf16 %v1701_v3, %v1700_v14  ;;  %v1459_v20 = vpop.permute.xlu1 %1458  ;;  %v1632_v27 = vadd.f32 %v1494_v44, %v1380_v63  ;;  %v1633_v50 = vadd.f32 %v1494_v44, %v1381_v12  ;;  %v2235_v63 = vld [vmem:[#allocation2 + $0x38] sm:$0xff]  ;;  %v1388_v18 = vmul.f32 %v11702_v28, %v12856_v5  ;;  %v11704_v44 = vld [vmem:[%s11823_s24 + $0xa0] sm:$0xff] }
 0x1de   : > { %v10821_v42 = vpack.c.bf16 %v1687_v55, %v1686_v56  ;;  %v1618_v29 = vadd.f32 %v1459_v20, %v1366_v33  ;;  %v1619_v58 = vadd.f32 %v1459_v20, %v1367_v2  ;;  %v2326_v3 = vmul.bf16 %v13113_v49, %v2235_v63  ;;  %v11703_v33 = vld [vmem:[%s11823_s24 + $0x118] sm:$0xff]  ;;  %v11705_v20 = vld [vmem:[%s11823_s24 + $0xa8] sm:$0xff] }
 0x1df   : > { %v1704_v22 = vmax.f32 %v1632_v27, 0.0  ;;  %v1705_v9 = vmax.f32 %v1633_v50, 0.0  ;;  %2027 = vrot.lane.b32.xlu0 %v10828_v7, %s11763_s9  ;;  %v1389_v17 = vmul.f32 %v11703_v33, %v12856_v5  ;;  %v1374_v7 = vmul.f32 %v11704_v44, %v12858_v13 }
 0x1e0   : > { %v1690_v23 = vmax.f32 %v1618_v29, 0.0  ;;  %v1691_v39 = vmax.f32 %v1619_v58, 0.0  ;;  %2013 = vrot.lane.b32.xlu1 %v10821_v42, %s11763_s9  ;;  %v1504_v43 = vpop.permute.xlu0 %1503  ;;  %v1375_v27 = vmul.f32 %v11705_v20, %v12858_v13  ;;  %2376 = vst.msk [vmem:[#allocation3 + $0x138] sm:$0xff] %vm13133_vm5, %v2326_v3  ;;  %v11706_v13 = vld [vmem:[%s11823_s24 + $0xc0] sm:$0xff] }
 0x1e1   : > { %v10830_v34 = vpack.c.bf16 %v1705_v9, %v1704_v22  ;;  %v1469_v41 = vpop.permute.xlu1 %1468  ;;  %v1636_v45 = vadd.f32 %v1504_v43, %v1384_v32  ;;  %v1637_v61 = vadd.f32 %v1504_v43, %v1385_v52  ;;  %v1378_v9 = vmul.f32 %v11706_v13, %v12862_v48  ;;  %v11708_v3 = vld [vmem:[%s11823_s24 + $0xe0] sm:$0xff]  ;;  %v11712_v13 = vld [vmem:[%s11823_s24 + $0x130] sm:$0xff] }
 0x1e2   : > { %v10823_v16 = vpack.c.bf16 %v1691_v39, %v1690_v23  ;;  %v1622_v12 = vadd.f32 %v1469_v41, %v1370_v31  ;;  %v1623_v14 = vadd.f32 %v1469_v41, %v1371_v21  ;;  %v1379_v21 = vmul.f32 %v11707_v40, %v12862_v48 }
 0x1e3   : > { %v1708_v2 = vmax.f32 %v1636_v45, 0.0  ;;  %v1709_v56 = vmax.f32 %v1637_v61, 0.0  ;;  %2031 = vrot.lane.b32.xlu0 %v10830_v34, %s11763_s9  ;;  %v10285_v34 = vld.sshfl [vmem:[%s16112_s4 + $0x2] sm:$0x11 pattern:$0x75316420]  ;;  %v1382_v28 = vmul.f32 %v11708_v3, %v12866_v4 }
 0x1e4   : > { %v1694_v50 = vmax.f32 %v1622_v12, 0.0  ;;  %v1695_v10 = vmax.f32 %v1623_v14, 0.0  ;;  %2017 = vrot.lane.b32.xlu1 %v10823_v16, %s11763_s9  ;;  %v1514_v5 = vpop.permute.xlu0 %1513  ;;  %v2231_v61 = vld [vmem:[#allocation2 + $0x18] sm:$0xff]  ;;  %v2858_v48 = vcombine.high %v10285_v34, %v10285_v34 }
 0x1e5   : > { %v10832_v32 = vpack.c.bf16 %v1709_v56, %v1708_v2  ;;  %v1479_v42 = vpop.permute.xlu1 %1478  ;;  %v1640_v29 = vadd.f32 %v1514_v5, %v1388_v18  ;;  %v1641_v58 = vadd.f32 %v1514_v5, %v1389_v17  ;;  %v2322_v14 = vmul.bf16 %v13113_v49, %v2231_v61  ;;  %v11709_v18 = vld [vmem:[%s11823_s24 + $0xe8] sm:$0xff]  ;;  %v2243_v3 = vld [vmem:[#allocation2 + $0x78] sm:$0xff] }
 0x1e6   : > { %v10825_v47 = vpack.c.bf16 %v1695_v10, %v1694_v50  ;;  %v1626_v31 = vadd.f32 %v1479_v42, %v1374_v7  ;;  %v1627_v60 = vadd.f32 %v1479_v42, %v1375_v27  ;;  %v1383_v33 = vmul.f32 %v11709_v18, %v12866_v4  ;;  %v11710_v4 = vld [vmem:[%s11823_s24 + $0x100] sm:$0xff] }
 0x1e7   : > { %v1712_v52 = vmax.f32 %v1640_v29, 0.0  ;;  %v1713_v22 = vmax.f32 %v1641_v58, 0.0  ;;  %2035 = vrot.lane.b32.xlu0 %v10832_v32, %s11763_s9  ;;  %2372 = vst.msk [vmem:[#allocation3 + $0x18] sm:$0xff] %vm13133_vm5, %v2322_v14  ;;  %v2865_v50 = vrot.slane %v10285_v34, %v13060_v30  ;;  %v2872_v10 = vrot.slane %v2858_v48, %v13060_v30  ;;  %v11711_v32 = vld [vmem:[%s11823_s24 + $0x108] sm:$0xff] }
 0x1e8   : > { %v1698_v23 = vmax.f32 %v1626_v31, 0.0  ;;  %v1699_v39 = vmax.f32 %v1627_v60, 0.0  ;;  %2021 = vrot.lane.b32.xlu1 %v10825_v47, %s11763_s9  ;;  %v1524_v43 = vpop.permute.xlu0 %1523  ;;  %v1386_v5 = vmul.f32 %v11710_v4, %v12870_v38  ;;  %v1387_v42 = vmul.f32 %v11711_v32, %v12870_v38  ;;  %v11714_v38 = vld [vmem:[%s11823_s24 + $0x120] sm:$0xff]  ;;  %v11715_v34 = vld [vmem:[%s11823_s24 + $0x128] sm:$0xff] }
 0x1e9   : > { %v10834_v41 = vpack.c.bf16 %v1713_v22, %v1712_v52  ;;  %v1489_v45 = vpop.permute.xlu1 %1488  ;;  %v1392_v30 = vmul.f32 %v11712_v13, %v12860_v62 }
 0x1ea   : > { %v10827_v63 = vpack.c.bf16 %v1699_v39, %v1698_v23  ;;  %v1630_v16 = vadd.f32 %v1489_v45, %v1378_v9  ;;  %v1631_v12 = vadd.f32 %v1489_v45, %v1379_v21  ;;  %v11713_v9 = vld [vmem:[%s11823_s24 + $0x138] sm:$0xff]  ;;  %v2874_v21 = vpack.i.b16 %v2865_v50, %v2865_v50 }
 0x1eb   : > { %2039 = vrot.lane.b32.xlu0 %v10834_v41, %s11763_s9  ;;  %v1393_v40 = vmul.f32 %v11713_v9, %v12860_v62  ;;  %v2881_v23 = vpack.i.b16 %v2872_v10, %v2872_v10  ;;  %v1390_v39 = vmul.f32 %v11714_v38, %v13023_v24  ;;  %v1391_v41 = vmul.f32 %v11715_v34, %v13023_v24  ;;  %v11722_v34 = vld [vmem:[%s11823_s24 + $0x170] sm:$0xff] }
 0x1ec   : > { %v1702_v17 = vmax.f32 %v1630_v16, 0.0  ;;  %v1703_v2 = vmax.f32 %v1631_v12, 0.0  ;;  %2025 = vrot.lane.b32.xlu1 %v10827_v63, %s11763_s9  ;;  %v13160_v56 = vpop.permute.xlu0 %1533  ;;  %v1644_v63 = vadd.f32 %v1524_v43, %v1392_v30  ;;  %v2334_v24 = vmul.bf16 %v13113_v49, %v2243_v3 }
 0x1ed   : > { %v1499_v44 = vpop.permute.xlu1 %1498  ;;  %v1645_v16 = vadd.f32 %v1524_v43, %v1393_v40  ;;  %v2886_v18 = vrot.slane %v2881_v23, %v13080_v11 }
 0x1ee   : > { %v10829_v7 = vpack.c.bf16 %v1703_v2, %v1702_v17  ;;  %v1634_v20 = vadd.f32 %v1499_v44, %v1382_v28  ;;  %v1635_v27 = vadd.f32 %v1499_v44, %v1383_v33  ;;  %v2879_v28 = vrot.slane %v2874_v21, %v13080_v11  ;;  %v11716_v33 = vld [vmem:[%s11823_s24 + $0x140] sm:$0xff]  ;;  %v11717_v2 = vld [vmem:[%s11823_s24 + $0x148] sm:$0xff]  ;;  %2384 = vst.msk [vmem:[#allocation3 + $0x378] sm:$0xff] %vm13133_vm5, %v2334_v24 }
 0x1ef   : > { %v1394_v17 = vmul.f32 %v11716_v33, %v13027_v8  ;;  %v1395_v44 = vmul.f32 %v11717_v2, %v13027_v8  ;;  %v1716_v50 = vmax.f32 %v1644_v63, 0.0  ;;  %v1717_v10 = vmax.f32 %v1645_v16, 0.0 }
 0x1f0   : > { %v1706_v29 = vmax.f32 %v1634_v20, 0.0  ;;  %v1707_v58 = vmax.f32 %v1635_v27, 0.0  ;;  %2029 = vrot.lane.b32.xlu1 %v10829_v7, %s11763_s9  ;;  %v13171_v22 = vpop.permute.xlu0 %1543  ;;  %v11718_v27 = vld [vmem:[%s11823_s24 + $0x150] sm:$0xff] }
 0x1f1   : > { %v1509_v47 = vpop.permute.xlu1 %1508  ;;  %v1396_v11 = vmul.f32 %v11718_v27, %v12864_v19  ;;  %v11728_v27 = vld [vmem:[%s11823_s24 + $0x1a0] sm:$0xff] }
 0x1f2   : > { %v10831_v31 = vpack.c.bf16 %v1707_v58, %v1706_v29  ;;  %v1638_v60 = vadd.f32 %v1509_v47, %v1386_v5  ;;  %v1639_v52 = vadd.f32 %v1509_v47, %v1387_v42  ;;  %v11719_v5 = vld [vmem:[%s11823_s24 + $0x158] sm:$0xff]  ;;  %v11720_v58 = vld [vmem:[%s11823_s24 + $0x160] sm:$0xff] }
 0x1f3   : > { %v1397_v8 = vmul.f32 %v11719_v5, %v12864_v19  ;;  %v1398_v47 = vmul.f32 %v11720_v58, %v13031_v54  ;;  %v1648_v13 = vadd.f32 %v13160_v56, %v1396_v11  ;;  %v10836_v19 = vpack.c.bf16 %v1717_v10, %v1716_v50  ;;  %v11729_v50 = vld [vmem:[%s11823_s24 + $0x1a8] sm:$0xff] }
 0x1f4   : > { %v1710_v45 = vmax.f32 %v1638_v60, 0.0  ;;  %v1711_v61 = vmax.f32 %v1639_v52, 0.0  ;;  %2033 = vrot.lane.b32.xlu1 %v10831_v31, %s11763_s9  ;;  %v13189_v20 = vpop.permute.xlu0 %1553  ;;  %v13200_v31 = vcombine.low %v2879_v28, %v2886_v18  ;;  %v11721_v60 = vld [vmem:[%s11823_s24 + $0x168] sm:$0xff]  ;;  %v1406_v11 = vmul.f32 %v11728_v27, %v13039_v51 }
 0x1f5   : > { %v1519_v12 = vpop.permute.xlu1 %1518  ;;  %v1399_v52 = vmul.f32 %v11721_v60, %v13031_v54  ;;  %v1649_v30 = vadd.f32 %v13160_v56, %v1397_v8  ;;  %v1400_v56 = vmul.f32 %v11722_v34, %v12868_v25  ;;  %v1720_v3 = vmax.f32 %v1648_v13, 0.0  ;;  %v11730_v60 = vld [vmem:[%s11823_s24 + $0x1b0] sm:$0xff]  ;;  %v11731_v13 = vld [vmem:[%s11823_s24 + $0x1b8] sm:$0xff] }
 0x1f6   : > { %v10833_v14 = vpack.c.bf16 %v1711_v61, %v1710_v45  ;;  %v1642_v62 = vadd.f32 %v1519_v12, %v1390_v39  ;;  %v1643_v48 = vadd.f32 %v1519_v12, %v1391_v41  ;;  %v2239_v39 = vld [vmem:[#allocation2 + $0x58] sm:$0xff]  ;;  %v11724_v61 = vld [vmem:[%s11823_s24 + $0x190] sm:$0xff]  ;;  %v11725_v12 = vld [vmem:[%s11823_s24 + $0x180] sm:$0xff]  ;;  %v1407_v10 = vmul.f32 %v11729_v50, %v13039_v51 }
 0x1f7   : > { %v11723_v41 = vld [vmem:[%s11823_s24 + $0x178] sm:$0xff]  ;;  %v1404_v63 = vmul.f32 %v11724_v61, %v13021_v59  ;;  %v2330_v16 = vmul.bf16 %v13113_v49, %v2239_v39  ;;  %v1721_v28 = vmax.f32 %v1649_v30, 0.0  ;;  %v1409_v30 = vmul.f32 %v11731_v13, %v13025_v26  ;;  %v11735_v39 = vld [vmem:[%s11823_s24 + $0x1c8] sm:$0xff] }
 0x1f8   : > { %v1714_v43 = vmax.f32 %v1642_v62, 0.0  ;;  %v1715_v7 = vmax.f32 %v1643_v48, 0.0  ;;  %2037 = vrot.lane.b32.xlu1 %v10833_v14, %s11763_s9  ;;  %v13208_v23 = vpop.permute.xlu0 %1563  ;;  %v1401_v45 = vmul.f32 %v11723_v41, %v12868_v25  ;;  %v1402_v14 = vmul.f32 %v11725_v12, %v13035_v36  ;;  %v11726_v62 = vld [vmem:[%s11823_s24 + $0x188] sm:$0xff] }
 0x1f9   : > { %v1529_v4 = vpop.permute.xlu1 %1528  ;;  %v1403_v48 = vmul.f32 %v11726_v62, %v13035_v36  ;;  %v1652_v25 = vadd.f32 %v13171_v22, %v1400_v56  ;;  %2380 = vst.msk [vmem:[#allocation3 + $0x258] sm:$0xff] %vm13133_vm5, %v2330_v16  ;;  %v11727_v36 = vld [vmem:[%s11823_s24 + $0x198] sm:$0xff]  ;;  %v1411_v34 = vmul.f32 %v11735_v39, %v13043_v0  ;;  %v11745_v39 = vld [vmem:[%s11823_s24 + $0x228] sm:$0xff] }
 0x1fa   : > { %v10835_v32 = vpack.c.bf16 %v1715_v7, %v1714_v43  ;;  %v1646_v42 = vadd.f32 %v1529_v4, %v1394_v17  ;;  %v1647_v29 = vadd.f32 %v1529_v4, %v1395_v44  ;;  %v1653_v18 = vadd.f32 %v13171_v22, %v1401_v45 }
 0x1fb   : > { %v1405_v2 = vmul.f32 %v11727_v36, %v13021_v59  ;;  %v1656_v22 = vadd.f32 %v13189_v20, %v1404_v63  ;;  %v10838_v59 = vpack.c.bf16 %v1721_v28, %v1720_v3  ;;  %v1724_v8 = vmax.f32 %v1652_v25, 0.0  ;;  %v11737_v28 = vld [vmem:[%s11823_s24 + $0x1f8] sm:$0xff] }
 0x1fc   : > { %3331 = vrot.lane.b32.xlu1 %v13113_v49, %s11764_s12  ;;  %2041 = vrot.lane.b32.xlu0 %v10835_v32, %s11763_s9  ;;  %v1718_v40 = vmax.f32 %v1646_v42, 0.0  ;;  %v1719_v21 = vmax.f32 %v1647_v29, 0.0  ;;  %v1574_v5 = vpop.permute.xlu0 %1573  ;;  %v1725_v32 = vmax.f32 %v1653_v18, 0.0  ;;  %v1417_v25 = vmul.f32 %v11737_v28, %v13033_v57  ;;  %v11738_v18 = vld [vmem:[%s11823_s24 + $0x1e0] sm:$0xff]  ;;  %v11747_v28 = vld [vmem:[%s11823_s24 + $0x238] sm:$0xff] }
 0x1fd   : > { %v1539_v9 = vpop.permute.xlu1 %1538  ;;  %v1657_v4 = vadd.f32 %v13189_v20, %v1405_v2  ;;  %v1728_v56 = vmax.f32 %v1656_v22, 0.0 }
 0x1fe   : > { %v1650_v54 = vadd.f32 %v1539_v9, %v1398_v47  ;;  %v1651_v38 = vadd.f32 %v1539_v9, %v1399_v52  ;;  %v10837_v44 = vpack.c.bf16 %v1719_v21, %v1718_v40  ;;  %v1408_v52 = vmul.f32 %v11730_v60, %v13025_v26  ;;  %v11733_v40 = vld [vmem:[%s11823_s24 + $0x1d8] sm:$0xff] }
 0x1ff   : > { %v1413_v21 = vmul.f32 %v11733_v40, %v13029_v46  ;;  %v1729_v41 = vmax.f32 %v1657_v4, 0.0  ;;  %v10840_v16 = vpack.c.bf16 %v1725_v32, %v1724_v8  ;;  %v11740_v4 = vld [vmem:[%s11823_s24 + $0x200] sm:$0xff]  ;;  %v11741_v8 = vld [vmem:[%s11823_s24 + $0x208] sm:$0xff]  ;;  %v11743_v40 = vld [vmem:[%s11823_s24 + $0x218] sm:$0xff] }
 0x200   : > { %5418 = vrot.lane.b32.xlu0 %v13200_v31, %s11765_s13  ;;  %2043 = vrot.lane.b32.xlu1 %v10836_v19, %s11763_s9  ;;  %v1722_v24 = vmax.f32 %v1650_v54, 0.0  ;;  %v1723_v33 = vmax.f32 %v1651_v38, 0.0  ;;  %v11732_v19 = vld [vmem:[%s11823_s24 + $0x1d0] sm:$0xff]  ;;  %v11734_v54 = vld [vmem:[%s11823_s24 + $0x1c0] sm:$0xff]  ;;  %v1660_v26 = vadd.f32 %v13208_v23, %v1408_v52 }
 0x201   : > { %v1549_v17 = vpop.permute.xlu1 %1548  ;;  %v1412_v9 = vmul.f32 %v11732_v19, %v13029_v46  ;;  %v1410_v38 = vmul.f32 %v11734_v54, %v13043_v0  ;;  %v1661_v46 = vadd.f32 %v13208_v23, %v1409_v30  ;;  %v1665_v2 = vadd.f32 %v1574_v5, %v1413_v21  ;;  %v11742_v19 = vld [vmem:[%s11823_s24 + $0x210] sm:$0xff]  ;;  %v11744_v54 = vld [vmem:[%s11823_s24 + $0x220] sm:$0xff] }
 0x202   : > { %v1654_v43 = vadd.f32 %v1549_v17, %v1402_v14  ;;  %v1655_v7 = vadd.f32 %v1549_v17, %v1403_v48  ;;  %v10839_v42 = vpack.c.bf16 %v1723_v33, %v1722_v24  ;;  %v1584_v14 = vpop.permute.xlu0 %1583  ;;  %v11736_v48 = vld [vmem:[%s11823_s24 + $0x1f0] sm:$0xff]  ;;  %v1414_v24 = vmul.f32 %v11738_v18, %v13049_v15  ;;  %v11739_v33 = vld [vmem:[%s11823_s24 + $0x1e8] sm:$0xff] }
 0x203   : > { %v1416_v3 = vmul.f32 %v11736_v48, %v13033_v57  ;;  %v1415_v23 = vmul.f32 %v11739_v33, %v13049_v15  ;;  %v10842_v17 = vpack.c.bf16 %v1729_v41, %v1728_v56  ;;  %v1664_v36 = vadd.f32 %v1574_v5, %v1412_v9  ;;  %v11746_v48 = vld [vmem:[%s11823_s24 + $0x230] sm:$0xff]  ;;  %s10855_s24 = smul.u32 36, %s16238_s20 }
 0x204   : > { %2045 = vrot.lane.b32.xlu0 %v10837_v44, %s11763_s9  ;;  %2892 = vrot.lane.b32.xlu1 %v13200_v31, %s11766_s14  ;;  %v1726_v29 = vmax.f32 %v1654_v43, 0.0  ;;  %v1727_v58 = vmax.f32 %v1655_v7, 0.0  ;;  %v1732_v44 = vmax.f32 %v1660_v26, 0.0  ;;  %v1733_v43 = vmax.f32 %v1661_v46, 0.0 }
 0x205   : > { %v1559_v51 = vpop.permute.xlu1 %1558  ;;  %v1419_v5 = vmul.f32 %v11741_v8, %v13055_v6  ;;  %v1736_v32 = vmax.f32 %v1664_v36, 0.0  ;;  %v1420_v9 = vmul.f32 %v11742_v19, %v13037_v1  ;;  %v1421_v21 = vmul.f32 %v11743_v40, %v13037_v1  ;;  %s13629_s27 = scalar_lea.vmem %s16111_s3, %s10855_s24 }
 0x206   : > { %v1658_v47 = vadd.f32 %v1559_v51, %v1406_v11  ;;  %v1659_v20 = vadd.f32 %v1559_v51, %v1407_v10  ;;  %v10841_v12 = vpack.c.bf16 %v1727_v58, %v1726_v29  ;;  %v2251_v11 = vld [vmem:[#allocation2 + $0xb8] sm:$0xff]  ;;  %v1668_v51 = vadd.f32 %v1584_v14, %v1416_v3  ;;  %v1594_v58 = vpop.permute.xlu0 %1593 }
 0x207   : > { %v2342_v15 = vmul.bf16 %v13113_v49, %v2251_v11  ;;  %v1669_v29 = vadd.f32 %v1584_v14, %v1417_v25  ;;  %v1672_v46 = vadd.f32 %v1594_v58, %v1420_v9  ;;  %v1424_v3 = vmul.f32 %v11746_v48, %v13041_v35  ;;  %v13298_v11 = vld [vmem:[#allocation2 + $0x18] sm:$0xff] }
 0x208   : > { %2049 = vrot.lane.b32.xlu0 %v10839_v42, %s11763_s9  ;;  %2047 = vrot.lane.b32.xlu1 %v10838_v59, %s11763_s9  ;;  %v1730_v45 = vmax.f32 %v1658_v47, 0.0  ;;  %v1731_v61 = vmax.f32 %v1659_v20, 0.0  ;;  %v1418_v59 = vmul.f32 %v11740_v4, %v13055_v6  ;;  %v1737_v42 = vmax.f32 %v1665_v2, 0.0 }
 0x209   : > { %v1569_v63 = vpop.permute.xlu1 %1568  ;;  %2392 = vst.msk [vmem:[#allocation3 + $0x5b8] sm:$0xff] %vm13133_vm5, %v2342_v15  ;;  %v10844_v6 = vpack.c.bf16 %v1733_v43, %v1732_v44  ;;  %v1740_v41 = vmax.f32 %v1668_v51, 0.0  ;;  %v1741_v26 = vmax.f32 %v1669_v29, 0.0  ;;  %v1425_v25 = vmul.f32 %v11747_v28, %v13041_v35 }
 0x20a   : > { %v1662_v0 = vadd.f32 %v1569_v63, %v1410_v38  ;;  %v1663_v62 = vadd.f32 %v1569_v63, %v1411_v34  ;;  %v10843_v7 = vpack.c.bf16 %v1731_v61, %v1730_v45  ;;  %v1422_v38 = vmul.f32 %v11744_v54, %v13067_v37 }
 0x20b   : > { %v1423_v34 = vmul.f32 %v11745_v39, %v13067_v37  ;;  %v10846_v56 = vpack.c.bf16 %v1737_v42, %v1736_v32  ;;  %v1673_v45 = vadd.f32 %v1594_v58, %v1421_v21  ;;  %v10848_v18 = vpack.c.bf16 %v1741_v26, %v1740_v41 }
 0x20c   : > { %2053 = vrot.lane.b32.xlu0 %v10841_v12, %s11763_s9  ;;  %2051 = vrot.lane.b32.xlu1 %v10840_v16, %s11763_s9  ;;  %v1734_v27 = vmax.f32 %v1662_v0, 0.0  ;;  %v1735_v50 = vmax.f32 %v1663_v62, 0.0  ;;  %v2247_v16 = vld [vmem:[#allocation2 + $0x98] sm:$0xff]  ;;  %v1604_v12 = vpop.permute.xlu0 %1603 }
 0x20d   : > { %v1579_v57 = vpop.permute.xlu1 %1578  ;;  %v2338_v37 = vmul.bf16 %v13113_v49, %v2247_v16  ;;  %v1745_v33 = vmax.f32 %v1673_v45, 0.0 }
 0x20e   : > { %v1666_v10 = vadd.f32 %v1579_v57, %v1414_v24  ;;  %v1667_v22 = vadd.f32 %v1579_v57, %v1415_v23  ;;  %v10845_v52 = vpack.c.bf16 %v1735_v50, %v1734_v27  ;;  %v1744_v24 = vmax.f32 %v1672_v46, 0.0  ;;  %v13302_v50 = vld [vmem:[#allocation2 + $0x38] sm:$0xff] }
 0x20f   : > { %2388 = vst.msk [vmem:[#allocation3 + $0x498] sm:$0xff] %vm13133_vm5, %v2338_v37  ;;  %v1676_v23 = vadd.f32 %v1604_v12, %v1424_v3 }
 0x210   : > { %2057 = vrot.lane.b32.xlu0 %v10843_v7, %s11763_s9  ;;  %2055 = vrot.lane.b32.xlu1 %v10842_v17, %s11763_s9  ;;  %v1738_v47 = vmax.f32 %v1666_v10, 0.0  ;;  %v1739_v20 = vmax.f32 %v1667_v22, 0.0  ;;  %v1677_v17 = vadd.f32 %v1604_v12, %v1425_v25  ;;  %v10850_v35 = vpack.c.bf16 %v1745_v33, %v1744_v24  ;;  %v2263_v33 = vld [vmem:[#allocation2 + $0x118] sm:$0xff] }
 0x211   : > { %v1589_v60 = vpop.permute.xlu1 %1588  ;;  %v1748_v43 = vmax.f32 %v1676_v23, 0.0 }
 0x212   : > { %v1670_v13 = vadd.f32 %v1589_v60, %v1418_v59  ;;  %v1671_v30 = vadd.f32 %v1589_v60, %v1419_v5  ;;  %v10847_v61 = vpack.c.bf16 %v1739_v20, %v1738_v47  ;;  %v1749_v7 = vmax.f32 %v1677_v17, 0.0  ;;  %v2255_v59 = vld [vmem:[#allocation2 + $0xd8] sm:$0xff] }
 0x213   : > { %v2346_v5 = vmul.bf16 %v13113_v49, %v2255_v59  ;;  %v2259_v60 = vld [vmem:[#allocation2 + $0xf8] sm:$0xff] }
 0x214   : > { %2061 = vrot.lane.b32.xlu0 %v10845_v52, %s11763_s9  ;;  %2059 = vrot.lane.b32.xlu1 %v10844_v6, %s11763_s9  ;;  %v1742_v63 = vmax.f32 %v1670_v13, 0.0  ;;  %v1743_v14 = vmax.f32 %v1671_v30, 0.0  ;;  %v10852_v57 = vpack.c.bf16 %v1749_v7, %v1748_v43  ;;  %v2350_v13 = vmul.bf16 %v13113_v49, %v2259_v60 }
 0x215   : > { %v1599_v1 = vpop.permute.xlu1 %1598  ;;  %2396 = vst.msk [vmem:[#allocation3 + $0x6d8] sm:$0xff] %vm13133_vm5, %v2346_v5 }
 0x216   : > { %v1674_v0 = vadd.f32 %v1599_v1, %v1422_v38  ;;  %v1675_v62 = vadd.f32 %v1599_v1, %v1423_v34  ;;  %v10849_v36 = vpack.c.bf16 %v1743_v14, %v1742_v63  ;;  %2400 = vst.msk [vmem:[#allocation3 + $0x7f8] sm:$0xff] %vm13133_vm5, %v2350_v13 }
 0x218   : > { %2065 = vrot.lane.b32.xlu0 %v10847_v61, %s11763_s9  ;;  %2063 = vrot.lane.b32.xlu1 %v10846_v56, %s11763_s9  ;;  %v1746_v2 = vmax.f32 %v1674_v0, 0.0  ;;  %v1747_v44 = vmax.f32 %v1675_v62, 0.0 }
 0x21a   : > { %v10851_v27 = vpack.c.bf16 %v1747_v44, %v1746_v2  ;;  %v2354_v44 = vmul.bf16 %v13113_v49, %v2263_v33  ;;  %v5417_v33 = vld [vmem:[#allocation2 + $0x178] sm:$0xff] }
 0x21c   : > { %2069 = vrot.lane.b32.xlu0 %v10849_v36, %s11763_s9  ;;  %2067 = vrot.lane.b32.xlu1 %v10848_v18, %s11763_s9  ;;  %2404 = vst.msk [vmem:[#allocation3 + $0x918] sm:$0xff] %vm13133_vm5, %v2354_v44 }
 0x220   : > { %2073 = vrot.lane.b32.xlu0 %v10851_v27, %s11763_s9  ;;  %2071 = vrot.lane.b32.xlu1 %v10850_v35, %s11763_s9 }
 0x224   : > { %4594 = vrot.lane.b32.xlu1 %v13113_v49, %s11767_s15  ;;  %2075 = vrot.lane.b32.xlu0 %v10852_v57, %s11763_s9  ;;  %s14955_s9 = scalar_lea.vmem %s16113_s5, %s10853_s21 }
 0x228   : > { %4155 = vrot.lane.b32.xlu1 %v13200_v31, %s11768_s16 }
 0x22c   : > { %2519 = vrot.lane.b32.xlu1 %v13298_v11, %s11769_s17 }
 0x230   : > { %2527 = vrot.lane.b32.xlu1 %v13302_v50, %s11769_s17 }
 0x23d   : > { %v2008_v10 = vpop.permute.xlu0 %2007 }
 0x23e   : > { %v2078_v31 = vrot.slane %v2008_v10, 4 }
 0x240   : > { %v2115_v15 = vsel %vm2113_vm8, %v2078_v31, %v2008_v10 }
 0x241   : > { %2190 = vst.msk [vmem:[#allocation2 + $0x8] sm:$0xff] %vm13306_vm9, %v2115_v15  ;;  %v2012_v4 = vpop.permute.xlu0 %2011 }
 0x242   : > { %v2080_v8 = vrot.slane %v2012_v4, 4 }
 0x244   : > { %v2117_v32 = vsel %vm2113_vm8, %v2080_v8, %v2012_v4 }
 0x245   : > { %2192 = vst.msk [vmem:[#allocation2 + $0x20] sm:$0xff] %vm13306_vm9, %v2117_v32  ;;  %v2016_v42 = vpop.permute.xlu0 %2015 }
 0x246   : > { %v2082_v51 = vrot.slane %v2016_v42, 4 }
 0x248   : > { %v13319_v29 = vld [vmem:[#allocation2 + $0x8] sm:$0xff]  ;;  %v2119_v58 = vsel %vm2113_vm8, %v2082_v51, %v2016_v42 }
 0x249   : > { %v2320_v47 = vmul.bf16 %v13113_v49, %v13319_v29  ;;  %2194 = vst.msk [vmem:[#allocation2 + $0x30] sm:$0xff] %vm13306_vm9, %v2119_v58  ;;  %2515 = vrot.lane.b32.xlu0 %v13319_v29, %s11769_s17  ;;  %v2020_v20 = vpop.permute.xlu0 %2019 }
 0x24a   : > { %v2006_v6 = vpop.permute.xlu1 %2005  ;;  %v2084_v52 = vrot.slane %v2020_v20, 4 }
 0x24b   : > { %v2077_v30 = vrot.slane %v2006_v6, 4  ;;  %2370 = vst.msk [vmem:[#allocation3 + $0x8] sm:$0xff] %vm13133_vm5, %v2320_v47  ;;  %v2267_v47 = vld [vmem:[#allocation2 + $0x138] sm:$0xff] }
 0x24c   : > { %v13331_v19 = vld [vmem:[#allocation2 + $0x20] sm:$0xff]  ;;  %v2121_v9 = vsel %vm2113_vm8, %v2084_v52, %v2020_v20  ;;  %v2358_v52 = vmul.bf16 %v13113_v49, %v2267_v47 }
 0x24d   : > { %v2323_v40 = vmul.bf16 %v13113_v49, %v13331_v19  ;;  %v2114_v21 = vsel %vm2113_vm8, %v2077_v30, %v2006_v6  ;;  %2196 = vst.msk [vmem:[#allocation2 + $0x48] sm:$0xff] %vm13306_vm9, %v2121_v9  ;;  %v2024_v54 = vpop.permute.xlu0 %2023 }
 0x24e   : > { %2189 = vst.msk [vmem:[#allocation2] sm:$0xff] %vm13306_vm9, %v2114_v21  ;;  %v2010_v38 = vpop.permute.xlu1 %2009  ;;  %v2086_v39 = vrot.slane %v2024_v54, 4 }
 0x24f   : > { %2373 = vst.msk [vmem:[#allocation3 + $0x120] sm:$0xff] %vm13133_vm5, %v2323_v40  ;;  %v2079_v34 = vrot.slane %v2010_v38, 4  ;;  %2408 = vst.msk [vmem:[#allocation3 + $0xa38] sm:$0xff] %vm13133_vm5, %v2358_v52 }
 0x250   : > { %v13345_v56 = vld [vmem:[#allocation2 + $0x30] sm:$0xff]  ;;  %v2123_v41 = vsel %vm2113_vm8, %v2086_v39, %v2024_v54  ;;  %v3765_v39 = vld [vmem:[#allocation2 + $0x158] sm:$0xff] }
 0x251   : > { %v2325_v26 = vmul.bf16 %v13113_v49, %v13345_v56  ;;  %v2116_v46 = vsel %vm2113_vm8, %v2079_v34, %v2010_v38  ;;  %2198 = vst.msk [vmem:[#allocation2 + $0x60] sm:$0xff] %vm13306_vm9, %v2123_v41  ;;  %v2028_v45 = vpop.permute.xlu0 %2027 }
 0x252   : > { %2191 = vst.msk [vmem:[#allocation2 + $0x10] sm:$0xff] %vm13306_vm9, %v2116_v46  ;;  %v2014_v61 = vpop.permute.xlu1 %2013  ;;  %v2088_v63 = vrot.slane %v2028_v45, 4 }
 0x253   : > { %2375 = vst.msk [vmem:[#allocation3 + $0x130] sm:$0xff] %vm13133_vm5, %v2325_v26  ;;  %v2081_v1 = vrot.slane %v2014_v61, 4 }
 0x254   : > { %v13357_v16 = vld [vmem:[#allocation2 + $0x48] sm:$0xff]  ;;  %v2125_v12 = vsel %vm2113_vm8, %v2088_v63, %v2028_v45  ;;  %v2362_v45 = vmul.bf16 %v13113_v49, %v3765_v39 }
 0x255   : > { %v13360_v14 = vld [vmem:[#allocation2] sm:$0xff]  ;;  %v2328_v0 = vmul.bf16 %v13113_v49, %v13357_v16  ;;  %v2118_v62 = vsel %vm2113_vm8, %v2081_v1, %v2014_v61  ;;  %2200 = vst.msk [vmem:[#allocation2 + $0x70] sm:$0xff] %vm13306_vm9, %v2125_v12  ;;  %v2032_v37 = vpop.permute.xlu0 %2031 }
 0x256   : > { %v2319_v48 = vmul.bf16 %v13113_v49, %v13360_v14  ;;  %2193 = vst.msk [vmem:[#allocation2 + $0x28] sm:$0xff] %vm13306_vm9, %v2118_v62  ;;  %v2018_v3 = vpop.permute.xlu1 %2017  ;;  %v2090_v28 = vrot.slane %v2032_v37, 4 }
 0x257   : > { %2378 = vst.msk [vmem:[#allocation3 + $0x248] sm:$0xff] %vm13133_vm5, %v2328_v0  ;;  %v2083_v25 = vrot.slane %v2018_v3, 4  ;;  %2412 = vst.msk [vmem:[#allocation3 + $0xb58] sm:$0xff] %vm13133_vm5, %v2362_v45 }
 0x258   : > { %2369 = vst.msk [vmem:[#allocation3] sm:$0xff] %vm13133_vm5, %v2319_v48  ;;  %v2240_v18 = vld [vmem:[#allocation2 + $0x60] sm:$0xff]  ;;  %v2127_v24 = vsel %vm2113_vm8, %v2090_v28, %v2032_v37 }
 0x259   : > { %v13376_v23 = vld [vmem:[#allocation2 + $0x10] sm:$0xff]  ;;  %v2331_v17 = vmul.bf16 %v13113_v49, %v2240_v18  ;;  %v2120_v36 = vsel %vm2113_vm8, %v2083_v25, %v2018_v3  ;;  %2202 = vst.msk [vmem:[#allocation2 + $0x88] sm:$0xff] %vm13306_vm9, %v2127_v24  ;;  %v2036_v2 = vpop.permute.xlu0 %2035 }
 0x25a   : > { %v2321_v35 = vmul.bf16 %v13113_v49, %v13376_v23  ;;  %2195 = vst.msk [vmem:[#allocation2 + $0x40] sm:$0xff] %vm13306_vm9, %v2120_v36  ;;  %v2022_v43 = vpop.permute.xlu1 %2021  ;;  %2517 = vrot.lane.b32.xlu0 %v13376_v23, %s11769_s17  ;;  %v2092_v7 = vrot.slane %v2036_v2, 4 }
 0x25b   : > { %2381 = vst.msk [vmem:[#allocation3 + $0x360] sm:$0xff] %vm13133_vm5, %v2331_v17  ;;  %v2085_v27 = vrot.slane %v2022_v43, 4  ;;  %v2366_v17 = vmul.bf16 %v13113_v49, %v5417_v33 }
 0x25c   : > { %2371 = vst.msk [vmem:[#allocation3 + $0x10] sm:$0xff] %vm13133_vm5, %v2321_v35  ;;  %v2242_v57 = vld [vmem:[#allocation2 + $0x70] sm:$0xff]  ;;  %v2129_v10 = vsel %vm2113_vm8, %v2092_v7, %v2036_v2 }
 0x25d   : > { %v13396_v31 = vld [vmem:[#allocation2 + $0x28] sm:$0xff]  ;;  %v2333_v15 = vmul.bf16 %v13113_v49, %v2242_v57  ;;  %v2122_v4 = vsel %vm2113_vm8, %v2085_v27, %v2022_v43  ;;  %2204 = vst.msk [vmem:[#allocation2 + $0xa0] sm:$0xff] %vm13306_vm9, %v2129_v10  ;;  %v2040_v59 = vpop.permute.xlu0 %2039 }
 0x25e   : > { %v2324_v8 = vmul.bf16 %v13113_v49, %v13396_v31  ;;  %2197 = vst.msk [vmem:[#allocation2 + $0x50] sm:$0xff] %vm13306_vm9, %v2122_v4  ;;  %v2026_v5 = vpop.permute.xlu1 %2025  ;;  %2521 = vrot.lane.b32.xlu0 %v13331_v19, %s11769_s17  ;;  %v2094_v32 = vrot.slane %v2040_v59, 4 }
 0x25f   : > { %2383 = vst.msk [vmem:[#allocation3 + $0x370] sm:$0xff] %vm13133_vm5, %v2333_v15  ;;  %v2087_v42 = vrot.slane %v2026_v5, 4  ;;  %2416 = vst.msk [vmem:[#allocation3 + $0xc78] sm:$0xff] %vm13133_vm5, %v2366_v17 }
 0x260   : > { %2374 = vst.msk [vmem:[#allocation3 + $0x128] sm:$0xff] %vm13133_vm5, %v2324_v8  ;;  %v2245_v51 = vld [vmem:[#allocation2 + $0x88] sm:$0xff]  ;;  %v2131_v58 = vsel %vm2113_vm8, %v2094_v32, %v2040_v59 }
 0x261   : > { %v13413_v20 = vld [vmem:[#allocation2 + $0x40] sm:$0xff]  ;;  %v2336_v60 = vmul.bf16 %v13113_v49, %v2245_v51  ;;  %v2124_v6 = vsel %vm2113_vm8, %v2087_v42, %v2026_v5  ;;  %2206 = vst.msk [vmem:[#allocation2 + $0xb0] sm:$0xff] %vm13306_vm9, %v2131_v58 }
 0x262   : > { %v2327_v13 = vmul.bf16 %v13113_v49, %v13413_v20  ;;  %2199 = vst.msk [vmem:[#allocation2 + $0x68] sm:$0xff] %vm13306_vm9, %v2124_v6  ;;  %v2030_v30 = vpop.permute.xlu1 %2029  ;;  %2525 = vrot.lane.b32.xlu0 %v13345_v56, %s11769_s17 }
 0x263   : > { %2386 = vst.msk [vmem:[#allocation3 + $0x488] sm:$0xff] %vm13133_vm5, %v2336_v60  ;;  %v2089_v9 = vrot.slane %v2030_v30, 4 }
 0x264   : > { %2377 = vst.msk [vmem:[#allocation3 + $0x240] sm:$0xff] %vm13133_vm5, %v2327_v13  ;;  %v2248_v40 = vld [vmem:[#allocation2 + $0xa0] sm:$0xff] }
 0x265   : > { %v13432_v21 = vld [vmem:[#allocation2 + $0x50] sm:$0xff]  ;;  %v2339_v54 = vmul.bf16 %v13113_v49, %v2248_v40  ;;  %v2126_v38 = vsel %vm2113_vm8, %v2089_v9, %v2030_v30 }
 0x266   : > { %v2329_v34 = vmul.bf16 %v13113_v49, %v13432_v21  ;;  %2201 = vst.msk [vmem:[#allocation2 + $0x80] sm:$0xff] %vm13306_vm9, %v2126_v38  ;;  %v2034_v41 = vpop.permute.xlu1 %2033 }
 0x267   : > { %2389 = vst.msk [vmem:[#allocation3 + $0x5a0] sm:$0xff] %vm13133_vm5, %v2339_v54  ;;  %v2091_v26 = vrot.slane %v2034_v41, 4 }
 0x268   : > { %2379 = vst.msk [vmem:[#allocation3 + $0x250] sm:$0xff] %vm13133_vm5, %v2329_v34  ;;  %v2250_v46 = vld [vmem:[#allocation2 + $0xb0] sm:$0xff] }
 0x269   : > { %v2241_v61 = vld [vmem:[#allocation2 + $0x68] sm:$0xff]  ;;  %v2341_v63 = vmul.bf16 %v13113_v49, %v2250_v46  ;;  %v2128_v1 = vsel %vm2113_vm8, %v2091_v26, %v2034_v41 }
 0x26a   : > { %v2332_v12 = vmul.bf16 %v13113_v49, %v2241_v61  ;;  %2203 = vst.msk [vmem:[#allocation2 + $0x90] sm:$0xff] %vm13306_vm9, %v2128_v1  ;;  %v2038_v0 = vpop.permute.xlu1 %2037 }
 0x26b   : > { %2391 = vst.msk [vmem:[#allocation3 + $0x5b0] sm:$0xff] %vm13133_vm5, %v2341_v63  ;;  %v2093_v62 = vrot.slane %v2038_v0, 4 }
 0x26c   : > { %2382 = vst.msk [vmem:[#allocation3 + $0x368] sm:$0xff] %vm13133_vm5, %v2332_v12 }
 0x26d   : > { %v2244_v37 = vld [vmem:[#allocation2 + $0x80] sm:$0xff]  ;;  %v2130_v48 = vsel %vm2113_vm8, %v2093_v62, %v2038_v0 }
 0x26e   : > { %v2335_v3 = vmul.bf16 %v13113_v49, %v2244_v37  ;;  %2205 = vst.msk [vmem:[#allocation2 + $0xa8] sm:$0xff] %vm13306_vm9, %v2130_v48  ;;  %v3332_v28 = vpop.permute.xlu1 %3331  ;;  %v2042_v25 = vpop.permute.xlu0 %2041 }
 0x26f   : > { %v3333_v18 = vrot.slane %v3332_v28, 4  ;;  %v2095_v24 = vrot.slane %v2042_v25, 4 }
 0x270   : > { %2385 = vst.msk [vmem:[#allocation3 + $0x480] sm:$0xff] %vm13133_vm5, %v2335_v3 }
 0x271   : > { %v2246_v36 = vld [vmem:[#allocation2 + $0x90] sm:$0xff]  ;;  %v13463_v2 = vsel %vm3334_vm10, %v3333_v18, %v3332_v28  ;;  %v2132_v44 = vsel %vm2113_vm8, %v2095_v24, %v2042_v25 }
 0x272   : > { %v2337_v35 = vmul.bf16 %v13113_v49, %v2246_v36  ;;  %2207 = vst.msk [vmem:[#allocation2 + $0xc0] sm:$0xff] %vm13306_vm9, %v2132_v44  ;;  %v2044_v43 = vpop.permute.xlu1 %2043  ;;  %v5419_v7 = vpop.permute.xlu0 %5418  ;;  %v3340_v27 = vmul.bf16 %v13463_v2, %v13298_v11  ;;  %v3339_v57 = vmul.bf16 %v13463_v2, %v13376_v23  ;;  %v3337_v51 = vmul.bf16 %v13463_v2, %v13360_v14 }
 0x273   : > { %v2096_v10 = vrot.slane %v2044_v43, 4  ;;  %v5420_v15 = vrot.slane %v5419_v7, 4  ;;  %v3344_v1 = vmul.bf16 %v13463_v2, %v13302_v50 }
 0x274   : > { %2387 = vst.msk [vmem:[#allocation3 + $0x490] sm:$0xff] %vm13133_vm5, %v2337_v35  ;;  %3439 = vrot.lane.b32.xlu1 %v3340_v27, %s11770_s19  ;;  %3437 = vrot.lane.b32.xlu0 %v3339_v57, %s11770_s19 }
 0x275   : > { %v2249_v4 = vld [vmem:[#allocation2 + $0xa8] sm:$0xff]  ;;  %v2133_v59 = vsel %vm2113_vm8, %v2096_v10, %v2044_v43  ;;  %v13480_v8 = vsel %vm5421_vm11, %v5420_v15, %v5419_v7 }
 0x276   : > { %v2340_v5 = vmul.bf16 %v13113_v49, %v2249_v4  ;;  %2208 = vst.msk [vmem:[#allocation2 + $0xc8] sm:$0xff] %vm13306_vm9, %v2133_v59  ;;  %v2893_v32 = vpop.permute.xlu1 %2892  ;;  %v2046_v42 = vpop.permute.xlu0 %2045  ;;  %v5427_v58 = vmul.bf16 %v13480_v8, %v13298_v11  ;;  %v5426_v38 = vmul.bf16 %v13480_v8, %v13376_v23  ;;  %v5424_v24 = vmul.bf16 %v13480_v8, %v13360_v14 }
 0x277   : > { %v2894_v47 = vrot.slane %v2893_v32, 4  ;;  %v2097_v60 = vrot.slane %v2046_v42, 4 }
 0x278   : > { %2390 = vst.msk [vmem:[#allocation3 + $0x5a8] sm:$0xff] %vm13133_vm5, %v2340_v5  ;;  %3433 = vrot.lane.b32.xlu0 %v3337_v51, %s11770_s19  ;;  %5526 = vrot.lane.b32.xlu1 %v5427_v58, %s11771_s22 }
 0x279   : > { %v2252_v6 = vld [vmem:[#allocation2 + $0xc0] sm:$0xff]  ;;  %v13493_v52 = vsel %vm2895_vm12, %v2894_v47, %v2893_v32  ;;  %v2134_v13 = vsel %vm2113_vm8, %v2097_v60, %v2046_v42 }
 0x27a   : > { %v2343_v30 = vmul.bf16 %v13113_v49, %v2252_v6  ;;  %2209 = vst.msk [vmem:[#allocation2 + $0xd0] sm:$0xff] %vm13306_vm9, %v2134_v13  ;;  %v2048_v9 = vpop.permute.xlu1 %2047  ;;  %v2050_v40 = vpop.permute.xlu0 %2049  ;;  %v2901_v54 = vmul.bf16 %v13493_v52, %v13298_v11  ;;  %v2900_v12 = vmul.bf16 %v13493_v52, %v13376_v23  ;;  %v2898_v15 = vmul.bf16 %v13493_v52, %v13360_v14 }
 0x27b   : > { %v2098_v39 = vrot.slane %v2048_v9, 4  ;;  %v2099_v34 = vrot.slane %v2050_v40, 4  ;;  %v3338_v13 = vmul.bf16 %v13463_v2, %v13319_v29 }
 0x27c   : > { %2393 = vst.msk [vmem:[#allocation3 + $0x6c0] sm:$0xff] %vm13133_vm5, %v2343_v30  ;;  %3000 = vrot.lane.b32.xlu1 %v2901_v54, %s11772_s23  ;;  %5524 = vrot.lane.b32.xlu0 %v5426_v38, %s11771_s22  ;;  %v3343_v30 = vmul.bf16 %v13463_v2, %v13345_v56 }
 0x27d   : > { %v2253_v41 = vld [vmem:[#allocation2 + $0xc8] sm:$0xff]  ;;  %v2135_v26 = vsel %vm2113_vm8, %v2098_v39, %v2048_v9  ;;  %v2136_v46 = vsel %vm2113_vm8, %v2099_v34, %v2050_v40 }
 0x27e   : > { %v2344_v45 = vmul.bf16 %v13113_v49, %v2253_v41  ;;  %2210 = vst.msk [vmem:[#allocation2 + $0xe0] sm:$0xff] %vm13306_vm9, %v2135_v26  ;;  %2211 = vst.msk [vmem:[#allocation2 + $0xe8] sm:$0xff] %vm13306_vm9, %v2136_v46  ;;  %v2052_v61 = vpop.permute.xlu1 %2051  ;;  %v2054_v63 = vpop.permute.xlu0 %2053 }
 0x27f   : > { %v2100_v0 = vrot.slane %v2052_v61, 4  ;;  %v2101_v62 = vrot.slane %v2054_v63, 4 }
 0x280   : > { %2394 = vst.msk [vmem:[#allocation3 + $0x6c8] sm:$0xff] %vm13133_vm5, %v2344_v45  ;;  %3447 = vrot.lane.b32.xlu1 %v3344_v1, %s11770_s19  ;;  %2998 = vrot.lane.b32.xlu0 %v2900_v12, %s11772_s23 }
 0x281   : > { %v2254_v37 = vld [vmem:[#allocation2 + $0xd0] sm:$0xff]  ;;  %v2137_v48 = vsel %vm2113_vm8, %v2100_v0, %v2052_v61  ;;  %v2138_v3 = vsel %vm2113_vm8, %v2101_v62, %v2054_v63  ;;  %v5425_v61 = vmul.bf16 %v13480_v8, %v13319_v29  ;;  %v3341_v63 = vmul.bf16 %v13463_v2, %v13331_v19 }
 0x282   : > { %v2345_v28 = vmul.bf16 %v13113_v49, %v2254_v37  ;;  %2212 = vst.msk [vmem:[#allocation2 + $0xf0] sm:$0xff] %vm13306_vm9, %v2137_v48  ;;  %2213 = vst.msk [vmem:[#allocation2 + $0x100] sm:$0xff] %vm13306_vm9, %v2138_v3  ;;  %v2056_v25 = vpop.permute.xlu1 %2055  ;;  %v2058_v18 = vpop.permute.xlu0 %2057 }
 0x283   : > { %v2102_v33 = vrot.slane %v2056_v25, 4  ;;  %v2103_v17 = vrot.slane %v2058_v18, 4 }
 0x284   : > { %2395 = vst.msk [vmem:[#allocation3 + $0x6d0] sm:$0xff] %vm13133_vm5, %v2345_v28  ;;  %2513 = vrot.lane.b32.xlu1 %v13360_v14, %s11769_s17  ;;  %5520 = vrot.lane.b32.xlu0 %v5424_v24, %s11771_s22  ;;  %v2899_v24 = vmul.bf16 %v13493_v52, %v13319_v29 }
 0x285   : > { %v2256_v36 = vld [vmem:[#allocation2 + $0xe0] sm:$0xff]  ;;  %v2257_v44 = vld [vmem:[#allocation2 + $0xe8] sm:$0xff]  ;;  %v2139_v35 = vsel %vm2113_vm8, %v2102_v33, %v2056_v25  ;;  %v2140_v43 = vsel %vm2113_vm8, %v2103_v17, %v2058_v18  ;;  %v2904_v33 = vmul.bf16 %v13493_v52, %v13345_v56 }
 0x286   : > { %v2347_v7 = vmul.bf16 %v13113_v49, %v2256_v36  ;;  %v2348_v27 = vmul.bf16 %v13113_v49, %v2257_v44  ;;  %2214 = vst.msk [vmem:[#allocation2 + $0x108] sm:$0xff] %vm13306_vm9, %v2139_v35  ;;  %2215 = vst.msk [vmem:[#allocation2 + $0x110] sm:$0xff] %vm13306_vm9, %v2140_v43  ;;  %v2060_v57 = vpop.permute.xlu1 %2059  ;;  %v2062_v10 = vpop.permute.xlu0 %2061 }
 0x287   : > { %v2104_v4 = vrot.slane %v2060_v57, 4  ;;  %v2105_v59 = vrot.slane %v2062_v10, 4 }
 0x288   : > { %2397 = vst.msk [vmem:[#allocation3 + $0x7e0] sm:$0xff] %vm13133_vm5, %v2347_v7  ;;  %2398 = vst.msk [vmem:[#allocation3 + $0x7e8] sm:$0xff] %vm13133_vm5, %v2348_v27  ;;  %2523 = vrot.lane.b32.xlu1 %v13396_v31, %s11769_s17  ;;  %2994 = vrot.lane.b32.xlu0 %v2898_v15, %s11772_s23 }
 0x289   : > { %v2258_v5 = vld [vmem:[#allocation2 + $0xf0] sm:$0xff]  ;;  %v2260_v32 = vld [vmem:[#allocation2 + $0x100] sm:$0xff]  ;;  %v2141_v42 = vsel %vm2113_vm8, %v2104_v4, %v2060_v57  ;;  %v2142_v51 = vsel %vm2113_vm8, %v2105_v59, %v2062_v10  ;;  %v3342_v4 = vmul.bf16 %v13463_v2, %v13396_v31  ;;  %v2902_v59 = vmul.bf16 %v13493_v52, %v13331_v19 }
 0x28a   : > { %v2349_v58 = vmul.bf16 %v13113_v49, %v2258_v5  ;;  %v2351_v47 = vmul.bf16 %v13113_v49, %v2260_v32  ;;  %2216 = vst.msk [vmem:[#allocation2 + $0x120] sm:$0xff] %vm13306_vm9, %v2141_v42  ;;  %2217 = vst.msk [vmem:[#allocation2 + $0x128] sm:$0xff] %vm13306_vm9, %v2142_v51  ;;  %v2064_v60 = vpop.permute.xlu1 %2063  ;;  %v2066_v6 = vpop.permute.xlu0 %2065 }
 0x28b   : > { %v2106_v9 = vrot.slane %v2064_v60, 4  ;;  %v2107_v40 = vrot.slane %v2066_v6, 4 }
 0x28c   : > { %2399 = vst.msk [vmem:[#allocation3 + $0x7f0] sm:$0xff] %vm13133_vm5, %v2349_v58  ;;  %2401 = vst.msk [vmem:[#allocation3 + $0x900] sm:$0xff] %vm13133_vm5, %v2351_v47  ;;  %3435 = vrot.lane.b32.xlu1 %v3338_v13, %s11770_s19  ;;  %3445 = vrot.lane.b32.xlu0 %v3343_v30, %s11770_s19 }
 0x28d   : > { %v2261_v54 = vld [vmem:[#allocation2 + $0x108] sm:$0xff]  ;;  %v2262_v38 = vld [vmem:[#allocation2 + $0x110] sm:$0xff]  ;;  %v2143_v39 = vsel %vm2113_vm8, %v2106_v9, %v2064_v60  ;;  %v2144_v34 = vsel %vm2113_vm8, %v2107_v40, %v2066_v6  ;;  %v2905_v6 = vmul.bf16 %v13493_v52, %v13302_v50 }
 0x28e   : > { %v2352_v41 = vmul.bf16 %v13113_v49, %v2261_v54  ;;  %v2353_v26 = vmul.bf16 %v13113_v49, %v2262_v38  ;;  %2218 = vst.msk [vmem:[#allocation2 + $0x130] sm:$0xff] %vm13306_vm9, %v2143_v39  ;;  %2219 = vst.msk [vmem:[#allocation2 + $0x140] sm:$0xff] %vm13306_vm9, %v2144_v34  ;;  %v2068_v46 = vpop.permute.xlu1 %2067  ;;  %v2070_v45 = vpop.permute.xlu0 %2069  ;;  %v2903_v54 = vmul.bf16 %v13493_v52, %v13396_v31 }
 0x28f   : > { %v2108_v1 = vrot.slane %v2068_v46, 4  ;;  %v2109_v12 = vrot.slane %v2070_v45, 4 }
 0x290   : > { %2402 = vst.msk [vmem:[#allocation3 + $0x908] sm:$0xff] %vm13133_vm5, %v2352_v41  ;;  %2403 = vst.msk [vmem:[#allocation3 + $0x910] sm:$0xff] %vm13133_vm5, %v2353_v26  ;;  %5522 = vrot.lane.b32.xlu1 %v5425_v61, %s11771_s22  ;;  %3441 = vrot.lane.b32.xlu0 %v3341_v63, %s11770_s19 }
 0x291   : > { %v2264_v0 = vld [vmem:[#allocation2 + $0x120] sm:$0xff]  ;;  %v2265_v62 = vld [vmem:[#allocation2 + $0x128] sm:$0xff]  ;;  %v2145_v37 = vsel %vm2113_vm8, %v2108_v1, %v2068_v46  ;;  %v2146_v48 = vsel %vm2113_vm8, %v2109_v12, %v2070_v45 }
 0x292   : > { %v2355_v3 = vmul.bf16 %v13113_v49, %v2264_v0  ;;  %v2356_v28 = vmul.bf16 %v13113_v49, %v2265_v62  ;;  %2220 = vst.msk [vmem:[#allocation2 + $0x148] sm:$0xff] %vm13306_vm9, %v2145_v37  ;;  %2221 = vst.msk [vmem:[#allocation2 + $0x150] sm:$0xff] %vm13306_vm9, %v2146_v48  ;;  %v2072_v25 = vpop.permute.xlu1 %2071  ;;  %v2074_v18 = vpop.permute.xlu0 %2073 }
 0x293   : > { %v2110_v17 = vrot.slane %v2072_v25, 4  ;;  %v2111_v36 = vrot.slane %v2074_v18, 4 }
 0x294   : > { %2405 = vst.msk [vmem:[#allocation3 + $0xa20] sm:$0xff] %vm13133_vm5, %v2355_v3  ;;  %2406 = vst.msk [vmem:[#allocation3 + $0xa28] sm:$0xff] %vm13133_vm5, %v2356_v28  ;;  %2996 = vrot.lane.b32.xlu1 %v2899_v24, %s11772_s23  ;;  %3006 = vrot.lane.b32.xlu0 %v2904_v33, %s11772_s23 }
 0x295   : > { %v2266_v44 = vld [vmem:[#allocation2 + $0x130] sm:$0xff]  ;;  %v2268_v35 = vld [vmem:[#allocation2 + $0x140] sm:$0xff]  ;;  %v2147_v43 = vsel %vm2113_vm8, %v2110_v17, %v2072_v25  ;;  %v2148_v7 = vsel %vm2113_vm8, %v2111_v36, %v2074_v18 }
 0x296   : > { %v2357_v27 = vmul.bf16 %v13113_v49, %v2266_v44  ;;  %v2359_v57 = vmul.bf16 %v13113_v49, %v2268_v35  ;;  %2222 = vst.msk [vmem:[#allocation2 + $0x160] sm:$0xff] %vm13306_vm9, %v2147_v43  ;;  %2223 = vst.msk [vmem:[#allocation2 + $0x168] sm:$0xff] %vm13306_vm9, %v2148_v7  ;;  %v4595_v10 = vpop.permute.xlu1 %4594  ;;  %v2076_v15 = vpop.permute.xlu0 %2075 }
 0x297   : > { %v2112_v5 = vrot.slane %v2076_v15, 4  ;;  %v4596_v13 = vrot.slane %v4595_v10, 4 }
 0x298   : > { %2407 = vst.msk [vmem:[#allocation3 + $0xa30] sm:$0xff] %vm13133_vm5, %v2357_v27  ;;  %2409 = vst.msk [vmem:[#allocation3 + $0xb40] sm:$0xff] %vm13133_vm5, %v2359_v57  ;;  %3443 = vrot.lane.b32.xlu1 %v3342_v4, %s11770_s19  ;;  %3002 = vrot.lane.b32.xlu0 %v2902_v59, %s11772_s23 }
 0x299   : > { %v2269_v32 = vld [vmem:[#allocation2 + $0x148] sm:$0xff]  ;;  %v2270_v42 = vld [vmem:[#allocation2 + $0x150] sm:$0xff]  ;;  %v2149_v51 = vsel %vm2113_vm8, %v2112_v5, %v2076_v15  ;;  %v13649_v39 = vsel %vm4597_vm13, %v4596_v13, %v4595_v10  ;;  %v5430_v5 = vmul.bf16 %v13480_v8, %v13345_v56  ;;  %vm4401_vm8 = vcmask 916480  }
 0x29a   : > { %v2360_v58 = vmul.bf16 %v13113_v49, %v2269_v32  ;;  %v2361_v47 = vmul.bf16 %v13113_v49, %v2270_v42  ;;  %2224 = vst.msk [vmem:[#allocation2 + $0x170] sm:$0xff] %vm13306_vm9, %v2149_v51  ;;  %v4156_v60 = vpop.permute.xlu1 %4155  ;;  %v4602_v45 = vmul.bf16 %v13649_v39, %v13376_v23  ;;  %v4603_v0 = vmul.bf16 %v13649_v39, %v13298_v11  ;;  %v11748_v32 = vld [vmem:[#allocation2 + $0x38] sm:$0xff] }
 0x29b   : > { %v4157_v12 = vrot.slane %v4156_v60, 4  ;;  %v4601_v37 = vmul.bf16 %v13649_v39, %v13319_v29  ;;  %v4606_v25 = vmul.bf16 %v13649_v39, %v13345_v56  ;;  %v4607_v36 = vmul.bf16 %v13649_v39, %v13302_v50 }
 0x29c   : > { %2410 = vst.msk [vmem:[#allocation3 + $0xb48] sm:$0xff] %vm13133_vm5, %v2360_v58  ;;  %2411 = vst.msk [vmem:[#allocation3 + $0xb50] sm:$0xff] %vm13133_vm5, %v2361_v47  ;;  %3008 = vrot.lane.b32.xlu1 %v2905_v6, %s11772_s23  ;;  %5085 = vrot.lane.b32.xlu0 %v13376_v23, %s11773_s28  ;;  %v4604_v44 = vmul.bf16 %v13649_v39, %v13331_v19  ;;  %v4605_v35 = vmul.bf16 %v13649_v39, %v13396_v31  ;;  %v10975_v58 = vld [vmem:[%s13629_s27 + $0x4] ss:$12 sps:$4 sm:$0xff]   ;;  %vm3962_vm9 = vcmask 924672  }
 0x29d   : > { %v2272_v22 = vld [vmem:[#allocation2 + $0x160] sm:$0xff]  ;;  %v2273_v30 = vld [vmem:[#allocation2 + $0x168] sm:$0xff]  ;;  %v13679_v62 = vsel %vm4158_vm15, %v4157_v12, %v4156_v60  ;;  %v5431_v42 = vmul.bf16 %v11748_v32, %v13480_v8  ;;  %v3347_v51 = vmul.bf16 %v13463_v2, %v13432_v21  ;;  %6557 = vmatprep.mubr.bf16.mxu0 %v10975_v58  ;;  %v3345_v6 = vmul.bf16 %v13463_v2, %v13413_v20 }
 0x29e   : > { %v2363_v9 = vmul.bf16 %v13113_v49, %v2272_v22  ;;  %v2364_v40 = vmul.bf16 %v13113_v49, %v2273_v30  ;;  %v2520_v38 = vpop.permute.xlu1 %2519  ;;  %v4163_v48 = vmul.bf16 %v13679_v62, %v13376_v23  ;;  %v4164_v3 = vmul.bf16 %v13679_v62, %v13298_v11  ;;  %v13772_v30 = vld [vmem:[#allocation2 + $0x58] sm:$0xff] }
 0x29f   : > { %v2612_v34 = vrot.slane %v2520_v38, 4  ;;  %v4161_v28 = vmul.bf16 %v13679_v62, %v13360_v14  ;;  %v4162_v17 = vmul.bf16 %v13679_v62, %v13319_v29  ;;  %v4165_v27 = vmul.bf16 %v13679_v62, %v13331_v19 }
 0x2a0   : > { %2413 = vst.msk [vmem:[#allocation3 + $0xc60] sm:$0xff] %vm13133_vm5, %v2363_v9  ;;  %2414 = vst.msk [vmem:[#allocation3 + $0xc68] sm:$0xff] %vm13133_vm5, %v2364_v40  ;;  %3004 = vrot.lane.b32.xlu1 %v2903_v54, %s11772_s23  ;;  %5081 = vrot.lane.b32.xlu0 %v13360_v14, %s11773_s28  ;;  %v4168_v10 = vmul.bf16 %v13679_v62, %v13302_v50  ;;  %v4166_v59 = vmul.bf16 %v13679_v62, %v13396_v31 }
 0x2a1   : > { %v2274_v41 = vld [vmem:[#allocation2 + $0x170] sm:$0xff]  ;;  %v2661_v26 = vsel %vm2657_vm14, %v2520_v38, %v2612_v34  ;;  %v3348_v38 = vmul.bf16 %v13463_v2, %v13772_v30  ;;  %v2908_v34 = vmul.bf16 %v13493_v52, %v13432_v21 }
 0x2a2   : > { %v2365_v46 = vmul.bf16 %v13113_v49, %v2274_v41  ;;  %2757 = vst.msk [vmem:[#allocation3 + $0x38] sm:$0xff] %vm13133_vm5, %v2661_v26  ;;  %v2528_v61 = vpop.permute.xlu1 %2527  ;;  %v4600_v49 = vmul.bf16 %v13649_v39, %v13360_v14 }
 0x2a3   : > { %v2616_v63 = vrot.slane %v2528_v61, 4 }
 0x2a4   : > { %2415 = vst.msk [vmem:[#allocation3 + $0xc70] sm:$0xff] %vm13133_vm5, %v2365_v46  ;;  %5087 = vrot.lane.b32.xlu1 %v13298_v11, %s11773_s28  ;;  %4700 = vrot.lane.b32.xlu0 %v4602_v45, %s11774_s29 }
 0x2a5   : > { %v2665_v1 = vsel %vm2657_vm14, %v2528_v61, %v2616_v63 }
 0x2a6   : > { %2761 = vst.msk [vmem:[#allocation3 + $0x158] sm:$0xff] %vm13133_vm5, %v2665_v1  ;;  %v3346_v1 = vmul.bf16 %v13463_v2, %v13357_v16 }
 0x2a8   : > { %5083 = vrot.lane.b32.xlu1 %v13319_v29, %s11773_s28  ;;  %4696 = vrot.lane.b32.xlu0 %v4600_v49, %s11774_s29  ;;  %v5434_v49 = vmul.bf16 %v13480_v8, %v13432_v21 }
 0x2ac   : > { %4702 = vrot.lane.b32.xlu1 %v4603_v0, %s11774_s29  ;;  %5093 = vrot.lane.b32.xlu0 %v13345_v56, %s11773_s28 }
 0x2b0   : > { %4698 = vrot.lane.b32.xlu1 %v4601_v37, %s11774_s29  ;;  %4261 = vrot.lane.b32.xlu0 %v4163_v48, %s11775_s30 }
 0x2b4   : > { %5095 = vrot.lane.b32.xlu1 %v13302_v50, %s11773_s28  ;;  %5089 = vrot.lane.b32.xlu0 %v13331_v19, %s11773_s28 }
 0x2b8   : > { %4263 = vrot.lane.b32.xlu1 %v4164_v3, %s11775_s30  ;;  %4257 = vrot.lane.b32.xlu0 %v4161_v28, %s11775_s30 }
 0x2bb   : > { %v2516_v18 = vpop.permute.xlu0 %2515 }
 0x2bc   : > { %5091 = vrot.lane.b32.xlu1 %v13396_v31, %s11773_s28  ;;  %4708 = vrot.lane.b32.xlu0 %v4606_v25, %s11774_s29  ;;  %v2610_v24 = vrot.slane %v2516_v18, 4  ;;  %v2909_v25 = vmul.bf16 %v13772_v30, %v13493_v52 }
 0x2be   : > { %v2659_v33 = vsel %vm2657_vm14, %v2516_v18, %v2610_v24  ;;  %v2906_v18 = vmul.bf16 %v13493_v52, %v13413_v20 }
 0x2bf   : > { %2755 = vst.msk [vmem:[#allocation3 + $0x28] sm:$0xff] %vm13133_vm5, %v2659_v33 }
 0x2c0   : > { %4259 = vrot.lane.b32.xlu1 %v4162_v17, %s11775_s30  ;;  %3822 = vrot.lane.b32.xlu0 %v13376_v23, %s11776_s6  ;;  %v4167_v23 = vmul.bf16 %v13679_v62, %v13345_v56 }
 0x2c4   : > { %4710 = vrot.lane.b32.xlu1 %v4607_v36, %s11774_s29  ;;  %4704 = vrot.lane.b32.xlu0 %v4604_v44, %s11774_s29 }
 0x2c8   : > { %3824 = vrot.lane.b32.xlu1 %v13298_v11, %s11776_s6  ;;  %3818 = vrot.lane.b32.xlu0 %v13360_v14, %s11776_s6 }
 0x2cc   : > { %4706 = vrot.lane.b32.xlu1 %v4605_v35, %s11774_s29  ;;  %4269 = vrot.lane.b32.xlu0 %v4167_v23, %s11775_s30  ;;  %v2518_v43 = vpop.permute.xlu0 %2517 }
 0x2cd   : > { %v2611_v7 = vrot.slane %v2518_v43, 4 }
 0x2cf   : > { %v2660_v11 = vsel %vm2657_vm14, %v2518_v43, %v2611_v7  ;;  %v5435_v43 = vmul.bf16 %v13480_v8, %v13772_v30  ;;  %v5432_v7 = vmul.bf16 %v13480_v8, %v13413_v20 }
 0x2d0   : > { %2756 = vst.msk [vmem:[#allocation3 + $0x30] sm:$0xff] %vm13133_vm5, %v2660_v11  ;;  %3820 = vrot.lane.b32.xlu1 %v13319_v29, %s11776_s6  ;;  %4265 = vrot.lane.b32.xlu0 %v4165_v27, %s11775_s30  ;;  %v2522_v14 = vpop.permute.xlu0 %2521 }
 0x2d1   : > { %v2613_v57 = vrot.slane %v2522_v14, 4 }
 0x2d3   : > { %v2662_v15 = vsel %vm2657_vm14, %v2522_v14, %v2613_v57  ;;  %v13824_v14 = vld [vmem:[#allocation2 + $0x48] sm:$0xff] }
 0x2d4   : > { %2758 = vst.msk [vmem:[#allocation3 + $0x140] sm:$0xff] %vm13133_vm5, %v2662_v15  ;;  %4271 = vrot.lane.b32.xlu1 %v4168_v10, %s11775_s30  ;;  %3830 = vrot.lane.b32.xlu0 %v13345_v56, %s11776_s6  ;;  %v2526_v4 = vpop.permute.xlu0 %2525  ;;  %v5428_v56 = vmul.bf16 %v13480_v8, %v13331_v19 }
 0x2d5   : > { %v2615_v29 = vrot.slane %v2526_v4, 4 }
 0x2d7   : > { %v2664_v50 = vsel %vm2657_vm14, %v2526_v4, %v2615_v29 }
 0x2d8   : > { %2760 = vst.msk [vmem:[#allocation3 + $0x150] sm:$0xff] %vm13133_vm5, %v2664_v50  ;;  %4267 = vrot.lane.b32.xlu1 %v4166_v59, %s11775_s30  ;;  %5532 = vrot.lane.b32.xlu0 %v5430_v5, %s11771_s22  ;;  %v2907_v59 = vmul.bf16 %v13493_v52, %v13824_v14 }
 0x2dc   : > { %3832 = vrot.lane.b32.xlu1 %v11748_v32, %s11776_s6  ;;  %3826 = vrot.lane.b32.xlu0 %v13331_v19, %s11776_s6  ;;  %v5429_v19 = vmul.bf16 %v13480_v8, %v13396_v31 }
 0x2e0   : > { %5534 = vrot.lane.b32.xlu1 %v5431_v42, %s11771_s22  ;;  %5528 = vrot.lane.b32.xlu0 %v5428_v56, %s11771_s22  ;;  %v13839_v56 = vld [vmem:[#allocation2 + $0x70] sm:$0xff] }
 0x2e4   : > { %3828 = vrot.lane.b32.xlu1 %v13396_v31, %s11776_s6  ;;  %3453 = vrot.lane.b32.xlu0 %v3347_v51, %s11770_s19 }
 0x2e6   : > { %v3440_v47 = vpop.permute.xlu1 %3439  ;;  %v3438_v60 = vpop.permute.xlu0 %3437 }
 0x2e7   : > { %v3532_v13 = vrot.slane %v3440_v47, 4  ;;  %v3531_v22 = vrot.slane %v3438_v60, 4 }
 0x2e8   : > { %5530 = vrot.lane.b32.xlu1 %v5429_v19, %s11771_s22  ;;  %3449 = vrot.lane.b32.xlu0 %v3345_v6, %s11770_s19 }
 0x2e9   : > { %v3581_v9 = vsel %vm3577_vm1, %v3440_v47, %v3532_v13  ;;  %v3580_v40 = vsel %vm3577_vm1, %v3438_v60, %v3531_v22  ;;  %v5433_v47 = vmul.bf16 %v13480_v8, %v13824_v14 }
 0x2ea   : > { %3677 = vst.msk [vmem:[#allocation3 + $0x78] sm:$0xff] %vm13133_vm5, %v3581_v9  ;;  %3676 = vst.msk [vmem:[#allocation3 + $0x70] sm:$0xff] %vm13133_vm5, %v3580_v40  ;;  %v5527_v31 = vpop.permute.xlu1 %5526  ;;  %v3434_v54 = vpop.permute.xlu0 %3433 }
 0x2eb   : > { %v5619_v41 = vrot.slane %v5527_v31, 4  ;;  %v3529_v26 = vrot.slane %v3434_v54, 4 }
 0x2ec   : > { %3455 = vrot.lane.b32.xlu1 %v3348_v38, %s11770_s19  ;;  %3014 = vrot.lane.b32.xlu0 %v2908_v34, %s11772_s23  ;;  %v13859_v38 = vld [vmem:[#allocation2 + $0x78] sm:$0xff] }
 0x2ed   : > { %v5668_v46 = vsel %vm5664_vm2, %v5527_v31, %v5619_v41  ;;  %v3578_v45 = vsel %vm3577_vm1, %v3434_v54, %v3529_v26  ;;  %v13857_v54 = vld [vmem:[#allocation2 + $0x40] sm:$0xff] }
 0x2ee   : > { %5764 = vst.msk [vmem:[#allocation3 + $0x118] sm:$0xff] %vm13133_vm5, %v5668_v46  ;;  %3674 = vst.msk [vmem:[#allocation3 + $0x60] sm:$0xff] %vm13133_vm5, %v3578_v45  ;;  %v3001_v61 = vpop.permute.xlu1 %3000  ;;  %v5525_v63 = vpop.permute.xlu0 %5524  ;;  %v13867_v26 = vld [vmem:[#allocation2 + $0x60] sm:$0xff] }
 0x2ef   : > { %v3093_v12 = vrot.slane %v3001_v61, 4  ;;  %v5618_v0 = vrot.slane %v5525_v63, 4 }
 0x2f0   : > { %3451 = vrot.lane.b32.xlu1 %v3346_v1, %s11770_s19  ;;  %5540 = vrot.lane.b32.xlu0 %v5434_v49, %s11771_s22 }
 0x2f1   : > { %v3142_v37 = vsel %vm3138_vm3, %v3001_v61, %v3093_v12  ;;  %v5667_v48 = vsel %vm5664_vm2, %v5525_v63, %v5618_v0  ;;  %v10882_v3 = vld [vmem:[#allocation3 + $0x74] ss:$8 sps:$4 sm:$0xff]   ;;  %v10884_v24 = vld [vmem:[#allocation3 + $0x70] ss:$8 sps:$4 sm:$0xff]   ;;  %v3352_v61 = vmul.bf16 %v13463_v2, %v13859_v38  ;;  %v3349_v63 = vmul.bf16 %v13463_v2, %v13867_v26 }
 0x2f2   : > { %3238 = vst.msk [vmem:[#allocation3 + $0x58] sm:$0xff] %vm13133_vm5, %v3142_v37  ;;  %5763 = vst.msk [vmem:[#allocation3 + $0x110] sm:$0xff] %vm13133_vm5, %v5667_v48  ;;  %v3448_v16 = vpop.permute.xlu1 %3447  ;;  %v2999_v28 = vpop.permute.xlu0 %2998  ;;  %6525 = vmatprep.subr.bf16.mxu0 %v10882_v3 }
 0x2f3   : > { %v3536_v33 = vrot.slane %v3448_v16, 4  ;;  %v3092_v17 = vrot.slane %v2999_v28, 4  ;;  %6526 = vmatpush1.bf16.msra.mxu0 %v10884_v24 }
 0x2f4   : > { %3016 = vrot.lane.b32.xlu1 %v2909_v25, %s11772_s23  ;;  %3010 = vrot.lane.b32.xlu0 %v2906_v18, %s11772_s23 }
 0x2f5   : > { %v3585_v36 = vsel %vm3577_vm1, %v3448_v16, %v3536_v33  ;;  %v3141_v44 = vsel %vm3138_vm3, %v2999_v28, %v3092_v17  ;;  %v2912_v28 = vmul.bf16 %v13839_v56, %v13493_v52  ;;  %v13890_v17 = vld [vmem:[#allocation2 + $0x68] sm:$0xff] }
 0x2f6   : > { %3681 = vst.msk [vmem:[#allocation3 + $0x198] sm:$0xff] %vm13133_vm5, %v3585_v36  ;;  %3237 = vst.msk [vmem:[#allocation3 + $0x50] sm:$0xff] %vm13133_vm5, %v3141_v44  ;;  %v2514_v35 = vpop.permute.xlu1 %2513  ;;  %v5521_v23 = vpop.permute.xlu0 %5520 }
 0x2f7   : > { %v2609_v27 = vrot.slane %v2514_v35, 4  ;;  %v5616_v11 = vrot.slane %v5521_v23, 4 }
 0x2f8   : > { %5542 = vrot.lane.b32.xlu1 %v5435_v43, %s11771_s22  ;;  %5536 = vrot.lane.b32.xlu0 %v5432_v7, %s11771_s22 }
 0x2f9   : > { %v2658_v57 = vsel %vm2657_vm14, %v2514_v35, %v2609_v27  ;;  %v5665_v10 = vsel %vm5664_vm2, %v5521_v23, %v5616_v11  ;;  %v10885_v15 = vld [vmem:[#allocation3 + $0x114] ss:$8 sps:$4 sm:$0xff]   ;;  %v10887_v4 = vld [vmem:[#allocation3 + $0x110] ss:$8 sps:$4 sm:$0xff]   ;;  %v3350_v11 = vmul.bf16 %v13463_v2, %v13890_v17 }
 0x2fa   : > { %2754 = vst.msk [vmem:[#allocation3 + $0x20] sm:$0xff] %vm13133_vm5, %v2658_v57  ;;  %5761 = vst.msk [vmem:[#allocation3 + $0x100] sm:$0xff] %vm13133_vm5, %v5665_v10  ;;  %v2524_v20 = vpop.permute.xlu1 %2523  ;;  %v2995_v29 = vpop.permute.xlu0 %2994  ;;  %6588 = vmatprep.subr.bf16.mxu1 %v10885_v15  ;;  %v5892_v7 = vld [vmem:[#allocation3 + $0x58] sm:$0xff]  ;;  %v2910_v57 = vmul.bf16 %v13867_v26, %v13493_v52 }
 0x2fb   : > { %v2614_v5 = vrot.slane %v2524_v20, 4  ;;  %v3090_v50 = vrot.slane %v2995_v29, 4  ;;  %6589 = vmatpush1.bf16.msra.mxu1 %v10887_v4 }
 0x2fc   : > { %3012 = vrot.lane.b32.xlu1 %v2907_v59, %s11772_s23  ;;  %2533 = vrot.lane.b32.xlu0 %v13432_v21, %s11769_s17  ;;  %v3351_v21 = vmul.bf16 %v13463_v2, %v13839_v56 }
 0x2fd   : > { %v2663_v32 = vsel %vm2657_vm14, %v2524_v20, %v2614_v5  ;;  %v3139_v42 = vsel %vm3138_vm3, %v2995_v29, %v3090_v50  ;;  %v5891_v24 = vld [vmem:[#allocation3 + $0x50] sm:$0xff] }
 0x2fe   : > { %2759 = vst.msk [vmem:[#allocation3 + $0x148] sm:$0xff] %vm13133_vm5, %v2663_v32  ;;  %3235 = vst.msk [vmem:[#allocation3 + $0x40] sm:$0xff] %vm13133_vm5, %v3139_v42  ;;  %v3436_v51 = vpop.permute.xlu1 %3435  ;;  %v3446_v58 = vpop.permute.xlu0 %3445  ;;  %v10891_v33 = vld [vmem:[#allocation3 + $0x54] ss:$8 sps:$4 sm:$0xff]   ;;  %v10303_v4 = vcombine.low %v5891_v24, %v5892_v7 }
 0x2ff   : > { %v3530_v60 = vrot.slane %v3436_v51, 4  ;;  %v3535_v19 = vrot.slane %v3446_v58, 4  ;;  %v10902_v29 = vld [vmem:[%s13629_s27 + $0x8] ss:$12 sps:$4 sm:$0xff]  }
 0x300   : > { %5538 = vrot.lane.b32.xlu1 %v5433_v47, %s11771_s22  ;;  %3461 = vrot.lane.b32.xlu0 %v3351_v21, %s11770_s19 }
 0x301   : > { %v3579_v6 = vsel %vm3577_vm1, %v3436_v51, %v3530_v60  ;;  %v3584_v13 = vsel %vm3577_vm1, %v3446_v58, %v3535_v19  ;;  %v2913_v58 = vmul.bf16 %v13859_v38, %v13493_v52  ;;  %v5888_v60 = vld [vmem:[#allocation3 + $0x38] sm:$0xff] }
 0x302   : > { %3675 = vst.msk [vmem:[#allocation3 + $0x68] sm:$0xff] %vm13133_vm5, %v3579_v6  ;;  %3680 = vst.msk [vmem:[#allocation3 + $0x190] sm:$0xff] %vm13133_vm5, %v3584_v13  ;;  %v5523_v22 = vpop.permute.xlu1 %5522  ;;  %v3442_v9 = vpop.permute.xlu0 %3441  ;;  %v5887_v6 = vld [vmem:[#allocation3 + $0x30] sm:$0xff] }
 0x303   : > { %v5617_v40 = vrot.slane %v5523_v22, 4  ;;  %v3533_v31 = vrot.slane %v3442_v9, 4  ;;  %v10903_v13 = vld [vmem:[#allocation3 + $0x34] ss:$8 sps:$4 sm:$0xff]  }
 0x304   : > { %2535 = vrot.lane.b32.xlu1 %v13772_v30, %s11769_s17  ;;  %2529 = vrot.lane.b32.xlu0 %v13857_v54, %s11769_s17 }
 0x305   : > { %v5666_v34 = vsel %vm5664_vm2, %v5523_v22, %v5617_v40  ;;  %v3582_v41 = vsel %vm3577_vm1, %v3442_v9, %v3533_v31 }
 0x306   : > { %5762 = vst.msk [vmem:[#allocation3 + $0x108] sm:$0xff] %vm13133_vm5, %v5666_v34  ;;  %3678 = vst.msk [vmem:[#allocation3 + $0x180] sm:$0xff] %vm13133_vm5, %v3582_v41  ;;  %v2997_v46 = vpop.permute.xlu1 %2996  ;;  %v3007_v45 = vpop.permute.xlu0 %3006  ;;  %v2911_v41 = vmul.bf16 %v13890_v17, %v13493_v52 }
 0x307   : > { %v3091_v1 = vrot.slane %v2997_v46, 4  ;;  %v3096_v49 = vrot.slane %v3007_v45, 4 }
 0x308   : > { %3463 = vrot.lane.b32.xlu1 %v3352_v61, %s11770_s19  ;;  %3457 = vrot.lane.b32.xlu0 %v3349_v63, %s11770_s19  ;;  %v13925_v63 = vld [vmem:[#allocation2 + $0x50] sm:$0xff] }
 0x309   : > { %v3140_v12 = vsel %vm3138_vm3, %v2997_v46, %v3091_v1  ;;  %v3145_v0 = vsel %vm3138_vm3, %v3007_v45, %v3096_v49  ;;  %v10888_v37 = vld [vmem:[#allocation3 + $0x64] ss:$8 sps:$4 sm:$0xff]   ;;  %v10890_v48 = vld [vmem:[#allocation3 + $0x60] ss:$8 sps:$4 sm:$0xff]   ;;  %v10898_v20 = vld [vmem:[#allocation3 + $0x194] ss:$8 sps:$4 sm:$0xff]   ;;  %v10299_v1 = vcombine.low %v5887_v6, %v5888_v60 }
 0x30a   : > { %3236 = vst.msk [vmem:[#allocation3 + $0x48] sm:$0xff] %vm13133_vm5, %v3140_v12  ;;  %3241 = vst.msk [vmem:[#allocation3 + $0x170] sm:$0xff] %vm13133_vm5, %v3145_v0  ;;  %v3444_v3 = vpop.permute.xlu1 %3443  ;;  %v3003_v16 = vpop.permute.xlu0 %3002  ;;  %6527 = vmatprep.subr.bf16.mxu0 %v10888_v37  ;;  %v10896_v19 = vld [vmem:[#allocation3 + $0x190] ss:$8 sps:$4 sm:$0xff]   ;;  %v5885_v49 = vld [vmem:[#allocation3 + $0x20] sm:$0xff] }
 0x30b   : > { %v3534_v25 = vrot.slane %v3444_v3, 4  ;;  %v3094_v18 = vrot.slane %v3003_v16, 4  ;;  %6528 = vmatpush1.bf16.msra.mxu0 %v10890_v48  ;;  %v10908_v12 = vld [vmem:[#allocation3 + $0x24] ss:$8 sps:$4 sm:$0xff]  }
 0x30c   : > { %2531 = vrot.lane.b32.xlu1 %v13824_v14, %s11769_s17  ;;  %3022 = vrot.lane.b32.xlu0 %v2912_v28, %s11772_s23  ;;  %v5886_v28 = vld [vmem:[#allocation3 + $0x28] sm:$0xff] }
 0x30d   : > { %v3583_v36 = vsel %vm3577_vm1, %v3444_v3, %v3534_v25  ;;  %v3143_v44 = vsel %vm3138_vm3, %v3003_v16, %v3094_v18  ;;  %v10893_v35 = vld [vmem:[#allocation3 + $0x104] ss:$8 sps:$4 sm:$0xff]   ;;  %v10895_v23 = vld [vmem:[#allocation3 + $0x100] ss:$8 sps:$4 sm:$0xff]   ;;  %6529 = vmatprep.subr.bf16.mxu0 %v10891_v33 }
 0x30e   : > { %3679 = vst.msk [vmem:[#allocation3 + $0x188] sm:$0xff] %vm13133_vm5, %v3583_v36  ;;  %3239 = vst.msk [vmem:[#allocation3 + $0x160] sm:$0xff] %vm13133_vm5, %v3143_v44  ;;  %v3009_v43 = vpop.permute.xlu1 %3008  ;;  %v5086_v27 = vpop.permute.xlu0 %5085  ;;  %6590 = vmatprep.subr.bf16.mxu1 %v10893_v35  ;;  %v10982_v3 = vld [vmem:[%s13629_s27 + $0x20] ss:$0 sps:$4 sm:$0xff]   ;;  %v10297_v36 = vcombine.low %v5885_v49, %v5886_v28  ;;  %v10988_v44 = vld [vmem:[%s13629_s27 + $0x28] ss:$12 sps:$4 sm:$0xff]  }
 0x30f   : > { %v3097_v10 = vrot.slane %v3009_v43, 4  ;;  %v5179_v15 = vrot.slane %v5086_v27, 4  ;;  %6530 = vmatpush1.bf16.msra.mxu0 %v10303_v4  ;;  %6591 = vmatpush1.bf16.msra.mxu1 %v10895_v23  ;;  %v5883_v35 = vld [vmem:[#allocation3 + $0x10] sm:$0xff]  ;;  %v5884_v23 = vld [vmem:[#allocation3 + $0x18] sm:$0xff] }
 0x310   : > { %3459 = vrot.lane.b32.xlu1 %v3350_v11, %s11770_s19  ;;  %3018 = vrot.lane.b32.xlu0 %v2910_v57, %s11772_s23  ;;  %v10932_v28 = vld [vmem:[#allocation3 + $0x134] ss:$8 sps:$4 sm:$0xff]  }
 0x311   : > { %v3146_v59 = vsel %vm3138_vm3, %v3009_v43, %v3097_v10  ;;  %v5228_v5 = vsel %vm5225_vm4, %v5086_v27, %v5179_v15  ;;  %v10899_v50 = vld [vmem:[#allocation3 + $0x44] ss:$8 sps:$4 sm:$0xff]   ;;  %v10901_v32 = vld [vmem:[#allocation3 + $0x40] ss:$8 sps:$4 sm:$0xff]   ;;  %6838 = vmatprep.subr.bf16.mxu1 %v10898_v20  ;;  %v10913_v43 = vld [vmem:[#allocation3 + $0x14] ss:$8 sps:$4 sm:$0xff]  }
 0x312   : > { %3242 = vst.msk [vmem:[#allocation3 + $0x178] sm:$0xff] %vm13133_vm5, %v3146_v59  ;;  %5324 = vst.msk [vmem:[#allocation3 + $0xf0] sm:$0xff] %vm13133_vm5, %v5228_v5  ;;  %v3005_v42 = vpop.permute.xlu1 %3004  ;;  %v5082_v51 = vpop.permute.xlu0 %5081  ;;  %6531 = vmatprep.subr.bf16.mxu0 %v10899_v50  ;;  %10329 = vmatmul.mubr.msk.bf16.vlgmr.msra.gmra.mxu1 %vm6518_vm6, %v10902_v29  ;;  %v10295_v29 = vcombine.low %v5883_v35, %v5884_v23  ;;  %v5881_v59 = vld [vmem:[#allocation3] sm:$0xff] }
 0x313   : > { %v3095_v47 = vrot.slane %v3005_v42, 4  ;;  %v5177_v21 = vrot.slane %v5082_v51, 4  ;;  %6532 = vmatpush1.bf16.msra.mxu0 %v10901_v32  ;;  %6839 = vmatpush1.bf16.msra.mxu1 %v10896_v19  ;;  %v10918_v5 = vld [vmem:[#allocation3 + $0x4] ss:$8 sps:$4 sm:$0xff]  }
 0x314   : > { %3024 = vrot.lane.b32.xlu1 %v2913_v58, %s11772_s23  ;;  %2541 = vrot.lane.b32.xlu0 %v13839_v56, %s11769_s17  ;;  %v5882_v58 = vld [vmem:[#allocation3 + $0x8] sm:$0xff] }
 0x315   : > { %v3144_v22 = vsel %vm3138_vm3, %v3005_v42, %v3095_v47  ;;  %v5226_v9 = vsel %vm5225_vm4, %v5082_v51, %v5177_v21  ;;  %v10907_v40 = vld [vmem:[#allocation3 + $0x184] ss:$8 sps:$4 sm:$0xff]   ;;  %6533 = vmatprep.subr.bf16.mxu0 %v10903_v13  ;;  %v10905_v46 = vld [vmem:[#allocation3 + $0x180] ss:$8 sps:$4 sm:$0xff]   ;;  %6618 = vmatprep.mubr.bf16.mxu1 %v16232_v53  ;;  %v10922_v42 = vld [vmem:[#allocation3 + $0x154] ss:$8 sps:$4 sm:$0xff]   ;;  %v4610_v21 = vmul.bf16 %v13925_v63, %v13649_v39 }
 0x316   : > { %3240 = vst.msk [vmem:[#allocation3 + $0x168] sm:$0xff] %vm13133_vm5, %v3144_v22  ;;  %5322 = vst.msk [vmem:[#allocation3 + $0xe0] sm:$0xff] %vm13133_vm5, %v5226_v9  ;;  %v5088_v31 = vpop.permute.xlu1 %5087  ;;  %v4701_v34 = vpop.permute.xlu0 %4700  ;;  %6840 = vmatprep.subr.bf16.mxu1 %v10907_v40  ;;  %v10293_v6 = vcombine.low %v5881_v59, %v5882_v58  ;;  %v10920_v13 = vld [vmem:[#allocation3 + $0x150] ss:$8 sps:$4 sm:$0xff]  }
 0x317   : > { %v5180_v45 = vrot.slane %v5088_v31, 4  ;;  %v4794_v61 = vrot.slane %v4701_v34, 4  ;;  %6534 = vmatpush1.bf16.msra.mxu0 %v10299_v1  ;;  %6841 = vmatpush1.bf16.msra.mxu1 %v10905_v46 }
 0x318   : > { %3020 = vrot.lane.b32.xlu1 %v2911_v41, %s11772_s23  ;;  %5101 = vrot.lane.b32.xlu0 %v13925_v63, %s11773_s28 }
 0x319   : > { %v5229_v0 = vsel %vm5225_vm4, %v5088_v31, %v5180_v45  ;;  %v4843_v37 = vsel %vm4840_vm7, %v4701_v34, %v4794_v61  ;;  %v10912_v48 = vld [vmem:[#allocation3 + $0x174] ss:$8 sps:$4 sm:$0xff]   ;;  %6535 = vmatprep.subr.bf16.mxu0 %v10908_v12  ;;  %v10910_v18 = vld [vmem:[#allocation3 + $0x170] ss:$8 sps:$4 sm:$0xff]   ;;  %v10927_v34 = vld [vmem:[#allocation3 + $0x144] ss:$8 sps:$4 sm:$0xff]   ;;  %v4608_v61 = vmul.bf16 %v13649_v39, %v13857_v54 }
 0x31a   : > { %5325 = vst.msk [vmem:[#allocation3 + $0xf8] sm:$0xff] %vm13133_vm5, %v5229_v0  ;;  %4939 = vst.msk [vmem:[#allocation3 + $0xd0] sm:$0xff] %vm13133_vm5, %v4843_v37  ;;  %v5084_v16 = vpop.permute.xlu1 %5083  ;;  %v4697_v25 = vpop.permute.xlu0 %4696  ;;  %6842 = vmatprep.subr.bf16.mxu1 %v10912_v48  ;;  %10330 = vmatmul.mubr.msk.bf16.gmra.mxu1 %vm6518_vm6, %v10982_v3  ;;  %v5911_v46 = vld [vmem:[#allocation3 + $0xf0] sm:$0xff]  ;;  %v10925_v0 = vld [vmem:[#allocation3 + $0x140] ss:$8 sps:$4 sm:$0xff]  }
 0x31b   : > { %v5178_v24 = vrot.slane %v5084_v16, 4  ;;  %v4792_v33 = vrot.slane %v4697_v25, 4  ;;  %6536 = vmatpush1.bf16.msra.mxu0 %v10297_v36  ;;  %6843 = vmatpush1.bf16.msra.mxu1 %v10910_v18  ;;  %v4171_v36 = vmul.bf16 %v13925_v63, %v13679_v62 }
 0x31c   : > { %2543 = vrot.lane.b32.xlu1 %v13859_v38, %s11769_s17  ;;  %2537 = vrot.lane.b32.xlu0 %v13867_v26, %s11769_s17 }
 0x31d   : > { %v5227_v7 = vsel %vm5225_vm4, %v5084_v16, %v5178_v24  ;;  %v4841_v27 = vsel %vm4840_vm7, %v4697_v25, %v4792_v33  ;;  %v10917_v11 = vld [vmem:[#allocation3 + $0x164] ss:$8 sps:$4 sm:$0xff]   ;;  %6537 = vmatprep.subr.bf16.mxu0 %v10913_v43  ;;  %v10915_v15 = vld [vmem:[#allocation3 + $0x160] ss:$8 sps:$4 sm:$0xff]   ;;  %6870 = vmatprep.mubr.bf16.mxu1 %v10988_v44  ;;  %v4611_v33 = vmul.bf16 %v13649_v39, %v13772_v30  ;;  %v10930_v43 = vld [vmem:[#allocation3 + $0x130] ss:$8 sps:$4 sm:$0xff]  }
 0x31e   : > { %5323 = vst.msk [vmem:[#allocation3 + $0xe8] sm:$0xff] %vm13133_vm5, %v5227_v7  ;;  %4937 = vst.msk [vmem:[#allocation3 + $0xc0] sm:$0xff] %vm13133_vm5, %v4841_v27  ;;  %v4703_v57 = vpop.permute.xlu1 %4702  ;;  %v5094_v10 = vpop.permute.xlu0 %5093  ;;  %6844 = vmatprep.subr.bf16.mxu1 %v10917_v11  ;;  %v5909_v18 = vld [vmem:[#allocation3 + $0xe0] sm:$0xff] }
 0x31f   : > { %v4795_v4 = vrot.slane %v4703_v57, 4  ;;  %v5183_v20 = vrot.slane %v5094_v10, 4  ;;  %6538 = vmatpush1.bf16.msra.mxu0 %v10295_v29  ;;  %6845 = vmatpush1.bf16.msra.mxu1 %v10915_v15  ;;  %v4609_v29 = vmul.bf16 %v13649_v39, %v13824_v14 }
 0x320   : > { %5103 = vrot.lane.b32.xlu1 %v13772_v30, %s11773_s28  ;;  %5097 = vrot.lane.b32.xlu0 %v13857_v54, %s11773_s28 }
 0x321   : > { %v4844_v50 = vsel %vm4840_vm7, %v4703_v57, %v4795_v4  ;;  %v5232_v32 = vsel %vm5225_vm4, %v5094_v10, %v5183_v20  ;;  %6539 = vmatprep.subr.bf16.mxu0 %v10918_v5  ;;  %6846 = vmatprep.subr.bf16.mxu1 %v10922_v42  ;;  %v5912_v22 = vld [vmem:[#allocation3 + $0xf8] sm:$0xff]  ;;  %v10937_v10 = vld [vmem:[#allocation3 + $0x124] ss:$8 sps:$4 sm:$0xff]   ;;  %v5907_v4 = vld [vmem:[#allocation3 + $0xd0] sm:$0xff] }
 0x322   : > { %4940 = vst.msk [vmem:[#allocation3 + $0xd8] sm:$0xff] %vm13133_vm5, %v4844_v50  ;;  %5328 = vst.msk [vmem:[#allocation3 + $0x210] sm:$0xff] %vm13133_vm5, %v5232_v32  ;;  %v4699_v51 = vpop.permute.xlu1 %4698  ;;  %v4262_v47 = vpop.permute.xlu0 %4261  ;;  %v10923_v9 = vld [vmem:[#allocation3 + $0xf4] ss:$8 sps:$4 sm:$0xff]   ;;  %v10323_v12 = vcombine.low %v5911_v46, %v5912_v22  ;;  %v10935_v32 = vld [vmem:[#allocation3 + $0x120] ss:$8 sps:$4 sm:$0xff]   ;;  %v4169_v22 = vmul.bf16 %v13679_v62, %v13857_v54 }
 0x323   : > { %v4793_v60 = vrot.slane %v4699_v51, 4  ;;  %v4355_v19 = vrot.slane %v4262_v47, 4  ;;  %6540 = vmatpush1.bf16.msra.mxu0 %v10293_v6  ;;  %6847 = vmatpush1.bf16.msra.mxu1 %v10920_v13  ;;  %v4172_v13 = vmul.bf16 %v13679_v62, %v13772_v30 }
 0x324   : > { %2539 = vrot.lane.b32.xlu1 %v13890_v17, %s11769_s17  ;;  %4716 = vrot.lane.b32.xlu0 %v4610_v21, %s11774_s29 }
 0x325   : > { %v4842_v40 = vsel %vm4840_vm7, %v4699_v51, %v4793_v60  ;;  %v4404_v31 = vsel %vm4401_vm8, %v4262_v47, %v4355_v19  ;;  %6541 = vmatprep.subr.bf16.mxu0 %v10923_v9  ;;  %6848 = vmatprep.subr.bf16.mxu1 %v10927_v34  ;;  %v5910_v37 = vld [vmem:[#allocation3 + $0xe8] sm:$0xff]  ;;  %v5905_v19 = vld [vmem:[#allocation3 + $0xc0] sm:$0xff] }
 0x326   : > { %4938 = vst.msk [vmem:[#allocation3 + $0xc8] sm:$0xff] %vm13133_vm5, %v4842_v40  ;;  %4500 = vst.msk [vmem:[#allocation3 + $0xb0] sm:$0xff] %vm13133_vm5, %v4404_v31  ;;  %v5096_v41 = vpop.permute.xlu1 %5095  ;;  %v5090_v45 = vpop.permute.xlu0 %5089  ;;  %v10928_v48 = vld [vmem:[#allocation3 + $0xe4] ss:$8 sps:$4 sm:$0xff]   ;;  %v10321_v23 = vcombine.low %v5909_v18, %v5910_v37  ;;  %v4170_v18 = vmul.bf16 %v13679_v62, %v13824_v14 }
 0x327   : > { %v5184_v1 = vrot.slane %v5096_v41, 4  ;;  %v5181_v49 = vrot.slane %v5090_v45, 4  ;;  %6542 = vmatpush2.bf16.msra.mxu0 %v10323_v12  ;;  %6849 = vmatpush1.bf16.msra.mxu1 %v10925_v0 }
 0x328   : > { %5099 = vrot.lane.b32.xlu1 %v13824_v14, %s11773_s28  ;;  %4712 = vrot.lane.b32.xlu0 %v4608_v61, %s11774_s29 }
 0x329   : > { %v5233_v3 = vsel %vm5225_vm4, %v5096_v41, %v5184_v1  ;;  %v5230_v16 = vsel %vm5225_vm4, %v5090_v45, %v5181_v49  ;;  %6543 = vmatprep.subr.bf16.mxu0 %v10928_v48  ;;  %6850 = vmatprep.subr.bf16.mxu1 %v10932_v28  ;;  %v5908_v7 = vld [vmem:[#allocation3 + $0xd8] sm:$0xff] }
 0x32a   : > { %5329 = vst.msk [vmem:[#allocation3 + $0x218] sm:$0xff] %vm13133_vm5, %v5233_v3  ;;  %5326 = vst.msk [vmem:[#allocation3 + $0x200] sm:$0xff] %vm13133_vm5, %v5230_v16  ;;  %v4264_v25 = vpop.permute.xlu1 %4263  ;;  %v4258_v24 = vpop.permute.xlu0 %4257  ;;  %v10933_v27 = vld [vmem:[#allocation3 + $0xd4] ss:$8 sps:$4 sm:$0xff]   ;;  %v10319_v50 = vcombine.low %v5907_v4, %v5908_v7 }
 0x32b   : > { %v4356_v44 = vrot.slane %v4264_v25, 4  ;;  %v4353_v35 = vrot.slane %v4258_v24, 4  ;;  %6544 = vmatpush2.bf16.msra.mxu0 %v10321_v23  ;;  %6851 = vmatpush1.bf16.msra.mxu1 %v10930_v43 }
 0x32c   : > { %4718 = vrot.lane.b32.xlu1 %v4611_v33, %s11774_s29  ;;  %4277 = vrot.lane.b32.xlu0 %v4171_v36, %s11775_s30 }
 0x32d   : > { %v4405_v11 = vsel %vm4401_vm8, %v4264_v25, %v4356_v44  ;;  %v4402_v57 = vsel %vm4401_vm8, %v4258_v24, %v4353_v35  ;;  %6545 = vmatprep.subr.bf16.mxu0 %v10933_v27  ;;  %6852 = vmatprep.subr.bf16.mxu1 %v10937_v10  ;;  %v5906_v42 = vld [vmem:[#allocation3 + $0xc8] sm:$0xff]  ;;  %v4614_v27 = vmul.bf16 %v13649_v39, %v13839_v56 }
 0x32e   : > { %4501 = vst.msk [vmem:[#allocation3 + $0xb8] sm:$0xff] %vm13133_vm5, %v4405_v11  ;;  %4498 = vst.msk [vmem:[#allocation3 + $0xa0] sm:$0xff] %vm13133_vm5, %v4402_v57  ;;  %v5092_v15 = vpop.permute.xlu1 %5091  ;;  %v4709_v20 = vpop.permute.xlu0 %4708  ;;  %v10938_v51 = vld [vmem:[#allocation3 + $0xc4] ss:$8 sps:$4 sm:$0xff]   ;;  %v10317_v34 = vcombine.low %v5905_v19, %v5906_v42 }
 0x32f   : > { %v5182_v59 = vrot.slane %v5092_v15, 4  ;;  %v4798_v5 = vrot.slane %v4709_v20, 4  ;;  %6546 = vmatpush2.bf16.msra.mxu0 %v10319_v50  ;;  %6853 = vmatpush1.bf16.msra.mxu1 %v10935_v32 }
 0x330   : > { %4714 = vrot.lane.b32.xlu1 %v4609_v29, %s11774_s29  ;;  %5109 = vrot.lane.b32.xlu0 %v13839_v56, %s11773_s28 }
 0x331   : > { %v5231_v58 = vsel %vm5225_vm4, %v5092_v15, %v5182_v59  ;;  %v4847_v47 = vsel %vm4840_vm7, %v4709_v20, %v4798_v5  ;;  %v10942_v21 = vld [vmem:[#allocation3 + $0x214] ss:$8 sps:$4 sm:$0xff]   ;;  %6547 = vmatprep.subr.bf16.mxu0 %v10938_v51  ;;  %v10940_v9 = vld [vmem:[#allocation3 + $0x210] ss:$8 sps:$4 sm:$0xff]  }
 0x332   : > { %5327 = vst.msk [vmem:[#allocation3 + $0x208] sm:$0xff] %vm13133_vm5, %v5231_v58  ;;  %4943 = vst.msk [vmem:[#allocation3 + $0x1f0] sm:$0xff] %vm13133_vm5, %v4847_v47  ;;  %v4260_v60 = vpop.permute.xlu1 %4259  ;;  %v3823_v6 = vpop.permute.xlu0 %3822  ;;  %6854 = vmatprep.subr.bf16.mxu1 %v10942_v21 }
 0x333   : > { %v4354_v40 = vrot.slane %v4260_v60, 4  ;;  %v3916_v31 = vrot.slane %v3823_v6, 4  ;;  %6548 = vmatpush2.bf16.msra.mxu0 %v10317_v34  ;;  %6855 = vmatpush2.bf16.msra.mxu1 %v10940_v9 }
 0x334   : > { %4279 = vrot.lane.b32.xlu1 %v4172_v13, %s11775_s30  ;;  %4273 = vrot.lane.b32.xlu0 %v4169_v22, %s11775_s30 }
 0x335   : > { %v4403_v41 = vsel %vm4401_vm8, %v4260_v60, %v4354_v40  ;;  %v3965_v46 = vsel %vm3962_vm9, %v3823_v6, %v3916_v31  ;;  %v10943_v45 = vld [vmem:[#allocation3 + $0xb4] ss:$8 sps:$4 sm:$0xff]   ;;  %v10945_v61 = vld [vmem:[#allocation3 + $0xb0] ss:$8 sps:$4 sm:$0xff]   ;;  %v4175_v31 = vmul.bf16 %v13679_v62, %v13839_v56 }
 0x336   : > { %4499 = vst.msk [vmem:[#allocation3 + $0xa8] sm:$0xff] %vm13133_vm5, %v4403_v41  ;;  %4061 = vst.msk [vmem:[#allocation3 + $0x90] sm:$0xff] %vm13133_vm5, %v3965_v46  ;;  %v4711_v1 = vpop.permute.xlu1 %4710  ;;  %v4705_v49 = vpop.permute.xlu0 %4704  ;;  %6549 = vmatprep.subr.bf16.mxu0 %v10943_v45 }
 0x337   : > { %v4799_v12 = vrot.slane %v4711_v1, 4  ;;  %v4796_v0 = vrot.slane %v4705_v49, 4  ;;  %6550 = vmatpush2.bf16.msra.mxu0 %v10945_v61 }
 0x338   : > { %5111 = vrot.lane.b32.xlu1 %v13859_v38, %s11773_s28  ;;  %5105 = vrot.lane.b32.xlu0 %v13867_v26, %s11773_s28 }
 0x339   : > { %v4848_v37 = vsel %vm4840_vm7, %v4711_v1, %v4799_v12  ;;  %v4845_v48 = vsel %vm4840_vm7, %v4705_v49, %v4796_v0  ;;  %v10946_v3 = vld [vmem:[#allocation3 + $0x200] ss:$8 sps:$4 sm:$0xff]   ;;  %v10948_v16 = vld [vmem:[#allocation3 + $0x204] ss:$8 sps:$4 sm:$0xff]   ;;  %v4173_v0 = vmul.bf16 %v13679_v62, %v13867_v26 }
 0x33a   : > { %4944 = vst.msk [vmem:[#allocation3 + $0x1f8] sm:$0xff] %vm13133_vm5, %v4848_v37  ;;  %4941 = vst.msk [vmem:[#allocation3 + $0x1e0] sm:$0xff] %vm13133_vm5, %v4845_v48  ;;  %v3825_v28 = vpop.permute.xlu1 %3824  ;;  %v3819_v25 = vpop.permute.xlu0 %3818  ;;  %6856 = vmatprep.subr.bf16.mxu1 %v10948_v16  ;;  %v10973_v16 = vld [vmem:[%s13629_s27] ss:$12 sps:$4 sm:$0xff]  }
 0x33b   : > { %v3917_v24 = vrot.slane %v3825_v28, 4  ;;  %v3914_v33 = vrot.slane %v3819_v25, 4  ;;  %6857 = vmatpush2.bf16.msra.mxu1 %v10946_v3  ;;  %v5813_v3 = vld [vmem:[%s13629_s27 + $0x18] sm:$0xff] }
 0x33c   : > { %4275 = vrot.lane.b32.xlu1 %v4170_v18, %s11775_s30  ;;  %3838 = vrot.lane.b32.xlu0 %v13925_v63, %s11776_s6 }
 0x33d   : > { %v3966_v36 = vsel %vm3962_vm9, %v3825_v28, %v3917_v24  ;;  %v3963_v44 = vsel %vm3962_vm9, %v3819_v25, %v3914_v33  ;;  %v10949_v35 = vld [vmem:[#allocation3 + $0xa4] ss:$8 sps:$4 sm:$0xff]   ;;  %v10951_v23 = vld [vmem:[#allocation3 + $0xa0] ss:$8 sps:$4 sm:$0xff]  }
 0x33e   : > { %4062 = vst.msk [vmem:[#allocation3 + $0x98] sm:$0xff] %vm13133_vm5, %v3966_v36  ;;  %4059 = vst.msk [vmem:[#allocation3 + $0x80] sm:$0xff] %vm13133_vm5, %v3963_v44  ;;  %v4707_v43 = vpop.permute.xlu1 %4706  ;;  %v4270_v7 = vpop.permute.xlu0 %4269  ;;  %6551 = vmatprep.subr.bf16.mxu0 %v10949_v35  ;;  %v4176_v44 = vmul.bf16 %v13679_v62, %v13859_v38  ;;  %v5438_v35 = vmul.bf16 %v13480_v8, %v13839_v56 }
 0x33f   : > { %v4797_v11 = vrot.slane %v4707_v43, 4  ;;  %v4359_v63 = vrot.slane %v4270_v7, 4  ;;  %6552 = vmatpush2.bf16.msra.mxu0 %v10951_v23  ;;  %v10291_v23 = vcombine.high %v5813_v3, %v5813_v3 }
 0x340   : > { %5107 = vrot.lane.b32.xlu1 %v13890_v17, %s11773_s28  ;;  %4724 = vrot.lane.b32.xlu0 %v4614_v27, %s11774_s29 }
 0x341   : > { %v4846_v57 = vsel %vm4840_vm7, %v4707_v43, %v4797_v11  ;;  %v4408_v10 = vsel %vm4401_vm8, %v4270_v7, %v4359_v63  ;;  %v10952_v15 = vld [vmem:[#allocation3 + $0x1f0] ss:$8 sps:$4 sm:$0xff]   ;;  %v10954_v4 = vld [vmem:[#allocation3 + $0x1f4] ss:$8 sps:$4 sm:$0xff]  }
 0x342   : > { %4942 = vst.msk [vmem:[#allocation3 + $0x1e8] sm:$0xff] %vm13133_vm5, %v4846_v57  ;;  %4504 = vst.msk [vmem:[#allocation3 + $0x1d0] sm:$0xff] %vm13133_vm5, %v4408_v10  ;;  %v3821_v20 = vpop.permute.xlu1 %3820  ;;  %v4266_v29 = vpop.permute.xlu0 %4265  ;;  %6858 = vmatprep.subr.bf16.mxu1 %v10954_v4  ;;  %v4174_v4 = vmul.bf16 %v13679_v62, %v13890_v17 }
 0x343   : > { %v3915_v59 = vrot.slane %v3821_v20, 4  ;;  %v4357_v5 = vrot.slane %v4266_v29, 4  ;;  %6859 = vmatpush2.bf16.msra.mxu1 %v10952_v15 }
 0x344   : > { %3840 = vrot.lane.b32.xlu1 %v13772_v30, %s11776_s6  ;;  %3834 = vrot.lane.b32.xlu0 %v13857_v54, %s11776_s6  ;;  %v4615_v30 = vmul.bf16 %v13649_v39, %v13859_v38  ;;  %v4612_v54 = vmul.bf16 %v13649_v39, %v13867_v26 }
 0x345   : > { %v3964_v50 = vsel %vm3962_vm9, %v3821_v20, %v3915_v59  ;;  %v4406_v32 = vsel %vm4401_vm8, %v4266_v29, %v4357_v5  ;;  %v10955_v42 = vld [vmem:[#allocation3 + $0x94] ss:$8 sps:$4 sm:$0xff]   ;;  %v10957_v51 = vld [vmem:[#allocation3 + $0x90] ss:$8 sps:$4 sm:$0xff]  }
 0x346   : > { %4060 = vst.msk [vmem:[#allocation3 + $0x88] sm:$0xff] %vm13133_vm5, %v3964_v50  ;;  %4502 = vst.msk [vmem:[#allocation3 + $0x1c0] sm:$0xff] %vm13133_vm5, %v4406_v32  ;;  %v4272_v58 = vpop.permute.xlu1 %4271  ;;  %v3831_v47 = vpop.permute.xlu0 %3830  ;;  %6553 = vmatprep.subr.bf16.mxu0 %v10955_v42  ;;  %v10290_v42 = vcombine.low %v5813_v3, %v5813_v3 }
 0x347   : > { %v4360_v21 = vrot.slane %v4272_v58, 4  ;;  %v3920_v60 = vrot.slane %v3831_v47, 4  ;;  %6554 = vmatpush2.bf16.msra.mxu0 %v10957_v51 }
 0x348   : > { %4726 = vrot.lane.b32.xlu1 %v4615_v30, %s11774_s29  ;;  %4720 = vrot.lane.b32.xlu0 %v4612_v54, %s11774_s29 }
 0x349   : > { %v4409_v19 = vsel %vm4401_vm8, %v4272_v58, %v4360_v21  ;;  %v3969_v6 = vsel %vm3962_vm9, %v3831_v47, %v3920_v60  ;;  %v10958_v13 = vld [vmem:[#allocation3 + $0x1e0] ss:$8 sps:$4 sm:$0xff]   ;;  %v10960_v22 = vld [vmem:[#allocation3 + $0x1e4] ss:$8 sps:$4 sm:$0xff]   ;;  %v5439_v47 = vmul.bf16 %v13480_v8, %v13859_v38 }
 0x34a   : > { %4505 = vst.msk [vmem:[#allocation3 + $0x1d8] sm:$0xff] %vm13133_vm5, %v4409_v19  ;;  %4065 = vst.msk [vmem:[#allocation3 + $0x1b0] sm:$0xff] %vm13133_vm5, %v3969_v6  ;;  %v4268_v9 = vpop.permute.xlu1 %4267  ;;  %v5533_v40 = vpop.permute.xlu0 %5532  ;;  %6860 = vmatprep.subr.bf16.mxu1 %v10960_v22 }
 0x34b   : > { %v4358_v34 = vrot.slane %v4268_v9, 4  ;;  %v5622_v41 = vrot.slane %v5533_v40, 4  ;;  %6861 = vmatpush2.bf16.msra.mxu1 %v10958_v13 }
 0x34c   : > { %3836 = vrot.lane.b32.xlu1 %v13824_v14, %s11776_s6  ;;  %4285 = vrot.lane.b32.xlu0 %v4175_v31, %s11775_s30  ;;  %v4613_v14 = vmul.bf16 %v13649_v39, %v13890_v17  ;;  %v14132_v31 = vld [vmem:[#allocation2 + $0x90] sm:$0xff] }
 0x34d   : > { %v4407_v46 = vsel %vm4401_vm8, %v4268_v9, %v4358_v34  ;;  %v5671_v45 = vsel %vm5664_vm2, %v5533_v40, %v5622_v41  ;;  %v10961_v61 = vld [vmem:[#allocation3 + $0x84] ss:$8 sps:$4 sm:$0xff]   ;;  %v10963_v1 = vld [vmem:[#allocation3 + $0x80] ss:$8 sps:$4 sm:$0xff]  }
 0x34e   : > { %4503 = vst.msk [vmem:[#allocation3 + $0x1c8] sm:$0xff] %vm13133_vm5, %v4407_v46  ;;  %5767 = vst.msk [vmem:[#allocation3 + $0x230] sm:$0xff] %vm13133_vm5, %v5671_v45  ;;  %v3833_v49 = vpop.permute.xlu1 %3832  ;;  %v3827_v12 = vpop.permute.xlu0 %3826  ;;  %6555 = vmatprep.subr.bf16.mxu0 %v10961_v61 }
 0x34f   : > { %v3921_v37 = vrot.slane %v3833_v49, 4  ;;  %v3918_v48 = vrot.slane %v3827_v12, 4  ;;  %6556 = vmatpush2.bf16.msra.mxu0 %v10963_v1  ;;  %v5437_v1 = vmul.bf16 %v13480_v8, %v13890_v17 }
 0x350   : > { %4722 = vrot.lane.b32.xlu1 %v4613_v14, %s11774_s29  ;;  %4281 = vrot.lane.b32.xlu0 %v4173_v0, %s11775_s30  ;;  %v14149_v14 = vld [vmem:[%s13629_s27 + $0x3c] sm:$0xff] }
 0x351   : > { %v3970_v28 = vsel %vm3962_vm9, %v3833_v49, %v3921_v37  ;;  %v3967_v25 = vsel %vm3962_vm9, %v3827_v12, %v3918_v48  ;;  %v10964_v18 = vld [vmem:[#allocation3 + $0x1d0] ss:$8 sps:$4 sm:$0xff]   ;;  %v10966_v24 = vld [vmem:[#allocation3 + $0x1d4] ss:$8 sps:$4 sm:$0xff]   ;;  %v14153_v0 = vld [vmem:[#allocation2 + $0x80] sm:$0xff] }
 0x352   : > { %4066 = vst.msk [vmem:[#allocation3 + $0x1b8] sm:$0xff] %vm13133_vm5, %v3970_v28  ;;  %4063 = vst.msk [vmem:[#allocation3 + $0x1a0] sm:$0xff] %vm13133_vm5, %v3967_v25  ;;  %v5535_v33 = vpop.permute.xlu1 %5534  ;;  %v5529_v36 = vpop.permute.xlu0 %5528  ;;  %6862 = vmatprep.subr.bf16.mxu1 %v10966_v24  ;;  %6558 = vmatmul.mubr.bf16.vlgmr.msra.gmra.mxu0 %v10973_v16  ;;  %v10986_v37 = vld [vmem:[%s13629_s27 + $0x24] ss:$12 sps:$4 sm:$0xff]   ;;  %v3353_v24 = vmul.bf16 %v13463_v2, %v14153_v0 }
 0x353   : > { %v5623_v43 = vrot.slane %v5535_v33, 4  ;;  %v5620_v7 = vrot.slane %v5529_v36, 4  ;;  %6863 = vmatpush2.bf16.msra.mxu1 %v10964_v18  ;;  %6567 = vmatprep.mubr.bf16.mxu0 %v10291_v23  ;;  %v11003_v23 = vld [vmem:[%s13629_s27 + $0x2c] ss:$12 sps:$4 sm:$0xff]  }
 0x354   : > { %4287 = vrot.lane.b32.xlu1 %v4176_v44, %s11775_s30  ;;  %5548 = vrot.lane.b32.xlu0 %v5438_v35, %s11771_s22  ;;  %v14166_v35 = vld [vmem:[#allocation2 + $0x98] sm:$0xff] }
 0x355   : > { %v5672_v27 = vsel %vm5664_vm2, %v5535_v33, %v5623_v43  ;;  %v5669_v11 = vsel %vm5664_vm2, %v5529_v36, %v5620_v7  ;;  %v10967_v63 = vld [vmem:[#allocation3 + $0x1c0] ss:$8 sps:$4 sm:$0xff]   ;;  %v10969_v57 = vld [vmem:[#allocation3 + $0x1c4] ss:$8 sps:$4 sm:$0xff]   ;;  %v10335_v33 = vcombine.high %v14149_v14, %v14149_v14 }
 0x356   : > { %5768 = vst.msk [vmem:[#allocation3 + $0x238] sm:$0xff] %vm13133_vm5, %v5672_v27  ;;  %5765 = vst.msk [vmem:[#allocation3 + $0x220] sm:$0xff] %vm13133_vm5, %v5669_v11  ;;  %v3829_v10 = vpop.permute.xlu1 %3828  ;;  %v3454_v15 = vpop.permute.xlu0 %3453  ;;  %6864 = vmatprep.subr.bf16.mxu1 %v10969_v57 }
 0x357   : > { %v3919_v20 = vrot.slane %v3829_v10, 4  ;;  %v3539_v29 = vrot.slane %v3454_v15, 4  ;;  %6865 = vmatpush2.bf16.msra.mxu1 %v10967_v63 }
 0x358   : > { %4283 = vrot.lane.b32.xlu1 %v4174_v4, %s11775_s30  ;;  %3846 = vrot.lane.b32.xlu0 %v13839_v56, %s11776_s6  ;;  %v5436_v56 = vmul.bf16 %v13480_v8, %v13867_v26 }
 0x359   : > { %v3968_v59 = vsel %vm3962_vm9, %v3829_v10, %v3919_v20  ;;  %v3588_v5 = vsel %vm3577_vm1, %v3454_v15, %v3539_v29  ;;  %v10970_v50 = vld [vmem:[#allocation3 + $0x1b0] ss:$8 sps:$4 sm:$0xff]   ;;  %v10972_v32 = vld [vmem:[#allocation3 + $0x1b4] ss:$8 sps:$4 sm:$0xff]   ;;  %v2916_v10 = vmul.bf16 %v14132_v31, %v13493_v52  ;;  %v14184_v20 = vld [vmem:[#allocation2 + $0x88] sm:$0xff] }
 0x35a   : > { %4064 = vst.msk [vmem:[#allocation3 + $0x1a8] sm:$0xff] %vm13133_vm5, %v3968_v59  ;;  %3684 = vst.msk [vmem:[#allocation3 + $0x2b0] sm:$0xff] %vm13133_vm5, %v3588_v5  ;;  %v5531_v51 = vpop.permute.xlu1 %5530  ;;  %v3450_v58 = vpop.permute.xlu0 %3449  ;;  %6866 = vmatprep.subr.bf16.mxu1 %v10972_v32  ;;  %6568 = vmatmul.mubr.bf16.gmra.mxu0 %v10290_v42 }
 0x35b   : > { %v5621_v30 = vrot.slane %v5531_v51, 4  ;;  %v3537_v54 = vrot.slane %v3450_v58, 4  ;;  %6867 = vmatpush2.bf16.msra.mxu1 %v10970_v50  ;;  %6921 = vmatprep.mubr.bf16.mxu0 %v16232_v53 }
 0x35c   : > { %5550 = vrot.lane.b32.xlu1 %v5439_v47, %s11771_s22  ;;  %5544 = vrot.lane.b32.xlu0 %v5436_v56, %s11771_s22  ;;  %v10334_v47 = vcombine.low %v14149_v14, %v14149_v14  ;;  %v5440_v14 = vmul.bf16 %v13480_v8, %v14153_v0 }
 0x35d   : > { %v5670_v21 = vsel %vm5664_vm2, %v5531_v51, %v5621_v30  ;;  %v3586_v60 = vsel %vm3577_vm1, %v3450_v58, %v3537_v54  ;;  %v10976_v19 = vld [vmem:[#allocation3 + $0x230] ss:$8 sps:$4 sm:$0xff]   ;;  %v10978_v6 = vld [vmem:[#allocation3 + $0x234] ss:$8 sps:$4 sm:$0xff]   ;;  %v3354_v51 = vmul.bf16 %v13463_v2, %v14184_v20  ;;  %v5442_v58 = vmul.bf16 %v13480_v8, %v14132_v31 }
 0x35e   : > { %5766 = vst.msk [vmem:[#allocation3 + $0x228] sm:$0xff] %vm13133_vm5, %v5670_v21  ;;  %3682 = vst.msk [vmem:[#allocation3 + $0x2a0] sm:$0xff] %vm13133_vm5, %v3586_v60  ;;  %v3456_v13 = vpop.permute.xlu1 %3455  ;;  %v3015_v22 = vpop.permute.xlu0 %3014  ;;  %6901 = vmatprep.subr.bf16.mxu0 %v10978_v6  ;;  %v11094_v54 = vld [vmem:[%s13629_s27 + $0x4c] ss:$12 sps:$4 sm:$0xff]   ;;  %v11010_v21 = vld [vmem:[%s13629_s27 + $0x44] ss:$0 sps:$4 sm:$0xff]  }
 0x35f   : > { %v3540_v9 = vrot.slane %v3456_v13, 4  ;;  %v3100_v40 = vrot.slane %v3015_v22, 4  ;;  %6902 = vmatpush1.bf16.msra.mxu0 %v10976_v19 }
 0x360   : > { %3848 = vrot.lane.b32.xlu1 %v13859_v38, %s11776_s6  ;;  %3842 = vrot.lane.b32.xlu0 %v13867_v26, %s11776_s6  ;;  %v3355_v26 = vmul.bf16 %v13463_v2, %v14132_v31 }
 0x361   : > { %v3589_v34 = vsel %vm3577_vm1, %v3456_v13, %v3540_v9  ;;  %v3149_v41 = vsel %vm3138_vm3, %v3015_v22, %v3100_v40  ;;  %v10979_v46 = vld [vmem:[#allocation3 + $0x1a0] ss:$8 sps:$4 sm:$0xff]   ;;  %v10981_v45 = vld [vmem:[#allocation3 + $0x1a4] ss:$8 sps:$4 sm:$0xff]   ;;  %v2917_v40 = vmul.bf16 %v14166_v35, %v13493_v52 }
 0x362   : > { %3685 = vst.msk [vmem:[#allocation3 + $0x2b8] sm:$0xff] %vm13133_vm5, %v3589_v34  ;;  %3245 = vst.msk [vmem:[#allocation3 + $0x290] sm:$0xff] %vm13133_vm5, %v3149_v41  ;;  %v3452_v61 = vpop.permute.xlu1 %3451  ;;  %v5541_v38 = vpop.permute.xlu0 %5540  ;;  %6868 = vmatprep.subr.bf16.mxu1 %v10981_v45  ;;  %v2914_v34 = vmul.bf16 %v14153_v0, %v13493_v52 }
 0x363   : > { %v3538_v49 = vrot.slane %v3452_v61, 4  ;;  %v5626_v12 = vrot.slane %v5541_v38, 4  ;;  %6869 = vmatpush2.bf16.msra.mxu1 %v10979_v46 }
 0x364   : > { %5546 = vrot.lane.b32.xlu1 %v5437_v1, %s11771_s22  ;;  %3469 = vrot.lane.b32.xlu0 %v3355_v26, %s11770_s19 }
 0x365   : > { %v3587_v48 = vsel %vm3577_vm1, %v3452_v61, %v3538_v49  ;;  %v5675_v3 = vsel %vm5664_vm2, %v5541_v38, %v5626_v12  ;;  %v10983_v16 = vld [vmem:[#allocation3 + $0x220] ss:$8 sps:$4 sm:$0xff]   ;;  %v10985_v28 = vld [vmem:[#allocation3 + $0x224] ss:$8 sps:$4 sm:$0xff]   ;;  %v5443_v12 = vmul.bf16 %v13480_v8, %v14166_v35 }
 0x366   : > { %3683 = vst.msk [vmem:[#allocation3 + $0x2a8] sm:$0xff] %vm13133_vm5, %v3587_v48  ;;  %5771 = vst.msk [vmem:[#allocation3 + $0x350] sm:$0xff] %vm13133_vm5, %v5675_v3  ;;  %v3017_v25 = vpop.permute.xlu1 %3016  ;;  %v3011_v18 = vpop.permute.xlu0 %3010  ;;  %6903 = vmatprep.subr.bf16.mxu0 %v10985_v28  ;;  %6871 = vmatmul.mubr.bf16.vlgmr.msra.gmra.mxu1 %v10986_v37 }
 0x367   : > { %v3101_v36 = vrot.slane %v3017_v25, 4  ;;  %v3098_v44 = vrot.slane %v3011_v18, 4  ;;  %6904 = vmatpush1.bf16.msra.mxu0 %v10983_v16  ;;  %6880 = vmatprep.mubr.bf16.mxu1 %v10335_v33  ;;  %v2915_v33 = vmul.bf16 %v14184_v20, %v13493_v52 }
 0x368   : > { %3844 = vrot.lane.b32.xlu1 %v13890_v17, %s11776_s6  ;;  %3465 = vrot.lane.b32.xlu0 %v3353_v24, %s11770_s19  ;;  %v3356_v17 = vmul.bf16 %v13463_v2, %v14166_v35 }
 0x369   : > { %v3150_v43 = vsel %vm3138_vm3, %v3017_v25, %v3101_v36  ;;  %v3147_v7 = vsel %vm3138_vm3, %v3011_v18, %v3098_v44  ;;  %v10989_v27 = vld [vmem:[#allocation3 + $0x2b0] ss:$8 sps:$4 sm:$0xff]   ;;  %v10991_v11 = vld [vmem:[#allocation3 + $0x2b4] ss:$8 sps:$4 sm:$0xff]  }
 0x36a   : > { %3246 = vst.msk [vmem:[#allocation3 + $0x298] sm:$0xff] %vm13133_vm5, %v3150_v43  ;;  %3243 = vst.msk [vmem:[#allocation3 + $0x280] sm:$0xff] %vm13133_vm5, %v3147_v7  ;;  %v5543_v63 = vpop.permute.xlu1 %5542  ;;  %v5537_v57 = vpop.permute.xlu0 %5536  ;;  %7151 = vmatprep.subr.bf16.mxu1 %v10991_v11  ;;  %10373 = vmatmul.mubr.msk.bf16.vlgmr.msra.gmra.mxu0 %vm6518_vm6, %v11003_v23  ;;  %v14241_v23 = vld [vmem:[#allocation2 + $0xb0] sm:$0xff] }
 0x36b   : > { %v5627_v15 = vrot.slane %v5543_v63, 4  ;;  %v5624_v4 = vrot.slane %v5537_v57, 4  ;;  %7152 = vmatpush1.bf16.msra.mxu1 %v10989_v27  ;;  %6931 = vmatprep.mubr.bf16.mxu0 %v16232_v53 }
 0x36c   : > { %3471 = vrot.lane.b32.xlu1 %v3356_v17, %s11770_s19  ;;  %3030 = vrot.lane.b32.xlu0 %v2916_v10, %s11772_s23  ;;  %v5441_v17 = vmul.bf16 %v13480_v8, %v14184_v20  ;;  %v3359_v10 = vmul.bf16 %v13463_v2, %v14241_v23 }
 0x36d   : > { %v5676_v29 = vsel %vm5664_vm2, %v5543_v63, %v5627_v15  ;;  %v5673_v59 = vsel %vm5664_vm2, %v5537_v57, %v5624_v4  ;;  %v10993_v5 = vld [vmem:[#allocation3 + $0x2a0] ss:$8 sps:$4 sm:$0xff]   ;;  %v10995_v50 = vld [vmem:[#allocation3 + $0x2a4] ss:$8 sps:$4 sm:$0xff]  }
 0x36e   : > { %5772 = vst.msk [vmem:[#allocation3 + $0x358] sm:$0xff] %vm13133_vm5, %v5676_v29  ;;  %5769 = vst.msk [vmem:[#allocation3 + $0x340] sm:$0xff] %vm13133_vm5, %v5673_v59  ;;  %v3013_v32 = vpop.permute.xlu1 %3012  ;;  %v2534_v42 = vpop.permute.xlu0 %2533  ;;  %7153 = vmatprep.subr.bf16.mxu1 %v10995_v50  ;;  %6881 = vmatmul.mubr.bf16.gmra.mxu1 %v10334_v47  ;;  %v11017_v29 = vld [vmem:[%s13629_s27 + $0x50] ss:$12 sps:$4 sm:$0xff]  }
 0x36f   : > { %v3099_v56 = vrot.slane %v3013_v32, 4  ;;  %v2619_v30 = vrot.slane %v2534_v42, 4  ;;  %7154 = vmatpush1.bf16.msra.mxu1 %v10993_v5  ;;  %7183 = vmatprep.mubr.bf16.mxu1 %v11094_v54 }
 0x370   : > { %3467 = vrot.lane.b32.xlu1 %v3354_v51, %s11770_s19  ;;  %5556 = vrot.lane.b32.xlu0 %v5442_v58, %s11771_s22 }
 0x371   : > { %v3148_v60 = vsel %vm3138_vm3, %v3013_v32, %v3099_v56  ;;  %v2668_v19 = vsel %vm2657_vm14, %v2534_v42, %v2619_v30  ;;  %v10997_v6 = vld [vmem:[#allocation3 + $0x290] ss:$8 sps:$4 sm:$0xff]   ;;  %v10999_v13 = vld [vmem:[#allocation3 + $0x294] ss:$8 sps:$4 sm:$0xff]   ;;  %v14268_v30 = vld [vmem:[#allocation2 + $0xa0] sm:$0xff] }
 0x372   : > { %3244 = vst.msk [vmem:[#allocation3 + $0x288] sm:$0xff] %vm13133_vm5, %v3148_v60  ;;  %2764 = vst.msk [vmem:[#allocation3 + $0x270] sm:$0xff] %vm13133_vm5, %v2668_v19  ;;  %v5539_v22 = vpop.permute.xlu1 %5538  ;;  %v3462_v9 = vpop.permute.xlu0 %3461  ;;  %7155 = vmatprep.subr.bf16.mxu1 %v10999_v13  ;;  %10374 = vmatmul.mubr.msk.bf16.gmra.mxu0 %vm6518_vm6, %v11010_v21  ;;  %v14262_v56 = vld [vmem:[#allocation2 + $0xb8] sm:$0xff] }
 0x373   : > { %v5625_v41 = vrot.slane %v5539_v22, 4  ;;  %v3543_v46 = vrot.slane %v3462_v9, 4  ;;  %7156 = vmatpush1.bf16.msra.mxu1 %v10997_v6  ;;  %7234 = vmatprep.mubr.bf16.mxu0 %v16232_v53 }
 0x374   : > { %3032 = vrot.lane.b32.xlu1 %v2917_v40, %s11772_s23  ;;  %3026 = vrot.lane.b32.xlu0 %v2914_v34, %s11772_s23 }
 0x375   : > { %v5674_v45 = vsel %vm5664_vm2, %v5539_v22, %v5625_v41  ;;  %v3592_v61 = vsel %vm3577_vm1, %v3462_v9, %v3543_v46  ;;  %v11000_v38 = vld [vmem:[#allocation3 + $0x350] ss:$8 sps:$4 sm:$0xff]   ;;  %v11002_v1 = vld [vmem:[#allocation3 + $0x354] ss:$8 sps:$4 sm:$0xff]   ;;  %v3360_v22 = vmul.bf16 %v13463_v2, %v14262_v56  ;;  %v3357_v9 = vmul.bf16 %v13463_v2, %v14268_v30  ;;  %v11116_v41 = vld [vmem:[%s13629_s27 + $0x68] ss:$0 sps:$4 sm:$0xff]  }
 0x376   : > { %5770 = vst.msk [vmem:[#allocation3 + $0x348] sm:$0xff] %vm13133_vm5, %v5674_v45  ;;  %3688 = vst.msk [vmem:[#allocation3 + $0x3d0] sm:$0xff] %vm13133_vm5, %v3592_v61  ;;  %v2536_v26 = vpop.permute.xlu1 %2535  ;;  %v2530_v49 = vpop.permute.xlu0 %2529  ;;  %7214 = vmatprep.subr.bf16.mxu0 %v11002_v1 }
 0x377   : > { %v2620_v37 = vrot.slane %v2536_v26, 4  ;;  %v2617_v48 = vrot.slane %v2530_v49, 4  ;;  %7215 = vmatpush1.bf16.msra.mxu0 %v11000_v38 }
 0x378   : > { %5558 = vrot.lane.b32.xlu1 %v5443_v12, %s11771_s22  ;;  %5552 = vrot.lane.b32.xlu0 %v5440_v14, %s11771_s22  ;;  %v11122_v12 = vld [vmem:[%s13629_s27 + $0x70] ss:$12 sps:$4 sm:$0xff]  }
 0x379   : > { %v2669_v3 = vsel %vm2657_vm14, %v2536_v26, %v2620_v37  ;;  %v2666_v16 = vsel %vm2657_vm14, %v2530_v49, %v2617_v48  ;;  %v11004_v28 = vld [vmem:[#allocation3 + $0x280] ss:$8 sps:$4 sm:$0xff]   ;;  %v11006_v25 = vld [vmem:[#allocation3 + $0x284] ss:$8 sps:$4 sm:$0xff]   ;;  %v2920_v49 = vmul.bf16 %v14241_v23, %v13493_v52 }
 0x37a   : > { %2765 = vst.msk [vmem:[#allocation3 + $0x278] sm:$0xff] %vm13133_vm5, %v2669_v3  ;;  %2762 = vst.msk [vmem:[#allocation3 + $0x260] sm:$0xff] %vm13133_vm5, %v2666_v16  ;;  %v3464_v18 = vpop.permute.xlu1 %3463  ;;  %v3458_v24 = vpop.permute.xlu0 %3457  ;;  %7157 = vmatprep.subr.bf16.mxu1 %v11006_v25  ;;  %v14294_v48 = vld [vmem:[#allocation2 + $0xa8] sm:$0xff]  ;;  %v11023_v3 = vld [vmem:[#allocation3 + $0x254] ss:$8 sps:$4 sm:$0xff]  }
 0x37b   : > { %v3544_v36 = vrot.slane %v3464_v18, 4  ;;  %v3541_v44 = vrot.slane %v3458_v24, 4  ;;  %7158 = vmatpush1.bf16.msra.mxu1 %v11004_v28 }
 0x37c   : > { %3028 = vrot.lane.b32.xlu1 %v2915_v33, %s11772_s23  ;;  %2549 = vrot.lane.b32.xlu0 %v14132_v31, %s11769_s17 }
 0x37d   : > { %v3593_v43 = vsel %vm3577_vm1, %v3464_v18, %v3544_v36  ;;  %v3590_v7 = vsel %vm3577_vm1, %v3458_v24, %v3541_v44  ;;  %v11007_v27 = vld [vmem:[#allocation3 + $0x340] ss:$8 sps:$4 sm:$0xff]   ;;  %v11009_v11 = vld [vmem:[#allocation3 + $0x344] ss:$8 sps:$4 sm:$0xff]   ;;  %v3358_v36 = vmul.bf16 %v13463_v2, %v14294_v48  ;;  %v2918_v44 = vmul.bf16 %v14268_v30, %v13493_v52 }
 0x37e   : > { %3689 = vst.msk [vmem:[#allocation3 + $0x3d8] sm:$0xff] %vm13133_vm5, %v3593_v43  ;;  %3686 = vst.msk [vmem:[#allocation3 + $0x3c0] sm:$0xff] %vm13133_vm5, %v3590_v7  ;;  %v2532_v63 = vpop.permute.xlu1 %2531  ;;  %v3023_v57 = vpop.permute.xlu0 %3022  ;;  %7216 = vmatprep.subr.bf16.mxu0 %v11009_v11  ;;  %v11021_v7 = vld [vmem:[#allocation3 + $0x250] ss:$8 sps:$4 sm:$0xff]   ;;  %v11029_v11 = vld [vmem:[#allocation3 + $0x244] ss:$8 sps:$4 sm:$0xff]  }
 0x37f   : > { %v2618_v15 = vrot.slane %v2532_v63, 4  ;;  %v3104_v4 = vrot.slane %v3023_v57, 4  ;;  %7217 = vmatpush1.bf16.msra.mxu0 %v11007_v27 }
 0x380   : > { %5554 = vrot.lane.b32.xlu1 %v5441_v17, %s11771_s22  ;;  %3477 = vrot.lane.b32.xlu0 %v3359_v10, %s11770_s19 }
 0x381   : > { %v2667_v59 = vsel %vm2657_vm14, %v2532_v63, %v2618_v15  ;;  %v3153_v5 = vsel %vm3138_vm3, %v3023_v57, %v3104_v4  ;;  %v11011_v50 = vld [vmem:[#allocation3 + $0x270] ss:$8 sps:$4 sm:$0xff]   ;;  %v11013_v32 = vld [vmem:[#allocation3 + $0x274] ss:$8 sps:$4 sm:$0xff]  }
 0x382   : > { %2763 = vst.msk [vmem:[#allocation3 + $0x268] sm:$0xff] %vm13133_vm5, %v2667_v59  ;;  %3249 = vst.msk [vmem:[#allocation3 + $0x3b0] sm:$0xff] %vm13133_vm5, %v3153_v5  ;;  %v3460_v42 = vpop.permute.xlu1 %3459  ;;  %v3019_v51 = vpop.permute.xlu0 %3018  ;;  %7159 = vmatprep.subr.bf16.mxu1 %v11013_v32  ;;  %10417 = vmatmul.mubr.msk.bf16.vlgmr.msra.gmra.mxu0 %vm6518_vm6, %v11017_v29  ;;  %v2921_v29 = vmul.bf16 %v14262_v56, %v13493_v52  ;;  %v11027_v5 = vld [vmem:[#allocation3 + $0x240] ss:$8 sps:$4 sm:$0xff]  }
 0x383   : > { %v3542_v58 = vrot.slane %v3460_v42, 4  ;;  %v3102_v47 = vrot.slane %v3019_v51, 4  ;;  %7160 = vmatpush1.bf16.msra.mxu1 %v11011_v50  ;;  %7244 = vmatprep.mubr.bf16.mxu0 %v16232_v53 }
 0x384   : > { %2551 = vrot.lane.b32.xlu1 %v14166_v35, %s11769_s17  ;;  %2545 = vrot.lane.b32.xlu0 %v14153_v0, %s11769_s17 }
 0x385   : > { %v3591_v54 = vsel %vm3577_vm1, %v3460_v42, %v3542_v58  ;;  %v3151_v21 = vsel %vm3138_vm3, %v3019_v51, %v3102_v47  ;;  %v11014_v60 = vld [vmem:[#allocation3 + $0x3d0] ss:$8 sps:$4 sm:$0xff]   ;;  %v11016_v19 = vld [vmem:[#allocation3 + $0x3d4] ss:$8 sps:$4 sm:$0xff]  }
 0x386   : > { %3687 = vst.msk [vmem:[#allocation3 + $0x3c8] sm:$0xff] %vm13133_vm5, %v3591_v54  ;;  %3247 = vst.msk [vmem:[#allocation3 + $0x3a0] sm:$0xff] %vm13133_vm5, %v3151_v21  ;;  %v3025_v6 = vpop.permute.xlu1 %3024  ;;  %v2542_v13 = vpop.permute.xlu0 %2541  ;;  %7464 = vmatprep.subr.bf16.mxu0 %v11016_v19  ;;  %v2919_v21 = vmul.bf16 %v14294_v48, %v13493_v52 }
 0x387   : > { %v3105_v40 = vrot.slane %v3025_v6, 4  ;;  %v2623_v34 = vrot.slane %v2542_v13, 4  ;;  %7465 = vmatpush1.bf16.msra.mxu0 %v11014_v60 }
 0x388   : > { %3479 = vrot.lane.b32.xlu1 %v3360_v22, %s11770_s19  ;;  %3473 = vrot.lane.b32.xlu0 %v3357_v9, %s11770_s19 }
 0x389   : > { %v3154_v46 = vsel %vm3138_vm3, %v3025_v6, %v3105_v40  ;;  %v2672_v45 = vsel %vm2657_vm14, %v2542_v13, %v2623_v34  ;;  %v11018_v61 = vld [vmem:[#allocation3 + $0x260] ss:$8 sps:$4 sm:$0xff]   ;;  %v11020_v38 = vld [vmem:[#allocation3 + $0x264] ss:$8 sps:$4 sm:$0xff]  }
 0x38a   : > { %3250 = vst.msk [vmem:[#allocation3 + $0x3b8] sm:$0xff] %vm13133_vm5, %v3154_v46  ;;  %2768 = vst.msk [vmem:[#allocation3 + $0x390] sm:$0xff] %vm13133_vm5, %v2672_v45  ;;  %v3021_v1 = vpop.permute.xlu1 %3020  ;;  %v5102_v26 = vpop.permute.xlu0 %5101  ;;  %7161 = vmatprep.subr.bf16.mxu1 %v11020_v38  ;;  %10418 = vmatmul.mubr.msk.bf16.gmra.mxu0 %vm6518_vm6, %v11116_v41 }
 0x38b   : > { %v3103_v14 = vrot.slane %v3021_v1, 4  ;;  %v5187_v37 = vrot.slane %v5102_v26, 4  ;;  %7162 = vmatpush1.bf16.msra.mxu1 %v11018_v61  ;;  %7496 = vmatprep.mubr.bf16.mxu0 %v11122_v12 }
 0x38c   : > { %2547 = vrot.lane.b32.xlu1 %v14184_v20, %s11769_s17  ;;  %3038 = vrot.lane.b32.xlu0 %v2920_v49, %s11772_s23 }
 0x38d   : > { %v3152_v16 = vsel %vm3138_vm3, %v3021_v1, %v3103_v14  ;;  %v5236_v28 = vsel %vm5225_vm4, %v5102_v26, %v5187_v37  ;;  %v11024_v25 = vld [vmem:[#allocation3 + $0x3c0] ss:$8 sps:$4 sm:$0xff]   ;;  %v11026_v18 = vld [vmem:[#allocation3 + $0x3c4] ss:$8 sps:$4 sm:$0xff]   ;;  %7163 = vmatprep.subr.bf16.mxu1 %v11023_v3 }
 0x38e   : > { %3248 = vst.msk [vmem:[#allocation3 + $0x3a8] sm:$0xff] %vm13133_vm5, %v3152_v16  ;;  %5332 = vst.msk [vmem:[#allocation3 + $0x330] sm:$0xff] %vm13133_vm5, %v5236_v28  ;;  %v2544_v24 = vpop.permute.xlu1 %2543  ;;  %v2538_v33 = vpop.permute.xlu0 %2537  ;;  %7466 = vmatprep.subr.bf16.mxu0 %v11026_v18 }
 0x38f   : > { %v2624_v43 = vrot.slane %v2544_v24, 4  ;;  %v2621_v27 = vrot.slane %v2538_v33, 4  ;;  %7164 = vmatpush1.bf16.msra.mxu1 %v11021_v7  ;;  %7467 = vmatpush1.bf16.msra.mxu0 %v11024_v25 }
 0x390   : > { %3475 = vrot.lane.b32.xlu1 %v3358_v36, %s11770_s19  ;;  %3034 = vrot.lane.b32.xlu0 %v2918_v44, %s11772_s23  ;;  %v11047_v44 = vld [vmem:[#allocation3 + $0x374] ss:$8 sps:$4 sm:$0xff]  }
 0x391   : > { %v2673_v63 = vsel %vm2657_vm14, %v2544_v24, %v2624_v43  ;;  %v2670_v57 = vsel %vm2657_vm14, %v2538_v33, %v2621_v27  ;;  %v11030_v17 = vld [vmem:[#allocation3 + $0x3b0] ss:$8 sps:$4 sm:$0xff]   ;;  %v11032_v10 = vld [vmem:[#allocation3 + $0x3b4] ss:$8 sps:$4 sm:$0xff]   ;;  %7165 = vmatprep.subr.bf16.mxu1 %v11029_v11  ;;  %v4618_v24 = vmul.bf16 %v13649_v39, %v14132_v31 }
 0x392   : > { %2769 = vst.msk [vmem:[#allocation3 + $0x398] sm:$0xff] %vm13133_vm5, %v2673_v63  ;;  %2766 = vst.msk [vmem:[#allocation3 + $0x380] sm:$0xff] %vm13133_vm5, %v2670_v57  ;;  %v5104_v15 = vpop.permute.xlu1 %5103  ;;  %v5098_v4 = vpop.permute.xlu0 %5097  ;;  %7468 = vmatprep.subr.bf16.mxu0 %v11032_v10 }
 0x393   : > { %v5188_v59 = vrot.slane %v5104_v15, 4  ;;  %v5185_v50 = vrot.slane %v5098_v4, 4  ;;  %7166 = vmatpush1.bf16.msra.mxu1 %v11027_v5  ;;  %7469 = vmatpush1.bf16.msra.mxu0 %v11030_v17  ;;  %v4616_v17 = vmul.bf16 %v13649_v39, %v14153_v0 }
 0x394   : > { %3040 = vrot.lane.b32.xlu1 %v2921_v29, %s11772_s23  ;;  %2557 = vrot.lane.b32.xlu0 %v14241_v23, %s11769_s17  ;;  %v11053_v29 = vld [vmem:[#allocation3 + $0x364] ss:$8 sps:$4 sm:$0xff]  }
 0x395   : > { %v5237_v32 = vsel %vm5225_vm4, %v5104_v15, %v5188_v59  ;;  %v5234_v42 = vsel %vm5225_vm4, %v5098_v4, %v5185_v50  ;;  %v11033_v51 = vld [vmem:[#allocation3 + $0x3a0] ss:$8 sps:$4 sm:$0xff]   ;;  %v11035_v58 = vld [vmem:[#allocation3 + $0x3a4] ss:$8 sps:$4 sm:$0xff]   ;;  %v11045_v15 = vld [vmem:[#allocation3 + $0x370] ss:$8 sps:$4 sm:$0xff]  }
 0x396   : > { %5333 = vst.msk [vmem:[#allocation3 + $0x338] sm:$0xff] %vm13133_vm5, %v5237_v32  ;;  %5330 = vst.msk [vmem:[#allocation3 + $0x320] sm:$0xff] %vm13133_vm5, %v5234_v42  ;;  %v2540_v47 = vpop.permute.xlu1 %2539  ;;  %v4717_v54 = vpop.permute.xlu0 %4716  ;;  %7470 = vmatprep.subr.bf16.mxu0 %v11035_v58  ;;  %v4619_v58 = vmul.bf16 %v13649_v39, %v14166_v35 }
 0x397   : > { %v2622_v60 = vrot.slane %v2540_v47, 4  ;;  %v4802_v19 = vrot.slane %v4717_v54, 4  ;;  %7471 = vmatpush1.bf16.msra.mxu0 %v11033_v51 }
 0x398   : > { %3036 = vrot.lane.b32.xlu1 %v2919_v21, %s11772_s23  ;;  %5117 = vrot.lane.b32.xlu0 %v14132_v31, %s11773_s28  ;;  %v11051_v21 = vld [vmem:[#allocation3 + $0x360] ss:$8 sps:$4 sm:$0xff]  }
 0x399   : > { %v2671_v6 = vsel %vm2657_vm14, %v2540_v47, %v2622_v60  ;;  %v4851_v13 = vsel %vm4840_vm7, %v4717_v54, %v4802_v19  ;;  %v11036_v22 = vld [vmem:[#allocation3 + $0x390] ss:$8 sps:$4 sm:$0xff]   ;;  %v11038_v9 = vld [vmem:[#allocation3 + $0x394] ss:$8 sps:$4 sm:$0xff]   ;;  %v4179_v47 = vmul.bf16 %v13679_v62, %v14132_v31 }
 0x39a   : > { %2767 = vst.msk [vmem:[#allocation3 + $0x388] sm:$0xff] %vm13133_vm5, %v2671_v6  ;;  %4947 = vst.msk [vmem:[#allocation3 + $0x310] sm:$0xff] %vm13133_vm5, %v4851_v13  ;;  %v5100_v40 = vpop.permute.xlu1 %5099  ;;  %v4713_v34 = vpop.permute.xlu0 %4712  ;;  %7472 = vmatprep.subr.bf16.mxu0 %v11038_v9 }
 0x39b   : > { %v5186_v41 = vrot.slane %v5100_v40, 4  ;;  %v4800_v46 = vrot.slane %v4713_v34, 4  ;;  %7473 = vmatpush1.bf16.msra.mxu0 %v11036_v22 }
 0x39c   : > { %2559 = vrot.lane.b32.xlu1 %v14262_v56, %s11769_s17  ;;  %2553 = vrot.lane.b32.xlu0 %v14268_v30, %s11769_s17 }
 0x39d   : > { %v5235_v45 = vsel %vm5225_vm4, %v5100_v40, %v5186_v41  ;;  %v4849_v61 = vsel %vm4840_vm7, %v4713_v34, %v4800_v46  ;;  %v11039_v38 = vld [vmem:[#allocation3 + $0x330] ss:$8 sps:$4 sm:$0xff]   ;;  %v11041_v1 = vld [vmem:[#allocation3 + $0x334] ss:$8 sps:$4 sm:$0xff]   ;;  %v4617_v34 = vmul.bf16 %v13649_v39, %v14184_v20 }
 0x39e   : > { %5331 = vst.msk [vmem:[#allocation3 + $0x328] sm:$0xff] %vm13133_vm5, %v5235_v45  ;;  %4945 = vst.msk [vmem:[#allocation3 + $0x300] sm:$0xff] %vm13133_vm5, %v4849_v61  ;;  %v4719_v26 = vpop.permute.xlu1 %4718  ;;  %v4278_v49 = vpop.permute.xlu0 %4277  ;;  %7167 = vmatprep.subr.bf16.mxu1 %v11041_v1 }
 0x39f   : > { %v4803_v12 = vrot.slane %v4719_v26, 4  ;;  %v4363_v14 = vrot.slane %v4278_v49, 4  ;;  %7168 = vmatpush2.bf16.msra.mxu1 %v11039_v38 }
 0x3a0   : > { %5119 = vrot.lane.b32.xlu1 %v14166_v35, %s11773_s28  ;;  %5113 = vrot.lane.b32.xlu0 %v14153_v0, %s11773_s28 }
 0x3a1   : > { %v4852_v37 = vsel %vm4840_vm7, %v4719_v26, %v4803_v12  ;;  %v4412_v3 = vsel %vm4401_vm8, %v4278_v49, %v4363_v14  ;;  %v11042_v16 = vld [vmem:[#allocation3 + $0x380] ss:$8 sps:$4 sm:$0xff]   ;;  %v11044_v28 = vld [vmem:[#allocation3 + $0x384] ss:$8 sps:$4 sm:$0xff]   ;;  %v4180_v12 = vmul.bf16 %v13679_v62, %v14166_v35  ;;  %v4177_v14 = vmul.bf16 %v13679_v62, %v14153_v0 }
 0x3a2   : > { %4948 = vst.msk [vmem:[#allocation3 + $0x318] sm:$0xff] %vm13133_vm5, %v4852_v37  ;;  %4508 = vst.msk [vmem:[#allocation3 + $0x2f0] sm:$0xff] %vm13133_vm5, %v4412_v3  ;;  %v4715_v25 = vpop.permute.xlu1 %4714  ;;  %v5110_v18 = vpop.permute.xlu0 %5109  ;;  %7474 = vmatprep.subr.bf16.mxu0 %v11044_v28 }
 0x3a3   : > { %v4801_v33 = vrot.slane %v4715_v25, 4  ;;  %v5191_v36 = vrot.slane %v5110_v18, 4  ;;  %7475 = vmatpush1.bf16.msra.mxu0 %v11042_v16 }
 0x3a4   : > { %2555 = vrot.lane.b32.xlu1 %v14294_v48, %s11769_s17  ;;  %4732 = vrot.lane.b32.xlu0 %v4618_v24, %s11774_s29 }
 0x3a5   : > { %v4850_v43 = vsel %vm4840_vm7, %v4715_v25, %v4801_v33  ;;  %v5240_v7 = vsel %vm5225_vm4, %v5110_v18, %v5191_v36  ;;  %v11048_v27 = vld [vmem:[#allocation3 + $0x320] ss:$8 sps:$4 sm:$0xff]   ;;  %v11050_v11 = vld [vmem:[#allocation3 + $0x324] ss:$8 sps:$4 sm:$0xff]   ;;  %7476 = vmatprep.subr.bf16.mxu0 %v11047_v44 }
 0x3a6   : > { %4946 = vst.msk [vmem:[#allocation3 + $0x308] sm:$0xff] %vm13133_vm5, %v4850_v43  ;;  %5336 = vst.msk [vmem:[#allocation3 + $0x450] sm:$0xff] %vm13133_vm5, %v5240_v7  ;;  %v4280_v63 = vpop.permute.xlu1 %4279  ;;  %v4274_v57 = vpop.permute.xlu0 %4273  ;;  %7169 = vmatprep.subr.bf16.mxu1 %v11050_v11 }
 0x3a7   : > { %v4364_v10 = vrot.slane %v4280_v63, 4  ;;  %v4361_v4 = vrot.slane %v4274_v57, 4  ;;  %7170 = vmatpush2.bf16.msra.mxu1 %v11048_v27  ;;  %7477 = vmatpush1.bf16.msra.mxu0 %v11045_v15 }
 0x3a8   : > { %5115 = vrot.lane.b32.xlu1 %v14184_v20, %s11773_s28  ;;  %4728 = vrot.lane.b32.xlu0 %v4616_v17, %s11774_s29  ;;  %v4178_v17 = vmul.bf16 %v13679_v62, %v14184_v20 }
 0x3a9   : > { %v4413_v59 = vsel %vm4401_vm8, %v4280_v63, %v4364_v10  ;;  %v4410_v5 = vsel %vm4401_vm8, %v4274_v57, %v4361_v4  ;;  %v11054_v50 = vld [vmem:[#allocation3 + $0x310] ss:$8 sps:$4 sm:$0xff]   ;;  %v11056_v32 = vld [vmem:[#allocation3 + $0x314] ss:$8 sps:$4 sm:$0xff]   ;;  %7478 = vmatprep.subr.bf16.mxu0 %v11053_v29 }
 0x3aa   : > { %4509 = vst.msk [vmem:[#allocation3 + $0x2f8] sm:$0xff] %vm13133_vm5, %v4413_v59  ;;  %4506 = vst.msk [vmem:[#allocation3 + $0x2e0] sm:$0xff] %vm13133_vm5, %v4410_v5  ;;  %v5112_v42 = vpop.permute.xlu1 %5111  ;;  %v5106_v51 = vpop.permute.xlu0 %5105  ;;  %7171 = vmatprep.subr.bf16.mxu1 %v11056_v32 }
 0x3ab   : > { %v5192_v54 = vrot.slane %v5112_v42, 4  ;;  %v5189_v60 = vrot.slane %v5106_v51, 4  ;;  %7172 = vmatpush2.bf16.msra.mxu1 %v11054_v50  ;;  %7479 = vmatpush1.bf16.msra.mxu0 %v11051_v21 }
 0x3ac   : > { %4734 = vrot.lane.b32.xlu1 %v4619_v58, %s11774_s29  ;;  %4293 = vrot.lane.b32.xlu0 %v4179_v47, %s11775_s30 }
 0x3ad   : > { %v5241_v19 = vsel %vm5225_vm4, %v5112_v42, %v5192_v54  ;;  %v5238_v6 = vsel %vm5225_vm4, %v5106_v51, %v5189_v60  ;;  %v11057_v13 = vld [vmem:[#allocation3 + $0x300] ss:$8 sps:$4 sm:$0xff]   ;;  %v11059_v22 = vld [vmem:[#allocation3 + $0x304] ss:$8 sps:$4 sm:$0xff]   ;;  %v4622_v42 = vmul.bf16 %v13649_v39, %v14241_v23 }
 0x3ae   : > { %5337 = vst.msk [vmem:[#allocation3 + $0x458] sm:$0xff] %vm13133_vm5, %v5241_v19  ;;  %5334 = vst.msk [vmem:[#allocation3 + $0x440] sm:$0xff] %vm13133_vm5, %v5238_v6  ;;  %v4276_v9 = vpop.permute.xlu1 %4275  ;;  %v3839_v40 = vpop.permute.xlu0 %3838  ;;  %7173 = vmatprep.subr.bf16.mxu1 %v11059_v22 }
 0x3af   : > { %v4362_v41 = vrot.slane %v4276_v9, 4  ;;  %v3924_v46 = vrot.slane %v3839_v40, 4  ;;  %7174 = vmatpush2.bf16.msra.mxu1 %v11057_v13 }
 0x3b0   : > { %4730 = vrot.lane.b32.xlu1 %v4617_v34, %s11774_s29  ;;  %5125 = vrot.lane.b32.xlu0 %v14241_v23, %s11773_s28 }
 0x3b1   : > { %v4411_v45 = vsel %vm4401_vm8, %v4276_v9, %v4362_v41  ;;  %v3973_v61 = vsel %vm3962_vm9, %v3839_v40, %v3924_v46  ;;  %v11060_v38 = vld [vmem:[#allocation3 + $0x2f0] ss:$8 sps:$4 sm:$0xff]   ;;  %v11062_v1 = vld [vmem:[#allocation3 + $0x2f4] ss:$8 sps:$4 sm:$0xff]  }
 0x3b2   : > { %4507 = vst.msk [vmem:[#allocation3 + $0x2e8] sm:$0xff] %vm13133_vm5, %v4411_v45  ;;  %4069 = vst.msk [vmem:[#allocation3 + $0x2d0] sm:$0xff] %vm13133_vm5, %v3973_v61  ;;  %v5108_v26 = vpop.permute.xlu1 %5107  ;;  %v4725_v49 = vpop.permute.xlu0 %4724  ;;  %7175 = vmatprep.subr.bf16.mxu1 %v11062_v1 }
 0x3b3   : > { %v5190_v37 = vrot.slane %v5108_v26, 4  ;;  %v4806_v3 = vrot.slane %v4725_v49, 4  ;;  %7176 = vmatpush2.bf16.msra.mxu1 %v11060_v38 }
 0x3b4   : > { %4295 = vrot.lane.b32.xlu1 %v4180_v12, %s11775_s30  ;;  %4289 = vrot.lane.b32.xlu0 %v4177_v14, %s11775_s30 }
 0x3b5   : > { %v5239_v16 = vsel %vm5225_vm4, %v5108_v26, %v5190_v37  ;;  %v4855_v28 = vsel %vm4840_vm7, %v4725_v49, %v4806_v3  ;;  %v11063_v25 = vld [vmem:[#allocation3 + $0x450] ss:$8 sps:$4 sm:$0xff]   ;;  %v11065_v18 = vld [vmem:[#allocation3 + $0x454] ss:$8 sps:$4 sm:$0xff]   ;;  %v4183_v37 = vmul.bf16 %v13679_v62, %v14241_v23 }
 0x3b6   : > { %5335 = vst.msk [vmem:[#allocation3 + $0x448] sm:$0xff] %vm13133_vm5, %v5239_v16  ;;  %4951 = vst.msk [vmem:[#allocation3 + $0x430] sm:$0xff] %vm13133_vm5, %v4855_v28  ;;  %v3841_v24 = vpop.permute.xlu1 %3840  ;;  %v3835_v33 = vpop.permute.xlu0 %3834  ;;  %7480 = vmatprep.subr.bf16.mxu0 %v11065_v18  ;;  %v5825_v28 = vld [vmem:[%s13629_s27 + $0x60] sm:$0xff] }
 0x3b7   : > { %v3925_v36 = vrot.slane %v3841_v24, 4  ;;  %v3922_v44 = vrot.slane %v3835_v33, 4  ;;  %7481 = vmatpush2.bf16.msra.mxu0 %v11063_v25  ;;  %v11092_v25 = vld [vmem:[%s13629_s27 + $0x48] ss:$12 sps:$4 sm:$0xff]  }
 0x3b8   : > { %5127 = vrot.lane.b32.xlu1 %v14262_v56, %s11773_s28  ;;  %5121 = vrot.lane.b32.xlu0 %v14268_v30, %s11773_s28 }
 0x3b9   : > { %v3974_v43 = vsel %vm3962_vm9, %v3841_v24, %v3925_v36  ;;  %v3971_v7 = vsel %vm3962_vm9, %v3835_v33, %v3922_v44  ;;  %v11066_v27 = vld [vmem:[#allocation3 + $0x2e0] ss:$8 sps:$4 sm:$0xff]   ;;  %v11068_v11 = vld [vmem:[#allocation3 + $0x2e4] ss:$8 sps:$4 sm:$0xff]  }
 0x3ba   : > { %4070 = vst.msk [vmem:[#allocation3 + $0x2d8] sm:$0xff] %vm13133_vm5, %v3974_v43  ;;  %4067 = vst.msk [vmem:[#allocation3 + $0x2c0] sm:$0xff] %vm13133_vm5, %v3971_v7  ;;  %v4727_v63 = vpop.permute.xlu1 %4726  ;;  %v4721_v57 = vpop.permute.xlu0 %4720  ;;  %7177 = vmatprep.subr.bf16.mxu1 %v11068_v11  ;;  %v4181_v7 = vmul.bf16 %v13679_v62, %v14268_v30 }
 0x3bb   : > { %v4807_v10 = vrot.slane %v4727_v63, 4  ;;  %v4804_v15 = vrot.slane %v4721_v57, 4  ;;  %7178 = vmatpush2.bf16.msra.mxu1 %v11066_v27  ;;  %v10379_v27 = vcombine.high %v5825_v28, %v5825_v28 }
 0x3bc   : > { %4291 = vrot.lane.b32.xlu1 %v4178_v17, %s11775_s30  ;;  %3854 = vrot.lane.b32.xlu0 %v14132_v31, %s11776_s6 }
 0x3bd   : > { %v4856_v4 = vsel %vm4840_vm7, %v4727_v63, %v4807_v10  ;;  %v4853_v29 = vsel %vm4840_vm7, %v4721_v57, %v4804_v15  ;;  %v11069_v59 = vld [vmem:[#allocation3 + $0x440] ss:$8 sps:$4 sm:$0xff]   ;;  %v11071_v5 = vld [vmem:[#allocation3 + $0x444] ss:$8 sps:$4 sm:$0xff]  }
 0x3be   : > { %4952 = vst.msk [vmem:[#allocation3 + $0x438] sm:$0xff] %vm13133_vm5, %v4856_v4  ;;  %4949 = vst.msk [vmem:[#allocation3 + $0x420] sm:$0xff] %vm13133_vm5, %v4853_v29  ;;  %v3837_v50 = vpop.permute.xlu1 %3836  ;;  %v4286_v32 = vpop.permute.xlu0 %4285  ;;  %7482 = vmatprep.subr.bf16.mxu0 %v11071_v5  ;;  %v5446_v5 = vmul.bf16 %v13480_v8, %v14241_v23 }
 0x3bf   : > { %v3923_v51 = vrot.slane %v3837_v50, 4  ;;  %v4367_v31 = vrot.slane %v4286_v32, 4  ;;  %7483 = vmatpush2.bf16.msra.mxu0 %v11069_v59  ;;  %v4184_v59 = vmul.bf16 %v13679_v62, %v14262_v56 }
 0x3c0   : > { %5123 = vrot.lane.b32.xlu1 %v14294_v48, %s11773_s28  ;;  %4740 = vrot.lane.b32.xlu0 %v4622_v42, %s11774_s29 }
 0x3c1   : > { %v3972_v58 = vsel %vm3962_vm9, %v3837_v50, %v3923_v51  ;;  %v4416_v47 = vsel %vm4401_vm8, %v4286_v32, %v4367_v31  ;;  %v11072_v54 = vld [vmem:[#allocation3 + $0x2d0] ss:$8 sps:$4 sm:$0xff]   ;;  %v11074_v21 = vld [vmem:[#allocation3 + $0x2d4] ss:$8 sps:$4 sm:$0xff]  }
 0x3c2   : > { %4068 = vst.msk [vmem:[#allocation3 + $0x2c8] sm:$0xff] %vm13133_vm5, %v3972_v58  ;;  %4512 = vst.msk [vmem:[#allocation3 + $0x410] sm:$0xff] %vm13133_vm5, %v4416_v47  ;;  %v4723_v60 = vpop.permute.xlu1 %4722  ;;  %v4282_v19 = vpop.permute.xlu0 %4281  ;;  %7179 = vmatprep.subr.bf16.mxu1 %v11074_v21  ;;  %v10378_v47 = vcombine.low %v5825_v28, %v5825_v28 }
 0x3c3   : > { %v4805_v6 = vrot.slane %v4723_v60, 4  ;;  %v4365_v13 = vrot.slane %v4282_v19, 4  ;;  %7180 = vmatpush2.bf16.msra.mxu1 %v11072_v54 }
 0x3c4   : > { %3856 = vrot.lane.b32.xlu1 %v14166_v35, %s11776_s6  ;;  %3850 = vrot.lane.b32.xlu0 %v14153_v0, %s11776_s6  ;;  %v4623_v35 = vmul.bf16 %v13649_v39, %v14262_v56  ;;  %v4620_v0 = vmul.bf16 %v13649_v39, %v14268_v30 }
 0x3c5   : > { %v4854_v22 = vsel %vm4840_vm7, %v4723_v60, %v4805_v6  ;;  %v4414_v9 = vsel %vm4401_vm8, %v4282_v19, %v4365_v13  ;;  %v11075_v40 = vld [vmem:[#allocation3 + $0x430] ss:$8 sps:$4 sm:$0xff]   ;;  %v11077_v34 = vld [vmem:[#allocation3 + $0x434] ss:$8 sps:$4 sm:$0xff]   ;;  %v4182_v60 = vmul.bf16 %v13679_v62, %v14294_v48 }
 0x3c6   : > { %4950 = vst.msk [vmem:[#allocation3 + $0x428] sm:$0xff] %vm13133_vm5, %v4854_v22  ;;  %4510 = vst.msk [vmem:[#allocation3 + $0x400] sm:$0xff] %vm13133_vm5, %v4414_v9  ;;  %v4288_v41 = vpop.permute.xlu1 %4287  ;;  %v5549_v46 = vpop.permute.xlu0 %5548  ;;  %7484 = vmatprep.subr.bf16.mxu0 %v11077_v34 }
 0x3c7   : > { %v4368_v45 = vrot.slane %v4288_v41, 4  ;;  %v5630_v61 = vrot.slane %v5549_v46, 4  ;;  %7485 = vmatpush2.bf16.msra.mxu0 %v11075_v40 }
 0x3c8   : > { %4742 = vrot.lane.b32.xlu1 %v4623_v35, %s11774_s29  ;;  %4736 = vrot.lane.b32.xlu0 %v4620_v0, %s11774_s29 }
 0x3c9   : > { %v4417_v38 = vsel %vm4401_vm8, %v4288_v41, %v4368_v45  ;;  %v5679_v1 = vsel %vm5664_vm2, %v5549_v46, %v5630_v61  ;;  %v11078_v26 = vld [vmem:[#allocation3 + $0x2c0] ss:$8 sps:$4 sm:$0xff]   ;;  %v11080_v49 = vld [vmem:[#allocation3 + $0x2c4] ss:$8 sps:$4 sm:$0xff]   ;;  %v5447_v46 = vmul.bf16 %v13480_v8, %v14262_v56 }
 0x3ca   : > { %4513 = vst.msk [vmem:[#allocation3 + $0x418] sm:$0xff] %vm13133_vm5, %v4417_v38  ;;  %5775 = vst.msk [vmem:[#allocation3 + $0x470] sm:$0xff] %vm13133_vm5, %v5679_v1  ;;  %v4284_v12 = vpop.permute.xlu1 %4283  ;;  %v3847_v14 = vpop.permute.xlu0 %3846  ;;  %7181 = vmatprep.subr.bf16.mxu1 %v11080_v49 }
 0x3cb   : > { %v4366_v3 = vrot.slane %v4284_v12, 4  ;;  %v3928_v16 = vrot.slane %v3847_v14, 4  ;;  %7182 = vmatpush2.bf16.msra.mxu1 %v11078_v26 }
 0x3cc   : > { %3852 = vrot.lane.b32.xlu1 %v14184_v20, %s11776_s6  ;;  %4301 = vrot.lane.b32.xlu0 %v4183_v37, %s11775_s30  ;;  %v4621_v20 = vmul.bf16 %v13649_v39, %v14294_v48  ;;  %v14532_v37 = vld [vmem:[#allocation2 + $0xd0] sm:$0xff] }
 0x3cd   : > { %v4415_v18 = vsel %vm4401_vm8, %v4284_v12, %v4366_v3  ;;  %v3977_v24 = vsel %vm3962_vm9, %v3847_v14, %v3928_v16  ;;  %v11081_v33 = vld [vmem:[#allocation3 + $0x420] ss:$8 sps:$4 sm:$0xff]   ;;  %v11083_v36 = vld [vmem:[#allocation3 + $0x424] ss:$8 sps:$4 sm:$0xff]  }
 0x3ce   : > { %4511 = vst.msk [vmem:[#allocation3 + $0x408] sm:$0xff] %vm13133_vm5, %v4415_v18  ;;  %4073 = vst.msk [vmem:[#allocation3 + $0x3f0] sm:$0xff] %vm13133_vm5, %v3977_v24  ;;  %v5551_v44 = vpop.permute.xlu1 %5550  ;;  %v5545_v43 = vpop.permute.xlu0 %5544  ;;  %7486 = vmatprep.subr.bf16.mxu0 %v11083_v36  ;;  %7184 = vmatmul.mubr.bf16.vlgmr.msra.gmra.mxu1 %v11092_v25 }
 0x3cf   : > { %v5631_v11 = vrot.slane %v5551_v44, 4  ;;  %v5628_v63 = vrot.slane %v5545_v43, 4  ;;  %7487 = vmatpush2.bf16.msra.mxu0 %v11081_v33  ;;  %7193 = vmatprep.mubr.bf16.mxu1 %v10379_v27 }
 0x3d0   : > { %4738 = vrot.lane.b32.xlu1 %v4621_v20, %s11774_s29  ;;  %4297 = vrot.lane.b32.xlu0 %v4181_v7, %s11775_s30 }
 0x3d1   : > { %v5680_v57 = vsel %vm5664_vm2, %v5551_v44, %v5631_v11  ;;  %v5677_v17 = vsel %vm5664_vm2, %v5545_v43, %v5628_v63  ;;  %v11085_v10 = vld [vmem:[#allocation3 + $0x410] ss:$8 sps:$4 sm:$0xff]   ;;  %v11087_v15 = vld [vmem:[#allocation3 + $0x414] ss:$8 sps:$4 sm:$0xff]   ;;  %v14548_v44 = vld [vmem:[#allocation2 + $0xc0] sm:$0xff] }
 0x3d2   : > { %5776 = vst.msk [vmem:[#allocation3 + $0x478] sm:$0xff] %vm13133_vm5, %v5680_v57  ;;  %5773 = vst.msk [vmem:[#allocation3 + $0x460] sm:$0xff] %vm13133_vm5, %v5677_v17  ;;  %v3849_v4 = vpop.permute.xlu1 %3848  ;;  %v3843_v29 = vpop.permute.xlu0 %3842  ;;  %7488 = vmatprep.subr.bf16.mxu0 %v11087_v15  ;;  %v11112_v43 = vld [vmem:[%s13629_s27 + $0x74] ss:$12 sps:$4 sm:$0xff]   ;;  %v3361_v17 = vmul.bf16 %v13463_v2, %v14548_v44 }
 0x3d3   : > { %v3929_v50 = vrot.slane %v3849_v4, 4  ;;  %v3926_v32 = vrot.slane %v3843_v29, 4  ;;  %7489 = vmatpush2.bf16.msra.mxu0 %v11085_v10 }
 0x3d4   : > { %4303 = vrot.lane.b32.xlu1 %v4184_v59, %s11775_s30  ;;  %5564 = vrot.lane.b32.xlu0 %v5446_v5, %s11771_s22  ;;  %v11120_v59 = vld [vmem:[%s13629_s27 + $0x6c] ss:$12 sps:$4 sm:$0xff]  }
 0x3d5   : > { %v3978_v42 = vsel %vm3962_vm9, %v3849_v4, %v3929_v50  ;;  %v3975_v51 = vsel %vm3962_vm9, %v3843_v29, %v3926_v32  ;;  %v11089_v31 = vld [vmem:[#allocation3 + $0x400] ss:$8 sps:$4 sm:$0xff]   ;;  %v11091_v58 = vld [vmem:[#allocation3 + $0x404] ss:$8 sps:$4 sm:$0xff]   ;;  %v14561_v4 = vld [vmem:[#allocation2 + $0xd8] sm:$0xff] }
 0x3d6   : > { %4074 = vst.msk [vmem:[#allocation3 + $0x3f8] sm:$0xff] %vm13133_vm5, %v3978_v42  ;;  %4071 = vst.msk [vmem:[#allocation3 + $0x3e0] sm:$0xff] %vm13133_vm5, %v3975_v51  ;;  %v5547_v54 = vpop.permute.xlu1 %5546  ;;  %v3470_v21 = vpop.permute.xlu0 %3469  ;;  %7490 = vmatprep.subr.bf16.mxu0 %v11091_v58  ;;  %7194 = vmatmul.mubr.bf16.gmra.mxu1 %v10378_v47  ;;  %v14564_v29 = vld [vmem:[%s13629_s27 + $0x84] sm:$0xff]  ;;  %v2924_v58 = vmul.bf16 %v14532_v37, %v13493_v52 }
 0x3d7   : > { %v5629_v19 = vrot.slane %v5547_v54, 4  ;;  %v3547_v6 = vrot.slane %v3470_v21, 4  ;;  %7491 = vmatpush2.bf16.msra.mxu0 %v11089_v31  ;;  %7547 = vmatprep.mubr.bf16.mxu1 %v16232_v53  ;;  %v3364_v31 = vmul.bf16 %v13463_v2, %v14561_v4  ;;  %v10423_v47 = vcombine.high %v14564_v29, %v14564_v29 }
 0x3d8   : > { %4299 = vrot.lane.b32.xlu1 %v4182_v60, %s11775_s30  ;;  %3862 = vrot.lane.b32.xlu0 %v14241_v23, %s11776_s6  ;;  %v5444_v23 = vmul.bf16 %v13480_v8, %v14268_v30  ;;  %v14584_v60 = vld [vmem:[#allocation2 + $0xc8] sm:$0xff] }
 0x3d9   : > { %v5678_v13 = vsel %vm5664_vm2, %v5547_v54, %v5629_v19  ;;  %v3596_v22 = vsel %vm3577_vm1, %v3470_v21, %v3547_v6  ;;  %v11095_v9 = vld [vmem:[#allocation3 + $0x470] ss:$8 sps:$4 sm:$0xff]   ;;  %v11097_v40 = vld [vmem:[#allocation3 + $0x474] ss:$8 sps:$4 sm:$0xff]  }
 0x3da   : > { %5774 = vst.msk [vmem:[#allocation3 + $0x468] sm:$0xff] %vm13133_vm5, %v5678_v13  ;;  %3692 = vst.msk [vmem:[#allocation3 + $0x4f0] sm:$0xff] %vm13133_vm5, %v3596_v22  ;;  %v3845_v34 = vpop.permute.xlu1 %3844  ;;  %v3466_v41 = vpop.permute.xlu0 %3465  ;;  %7527 = vmatprep.subr.bf16.mxu1 %v11097_v40 }
 0x3db   : > { %v3927_v35 = vrot.slane %v3845_v34, 4  ;;  %v3545_v0 = vrot.slane %v3466_v41, 4  ;;  %7528 = vmatpush1.bf16.msra.mxu1 %v11095_v9 }
 0x3dc   : > { %5566 = vrot.lane.b32.xlu1 %v5447_v46, %s11771_s22  ;;  %5560 = vrot.lane.b32.xlu0 %v5444_v23, %s11771_s22  ;;  %v11210_v46 = vld [vmem:[%s13629_s27 + $0x8c] ss:$0 sps:$4 sm:$0xff]  }
 0x3dd   : > { %v3976_v45 = vsel %vm3962_vm9, %v3845_v34, %v3927_v35  ;;  %v3594_v61 = vsel %vm3577_vm1, %v3466_v41, %v3545_v0  ;;  %v11098_v38 = vld [vmem:[#allocation3 + $0x3f0] ss:$8 sps:$4 sm:$0xff]   ;;  %v11100_v1 = vld [vmem:[#allocation3 + $0x3f4] ss:$8 sps:$4 sm:$0xff]   ;;  %v3362_v34 = vmul.bf16 %v13463_v2, %v14584_v60  ;;  %v5450_v41 = vmul.bf16 %v13480_v8, %v14532_v37 }
 0x3de   : > { %4072 = vst.msk [vmem:[#allocation3 + $0x3e8] sm:$0xff] %vm13133_vm5, %v3976_v45  ;;  %3690 = vst.msk [vmem:[#allocation3 + $0x4e0] sm:$0xff] %vm13133_vm5, %v3594_v61  ;;  %v3472_v26 = vpop.permute.xlu1 %3471  ;;  %v3031_v49 = vpop.permute.xlu0 %3030  ;;  %7492 = vmatprep.subr.bf16.mxu0 %v11100_v1  ;;  %v11216_v0 = vld [vmem:[%s13629_s27 + $0x94] ss:$12 sps:$4 sm:$0xff]  }
 0x3df   : > { %v3548_v12 = vrot.slane %v3472_v26, 4  ;;  %v3108_v14 = vrot.slane %v3031_v49, 4  ;;  %7493 = vmatpush2.bf16.msra.mxu0 %v11098_v38 }
 0x3e0   : > { %3864 = vrot.lane.b32.xlu1 %v14262_v56, %s11776_s6  ;;  %3858 = vrot.lane.b32.xlu0 %v14268_v30, %s11776_s6  ;;  %v5445_v56 = vmul.bf16 %v13480_v8, %v14294_v48  ;;  %v3363_v30 = vmul.bf16 %v13463_v2, %v14532_v37 }
 0x3e1   : > { %v3597_v3 = vsel %vm3577_vm1, %v3472_v26, %v3548_v12  ;;  %v3157_v16 = vsel %vm3138_vm3, %v3031_v49, %v3108_v14  ;;  %v11102_v28 = vld [vmem:[#allocation3 + $0x460] ss:$8 sps:$4 sm:$0xff]   ;;  %v11104_v25 = vld [vmem:[#allocation3 + $0x464] ss:$8 sps:$4 sm:$0xff]   ;;  %v10422_v26 = vcombine.low %v14564_v29, %v14564_v29  ;;  %v2925_v14 = vmul.bf16 %v14561_v4, %v13493_v52 }
 0x3e2   : > { %3693 = vst.msk [vmem:[#allocation3 + $0x4f8] sm:$0xff] %vm13133_vm5, %v3597_v3  ;;  %3253 = vst.msk [vmem:[#allocation3 + $0x4d0] sm:$0xff] %vm13133_vm5, %v3157_v16  ;;  %v3468_v18 = vpop.permute.xlu1 %3467  ;;  %v5557_v24 = vpop.permute.xlu0 %5556  ;;  %7529 = vmatprep.subr.bf16.mxu1 %v11104_v25  ;;  %v2922_v3 = vmul.bf16 %v14548_v44, %v13493_v52 }
 0x3e3   : > { %v3546_v33 = vrot.slane %v3468_v18, 4  ;;  %v5634_v36 = vrot.slane %v5557_v24, 4  ;;  %7530 = vmatpush1.bf16.msra.mxu1 %v11102_v28 }
 0x3e4   : > { %5562 = vrot.lane.b32.xlu1 %v5445_v56, %s11771_s22  ;;  %3485 = vrot.lane.b32.xlu0 %v3363_v30, %s11770_s19 }
 0x3e5   : > { %v3595_v20 = vsel %vm3577_vm1, %v3468_v18, %v3546_v33  ;;  %v5683_v7 = vsel %vm5664_vm2, %v5557_v24, %v5634_v36  ;;  %v11106_v27 = vld [vmem:[#allocation3 + $0x3e0] ss:$8 sps:$4 sm:$0xff]   ;;  %v11108_v11 = vld [vmem:[#allocation3 + $0x3e4] ss:$8 sps:$4 sm:$0xff]   ;;  %v5451_v36 = vmul.bf16 %v13480_v8, %v14561_v4 }
 0x3e6   : > { %3691 = vst.msk [vmem:[#allocation3 + $0x4e8] sm:$0xff] %vm13133_vm5, %v3595_v20  ;;  %5779 = vst.msk [vmem:[#allocation3 + $0x590] sm:$0xff] %vm13133_vm5, %v5683_v7  ;;  %v3033_v63 = vpop.permute.xlu1 %3032  ;;  %v3027_v57 = vpop.permute.xlu0 %3026  ;;  %7494 = vmatprep.subr.bf16.mxu0 %v11108_v11  ;;  %10461 = vmatmul.mubr.msk.bf16.vlgmr.msra.gmra.mxu1 %vm6518_vm6, %v11112_v43  ;;  %v5448_v43 = vmul.bf16 %v13480_v8, %v14548_v44 }
 0x3e7   : > { %v3109_v10 = vrot.slane %v3033_v63, 4  ;;  %v3106_v15 = vrot.slane %v3027_v57, 4  ;;  %7495 = vmatpush2.bf16.msra.mxu0 %v11106_v27  ;;  %7557 = vmatprep.mubr.bf16.mxu1 %v16232_v53 }
 0x3e8   : > { %3860 = vrot.lane.b32.xlu1 %v14294_v48, %s11776_s6  ;;  %3481 = vrot.lane.b32.xlu0 %v3361_v17, %s11770_s19 }
 0x3e9   : > { %v3158_v5 = vsel %vm3138_vm3, %v3033_v63, %v3109_v10  ;;  %v3155_v50 = vsel %vm3138_vm3, %v3027_v57, %v3106_v15  ;;  %v11109_v32 = vld [vmem:[#allocation3 + $0x4f0] ss:$8 sps:$4 sm:$0xff]   ;;  %v11111_v42 = vld [vmem:[#allocation3 + $0x4f4] ss:$8 sps:$4 sm:$0xff]   ;;  %v2923_v15 = vmul.bf16 %v14584_v60, %v13493_v52 }
 0x3ea   : > { %3254 = vst.msk [vmem:[#allocation3 + $0x4d8] sm:$0xff] %vm13133_vm5, %v3158_v5  ;;  %3251 = vst.msk [vmem:[#allocation3 + $0x4c0] sm:$0xff] %vm13133_vm5, %v3155_v50  ;;  %v5559_v51 = vpop.permute.xlu1 %5558  ;;  %v5553_v48 = vpop.permute.xlu0 %5552  ;;  %7777 = vmatprep.subr.bf16.mxu1 %v11111_v42  ;;  %7497 = vmatmul.mubr.bf16.vlgmr.msra.gmra.mxu0 %v11120_v59  ;;  %v14638_v5 = vld [vmem:[#allocation2 + $0xf0] sm:$0xff] }
 0x3eb   : > { %v5635_v54 = vrot.slane %v5559_v51, 4  ;;  %v5632_v21 = vrot.slane %v5553_v48, 4  ;;  %7778 = vmatpush1.bf16.msra.mxu1 %v11109_v32  ;;  %7506 = vmatprep.mubr.bf16.mxu0 %v10423_v47  ;;  %v3367_v47 = vmul.bf16 %v13463_v2, %v14638_v5 }
 0x3ec   : > { %3487 = vrot.lane.b32.xlu1 %v3364_v31, %s11770_s19  ;;  %3046 = vrot.lane.b32.xlu0 %v2924_v58, %s11772_s23  ;;  %v5449_v58 = vmul.bf16 %v13480_v8, %v14584_v60 }
 0x3ed   : > { %v5684_v19 = vsel %vm5664_vm2, %v5559_v51, %v5635_v54  ;;  %v5681_v6 = vsel %vm5664_vm2, %v5553_v48, %v5632_v21  ;;  %v11113_v13 = vld [vmem:[#allocation3 + $0x4e0] ss:$8 sps:$4 sm:$0xff]   ;;  %v11115_v22 = vld [vmem:[#allocation3 + $0x4e4] ss:$8 sps:$4 sm:$0xff]  }
 0x3ee   : > { %5780 = vst.msk [vmem:[#allocation3 + $0x598] sm:$0xff] %vm13133_vm5, %v5684_v19  ;;  %5777 = vst.msk [vmem:[#allocation3 + $0x580] sm:$0xff] %vm13133_vm5, %v5681_v6  ;;  %v3029_v9 = vpop.permute.xlu1 %3028  ;;  %v2550_v40 = vpop.permute.xlu0 %2549  ;;  %7779 = vmatprep.subr.bf16.mxu1 %v11115_v22  ;;  %10462 = vmatmul.mubr.msk.bf16.gmra.mxu1 %vm6518_vm6, %v11210_v46  ;;  %v11140_v19 = vld [vmem:[%s13629_s27 + $0x98] ss:$12 sps:$4 sm:$0xff]  }
 0x3ef   : > { %v3107_v23 = vrot.slane %v3029_v9, 4  ;;  %v2627_v35 = vrot.slane %v2550_v40, 4  ;;  %7780 = vmatpush1.bf16.msra.mxu1 %v11113_v13  ;;  %7809 = vmatprep.mubr.bf16.mxu1 %v11216_v0 }
 0x3f0   : > { %3483 = vrot.lane.b32.xlu1 %v3362_v34, %s11770_s19  ;;  %5572 = vrot.lane.b32.xlu0 %v5450_v41, %s11771_s22 }
 0x3f1   : > { %v3156_v45 = vsel %vm3138_vm3, %v3029_v9, %v3107_v23  ;;  %v2676_v61 = vsel %vm2657_vm14, %v2550_v40, %v2627_v35  ;;  %v11117_v38 = vld [vmem:[#allocation3 + $0x4d0] ss:$8 sps:$4 sm:$0xff]   ;;  %v11119_v1 = vld [vmem:[#allocation3 + $0x4d4] ss:$8 sps:$4 sm:$0xff]   ;;  %v14664_v35 = vld [vmem:[#allocation2 + $0xe0] sm:$0xff] }
 0x3f2   : > { %3252 = vst.msk [vmem:[#allocation3 + $0x4c8] sm:$0xff] %vm13133_vm5, %v3156_v45  ;;  %2772 = vst.msk [vmem:[#allocation3 + $0x4b0] sm:$0xff] %vm13133_vm5, %v2676_v61  ;;  %v5555_v49 = vpop.permute.xlu1 %5554  ;;  %v3478_v12 = vpop.permute.xlu0 %3477  ;;  %7781 = vmatprep.subr.bf16.mxu1 %v11119_v1  ;;  %7507 = vmatmul.mubr.bf16.gmra.mxu0 %v10422_v26  ;;  %v14662_v23 = vld [vmem:[#allocation2 + $0xf8] sm:$0xff] }
 0x3f3   : > { %v5633_v16 = vrot.slane %v5555_v49, 4  ;;  %v3551_v28 = vrot.slane %v3478_v12, 4  ;;  %7782 = vmatpush1.bf16.msra.mxu1 %v11117_v38  ;;  %7860 = vmatprep.mubr.bf16.mxu0 %v16232_v53 }
 0x3f4   : > { %3048 = vrot.lane.b32.xlu1 %v2925_v14, %s11772_s23  ;;  %3042 = vrot.lane.b32.xlu0 %v2922_v3, %s11772_s23 }
 0x3f5   : > { %v5682_v25 = vsel %vm5664_vm2, %v5555_v49, %v5633_v16  ;;  %v3600_v18 = vsel %vm3577_vm1, %v3478_v12, %v3551_v28  ;;  %v11123_v24 = vld [vmem:[#allocation3 + $0x590] ss:$8 sps:$4 sm:$0xff]   ;;  %v11125_v56 = vld [vmem:[#allocation3 + $0x594] ss:$8 sps:$4 sm:$0xff]   ;;  %v3368_v49 = vmul.bf16 %v13463_v2, %v14662_v23  ;;  %v3365_v12 = vmul.bf16 %v13463_v2, %v14664_v35 }
 0x3f6   : > { %5778 = vst.msk [vmem:[#allocation3 + $0x588] sm:$0xff] %vm13133_vm5, %v5682_v25  ;;  %3696 = vst.msk [vmem:[#allocation3 + $0x610] sm:$0xff] %vm13133_vm5, %v3600_v18  ;;  %v2552_v30 = vpop.permute.xlu1 %2551  ;;  %v2546_v33 = vpop.permute.xlu0 %2545  ;;  %7840 = vmatprep.subr.bf16.mxu0 %v11125_v56  ;;  %v11238_v16 = vld [vmem:[%s13629_s27 + $0xb0] ss:$0 sps:$4 sm:$0xff]  }
 0x3f7   : > { %v2628_v20 = vrot.slane %v2552_v30, 4  ;;  %v2625_v7 = vrot.slane %v2546_v33, 4  ;;  %7841 = vmatpush1.bf16.msra.mxu0 %v11123_v24 }
 0x3f8   : > { %5574 = vrot.lane.b32.xlu1 %v5451_v36, %s11771_s22  ;;  %5568 = vrot.lane.b32.xlu0 %v5448_v43, %s11771_s22  ;;  %v11244_v36 = vld [vmem:[%s13629_s27 + $0xb8] ss:$12 sps:$4 sm:$0xff]  }
 0x3f9   : > { %v2677_v27 = vsel %vm2657_vm14, %v2552_v30, %v2628_v20  ;;  %v2674_v11 = vsel %vm2657_vm14, %v2546_v33, %v2625_v7  ;;  %v11126_v63 = vld [vmem:[#allocation3 + $0x4c0] ss:$8 sps:$4 sm:$0xff]   ;;  %v11128_v57 = vld [vmem:[#allocation3 + $0x4c4] ss:$8 sps:$4 sm:$0xff]   ;;  %v2928_v33 = vmul.bf16 %v14638_v5, %v13493_v52 }
 0x3fa   : > { %2773 = vst.msk [vmem:[#allocation3 + $0x4b8] sm:$0xff] %vm13133_vm5, %v2677_v27  ;;  %2770 = vst.msk [vmem:[#allocation3 + $0x4a0] sm:$0xff] %vm13133_vm5, %v2674_v11  ;;  %v3480_v17 = vpop.permute.xlu1 %3479  ;;  %v3474_v10 = vpop.permute.xlu0 %3473  ;;  %7783 = vmatprep.subr.bf16.mxu1 %v11128_v57  ;;  %v14694_v7 = vld [vmem:[#allocation2 + $0xe8] sm:$0xff]  ;;  %v11146_v27 = vld [vmem:[#allocation3 + $0x494] ss:$8 sps:$4 sm:$0xff]  }
 0x3fb   : > { %v3552_v29 = vrot.slane %v3480_v17, 4  ;;  %v3549_v59 = vrot.slane %v3474_v10, 4  ;;  %7784 = vmatpush1.bf16.msra.mxu1 %v11126_v63 }
 0x3fc   : > { %3044 = vrot.lane.b32.xlu1 %v2923_v15, %s11772_s23  ;;  %2565 = vrot.lane.b32.xlu0 %v14532_v37, %s11769_s17 }
 0x3fd   : > { %v3601_v50 = vsel %vm3577_vm1, %v3480_v17, %v3552_v29  ;;  %v3598_v32 = vsel %vm3577_vm1, %v3474_v10, %v3549_v59  ;;  %v11130_v42 = vld [vmem:[#allocation3 + $0x580] ss:$8 sps:$4 sm:$0xff]   ;;  %v11132_v51 = vld [vmem:[#allocation3 + $0x584] ss:$8 sps:$4 sm:$0xff]   ;;  %v3366_v29 = vmul.bf16 %v13463_v2, %v14694_v7  ;;  %v2926_v59 = vmul.bf16 %v14664_v35, %v13493_v52 }
 0x3fe   : > { %3697 = vst.msk [vmem:[#allocation3 + $0x618] sm:$0xff] %vm13133_vm5, %v3601_v50  ;;  %3694 = vst.msk [vmem:[#allocation3 + $0x600] sm:$0xff] %vm13133_vm5, %v3598_v32  ;;  %v2548_v48 = vpop.permute.xlu1 %2547  ;;  %v3039_v31 = vpop.permute.xlu0 %3038  ;;  %7842 = vmatprep.subr.bf16.mxu0 %v11132_v51  ;;  %v11144_v32 = vld [vmem:[#allocation3 + $0x490] ss:$8 sps:$4 sm:$0xff]   ;;  %v11152_v51 = vld [vmem:[#allocation3 + $0x484] ss:$8 sps:$4 sm:$0xff]  }
 0x3ff   : > { %v2626_v54 = vrot.slane %v2548_v48, 4  ;;  %v3112_v21 = vrot.slane %v3039_v31, 4  ;;  %7843 = vmatpush1.bf16.msra.mxu0 %v11130_v42 }
 0x400   : > { %5570 = vrot.lane.b32.xlu1 %v5449_v58, %s11771_s22  ;;  %3493 = vrot.lane.b32.xlu0 %v3367_v47, %s11770_s19 }
 0x401   : > { %v2675_v6 = vsel %vm2657_vm14, %v2548_v48, %v2626_v54  ;;  %v3161_v13 = vsel %vm3138_vm3, %v3039_v31, %v3112_v21  ;;  %v11134_v22 = vld [vmem:[#allocation3 + $0x4b0] ss:$8 sps:$4 sm:$0xff]   ;;  %v11136_v9 = vld [vmem:[#allocation3 + $0x4b4] ss:$8 sps:$4 sm:$0xff]  }
 0x402   : > { %2771 = vst.msk [vmem:[#allocation3 + $0x4a8] sm:$0xff] %vm13133_vm5, %v2675_v6  ;;  %3257 = vst.msk [vmem:[#allocation3 + $0x5f0] sm:$0xff] %vm13133_vm5, %v3161_v13  ;;  %v3476_v40 = vpop.permute.xlu1 %3475  ;;  %v3035_v34 = vpop.permute.xlu0 %3034  ;;  %7785 = vmatprep.subr.bf16.mxu1 %v11136_v9  ;;  %10505 = vmatmul.mubr.msk.bf16.vlgmr.msra.gmra.mxu0 %vm6518_vm6, %v11140_v19  ;;  %v2929_v19 = vmul.bf16 %v14662_v23, %v13493_v52  ;;  %v11150_v13 = vld [vmem:[#allocation3 + $0x480] ss:$8 sps:$4 sm:$0xff]  }
 0x403   : > { %v3550_v41 = vrot.slane %v3476_v40, 4  ;;  %v3110_v46 = vrot.slane %v3035_v34, 4  ;;  %7786 = vmatpush1.bf16.msra.mxu1 %v11134_v22  ;;  %7870 = vmatprep.mubr.bf16.mxu0 %v16232_v53 }
 0x404   : > { %2567 = vrot.lane.b32.xlu1 %v14561_v4, %s11769_s17  ;;  %2561 = vrot.lane.b32.xlu0 %v14548_v44, %s11769_s17 }
 0x405   : > { %v3599_v0 = vsel %vm3577_vm1, %v3476_v40, %v3550_v41  ;;  %v3159_v45 = vsel %vm3138_vm3, %v3035_v34, %v3110_v46  ;;  %v11137_v61 = vld [vmem:[#allocation3 + $0x610] ss:$8 sps:$4 sm:$0xff]   ;;  %v11139_v38 = vld [vmem:[#allocation3 + $0x614] ss:$8 sps:$4 sm:$0xff]  }
 0x406   : > { %3695 = vst.msk [vmem:[#allocation3 + $0x608] sm:$0xff] %vm13133_vm5, %v3599_v0  ;;  %3255 = vst.msk [vmem:[#allocation3 + $0x5e0] sm:$0xff] %vm13133_vm5, %v3159_v45  ;;  %v3041_v1 = vpop.permute.xlu1 %3040  ;;  %v2558_v26 = vpop.permute.xlu0 %2557  ;;  %8090 = vmatprep.subr.bf16.mxu0 %v11139_v38  ;;  %v2927_v45 = vmul.bf16 %v14694_v7, %v13493_v52 }
 0x407   : > { %v3113_v14 = vrot.slane %v3041_v1, 4  ;;  %v2631_v3 = vrot.slane %v2558_v26, 4  ;;  %8091 = vmatpush1.bf16.msra.mxu0 %v11137_v61 }
 0x408   : > { %3495 = vrot.lane.b32.xlu1 %v3368_v49, %s11770_s19  ;;  %3489 = vrot.lane.b32.xlu0 %v3365_v12, %s11770_s19 }
 0x409   : > { %v3162_v28 = vsel %vm3138_vm3, %v3041_v1, %v3113_v14  ;;  %v2680_v25 = vsel %vm2657_vm14, %v2558_v26, %v2631_v3  ;;  %v11141_v18 = vld [vmem:[#allocation3 + $0x4a0] ss:$8 sps:$4 sm:$0xff]   ;;  %v11143_v24 = vld [vmem:[#allocation3 + $0x4a4] ss:$8 sps:$4 sm:$0xff]  }
 0x40a   : > { %3258 = vst.msk [vmem:[#allocation3 + $0x5f8] sm:$0xff] %vm13133_vm5, %v3162_v28  ;;  %2776 = vst.msk [vmem:[#allocation3 + $0x5d0] sm:$0xff] %vm13133_vm5, %v2680_v25  ;;  %v3037_v56 = vpop.permute.xlu1 %3036  ;;  %v5118_v30 = vpop.permute.xlu0 %5117  ;;  %7787 = vmatprep.subr.bf16.mxu1 %v11143_v24  ;;  %10506 = vmatmul.mubr.msk.bf16.gmra.mxu0 %vm6518_vm6, %v11238_v16 }
 0x40b   : > { %v3111_v43 = vrot.slane %v3037_v56, 4  ;;  %v5195_v20 = vrot.slane %v5118_v30, 4  ;;  %7788 = vmatpush1.bf16.msra.mxu1 %v11141_v18  ;;  %8122 = vmatprep.mubr.bf16.mxu0 %v11244_v36 }
 0x40c   : > { %2563 = vrot.lane.b32.xlu1 %v14584_v60, %s11769_s17  ;;  %3054 = vrot.lane.b32.xlu0 %v2928_v33, %s11772_s23 }
 0x40d   : > { %v3160_v11 = vsel %vm3138_vm3, %v3037_v56, %v3111_v43  ;;  %v5244_v63 = vsel %vm5225_vm4, %v5118_v30, %v5195_v20  ;;  %v11147_v57 = vld [vmem:[#allocation3 + $0x600] ss:$8 sps:$4 sm:$0xff]   ;;  %v11149_v17 = vld [vmem:[#allocation3 + $0x604] ss:$8 sps:$4 sm:$0xff]   ;;  %7789 = vmatprep.subr.bf16.mxu1 %v11146_v27 }
 0x40e   : > { %3256 = vst.msk [vmem:[#allocation3 + $0x5e8] sm:$0xff] %vm13133_vm5, %v3160_v11  ;;  %5340 = vst.msk [vmem:[#allocation3 + $0x570] sm:$0xff] %vm13133_vm5, %v5244_v63  ;;  %v2560_v10 = vpop.permute.xlu1 %2559  ;;  %v2554_v15 = vpop.permute.xlu0 %2553  ;;  %8092 = vmatprep.subr.bf16.mxu0 %v11149_v17 }
 0x40f   : > { %v2632_v50 = vrot.slane %v2560_v10, 4  ;;  %v2629_v42 = vrot.slane %v2554_v15, 4  ;;  %7790 = vmatpush1.bf16.msra.mxu1 %v11144_v32  ;;  %8093 = vmatpush1.bf16.msra.mxu0 %v11147_v57 }
 0x410   : > { %3491 = vrot.lane.b32.xlu1 %v3366_v29, %s11770_s19  ;;  %3050 = vrot.lane.b32.xlu0 %v2926_v59, %s11772_s23  ;;  %v11170_v59 = vld [vmem:[#allocation3 + $0x5b4] ss:$8 sps:$4 sm:$0xff]  }
 0x411   : > { %v2681_v48 = vsel %vm2657_vm14, %v2560_v10, %v2632_v50  ;;  %v2678_v31 = vsel %vm2657_vm14, %v2554_v15, %v2629_v42  ;;  %v11153_v58 = vld [vmem:[#allocation3 + $0x5f0] ss:$8 sps:$4 sm:$0xff]   ;;  %v11155_v47 = vld [vmem:[#allocation3 + $0x5f4] ss:$8 sps:$4 sm:$0xff]   ;;  %7791 = vmatprep.subr.bf16.mxu1 %v11152_v51  ;;  %v4626_v10 = vmul.bf16 %v13649_v39, %v14532_v37 }
 0x412   : > { %2777 = vst.msk [vmem:[#allocation3 + $0x5d8] sm:$0xff] %vm13133_vm5, %v2681_v48  ;;  %2774 = vst.msk [vmem:[#allocation3 + $0x5c0] sm:$0xff] %vm13133_vm5, %v2678_v31  ;;  %v5120_v54 = vpop.permute.xlu1 %5119  ;;  %v5114_v21 = vpop.permute.xlu0 %5113  ;;  %8094 = vmatprep.subr.bf16.mxu0 %v11155_v47 }
 0x413   : > { %v5196_v6 = vrot.slane %v5120_v54, 4  ;;  %v5193_v22 = vrot.slane %v5114_v21, 4  ;;  %7792 = vmatpush1.bf16.msra.mxu1 %v11150_v13  ;;  %8095 = vmatpush1.bf16.msra.mxu0 %v11153_v58  ;;  %v4624_v58 = vmul.bf16 %v13649_v39, %v14548_v44 }
 0x414   : > { %3056 = vrot.lane.b32.xlu1 %v2929_v19, %s11772_s23  ;;  %2573 = vrot.lane.b32.xlu0 %v14638_v5, %s11769_s17  ;;  %v11176_v19 = vld [vmem:[#allocation3 + $0x5a4] ss:$8 sps:$4 sm:$0xff]  }
 0x415   : > { %v5245_v9 = vsel %vm5225_vm4, %v5120_v54, %v5196_v6  ;;  %v5242_v40 = vsel %vm5225_vm4, %v5114_v21, %v5193_v22  ;;  %v11156_v34 = vld [vmem:[#allocation3 + $0x5e0] ss:$8 sps:$4 sm:$0xff]   ;;  %v11158_v41 = vld [vmem:[#allocation3 + $0x5e4] ss:$8 sps:$4 sm:$0xff]   ;;  %v11168_v54 = vld [vmem:[#allocation3 + $0x5b0] ss:$8 sps:$4 sm:$0xff]  }
 0x416   : > { %5341 = vst.msk [vmem:[#allocation3 + $0x578] sm:$0xff] %vm13133_vm5, %v5245_v9  ;;  %5338 = vst.msk [vmem:[#allocation3 + $0x560] sm:$0xff] %vm13133_vm5, %v5242_v40  ;;  %v2556_v46 = vpop.permute.xlu1 %2555  ;;  %v4733_v0 = vpop.permute.xlu0 %4732  ;;  %8096 = vmatprep.subr.bf16.mxu0 %v11158_v41  ;;  %v4627_v41 = vmul.bf16 %v13649_v39, %v14561_v4 }
 0x417   : > { %v2630_v61 = vrot.slane %v2556_v46, 4  ;;  %v4810_v38 = vrot.slane %v4733_v0, 4  ;;  %8097 = vmatpush1.bf16.msra.mxu0 %v11156_v34 }
 0x418   : > { %3052 = vrot.lane.b32.xlu1 %v2927_v45, %s11772_s23  ;;  %5133 = vrot.lane.b32.xlu0 %v14532_v37, %s11773_s28  ;;  %v11174_v45 = vld [vmem:[#allocation3 + $0x5a0] ss:$8 sps:$4 sm:$0xff]  }
 0x419   : > { %v2679_v1 = vsel %vm2657_vm14, %v2556_v46, %v2630_v61  ;;  %v4859_v26 = vsel %vm4840_vm7, %v4733_v0, %v4810_v38  ;;  %v11159_v49 = vld [vmem:[#allocation3 + $0x5d0] ss:$8 sps:$4 sm:$0xff]   ;;  %v11161_v12 = vld [vmem:[#allocation3 + $0x5d4] ss:$8 sps:$4 sm:$0xff]   ;;  %v4187_v46 = vmul.bf16 %v13679_v62, %v14532_v37 }
 0x41a   : > { %2775 = vst.msk [vmem:[#allocation3 + $0x5c8] sm:$0xff] %vm13133_vm5, %v2679_v1  ;;  %4955 = vst.msk [vmem:[#allocation3 + $0x550] sm:$0xff] %vm13133_vm5, %v4859_v26  ;;  %v5116_v14 = vpop.permute.xlu1 %5115  ;;  %v4729_v3 = vpop.permute.xlu0 %4728  ;;  %8098 = vmatprep.subr.bf16.mxu0 %v11161_v12 }
 0x41b   : > { %v5194_v16 = vrot.slane %v5116_v14, 4  ;;  %v4808_v28 = vrot.slane %v4729_v3, 4  ;;  %8099 = vmatpush1.bf16.msra.mxu0 %v11159_v49 }
 0x41c   : > { %2575 = vrot.lane.b32.xlu1 %v14662_v23, %s11769_s17  ;;  %2569 = vrot.lane.b32.xlu0 %v14664_v35, %s11769_s17 }
 0x41d   : > { %v5243_v25 = vsel %vm5225_vm4, %v5116_v14, %v5194_v16  ;;  %v4857_v18 = vsel %vm4840_vm7, %v4729_v3, %v4808_v28  ;;  %v11162_v24 = vld [vmem:[#allocation3 + $0x570] ss:$8 sps:$4 sm:$0xff]   ;;  %v11164_v56 = vld [vmem:[#allocation3 + $0x574] ss:$8 sps:$4 sm:$0xff]   ;;  %v4625_v3 = vmul.bf16 %v13649_v39, %v14584_v60 }
 0x41e   : > { %5339 = vst.msk [vmem:[#allocation3 + $0x568] sm:$0xff] %vm13133_vm5, %v5243_v25  ;;  %4953 = vst.msk [vmem:[#allocation3 + $0x540] sm:$0xff] %vm13133_vm5, %v4857_v18  ;;  %v4735_v30 = vpop.permute.xlu1 %4734  ;;  %v4294_v33 = vpop.permute.xlu0 %4293  ;;  %7793 = vmatprep.subr.bf16.mxu1 %v11164_v56 }
 0x41f   : > { %v4811_v36 = vrot.slane %v4735_v30, 4  ;;  %v4371_v43 = vrot.slane %v4294_v33, 4  ;;  %7794 = vmatpush2.bf16.msra.mxu1 %v11162_v24 }
 0x420   : > { %5135 = vrot.lane.b32.xlu1 %v14561_v4, %s11773_s28  ;;  %5129 = vrot.lane.b32.xlu0 %v14548_v44, %s11773_s28 }
 0x421   : > { %v4860_v20 = vsel %vm4840_vm7, %v4735_v30, %v4811_v36  ;;  %v4420_v27 = vsel %vm4401_vm8, %v4294_v33, %v4371_v43  ;;  %v11165_v11 = vld [vmem:[#allocation3 + $0x5c0] ss:$8 sps:$4 sm:$0xff]   ;;  %v11167_v63 = vld [vmem:[#allocation3 + $0x5c4] ss:$8 sps:$4 sm:$0xff]   ;;  %v4188_v36 = vmul.bf16 %v13679_v62, %v14561_v4  ;;  %v4185_v43 = vmul.bf16 %v13679_v62, %v14548_v44 }
 0x422   : > { %4956 = vst.msk [vmem:[#allocation3 + $0x558] sm:$0xff] %vm13133_vm5, %v4860_v20  ;;  %4516 = vst.msk [vmem:[#allocation3 + $0x530] sm:$0xff] %vm13133_vm5, %v4420_v27  ;;  %v4731_v57 = vpop.permute.xlu1 %4730  ;;  %v5126_v17 = vpop.permute.xlu0 %5125  ;;  %8100 = vmatprep.subr.bf16.mxu0 %v11167_v63 }
 0x423   : > { %v4809_v15 = vrot.slane %v4731_v57, 4  ;;  %v5199_v29 = vrot.slane %v5126_v17, 4  ;;  %8101 = vmatpush1.bf16.msra.mxu0 %v11165_v11 }
 0x424   : > { %2571 = vrot.lane.b32.xlu1 %v14694_v7, %s11769_s17  ;;  %4748 = vrot.lane.b32.xlu0 %v4626_v10, %s11774_s29 }
 0x425   : > { %v4858_v50 = vsel %vm4840_vm7, %v4731_v57, %v4809_v15  ;;  %v5248_v32 = vsel %vm5225_vm4, %v5126_v17, %v5199_v29  ;;  %v11171_v42 = vld [vmem:[#allocation3 + $0x560] ss:$8 sps:$4 sm:$0xff]   ;;  %v11173_v51 = vld [vmem:[#allocation3 + $0x564] ss:$8 sps:$4 sm:$0xff]   ;;  %8102 = vmatprep.subr.bf16.mxu0 %v11170_v59 }
 0x426   : > { %4954 = vst.msk [vmem:[#allocation3 + $0x548] sm:$0xff] %vm13133_vm5, %v4858_v50  ;;  %5344 = vst.msk [vmem:[#allocation3 + $0x690] sm:$0xff] %vm13133_vm5, %v5248_v32  ;;  %v4296_v48 = vpop.permute.xlu1 %4295  ;;  %v4290_v31 = vpop.permute.xlu0 %4289  ;;  %7795 = vmatprep.subr.bf16.mxu1 %v11173_v51 }
 0x427   : > { %v4372_v47 = vrot.slane %v4296_v48, 4  ;;  %v4369_v21 = vrot.slane %v4290_v31, 4  ;;  %7796 = vmatpush2.bf16.msra.mxu1 %v11171_v42  ;;  %8103 = vmatpush1.bf16.msra.mxu0 %v11168_v54 }
 0x428   : > { %5131 = vrot.lane.b32.xlu1 %v14584_v60, %s11773_s28  ;;  %4744 = vrot.lane.b32.xlu0 %v4624_v58, %s11774_s29  ;;  %v4186_v58 = vmul.bf16 %v13679_v62, %v14584_v60 }
 0x429   : > { %v4421_v6 = vsel %vm4401_vm8, %v4296_v48, %v4372_v47  ;;  %v4418_v13 = vsel %vm4401_vm8, %v4290_v31, %v4369_v21  ;;  %v11177_v22 = vld [vmem:[#allocation3 + $0x550] ss:$8 sps:$4 sm:$0xff]   ;;  %v11179_v9 = vld [vmem:[#allocation3 + $0x554] ss:$8 sps:$4 sm:$0xff]   ;;  %8104 = vmatprep.subr.bf16.mxu0 %v11176_v19 }
 0x42a   : > { %4517 = vst.msk [vmem:[#allocation3 + $0x538] sm:$0xff] %vm13133_vm5, %v4421_v6  ;;  %4514 = vst.msk [vmem:[#allocation3 + $0x520] sm:$0xff] %vm13133_vm5, %v4418_v13  ;;  %v5128_v40 = vpop.permute.xlu1 %5127  ;;  %v5122_v34 = vpop.permute.xlu0 %5121  ;;  %7797 = vmatprep.subr.bf16.mxu1 %v11179_v9 }
 0x42b   : > { %v5200_v0 = vrot.slane %v5128_v40, 4  ;;  %v5197_v61 = vrot.slane %v5122_v34, 4  ;;  %7798 = vmatpush2.bf16.msra.mxu1 %v11177_v22  ;;  %8105 = vmatpush1.bf16.msra.mxu0 %v11174_v45 }
 0x42c   : > { %4750 = vrot.lane.b32.xlu1 %v4627_v41, %s11774_s29  ;;  %4309 = vrot.lane.b32.xlu0 %v4187_v46, %s11775_s30 }
 0x42d   : > { %v5249_v38 = vsel %vm5225_vm4, %v5128_v40, %v5200_v0  ;;  %v5246_v1 = vsel %vm5225_vm4, %v5122_v34, %v5197_v61  ;;  %v11180_v26 = vld [vmem:[#allocation3 + $0x540] ss:$8 sps:$4 sm:$0xff]   ;;  %v11182_v49 = vld [vmem:[#allocation3 + $0x544] ss:$8 sps:$4 sm:$0xff]   ;;  %v4630_v40 = vmul.bf16 %v13649_v39, %v14638_v5 }
 0x42e   : > { %5345 = vst.msk [vmem:[#allocation3 + $0x698] sm:$0xff] %vm13133_vm5, %v5249_v38  ;;  %5342 = vst.msk [vmem:[#allocation3 + $0x680] sm:$0xff] %vm13133_vm5, %v5246_v1  ;;  %v4292_v12 = vpop.permute.xlu1 %4291  ;;  %v3855_v14 = vpop.permute.xlu0 %3854  ;;  %7799 = vmatprep.subr.bf16.mxu1 %v11182_v49 }
 0x42f   : > { %v4370_v16 = vrot.slane %v4292_v12, 4  ;;  %v3932_v28 = vrot.slane %v3855_v14, 4  ;;  %7800 = vmatpush2.bf16.msra.mxu1 %v11180_v26 }
 0x430   : > { %4746 = vrot.lane.b32.xlu1 %v4625_v3, %s11774_s29  ;;  %5141 = vrot.lane.b32.xlu0 %v14638_v5, %s11773_s28 }
 0x431   : > { %v4419_v25 = vsel %vm4401_vm8, %v4292_v12, %v4370_v16  ;;  %v3981_v18 = vsel %vm3962_vm9, %v3855_v14, %v3932_v28  ;;  %v11183_v24 = vld [vmem:[#allocation3 + $0x530] ss:$8 sps:$4 sm:$0xff]   ;;  %v11185_v56 = vld [vmem:[#allocation3 + $0x534] ss:$8 sps:$4 sm:$0xff]  }
 0x432   : > { %4515 = vst.msk [vmem:[#allocation3 + $0x528] sm:$0xff] %vm13133_vm5, %v4419_v25  ;;  %4077 = vst.msk [vmem:[#allocation3 + $0x510] sm:$0xff] %vm13133_vm5, %v3981_v18  ;;  %v5124_v30 = vpop.permute.xlu1 %5123  ;;  %v4741_v33 = vpop.permute.xlu0 %4740  ;;  %7801 = vmatprep.subr.bf16.mxu1 %v11185_v56 }
 0x433   : > { %v5198_v20 = vrot.slane %v5124_v30, 4  ;;  %v4814_v27 = vrot.slane %v4741_v33, 4  ;;  %7802 = vmatpush2.bf16.msra.mxu1 %v11183_v24 }
 0x434   : > { %4311 = vrot.lane.b32.xlu1 %v4188_v36, %s11775_s30  ;;  %4305 = vrot.lane.b32.xlu0 %v4185_v43, %s11775_s30 }
 0x435   : > { %v5247_v11 = vsel %vm5225_vm4, %v5124_v30, %v5198_v20  ;;  %v4863_v63 = vsel %vm4840_vm7, %v4741_v33, %v4814_v27  ;;  %v11186_v57 = vld [vmem:[#allocation3 + $0x690] ss:$8 sps:$4 sm:$0xff]   ;;  %v11188_v17 = vld [vmem:[#allocation3 + $0x694] ss:$8 sps:$4 sm:$0xff]   ;;  %v4191_v20 = vmul.bf16 %v13679_v62, %v14638_v5 }
 0x436   : > { %5343 = vst.msk [vmem:[#allocation3 + $0x688] sm:$0xff] %vm13133_vm5, %v5247_v11  ;;  %4959 = vst.msk [vmem:[#allocation3 + $0x670] sm:$0xff] %vm13133_vm5, %v4863_v63  ;;  %v3857_v10 = vpop.permute.xlu1 %3856  ;;  %v3851_v15 = vpop.permute.xlu0 %3850  ;;  %8106 = vmatprep.subr.bf16.mxu0 %v11188_v17  ;;  %v5837_v63 = vld [vmem:[%s13629_s27 + $0xa8] sm:$0xff] }
 0x437   : > { %v3933_v29 = vrot.slane %v3857_v10, 4  ;;  %v3930_v59 = vrot.slane %v3851_v15, 4  ;;  %8107 = vmatpush2.bf16.msra.mxu0 %v11186_v57  ;;  %v11214_v57 = vld [vmem:[%s13629_s27 + $0x90] ss:$12 sps:$4 sm:$0xff]  }
 0x438   : > { %5143 = vrot.lane.b32.xlu1 %v14662_v23, %s11773_s28  ;;  %5137 = vrot.lane.b32.xlu0 %v14664_v35, %s11773_s28 }
 0x439   : > { %v3982_v50 = vsel %vm3962_vm9, %v3857_v10, %v3933_v29  ;;  %v3979_v32 = vsel %vm3962_vm9, %v3851_v15, %v3930_v59  ;;  %v11189_v42 = vld [vmem:[#allocation3 + $0x520] ss:$8 sps:$4 sm:$0xff]   ;;  %v11191_v51 = vld [vmem:[#allocation3 + $0x524] ss:$8 sps:$4 sm:$0xff]  }
 0x43a   : > { %4078 = vst.msk [vmem:[#allocation3 + $0x518] sm:$0xff] %vm13133_vm5, %v3982_v50  ;;  %4075 = vst.msk [vmem:[#allocation3 + $0x500] sm:$0xff] %vm13133_vm5, %v3979_v32  ;;  %v4743_v48 = vpop.permute.xlu1 %4742  ;;  %v4737_v31 = vpop.permute.xlu0 %4736  ;;  %7803 = vmatprep.subr.bf16.mxu1 %v11191_v51  ;;  %v4189_v32 = vmul.bf16 %v13679_v62, %v14664_v35 }
 0x43b   : > { %v4815_v47 = vrot.slane %v4743_v48, 4  ;;  %v4812_v54 = vrot.slane %v4737_v31, 4  ;;  %7804 = vmatpush2.bf16.msra.mxu1 %v11189_v42  ;;  %v10467_v42 = vcombine.high %v5837_v63, %v5837_v63 }
 0x43c   : > { %4307 = vrot.lane.b32.xlu1 %v4186_v58, %s11775_s30  ;;  %3870 = vrot.lane.b32.xlu0 %v14532_v37, %s11776_s6 }
 0x43d   : > { %v4864_v21 = vsel %vm4840_vm7, %v4743_v48, %v4815_v47  ;;  %v4861_v19 = vsel %vm4840_vm7, %v4737_v31, %v4812_v54  ;;  %v11192_v6 = vld [vmem:[#allocation3 + $0x680] ss:$8 sps:$4 sm:$0xff]   ;;  %v11194_v13 = vld [vmem:[#allocation3 + $0x684] ss:$8 sps:$4 sm:$0xff]  }
 0x43e   : > { %4960 = vst.msk [vmem:[#allocation3 + $0x678] sm:$0xff] %vm13133_vm5, %v4864_v21  ;;  %4957 = vst.msk [vmem:[#allocation3 + $0x660] sm:$0xff] %vm13133_vm5, %v4861_v19  ;;  %v3853_v22 = vpop.permute.xlu1 %3852  ;;  %v4302_v9 = vpop.permute.xlu0 %4301  ;;  %8108 = vmatprep.subr.bf16.mxu0 %v11194_v13  ;;  %v5454_v13 = vmul.bf16 %v13480_v8, %v14638_v5 }
 0x43f   : > { %v3931_v34 = vrot.slane %v3853_v22, 4  ;;  %v4375_v37 = vrot.slane %v4302_v9, 4  ;;  %8109 = vmatpush2.bf16.msra.mxu0 %v11192_v6  ;;  %v4192_v6 = vmul.bf16 %v13679_v62, %v14662_v23 }
 0x440   : > { %5139 = vrot.lane.b32.xlu1 %v14694_v7, %s11773_s28  ;;  %4756 = vrot.lane.b32.xlu0 %v4630_v40, %s11774_s29 }
 0x441   : > { %v3980_v41 = vsel %vm3962_vm9, %v3853_v22, %v3931_v34  ;;  %v4424_v46 = vsel %vm4401_vm8, %v4302_v9, %v4375_v37  ;;  %v11195_v0 = vld [vmem:[#allocation3 + $0x510] ss:$8 sps:$4 sm:$0xff]   ;;  %v11197_v45 = vld [vmem:[#allocation3 + $0x514] ss:$8 sps:$4 sm:$0xff]  }
 0x442   : > { %4076 = vst.msk [vmem:[#allocation3 + $0x508] sm:$0xff] %vm13133_vm5, %v3980_v41  ;;  %4520 = vst.msk [vmem:[#allocation3 + $0x650] sm:$0xff] %vm13133_vm5, %v4424_v46  ;;  %v4739_v61 = vpop.permute.xlu1 %4738  ;;  %v4298_v38 = vpop.permute.xlu0 %4297  ;;  %7805 = vmatprep.subr.bf16.mxu1 %v11197_v45  ;;  %v10466_v46 = vcombine.low %v5837_v63, %v5837_v63 }
 0x443   : > { %v4813_v1 = vrot.slane %v4739_v61, 4  ;;  %v4373_v26 = vrot.slane %v4298_v38, 4  ;;  %7806 = vmatpush2.bf16.msra.mxu1 %v11195_v0 }
 0x444   : > { %3872 = vrot.lane.b32.xlu1 %v14561_v4, %s11776_s6  ;;  %3866 = vrot.lane.b32.xlu0 %v14548_v44, %s11776_s6  ;;  %v4631_v4 = vmul.bf16 %v13649_v39, %v14662_v23  ;;  %v4628_v44 = vmul.bf16 %v13649_v39, %v14664_v35 }
 0x445   : > { %v4862_v49 = vsel %vm4840_vm7, %v4739_v61, %v4813_v1  ;;  %v4422_v12 = vsel %vm4401_vm8, %v4298_v38, %v4373_v26  ;;  %v11198_v14 = vld [vmem:[#allocation3 + $0x670] ss:$8 sps:$4 sm:$0xff]   ;;  %v11200_v3 = vld [vmem:[#allocation3 + $0x674] ss:$8 sps:$4 sm:$0xff]   ;;  %v4190_v61 = vmul.bf16 %v13679_v62, %v14694_v7 }
 0x446   : > { %4958 = vst.msk [vmem:[#allocation3 + $0x668] sm:$0xff] %vm13133_vm5, %v4862_v49  ;;  %4518 = vst.msk [vmem:[#allocation3 + $0x640] sm:$0xff] %vm13133_vm5, %v4422_v12  ;;  %v4304_v16 = vpop.permute.xlu1 %4303  ;;  %v5565_v28 = vpop.permute.xlu0 %5564  ;;  %8110 = vmatprep.subr.bf16.mxu0 %v11200_v3 }
 0x447   : > { %v4376_v25 = vrot.slane %v4304_v16, 4  ;;  %v5638_v18 = vrot.slane %v5565_v28, 4  ;;  %8111 = vmatpush2.bf16.msra.mxu0 %v11198_v14 }
 0x448   : > { %4758 = vrot.lane.b32.xlu1 %v4631_v4, %s11774_s29  ;;  %4752 = vrot.lane.b32.xlu0 %v4628_v44, %s11774_s29 }
 0x449   : > { %v4425_v24 = vsel %vm4401_vm8, %v4304_v16, %v4376_v25  ;;  %v5687_v56 = vsel %vm5664_vm2, %v5565_v28, %v5638_v18  ;;  %v11201_v30 = vld [vmem:[#allocation3 + $0x500] ss:$8 sps:$4 sm:$0xff]   ;;  %v11203_v33 = vld [vmem:[#allocation3 + $0x504] ss:$8 sps:$4 sm:$0xff]   ;;  %v5455_v28 = vmul.bf16 %v13480_v8, %v14662_v23 }
 0x44a   : > { %4521 = vst.msk [vmem:[#allocation3 + $0x658] sm:$0xff] %vm13133_vm5, %v4425_v24  ;;  %5783 = vst.msk [vmem:[#allocation3 + $0x6b0] sm:$0xff] %vm13133_vm5, %v5687_v56  ;;  %v4300_v36 = vpop.permute.xlu1 %4299  ;;  %v3863_v43 = vpop.permute.xlu0 %3862  ;;  %7807 = vmatprep.subr.bf16.mxu1 %v11203_v33 }
 0x44b   : > { %v4374_v27 = vrot.slane %v4300_v36, 4  ;;  %v3936_v11 = vrot.slane %v3863_v43, 4  ;;  %7808 = vmatpush2.bf16.msra.mxu1 %v11201_v30 }
 0x44c   : > { %3868 = vrot.lane.b32.xlu1 %v14584_v60, %s11776_s6  ;;  %4317 = vrot.lane.b32.xlu0 %v4191_v20, %s11775_s30  ;;  %v4629_v60 = vmul.bf16 %v13649_v39, %v14694_v7  ;;  %v14932_v20 = vld [vmem:[#allocation2 + $0x110] sm:$0xff] }
 0x44d   : > { %v4423_v17 = vsel %vm4401_vm8, %v4300_v36, %v4374_v27  ;;  %v3985_v10 = vsel %vm3962_vm9, %v3863_v43, %v3936_v11  ;;  %v11204_v15 = vld [vmem:[#allocation3 + $0x660] ss:$8 sps:$4 sm:$0xff]   ;;  %v11206_v29 = vld [vmem:[#allocation3 + $0x664] ss:$8 sps:$4 sm:$0xff]  }
 0x44e   : > { %4519 = vst.msk [vmem:[#allocation3 + $0x648] sm:$0xff] %vm13133_vm5, %v4423_v17  ;;  %4081 = vst.msk [vmem:[#allocation3 + $0x630] sm:$0xff] %vm13133_vm5, %v3985_v10  ;;  %v5567_v59 = vpop.permute.xlu1 %5566  ;;  %v5561_v50 = vpop.permute.xlu0 %5560  ;;  %8112 = vmatprep.subr.bf16.mxu0 %v11206_v29  ;;  %7810 = vmatmul.mubr.bf16.vlgmr.msra.gmra.mxu1 %v11214_v57  ;;  %v3371_v10 = vmul.bf16 %v13463_v2, %v14932_v20 }
 0x44f   : > { %v5639_v51 = vrot.slane %v5567_v59, 4  ;;  %v5636_v48 = vrot.slane %v5561_v50, 4  ;;  %8113 = vmatpush2.bf16.msra.mxu0 %v11204_v15  ;;  %7819 = vmatprep.mubr.bf16.mxu1 %v10467_v42 }
 0x450   : > { %4754 = vrot.lane.b32.xlu1 %v4629_v60, %s11774_s29  ;;  %4313 = vrot.lane.b32.xlu0 %v4189_v32, %s11775_s30  ;;  %v6610_v60 = vpop.f32.mrf.mxu1  ;;  %v11234_v32 = vld [vmem:[%s13629_s27 + $0xbc] ss:$12 sps:$4 sm:$0xff]  }
 0x451   : > { %v5688_v31 = vsel %vm5664_vm2, %v5567_v59, %v5639_v51  ;;  %v5685_v58 = vsel %vm5664_vm2, %v5561_v50, %v5636_v48  ;;  %v11207_v47 = vld [vmem:[#allocation3 + $0x650] ss:$8 sps:$4 sm:$0xff]   ;;  %v11209_v54 = vld [vmem:[#allocation3 + $0x654] ss:$8 sps:$4 sm:$0xff]   ;;  %v14948_v59 = vld [vmem:[#allocation2 + $0x100] sm:$0xff]  ;;  %v6559_v50 = vpop.f32.mrf.mxu0 }
 0x452   : > { %5784 = vst.msk [vmem:[#allocation3 + $0x6b8] sm:$0xff] %vm13133_vm5, %v5688_v31  ;;  %5781 = vst.msk [vmem:[#allocation3 + $0x6a0] sm:$0xff] %vm13133_vm5, %v5685_v58  ;;  %v3865_v21 = vpop.permute.xlu1 %3864  ;;  %v3859_v19 = vpop.permute.xlu0 %3858  ;;  %8114 = vmatprep.subr.bf16.mxu0 %v11209_v54  ;;  %v6611_v42 = vadd.f32 %v6610_v60, %v6559_v50 }
 0x453   : > { %v3937_v22 = vrot.slane %v3865_v21, 4  ;;  %v3934_v9 = vrot.slane %v3859_v19, 4  ;;  %8115 = vmatpush2.bf16.msra.mxu0 %v11207_v47  ;;  %v6561_v47 = vpop.f32.mrf.mxu0  ;;  %v6612_v54 = vpop.f32.mrf.mxu1 }
 0x454   : > { %4319 = vrot.lane.b32.xlu1 %v4192_v6, %s11775_s30  ;;  %5580 = vrot.lane.b32.xlu0 %v5454_v13, %s11771_s22  ;;  %v3369_v6 = vmul.bf16 %v13463_v2, %v14948_v59  ;;  %10070 = vst [vmem:[%s14955_s9] sm:$0xff] %v6611_v42  ;;  %v6613_v13 = vadd.f32 %v6612_v54, %v6561_v47 }
 0x455   : > { %v3986_v40 = vsel %vm3962_vm9, %v3865_v21, %v3937_v22  ;;  %v3983_v34 = vsel %vm3962_vm9, %v3859_v19, %v3934_v9  ;;  %v11211_v37 = vld [vmem:[#allocation3 + $0x640] ss:$8 sps:$4 sm:$0xff]   ;;  %v11213_v41 = vld [vmem:[#allocation3 + $0x644] ss:$8 sps:$4 sm:$0xff]  }
 0x456   : > { %4082 = vst.msk [vmem:[#allocation3 + $0x638] sm:$0xff] %vm13133_vm5, %v3986_v40  ;;  %4079 = vst.msk [vmem:[#allocation3 + $0x620] sm:$0xff] %vm13133_vm5, %v3983_v34  ;;  %v5563_v0 = vpop.permute.xlu1 %5562  ;;  %v3486_v45 = vpop.permute.xlu0 %3485  ;;  %8116 = vmatprep.subr.bf16.mxu0 %v11213_v41  ;;  %7820 = vmatmul.mubr.bf16.gmra.mxu1 %v10466_v46  ;;  %v14969_v40 = vld [vmem:[#allocation2 + $0x118] sm:$0xff]  ;;  %v14972_v34 = vld [vmem:[%s13629_s27 + $0xcc] sm:$0xff] }
 0x457   : > { %v5637_v38 = vrot.slane %v5563_v0, 4  ;;  %v3555_v1 = vrot.slane %v3486_v45, 4  ;;  %8117 = vmatpush2.bf16.msra.mxu0 %v11211_v37  ;;  %8173 = vmatprep.mubr.bf16.mxu1 %v16232_v53  ;;  %v6563_v37 = vpop.f32.mrf.mxu0  ;;  %v6614_v41 = vpop.f32.mrf.mxu1  ;;  %v11242_v46 = vld [vmem:[%s13629_s27 + $0xb4] ss:$12 sps:$4 sm:$0xff]   ;;  %10071 = vst.msk [vmem:[%s14955_s9 + $0x8] sm:$0xff] %vm381_vm0, %v6613_v13  ;;  %v2933_v60 = vmul.bf16 %v14969_v40, %v13493_v52 }
 0x458   : > { %4315 = vrot.lane.b32.xlu1 %v4190_v61, %s11775_s30  ;;  %3878 = vrot.lane.b32.xlu0 %v14638_v5, %s11776_s6  ;;  %v5452_v5 = vmul.bf16 %v13480_v8, %v14664_v35 }
 0x459   : > { %v5686_v26 = vsel %vm5664_vm2, %v5563_v0, %v5637_v38  ;;  %v3604_v49 = vsel %vm3577_vm1, %v3486_v45, %v3555_v1  ;;  %v11217_v12 = vld [vmem:[#allocation3 + $0x6b0] ss:$8 sps:$4 sm:$0xff]   ;;  %v11219_v14 = vld [vmem:[#allocation3 + $0x6b4] ss:$8 sps:$4 sm:$0xff]   ;;  %v6615_v0 = vadd.f32 %v6614_v41, %v6563_v37 }
 0x45a   : > { %5782 = vst.msk [vmem:[#allocation3 + $0x6a8] sm:$0xff] %vm13133_vm5, %v5686_v26  ;;  %3700 = vst.msk [vmem:[#allocation3 + $0x730] sm:$0xff] %vm13133_vm5, %v3604_v49  ;;  %v3861_v3 = vpop.permute.xlu1 %3860  ;;  %v3482_v16 = vpop.permute.xlu0 %3481  ;;  %8153 = vmatprep.subr.bf16.mxu1 %v11219_v14  ;;  %v3372_v14 = vmul.bf16 %v13463_v2, %v14969_v40 }
 0x45b   : > { %v3935_v4 = vrot.slane %v3861_v3, 4  ;;  %v3553_v44 = vrot.slane %v3482_v16, 4  ;;  %8154 = vmatpush1.bf16.msra.mxu1 %v11217_v12  ;;  %v6565_v26 = vpop.f32.mrf.mxu0  ;;  %v6616_v49 = vpop.f32.mrf.mxu1  ;;  %10072 = vst [vmem:[%s14955_s9 + $0x10] sm:$0xff] %v6615_v0 }
 0x45c   : > { %5582 = vrot.lane.b32.xlu1 %v5455_v28, %s11771_s22  ;;  %5576 = vrot.lane.b32.xlu0 %v5452_v5, %s11771_s22  ;;  %v6617_v28 = vadd.f32 %v6616_v49, %v6565_v26 }
 0x45d   : > { %v3984_v25 = vsel %vm3962_vm9, %v3861_v3, %v3935_v4  ;;  %v3602_v18 = vsel %vm3577_vm1, %v3482_v16, %v3553_v44  ;;  %v11220_v24 = vld [vmem:[#allocation3 + $0x630] ss:$8 sps:$4 sm:$0xff]   ;;  %v11222_v56 = vld [vmem:[#allocation3 + $0x634] ss:$8 sps:$4 sm:$0xff]   ;;  %v2932_v3 = vmul.bf16 %v14932_v20, %v13493_v52  ;;  %v10511_v16 = vcombine.high %v14972_v34, %v14972_v34  ;;  %v14995_v44 = vld [vmem:[#allocation2 + $0x108] sm:$0xff] }
 0x45e   : > { %4080 = vst.msk [vmem:[#allocation3 + $0x628] sm:$0xff] %vm13133_vm5, %v3984_v25  ;;  %3698 = vst.msk [vmem:[#allocation3 + $0x720] sm:$0xff] %vm13133_vm5, %v3602_v18  ;;  %v3488_v30 = vpop.permute.xlu1 %3487  ;;  %v3047_v33 = vpop.permute.xlu0 %3046  ;;  %8118 = vmatprep.subr.bf16.mxu0 %v11222_v56 }
 0x45f   : > { %v3556_v36 = vrot.slane %v3488_v30, 4  ;;  %v3116_v43 = vrot.slane %v3047_v33, 4  ;;  %8119 = vmatpush2.bf16.msra.mxu0 %v11220_v24  ;;  %10073 = vst.msk [vmem:[%s14955_s9 + $0x18] sm:$0xff] %vm381_vm0, %v6617_v28 }
 0x460   : > { %3880 = vrot.lane.b32.xlu1 %v14662_v23, %s11776_s6  ;;  %3874 = vrot.lane.b32.xlu0 %v14664_v35, %s11776_s6  ;;  %v5453_v35 = vmul.bf16 %v13480_v8, %v14694_v7 }
 0x461   : > { %v3605_v27 = vsel %vm3577_vm1, %v3488_v30, %v3556_v36  ;;  %v3165_v11 = vsel %vm3138_vm3, %v3047_v33, %v3116_v43  ;;  %v11224_v63 = vld [vmem:[#allocation3 + $0x6a0] ss:$8 sps:$4 sm:$0xff]   ;;  %v11226_v57 = vld [vmem:[#allocation3 + $0x6a4] ss:$8 sps:$4 sm:$0xff]   ;;  %v3370_v36 = vmul.bf16 %v13463_v2, %v14995_v44  ;;  %v5458_v43 = vmul.bf16 %v13480_v8, %v14932_v20 }
 0x462   : > { %3701 = vst.msk [vmem:[#allocation3 + $0x738] sm:$0xff] %vm13133_vm5, %v3605_v27  ;;  %3261 = vst.msk [vmem:[#allocation3 + $0x710] sm:$0xff] %vm13133_vm5, %v3165_v11  ;;  %v3484_v17 = vpop.permute.xlu1 %3483  ;;  %v5573_v23 = vpop.permute.xlu0 %5572  ;;  %8155 = vmatprep.subr.bf16.mxu1 %v11226_v57  ;;  %v11332_v27 = vld [vmem:[%s13629_s27 + $0xd4] ss:$0 sps:$4 sm:$0xff]   ;;  %v11338_v57 = vld [vmem:[%s13629_s27 + $0xdc] ss:$12 sps:$4 sm:$0xff]  }
 0x463   : > { %v3554_v15 = vrot.slane %v3484_v17, 4  ;;  %v5642_v29 = vrot.slane %v5573_v23, 4  ;;  %8156 = vmatpush1.bf16.msra.mxu1 %v11224_v63 }
 0x464   : > { %5578 = vrot.lane.b32.xlu1 %v5453_v35, %s11771_s22  ;;  %3501 = vrot.lane.b32.xlu0 %v3371_v10, %s11770_s19 }
 0x465   : > { %v3603_v51 = vsel %vm3577_vm1, %v3484_v17, %v3554_v15  ;;  %v5691_v48 = vsel %vm5664_vm2, %v5573_v23, %v5642_v29  ;;  %v11228_v31 = vld [vmem:[#allocation3 + $0x620] ss:$8 sps:$4 sm:$0xff]   ;;  %v11230_v58 = vld [vmem:[#allocation3 + $0x624] ss:$8 sps:$4 sm:$0xff]   ;;  %v10510_v15 = vcombine.low %v14972_v34, %v14972_v34 }
 0x466   : > { %3699 = vst.msk [vmem:[#allocation3 + $0x728] sm:$0xff] %vm13133_vm5, %v3603_v51  ;;  %5787 = vst.msk [vmem:[#allocation3 + $0x7d0] sm:$0xff] %vm13133_vm5, %v5691_v48  ;;  %v3049_v21 = vpop.permute.xlu1 %3048  ;;  %v3043_v19 = vpop.permute.xlu0 %3042  ;;  %8120 = vmatprep.subr.bf16.mxu0 %v11230_v58  ;;  %10549 = vmatmul.mubr.msk.bf16.vlgmr.msra.gmra.mxu1 %vm6518_vm6, %v11234_v32  ;;  %v2930_v32 = vmul.bf16 %v14948_v59, %v13493_v52 }
 0x467   : > { %v3117_v22 = vrot.slane %v3049_v21, 4  ;;  %v3114_v9 = vrot.slane %v3043_v19, 4  ;;  %8121 = vmatpush2.bf16.msra.mxu0 %v11228_v31  ;;  %8183 = vmatprep.mubr.bf16.mxu1 %v16232_v53 }
 0x468   : > { %3876 = vrot.lane.b32.xlu1 %v14694_v7, %s11776_s6  ;;  %3497 = vrot.lane.b32.xlu0 %v3369_v6, %s11770_s19  ;;  %v5456_v6 = vmul.bf16 %v13480_v8, %v14948_v59 }
 0x469   : > { %v3166_v45 = vsel %vm3138_vm3, %v3049_v21, %v3117_v22  ;;  %v3163_v61 = vsel %vm3138_vm3, %v3043_v19, %v3114_v9  ;;  %v11231_v38 = vld [vmem:[#allocation3 + $0x730] ss:$8 sps:$4 sm:$0xff]   ;;  %v11233_v1 = vld [vmem:[#allocation3 + $0x734] ss:$8 sps:$4 sm:$0xff]   ;;  %v5459_v19 = vmul.bf16 %v13480_v8, %v14969_v40 }
 0x46a   : > { %3262 = vst.msk [vmem:[#allocation3 + $0x718] sm:$0xff] %vm13133_vm5, %v3166_v45  ;;  %3259 = vst.msk [vmem:[#allocation3 + $0x700] sm:$0xff] %vm13133_vm5, %v3163_v61  ;;  %v5575_v7 = vpop.permute.xlu1 %5574  ;;  %v5569_v12 = vpop.permute.xlu0 %5568  ;;  %8403 = vmatprep.subr.bf16.mxu1 %v11233_v1  ;;  %8123 = vmatmul.mubr.bf16.vlgmr.msra.gmra.mxu0 %v11242_v46  ;;  %v2931_v45 = vmul.bf16 %v14995_v44, %v13493_v52  ;;  %v15051_v1 = vld [vmem:[#allocation2 + $0x130] sm:$0xff] }
 0x46b   : > { %v5643_v5 = vrot.slane %v5575_v7, 4  ;;  %v5640_v4 = vrot.slane %v5569_v12, 4  ;;  %8404 = vmatpush1.bf16.msra.mxu1 %v11231_v38  ;;  %8132 = vmatprep.mubr.bf16.mxu0 %v10511_v16  ;;  %v5457_v16 = vmul.bf16 %v13480_v8, %v14995_v44  ;;  %v3375_v28 = vmul.bf16 %v13463_v2, %v15051_v1 }
 0x46c   : > { %3503 = vrot.lane.b32.xlu1 %v3372_v14, %s11770_s19  ;;  %3062 = vrot.lane.b32.xlu0 %v2932_v3, %s11772_s23 }
 0x46d   : > { %v5692_v25 = vsel %vm5664_vm2, %v5575_v7, %v5643_v5  ;;  %v5689_v18 = vsel %vm5664_vm2, %v5569_v12, %v5640_v4  ;;  %v11235_v24 = vld [vmem:[#allocation3 + $0x720] ss:$8 sps:$4 sm:$0xff]   ;;  %v11237_v56 = vld [vmem:[#allocation3 + $0x724] ss:$8 sps:$4 sm:$0xff]  }
 0x46e   : > { %5788 = vst.msk [vmem:[#allocation3 + $0x7d8] sm:$0xff] %vm13133_vm5, %v5692_v25  ;;  %5785 = vst.msk [vmem:[#allocation3 + $0x7c0] sm:$0xff] %vm13133_vm5, %v5689_v18  ;;  %v3045_v30 = vpop.permute.xlu1 %3044  ;;  %v2566_v33 = vpop.permute.xlu0 %2565  ;;  %8405 = vmatprep.subr.bf16.mxu1 %v11237_v56  ;;  %10550 = vmatmul.mubr.msk.bf16.gmra.mxu1 %vm6518_vm6, %v11332_v27  ;;  %v11262_v25 = vld [vmem:[%s13629_s27 + $0xe0] ss:$12 sps:$4 sm:$0xff]  }
 0x46f   : > { %v3115_v11 = vrot.slane %v3045_v30, 4  ;;  %v2635_v63 = vrot.slane %v2566_v33, 4  ;;  %8406 = vmatpush1.bf16.msra.mxu1 %v11235_v24  ;;  %8435 = vmatprep.mubr.bf16.mxu1 %v11338_v57 }
 0x470   : > { %3499 = vrot.lane.b32.xlu1 %v3370_v36, %s11770_s19  ;;  %5588 = vrot.lane.b32.xlu0 %v5458_v43, %s11771_s22 }
 0x471   : > { %v3164_v17 = vsel %vm3138_vm3, %v3045_v30, %v3115_v11  ;;  %v2684_v23 = vsel %vm2657_vm14, %v2566_v33, %v2635_v63  ;;  %v11239_v35 = vld [vmem:[#allocation3 + $0x710] ss:$8 sps:$4 sm:$0xff]   ;;  %v11241_v10 = vld [vmem:[#allocation3 + $0x714] ss:$8 sps:$4 sm:$0xff]   ;;  %v15077_v63 = vld [vmem:[#allocation2 + $0x120] sm:$0xff] }
 0x472   : > { %3260 = vst.msk [vmem:[#allocation3 + $0x708] sm:$0xff] %vm13133_vm5, %v3164_v17  ;;  %2780 = vst.msk [vmem:[#allocation3 + $0x6f0] sm:$0xff] %vm13133_vm5, %v2684_v23  ;;  %v5571_v29 = vpop.permute.xlu1 %5570  ;;  %v3494_v50 = vpop.permute.xlu0 %3493  ;;  %8407 = vmatprep.subr.bf16.mxu1 %v11241_v10  ;;  %8133 = vmatmul.mubr.bf16.gmra.mxu0 %v10510_v15  ;;  %v15075_v11 = vld [vmem:[#allocation2 + $0x138] sm:$0xff] }
 0x473   : > { %v5641_v42 = vrot.slane %v5571_v29, 4  ;;  %v3559_v51 = vrot.slane %v3494_v50, 4  ;;  %8408 = vmatpush1.bf16.msra.mxu1 %v11239_v35  ;;  %8486 = vmatprep.mubr.bf16.mxu0 %v16232_v53 }
 0x474   : > { %3064 = vrot.lane.b32.xlu1 %v2933_v60, %s11772_s23  ;;  %3058 = vrot.lane.b32.xlu0 %v2930_v32, %s11772_s23 }
 0x475   : > { %v5690_v48 = vsel %vm5664_vm2, %v5571_v29, %v5641_v42  ;;  %v3608_v31 = vsel %vm3577_vm1, %v3494_v50, %v3559_v51  ;;  %v11245_v58 = vld [vmem:[#allocation3 + $0x7d0] ss:$8 sps:$4 sm:$0xff]   ;;  %v11247_v47 = vld [vmem:[#allocation3 + $0x7d4] ss:$8 sps:$4 sm:$0xff]   ;;  %v3376_v29 = vmul.bf16 %v13463_v2, %v15075_v11  ;;  %v3373_v50 = vmul.bf16 %v13463_v2, %v15077_v63 }
 0x476   : > { %5786 = vst.msk [vmem:[#allocation3 + $0x7c8] sm:$0xff] %vm13133_vm5, %v5690_v48  ;;  %3704 = vst.msk [vmem:[#allocation3 + $0x850] sm:$0xff] %vm13133_vm5, %v3608_v31  ;;  %v2568_v54 = vpop.permute.xlu1 %2567  ;;  %v2562_v21 = vpop.permute.xlu0 %2561  ;;  %8466 = vmatprep.subr.bf16.mxu0 %v11247_v47  ;;  %v11359_v42 = vld [vmem:[%s13629_s27 + $0xf8] ss:$0 sps:$4 sm:$0xff]  }
 0x477   : > { %v2636_v13 = vrot.slane %v2568_v54, 4  ;;  %v2633_v22 = vrot.slane %v2562_v21, 4  ;;  %8467 = vmatpush1.bf16.msra.mxu0 %v11245_v58 }
 0x478   : > { %5590 = vrot.lane.b32.xlu1 %v5459_v19, %s11771_s22  ;;  %5584 = vrot.lane.b32.xlu0 %v5456_v6, %s11771_s22  ;;  %v11365_v19 = vld [vmem:[%s13629_s27 + $0x100] ss:$12 sps:$4 sm:$0xff]  }
 0x479   : > { %v2685_v9 = vsel %vm2657_vm14, %v2568_v54, %v2636_v13  ;;  %v2682_v34 = vsel %vm2657_vm14, %v2562_v21, %v2633_v22  ;;  %v11248_v37 = vld [vmem:[#allocation3 + $0x700] ss:$8 sps:$4 sm:$0xff]   ;;  %v11250_v41 = vld [vmem:[#allocation3 + $0x704] ss:$8 sps:$4 sm:$0xff]   ;;  %v2936_v21 = vmul.bf16 %v15051_v1, %v13493_v52 }
 0x47a   : > { %2781 = vst.msk [vmem:[#allocation3 + $0x6f8] sm:$0xff] %vm13133_vm5, %v2685_v9  ;;  %2778 = vst.msk [vmem:[#allocation3 + $0x6e0] sm:$0xff] %vm13133_vm5, %v2682_v34  ;;  %v3496_v46 = vpop.permute.xlu1 %3495  ;;  %v3490_v0 = vpop.permute.xlu0 %3489  ;;  %8409 = vmatprep.subr.bf16.mxu1 %v11250_v41  ;;  %v15107_v22 = vld [vmem:[#allocation2 + $0x128] sm:$0xff]  ;;  %v11268_v9 = vld [vmem:[#allocation3 + $0x6d4] ss:$8 sps:$4 sm:$0xff]  }
 0x47b   : > { %v3560_v61 = vrot.slane %v3496_v46, 4  ;;  %v3557_v38 = vrot.slane %v3490_v0, 4  ;;  %8410 = vmatpush1.bf16.msra.mxu1 %v11248_v37 }
 0x47c   : > { %3060 = vrot.lane.b32.xlu1 %v2931_v45, %s11772_s23  ;;  %2581 = vrot.lane.b32.xlu0 %v14932_v20, %s11769_s17 }
 0x47d   : > { %v3609_v26 = vsel %vm3577_vm1, %v3496_v46, %v3560_v61  ;;  %v3606_v49 = vsel %vm3577_vm1, %v3490_v0, %v3557_v38  ;;  %v11252_v7 = vld [vmem:[#allocation3 + $0x7c0] ss:$8 sps:$4 sm:$0xff]   ;;  %v11254_v12 = vld [vmem:[#allocation3 + $0x7c4] ss:$8 sps:$4 sm:$0xff]   ;;  %v3374_v61 = vmul.bf16 %v13463_v2, %v15107_v22  ;;  %v2934_v38 = vmul.bf16 %v15077_v63, %v13493_v52 }
 0x47e   : > { %3705 = vst.msk [vmem:[#allocation3 + $0x858] sm:$0xff] %vm13133_vm5, %v3609_v26  ;;  %3702 = vst.msk [vmem:[#allocation3 + $0x840] sm:$0xff] %vm13133_vm5, %v3606_v49  ;;  %v2564_v14 = vpop.permute.xlu1 %2563  ;;  %v3055_v3 = vpop.permute.xlu0 %3054  ;;  %8468 = vmatprep.subr.bf16.mxu0 %v11254_v12  ;;  %v11266_v49 = vld [vmem:[#allocation3 + $0x6d0] ss:$8 sps:$4 sm:$0xff]   ;;  %v11274_v12 = vld [vmem:[#allocation3 + $0x6c4] ss:$8 sps:$4 sm:$0xff]  }
 0x47f   : > { %v2634_v5 = vrot.slane %v2564_v14, 4  ;;  %v3120_v4 = vrot.slane %v3055_v3, 4  ;;  %8469 = vmatpush1.bf16.msra.mxu0 %v11252_v7 }
 0x480   : > { %5586 = vrot.lane.b32.xlu1 %v5457_v16, %s11771_s22  ;;  %3509 = vrot.lane.b32.xlu0 %v3375_v28, %s11770_s19 }
 0x481   : > { %v2683_v18 = vsel %vm2657_vm14, %v2564_v14, %v2634_v5  ;;  %v3169_v24 = vsel %vm3138_vm3, %v3055_v3, %v3120_v4  ;;  %v11256_v56 = vld [vmem:[#allocation3 + $0x6f0] ss:$8 sps:$4 sm:$0xff]   ;;  %v11258_v30 = vld [vmem:[#allocation3 + $0x6f4] ss:$8 sps:$4 sm:$0xff]  }
 0x482   : > { %2779 = vst.msk [vmem:[#allocation3 + $0x6e8] sm:$0xff] %vm13133_vm5, %v2683_v18  ;;  %3265 = vst.msk [vmem:[#allocation3 + $0x830] sm:$0xff] %vm13133_vm5, %v3169_v24  ;;  %v3492_v33 = vpop.permute.xlu1 %3491  ;;  %v3051_v36 = vpop.permute.xlu0 %3050  ;;  %8411 = vmatprep.subr.bf16.mxu1 %v11258_v30  ;;  %10593 = vmatmul.mubr.msk.bf16.vlgmr.msra.gmra.mxu0 %vm6518_vm6, %v11262_v25  ;;  %v2937_v25 = vmul.bf16 %v15075_v11, %v13493_v52  ;;  %v11272_v24 = vld [vmem:[#allocation3 + $0x6c0] ss:$8 sps:$4 sm:$0xff]  }
 0x483   : > { %v3558_v43 = vrot.slane %v3492_v33, 4  ;;  %v3118_v27 = vrot.slane %v3051_v36, 4  ;;  %8412 = vmatpush1.bf16.msra.mxu1 %v11256_v56  ;;  %8496 = vmatprep.mubr.bf16.mxu0 %v16232_v53 }
 0x484   : > { %2583 = vrot.lane.b32.xlu1 %v14969_v40, %s11769_s17  ;;  %2577 = vrot.lane.b32.xlu0 %v14948_v59, %s11769_s17 }
 0x485   : > { %v3607_v57 = vsel %vm3577_vm1, %v3492_v33, %v3558_v43  ;;  %v3167_v17 = vsel %vm3138_vm3, %v3051_v36, %v3118_v27  ;;  %v11259_v23 = vld [vmem:[#allocation3 + $0x850] ss:$8 sps:$4 sm:$0xff]   ;;  %v11261_v35 = vld [vmem:[#allocation3 + $0x854] ss:$8 sps:$4 sm:$0xff]  }
 0x486   : > { %3703 = vst.msk [vmem:[#allocation3 + $0x848] sm:$0xff] %vm13133_vm5, %v3607_v57  ;;  %3263 = vst.msk [vmem:[#allocation3 + $0x820] sm:$0xff] %vm13133_vm5, %v3167_v17  ;;  %v3057_v10 = vpop.permute.xlu1 %3056  ;;  %v2574_v15 = vpop.permute.xlu0 %2573  ;;  %8716 = vmatprep.subr.bf16.mxu0 %v11261_v35  ;;  %v2935_v17 = vmul.bf16 %v15107_v22, %v13493_v52 }
 0x487   : > { %v3121_v60 = vrot.slane %v3057_v10, 4  ;;  %v2639_v32 = vrot.slane %v2574_v15, 4  ;;  %8717 = vmatpush1.bf16.msra.mxu0 %v11259_v23 }
 0x488   : > { %3511 = vrot.lane.b32.xlu1 %v3376_v29, %s11770_s19  ;;  %3505 = vrot.lane.b32.xlu0 %v3373_v50, %s11770_s19 }
 0x489   : > { %v3170_v51 = vsel %vm3138_vm3, %v3057_v10, %v3121_v60  ;;  %v2688_v48 = vsel %vm2657_vm14, %v2574_v15, %v2639_v32  ;;  %v11263_v31 = vld [vmem:[#allocation3 + $0x6e0] ss:$8 sps:$4 sm:$0xff]   ;;  %v11265_v58 = vld [vmem:[#allocation3 + $0x6e4] ss:$8 sps:$4 sm:$0xff]  }
 0x48a   : > { %3266 = vst.msk [vmem:[#allocation3 + $0x838] sm:$0xff] %vm13133_vm5, %v3170_v51  ;;  %2784 = vst.msk [vmem:[#allocation3 + $0x810] sm:$0xff] %vm13133_vm5, %v2688_v48  ;;  %v3053_v47 = vpop.permute.xlu1 %3052  ;;  %v5134_v54 = vpop.permute.xlu0 %5133  ;;  %8413 = vmatprep.subr.bf16.mxu1 %v11265_v58  ;;  %10594 = vmatmul.mubr.msk.bf16.gmra.mxu0 %vm6518_vm6, %v11359_v42 }
 0x48b   : > { %v3119_v6 = vrot.slane %v3053_v47, 4  ;;  %v5203_v13 = vrot.slane %v5134_v54, 4  ;;  %8414 = vmatpush1.bf16.msra.mxu1 %v11263_v31  ;;  %8748 = vmatprep.mubr.bf16.mxu0 %v11365_v19  ;;  %v6569_v48 = vpop.f32.mrf.mxu0  ;;  %v6620_v31 = vpop.f32.mrf.mxu1 }
 0x48c   : > { %2579 = vrot.lane.b32.xlu1 %v14995_v44, %s11769_s17  ;;  %3070 = vrot.lane.b32.xlu0 %v2936_v21, %s11772_s23  ;;  %v6621_v58 = vadd.f32 %v6620_v31, %v6569_v48 }
 0x48d   : > { %v3168_v34 = vsel %vm3138_vm3, %v3053_v47, %v3119_v6  ;;  %v5252_v37 = vsel %vm5225_vm4, %v5134_v54, %v5203_v13  ;;  %v11269_v41 = vld [vmem:[#allocation3 + $0x840] ss:$8 sps:$4 sm:$0xff]   ;;  %v11271_v46 = vld [vmem:[#allocation3 + $0x844] ss:$8 sps:$4 sm:$0xff]   ;;  %8415 = vmatprep.subr.bf16.mxu1 %v11268_v9  ;;  %v6571_v6 = vpop.f32.mrf.mxu0  ;;  %v6622_v13 = vpop.f32.mrf.mxu1 }
 0x48e   : > { %3264 = vst.msk [vmem:[#allocation3 + $0x828] sm:$0xff] %vm13133_vm5, %v3168_v34  ;;  %5348 = vst.msk [vmem:[#allocation3 + $0x7b0] sm:$0xff] %vm13133_vm5, %v5252_v37  ;;  %v2576_v0 = vpop.permute.xlu1 %2575  ;;  %v2570_v45 = vpop.permute.xlu0 %2569  ;;  %8718 = vmatprep.subr.bf16.mxu0 %v11271_v46  ;;  %v6623_v37 = vadd.f32 %v6622_v13, %v6571_v6  ;;  %v4635_v6 = vmul.bf16 %v13649_v39, %v14969_v40  ;;  %v4195_v13 = vmul.bf16 %v13679_v62, %v14932_v20 }
 0x48f   : > { %v2640_v26 = vrot.slane %v2576_v0, 4  ;;  %v2637_v7 = vrot.slane %v2570_v45, 4  ;;  %8416 = vmatpush1.bf16.msra.mxu1 %v11266_v49  ;;  %8719 = vmatpush1.bf16.msra.mxu0 %v11269_v41  ;;  %10074 = vst [vmem:[%s14955_s9 + $0x20] sm:$0xff] %v6621_v58 }
 0x490   : > { %3507 = vrot.lane.b32.xlu1 %v3374_v61, %s11770_s19  ;;  %3066 = vrot.lane.b32.xlu0 %v2934_v38, %s11772_s23  ;;  %10075 = vst.msk [vmem:[%s14955_s9 + $0x28] sm:$0xff] %vm381_vm0, %v6623_v37  ;;  %v11296_v37 = vld [vmem:[#allocation3 + $0x7e0] ss:$8 sps:$4 sm:$0xff]  }
 0x491   : > { %v2689_v14 = vsel %vm2657_vm14, %v2576_v0, %v2640_v26  ;;  %v2686_v3 = vsel %vm2657_vm14, %v2570_v45, %v2637_v7  ;;  %v11275_v16 = vld [vmem:[#allocation3 + $0x830] ss:$8 sps:$4 sm:$0xff]   ;;  %v11277_v28 = vld [vmem:[#allocation3 + $0x834] ss:$8 sps:$4 sm:$0xff]   ;;  %8417 = vmatprep.subr.bf16.mxu1 %v11274_v12  ;;  %v6573_v0 = vpop.f32.mrf.mxu0  ;;  %v6624_v45 = vpop.f32.mrf.mxu1 }
 0x492   : > { %2785 = vst.msk [vmem:[#allocation3 + $0x818] sm:$0xff] %vm13133_vm5, %v2689_v14  ;;  %2782 = vst.msk [vmem:[#allocation3 + $0x800] sm:$0xff] %vm13133_vm5, %v2686_v3  ;;  %v5136_v5 = vpop.permute.xlu1 %5135  ;;  %v5130_v4 = vpop.permute.xlu0 %5129  ;;  %8720 = vmatprep.subr.bf16.mxu0 %v11277_v28 }
 0x493   : > { %v5204_v18 = vrot.slane %v5136_v5, 4  ;;  %v5201_v56 = vrot.slane %v5130_v4, 4  ;;  %8418 = vmatpush1.bf16.msra.mxu1 %v11272_v24  ;;  %8721 = vmatpush1.bf16.msra.mxu0 %v11275_v16  ;;  %v6574_v7 = vpop.f32.mrf.mxu0  ;;  %v6625_v12 = vpop.f32.mrf.mxu1  ;;  %v4634_v16 = vmul.bf16 %v13649_v39, %v14932_v20 }
 0x494   : > { %3072 = vrot.lane.b32.xlu1 %v2937_v25, %s11772_s23  ;;  %2589 = vrot.lane.b32.xlu0 %v15051_v1, %s11769_s17 }
 0x495   : > { %v5253_v30 = vsel %vm5225_vm4, %v5136_v5, %v5204_v18  ;;  %v5250_v33 = vsel %vm5225_vm4, %v5130_v4, %v5201_v56  ;;  %v11278_v36 = vld [vmem:[#allocation3 + $0x820] ss:$8 sps:$4 sm:$0xff]   ;;  %v11280_v43 = vld [vmem:[#allocation3 + $0x824] ss:$8 sps:$4 sm:$0xff]   ;;  %v6872_v4 = vpop.f32.mrf.mxu1  ;;  %v6923_v25 = vpop.f32.mrf.mxu0  ;;  %v11292_v18 = vld [vmem:[#allocation3 + $0x7f4] ss:$8 sps:$4 sm:$0xff]  }
 0x496   : > { %5349 = vst.msk [vmem:[#allocation3 + $0x7b8] sm:$0xff] %vm13133_vm5, %v5253_v30  ;;  %5346 = vst.msk [vmem:[#allocation3 + $0x7a0] sm:$0xff] %vm13133_vm5, %v5250_v33  ;;  %v2572_v27 = vpop.permute.xlu1 %2571  ;;  %v4749_v57 = vpop.permute.xlu0 %4748  ;;  %8722 = vmatprep.subr.bf16.mxu0 %v11280_v43  ;;  %v6924_v24 = vadd.f32 %v6923_v25, %v6872_v4 }
 0x497   : > { %v2638_v23 = vrot.slane %v2572_v27, 4  ;;  %v4818_v35 = vrot.slane %v4749_v57, 4  ;;  %8723 = vmatpush1.bf16.msra.mxu0 %v11278_v36  ;;  %v6874_v43 = vpop.f32.mrf.mxu1 }
 0x498   : > { %3068 = vrot.lane.b32.xlu1 %v2935_v17, %s11772_s23  ;;  %5149 = vrot.lane.b32.xlu0 %v14932_v20, %s11773_s28  ;;  %10076 = vst [vmem:[%s14955_s9 + $0x30] sm:$0xff] %v6924_v24 }
 0x499   : > { %v2687_v10 = vsel %vm2657_vm14, %v2572_v27, %v2638_v23  ;;  %v4867_v15 = vsel %vm4840_vm7, %v4749_v57, %v4818_v35  ;;  %v11281_v29 = vld [vmem:[#allocation3 + $0x810] ss:$8 sps:$4 sm:$0xff]   ;;  %v11283_v50 = vld [vmem:[#allocation3 + $0x814] ss:$8 sps:$4 sm:$0xff]   ;;  %v6925_v27 = vpop.f32.mrf.mxu0  ;;  %v4632_v23 = vmul.bf16 %v13649_v39, %v14948_v59 }
 0x49a   : > { %2783 = vst.msk [vmem:[#allocation3 + $0x808] sm:$0xff] %vm13133_vm5, %v2687_v10  ;;  %4963 = vst.msk [vmem:[#allocation3 + $0x790] sm:$0xff] %vm13133_vm5, %v4867_v15  ;;  %v5132_v60 = vpop.permute.xlu1 %5131  ;;  %v4745_v32 = vpop.permute.xlu0 %4744  ;;  %8724 = vmatprep.subr.bf16.mxu0 %v11283_v50  ;;  %v6926_v35 = vadd.f32 %v6925_v27, %v6874_v43  ;;  %v11290_v15 = vld [vmem:[#allocation3 + $0x7f0] ss:$8 sps:$4 sm:$0xff]  }
 0x49b   : > { %v5202_v42 = vrot.slane %v5132_v60, 4  ;;  %v4816_v51 = vrot.slane %v4745_v32, 4  ;;  %8725 = vmatpush1.bf16.msra.mxu0 %v11281_v29  ;;  %v6876_v50 = vpop.f32.mrf.mxu1 }
 0x49c   : > { %2591 = vrot.lane.b32.xlu1 %v15075_v11, %s11769_s17  ;;  %2585 = vrot.lane.b32.xlu0 %v15077_v63, %s11769_s17  ;;  %10077 = vst.msk [vmem:[%s14955_s9 + $0x38] sm:$0xff] %vm381_vm0, %v6926_v35 }
 0x49d   : > { %v5251_v47 = vsel %vm5225_vm4, %v5132_v60, %v5202_v42  ;;  %v4865_v54 = vsel %vm4840_vm7, %v4745_v32, %v4816_v51  ;;  %v11284_v21 = vld [vmem:[#allocation3 + $0x7b0] ss:$8 sps:$4 sm:$0xff]   ;;  %v11286_v19 = vld [vmem:[#allocation3 + $0x7b4] ss:$8 sps:$4 sm:$0xff]   ;;  %v6927_v60 = vpop.f32.mrf.mxu0  ;;  %v11298_v32 = vld [vmem:[#allocation3 + $0x7e4] ss:$8 sps:$4 sm:$0xff]  }
 0x49e   : > { %5347 = vst.msk [vmem:[#allocation3 + $0x7a8] sm:$0xff] %vm13133_vm5, %v5251_v47  ;;  %4961 = vst.msk [vmem:[#allocation3 + $0x780] sm:$0xff] %vm13133_vm5, %v4865_v54  ;;  %v4751_v9 = vpop.permute.xlu1 %4750  ;;  %v4310_v34 = vpop.permute.xlu0 %4309  ;;  %8419 = vmatprep.subr.bf16.mxu1 %v11286_v19  ;;  %v6928_v42 = vadd.f32 %v6927_v60, %v6876_v50 }
 0x49f   : > { %v4819_v41 = vrot.slane %v4751_v9, 4  ;;  %v4379_v46 = vrot.slane %v4310_v34, 4  ;;  %8420 = vmatpush2.bf16.msra.mxu1 %v11284_v21  ;;  %v6878_v47 = vpop.f32.mrf.mxu1  ;;  %v6929_v54 = vpop.f32.mrf.mxu0 }
 0x4a0   : > { %5151 = vrot.lane.b32.xlu1 %v14969_v40, %s11773_s28  ;;  %5145 = vrot.lane.b32.xlu0 %v14948_v59, %s11773_s28  ;;  %10078 = vst [vmem:[%s14955_s9 + $0x40] sm:$0xff] %v6928_v42 }
 0x4a1   : > { %v4868_v61 = vsel %vm4840_vm7, %v4751_v9, %v4819_v41  ;;  %v4428_v38 = vsel %vm4401_vm8, %v4310_v34, %v4379_v46  ;;  %v11287_v26 = vld [vmem:[#allocation3 + $0x800] ss:$8 sps:$4 sm:$0xff]   ;;  %v11289_v49 = vld [vmem:[#allocation3 + $0x804] ss:$8 sps:$4 sm:$0xff]   ;;  %v6930_v9 = vadd.f32 %v6929_v54, %v6878_v47  ;;  %v6882_v46 = vpop.f32.mrf.mxu1  ;;  %v6933_v0 = vpop.f32.mrf.mxu0 }
 0x4a2   : > { %4964 = vst.msk [vmem:[#allocation3 + $0x798] sm:$0xff] %vm13133_vm5, %v4868_v61  ;;  %4524 = vst.msk [vmem:[#allocation3 + $0x770] sm:$0xff] %vm13133_vm5, %v4428_v38  ;;  %v4747_v14 = vpop.permute.xlu1 %4746  ;;  %v5142_v3 = vpop.permute.xlu0 %5141  ;;  %8726 = vmatprep.subr.bf16.mxu0 %v11289_v49  ;;  %v6934_v45 = vadd.f32 %v6933_v0, %v6882_v46 }
 0x4a3   : > { %v4817_v28 = vrot.slane %v4747_v14, 4  ;;  %v5207_v5 = vrot.slane %v5142_v3, 4  ;;  %8727 = vmatpush1.bf16.msra.mxu0 %v11287_v26  ;;  %10079 = vst.msk [vmem:[%s14955_s9 + $0x48] sm:$0xff] %vm381_vm0, %v6930_v9  ;;  %v6884_v49 = vpop.f32.mrf.mxu1  ;;  %v6935_v7 = vpop.f32.mrf.mxu0 }
 0x4a4   : > { %2587 = vrot.lane.b32.xlu1 %v15107_v22, %s11769_s17  ;;  %4764 = vrot.lane.b32.xlu0 %v4634_v16, %s11774_s29  ;;  %10080 = vst [vmem:[%s14955_s9 + $0x50] sm:$0xff] %v6934_v45  ;;  %v6936_v16 = vadd.f32 %v6935_v7, %v6884_v49  ;;  %v11749_v49 = vld [vmem:[#allocation2 + $0x110] sm:$0xff] }
 0x4a5   : > { %v4866_v56 = vsel %vm4840_vm7, %v4747_v14, %v4817_v28  ;;  %v5256_v30 = vsel %vm5225_vm4, %v5142_v3, %v5207_v5  ;;  %v11293_v33 = vld [vmem:[#allocation3 + $0x7a0] ss:$8 sps:$4 sm:$0xff]   ;;  %v11295_v36 = vld [vmem:[#allocation3 + $0x7a4] ss:$8 sps:$4 sm:$0xff]   ;;  %8728 = vmatprep.subr.bf16.mxu0 %v11292_v18  ;;  %v4633_v3 = vmul.bf16 %v13649_v39, %v14995_v44  ;;  %v6886_v4 = vpop.f32.mrf.mxu1  ;;  %v6937_v25 = vpop.f32.mrf.mxu0 }
 0x4a6   : > { %4962 = vst.msk [vmem:[#allocation3 + $0x788] sm:$0xff] %vm13133_vm5, %v4866_v56  ;;  %5352 = vst.msk [vmem:[#allocation3 + $0x8d0] sm:$0xff] %vm13133_vm5, %v5256_v30  ;;  %v4312_v57 = vpop.permute.xlu1 %4311  ;;  %v4306_v17 = vpop.permute.xlu0 %4305  ;;  %8421 = vmatprep.subr.bf16.mxu1 %v11295_v36 }
 0x4a7   : > { %v4380_v10 = vrot.slane %v4312_v57, 4  ;;  %v4377_v29 = vrot.slane %v4306_v17, 4  ;;  %8422 = vmatpush2.bf16.msra.mxu1 %v11293_v33  ;;  %8729 = vmatpush1.bf16.msra.mxu0 %v11290_v15  ;;  %10081 = vst.msk [vmem:[%s14955_s9 + $0x58] sm:$0xff] %vm381_vm0, %v6936_v16  ;;  %v6887_v33 = vpop.f32.mrf.mxu1  ;;  %v6938_v36 = vpop.f32.mrf.mxu0 }
 0x4a8   : > { %5147 = vrot.lane.b32.xlu1 %v14995_v44, %s11773_s28  ;;  %4760 = vrot.lane.b32.xlu0 %v4632_v23, %s11774_s29 }
 0x4a9   : > { %v4429_v51 = vsel %vm4401_vm8, %v4312_v57, %v4380_v10  ;;  %v4426_v48 = vsel %vm4401_vm8, %v4306_v17, %v4377_v29  ;;  %v11299_v31 = vld [vmem:[#allocation3 + $0x790] ss:$8 sps:$4 sm:$0xff]   ;;  %v11301_v58 = vld [vmem:[#allocation3 + $0x794] ss:$8 sps:$4 sm:$0xff]   ;;  %8730 = vmatprep.subr.bf16.mxu0 %v11298_v32  ;;  %v4196_v57 = vmul.bf16 %v13679_v62, %v14969_v40  ;;  %v4193_v17 = vmul.bf16 %v13679_v62, %v14948_v59  ;;  %v7185_v10 = vpop.f32.mrf.mxu1  ;;  %v7236_v15 = vpop.f32.mrf.mxu0 }
 0x4aa   : > { %4525 = vst.msk [vmem:[#allocation3 + $0x778] sm:$0xff] %vm13133_vm5, %v4429_v51  ;;  %4522 = vst.msk [vmem:[#allocation3 + $0x760] sm:$0xff] %vm13133_vm5, %v4426_v48  ;;  %v5144_v21 = vpop.permute.xlu1 %5143  ;;  %v5138_v19 = vpop.permute.xlu0 %5137  ;;  %8423 = vmatprep.subr.bf16.mxu1 %v11301_v58  ;;  %v7237_v29 = vadd.f32 %v7236_v15, %v7185_v10 }
 0x4ab   : > { %v5208_v34 = vrot.slane %v5144_v21, 4  ;;  %v5205_v41 = vrot.slane %v5138_v19, 4  ;;  %8424 = vmatpush2.bf16.msra.mxu1 %v11299_v31  ;;  %8731 = vmatpush1.bf16.msra.mxu0 %v11296_v37  ;;  %v7187_v59 = vpop.f32.mrf.mxu1  ;;  %v7238_v51 = vpop.f32.mrf.mxu0 }
 0x4ac   : > { %4766 = vrot.lane.b32.xlu1 %v4635_v6, %s11774_s29  ;;  %4325 = vrot.lane.b32.xlu0 %v4195_v13, %s11775_s30  ;;  %10082 = vst [vmem:[%s14955_s9 + $0x60] sm:$0xff] %v7237_v29  ;;  %v7239_v58 = vadd.f32 %v7238_v51, %v7187_v59 }
 0x4ad   : > { %v5257_v61 = vsel %vm5225_vm4, %v5144_v21, %v5208_v34  ;;  %v5254_v20 = vsel %vm5225_vm4, %v5138_v19, %v5205_v41  ;;  %v11302_v38 = vld [vmem:[#allocation3 + $0x780] ss:$8 sps:$4 sm:$0xff]   ;;  %v11304_v26 = vld [vmem:[#allocation3 + $0x784] ss:$8 sps:$4 sm:$0xff]   ;;  %v7189_v21 = vpop.f32.mrf.mxu1  ;;  %v7240_v19 = vpop.f32.mrf.mxu0 }
 0x4ae   : > { %5353 = vst.msk [vmem:[#allocation3 + $0x8d8] sm:$0xff] %vm13133_vm5, %v5257_v61  ;;  %5350 = vst.msk [vmem:[#allocation3 + $0x8c0] sm:$0xff] %vm13133_vm5, %v5254_v20  ;;  %v4308_v12 = vpop.permute.xlu1 %4307  ;;  %v3871_v14 = vpop.permute.xlu0 %3870  ;;  %8425 = vmatprep.subr.bf16.mxu1 %v11304_v26  ;;  %v7241_v6 = vadd.f32 %v7240_v19, %v7189_v21  ;;  %v4194_v61 = vmul.bf16 %v13679_v62, %v14995_v44  ;;  %v5849_v19 = vld [vmem:[%s13629_s27 + $0xf0] sm:$0xff] }
 0x4af   : > { %v4378_v28 = vrot.slane %v4308_v12, 4  ;;  %v3940_v5 = vrot.slane %v3871_v14, 4  ;;  %8426 = vmatpush2.bf16.msra.mxu1 %v11302_v38  ;;  %10083 = vst.msk [vmem:[%s14955_s9 + $0x68] sm:$0xff] %vm381_vm0, %v7239_v58  ;;  %v7191_v41 = vpop.f32.mrf.mxu1  ;;  %v7242_v46 = vpop.f32.mrf.mxu0 }
 0x4b0   : > { %4762 = vrot.lane.b32.xlu1 %v4633_v3, %s11774_s29  ;;  %5157 = vrot.lane.b32.xlu0 %v15051_v1, %s11773_s28  ;;  %10084 = vst [vmem:[%s14955_s9 + $0x70] sm:$0xff] %v7241_v6  ;;  %v7243_v20 = vadd.f32 %v7242_v46, %v7191_v41  ;;  %v11336_v6 = vld [vmem:[%s13629_s27 + $0xd8] ss:$12 sps:$4 sm:$0xff]  }
 0x4b1   : > { %v4427_v18 = vsel %vm4401_vm8, %v4308_v12, %v4378_v28  ;;  %v3989_v24 = vsel %vm3962_vm9, %v3871_v14, %v3940_v5  ;;  %v11305_v56 = vld [vmem:[#allocation3 + $0x770] ss:$8 sps:$4 sm:$0xff]   ;;  %v11307_v30 = vld [vmem:[#allocation3 + $0x774] ss:$8 sps:$4 sm:$0xff]   ;;  %v4638_v5 = vmul.bf16 %v13649_v39, %v15051_v1 }
 0x4b2   : > { %4523 = vst.msk [vmem:[#allocation3 + $0x768] sm:$0xff] %vm13133_vm5, %v4427_v18  ;;  %4085 = vst.msk [vmem:[#allocation3 + $0x750] sm:$0xff] %vm13133_vm5, %v3989_v24  ;;  %v5140_v43 = vpop.permute.xlu1 %5139  ;;  %v4757_v27 = vpop.permute.xlu0 %4756  ;;  %8427 = vmatprep.subr.bf16.mxu1 %v11307_v30 }
 0x4b3   : > { %v5206_v23 = vrot.slane %v5140_v43, 4  ;;  %v4822_v35 = vrot.slane %v4757_v27, 4  ;;  %8428 = vmatpush2.bf16.msra.mxu1 %v11305_v56  ;;  %10085 = vst.msk [vmem:[%s14955_s9 + $0x78] sm:$0xff] %vm381_vm0, %v7243_v20 }
 0x4b4   : > { %4327 = vrot.lane.b32.xlu1 %v4196_v57, %s11775_s30  ;;  %4321 = vrot.lane.b32.xlu0 %v4193_v17, %s11775_s30  ;;  %v11750_v57 = vld [vmem:[#allocation2 + $0x100] sm:$0xff] }
 0x4b5   : > { %v5255_v50 = vsel %vm5225_vm4, %v5140_v43, %v5206_v23  ;;  %v4871_v60 = vsel %vm4840_vm7, %v4757_v27, %v4822_v35  ;;  %v11308_v32 = vld [vmem:[#allocation3 + $0x8d0] ss:$8 sps:$4 sm:$0xff]   ;;  %v11310_v42 = vld [vmem:[#allocation3 + $0x8d4] ss:$8 sps:$4 sm:$0xff]  }
 0x4b6   : > { %5351 = vst.msk [vmem:[#allocation3 + $0x8c8] sm:$0xff] %vm13133_vm5, %v5255_v50  ;;  %4967 = vst.msk [vmem:[#allocation3 + $0x8b0] sm:$0xff] %vm13133_vm5, %v4871_v60  ;;  %v3873_v48 = vpop.permute.xlu1 %3872  ;;  %v3867_v31 = vpop.permute.xlu0 %3866  ;;  %8732 = vmatprep.subr.bf16.mxu0 %v11310_v42  ;;  %v4636_v50 = vmul.bf16 %v13649_v39, %v15077_v63 }
 0x4b7   : > { %v3941_v47 = vrot.slane %v3873_v48, 4  ;;  %v3938_v54 = vrot.slane %v3867_v31, 4  ;;  %8733 = vmatpush2.bf16.msra.mxu0 %v11308_v32 }
 0x4b8   : > { %5159 = vrot.lane.b32.xlu1 %v15075_v11, %s11773_s28  ;;  %5153 = vrot.lane.b32.xlu0 %v15077_v63, %s11773_s28 }
 0x4b9   : > { %v3990_v13 = vsel %vm3962_vm9, %v3873_v48, %v3941_v47  ;;  %v3987_v9 = vsel %vm3962_vm9, %v3867_v31, %v3938_v54  ;;  %v11311_v34 = vld [vmem:[#allocation3 + $0x760] ss:$8 sps:$4 sm:$0xff]   ;;  %v11313_v37 = vld [vmem:[#allocation3 + $0x764] ss:$8 sps:$4 sm:$0xff]   ;;  %v4199_v47 = vmul.bf16 %v13679_v62, %v15051_v1 }
 0x4ba   : > { %4086 = vst.msk [vmem:[#allocation3 + $0x758] sm:$0xff] %vm13133_vm5, %v3990_v13  ;;  %4083 = vst.msk [vmem:[#allocation3 + $0x740] sm:$0xff] %vm13133_vm5, %v3987_v9  ;;  %v4759_v0 = vpop.permute.xlu1 %4758  ;;  %v4753_v45 = vpop.permute.xlu0 %4752  ;;  %8429 = vmatprep.subr.bf16.mxu1 %v11313_v37 }
 0x4bb   : > { %v4823_v38 = vrot.slane %v4759_v0, 4  ;;  %v4820_v26 = vrot.slane %v4753_v45, 4  ;;  %8430 = vmatpush2.bf16.msra.mxu1 %v11311_v34 }
 0x4bc   : > { %4323 = vrot.lane.b32.xlu1 %v4194_v61, %s11775_s30  ;;  %3886 = vrot.lane.b32.xlu0 %v11749_v49, %s11776_s6 }
 0x4bd   : > { %v4872_v7 = vsel %vm4840_vm7, %v4759_v0, %v4823_v38  ;;  %v4869_v12 = vsel %vm4840_vm7, %v4753_v45, %v4820_v26  ;;  %v11314_v14 = vld [vmem:[#allocation3 + $0x8c0] ss:$8 sps:$4 sm:$0xff]   ;;  %v11316_v3 = vld [vmem:[#allocation3 + $0x8c4] ss:$8 sps:$4 sm:$0xff]   ;;  %v4197_v0 = vmul.bf16 %v13679_v62, %v15077_v63  ;;  %v10555_v45 = vcombine.high %v5849_v19, %v5849_v19 }
 0x4be   : > { %4968 = vst.msk [vmem:[#allocation3 + $0x8b8] sm:$0xff] %vm13133_vm5, %v4872_v7  ;;  %4965 = vst.msk [vmem:[#allocation3 + $0x8a0] sm:$0xff] %vm13133_vm5, %v4869_v12  ;;  %v3869_v16 = vpop.permute.xlu1 %3868  ;;  %v4318_v28 = vpop.permute.xlu0 %4317  ;;  %8734 = vmatprep.subr.bf16.mxu0 %v11316_v3  ;;  %v4200_v3 = vmul.bf16 %v13679_v62, %v15075_v11 }
 0x4bf   : > { %v3939_v4 = vrot.slane %v3869_v16, 4  ;;  %v4383_v25 = vrot.slane %v4318_v28, 4  ;;  %8735 = vmatpush2.bf16.msra.mxu0 %v11314_v14 }
 0x4c0   : > { %5155 = vrot.lane.b32.xlu1 %v15107_v22, %s11773_s28  ;;  %4772 = vrot.lane.b32.xlu0 %v4638_v5, %s11774_s29 }
 0x4c1   : > { %v3988_v18 = vsel %vm3962_vm9, %v3869_v16, %v3939_v4  ;;  %v4432_v24 = vsel %vm4401_vm8, %v4318_v28, %v4383_v25  ;;  %v11317_v56 = vld [vmem:[#allocation3 + $0x750] ss:$8 sps:$4 sm:$0xff]   ;;  %v11319_v30 = vld [vmem:[#allocation3 + $0x754] ss:$8 sps:$4 sm:$0xff]   ;;  %v5462_v16 = vmul.bf16 %v13480_v8, %v15051_v1 }
 0x4c2   : > { %4084 = vst.msk [vmem:[#allocation3 + $0x748] sm:$0xff] %vm13133_vm5, %v3988_v18  ;;  %4528 = vst.msk [vmem:[#allocation3 + $0x890] sm:$0xff] %vm13133_vm5, %v4432_v24  ;;  %v4755_v33 = vpop.permute.xlu1 %4754  ;;  %v4314_v36 = vpop.permute.xlu0 %4313  ;;  %8431 = vmatprep.subr.bf16.mxu1 %v11319_v30 }
 0x4c3   : > { %v4821_v43 = vrot.slane %v4755_v33, 4  ;;  %v4381_v27 = vrot.slane %v4314_v36, 4  ;;  %8432 = vmatpush2.bf16.msra.mxu1 %v11317_v56  ;;  %v10554_v56 = vcombine.low %v5849_v19, %v5849_v19 }
 0x4c4   : > { %3888 = vrot.lane.b32.xlu1 %v14969_v40, %s11776_s6  ;;  %3882 = vrot.lane.b32.xlu0 %v11750_v57, %s11776_s6  ;;  %v4639_v40 = vmul.bf16 %v13649_v39, %v15075_v11 }
 0x4c5   : > { %v4870_v17 = vsel %vm4840_vm7, %v4755_v33, %v4821_v43  ;;  %v4430_v23 = vsel %vm4401_vm8, %v4314_v36, %v4381_v27  ;;  %v11320_v35 = vld [vmem:[#allocation3 + $0x8b0] ss:$8 sps:$4 sm:$0xff]   ;;  %v11322_v10 = vld [vmem:[#allocation3 + $0x8b4] ss:$8 sps:$4 sm:$0xff]   ;;  %v4198_v36 = vmul.bf16 %v13679_v62, %v15107_v22 }
 0x4c6   : > { %4966 = vst.msk [vmem:[#allocation3 + $0x8a8] sm:$0xff] %vm13133_vm5, %v4870_v17  ;;  %4526 = vst.msk [vmem:[#allocation3 + $0x880] sm:$0xff] %vm13133_vm5, %v4430_v23  ;;  %v4320_v15 = vpop.permute.xlu1 %4319  ;;  %v5581_v29 = vpop.permute.xlu0 %5580  ;;  %8736 = vmatprep.subr.bf16.mxu0 %v11322_v10 }
 0x4c7   : > { %v4384_v60 = vrot.slane %v4320_v15, 4  ;;  %v5646_v32 = vrot.slane %v5581_v29, 4  ;;  %8737 = vmatpush2.bf16.msra.mxu0 %v11320_v35 }
 0x4c8   : > { %4774 = vrot.lane.b32.xlu1 %v4639_v40, %s11774_s29  ;;  %4768 = vrot.lane.b32.xlu0 %v4636_v50, %s11774_s29 }
 0x4c9   : > { %v4433_v42 = vsel %vm4401_vm8, %v4320_v15, %v4384_v60  ;;  %v5695_v59 = vsel %vm5664_vm2, %v5581_v29, %v5646_v32  ;;  %v11323_v51 = vld [vmem:[#allocation3 + $0x740] ss:$8 sps:$4 sm:$0xff]   ;;  %v11325_v48 = vld [vmem:[#allocation3 + $0x744] ss:$8 sps:$4 sm:$0xff]   ;;  %v5463_v29 = vmul.bf16 %v13480_v8, %v15075_v11 }
 0x4ca   : > { %4529 = vst.msk [vmem:[#allocation3 + $0x898] sm:$0xff] %vm13133_vm5, %v4433_v42  ;;  %5791 = vst.msk [vmem:[#allocation3 + $0x8f0] sm:$0xff] %vm13133_vm5, %v5695_v59  ;;  %v4316_v31 = vpop.permute.xlu1 %4315  ;;  %v3879_v58 = vpop.permute.xlu0 %3878  ;;  %8433 = vmatprep.subr.bf16.mxu1 %v11325_v48 }
 0x4cb   : > { %v4382_v54 = vrot.slane %v4316_v31, 4  ;;  %v3944_v21 = vrot.slane %v3879_v58, 4  ;;  %8434 = vmatpush2.bf16.msra.mxu1 %v11323_v51 }
 0x4cc   : > { %3884 = vrot.lane.b32.xlu1 %v14995_v44, %s11776_s6  ;;  %4333 = vrot.lane.b32.xlu0 %v4199_v47, %s11775_s30  ;;  %v4637_v44 = vmul.bf16 %v13649_v39, %v15107_v22  ;;  %v15361_v47 = vld [vmem:[#allocation2 + $0x150] sm:$0xff] }
 0x4cd   : > { %v4431_v13 = vsel %vm4401_vm8, %v4316_v31, %v4382_v54  ;;  %v3993_v9 = vsel %vm3962_vm9, %v3879_v58, %v3944_v21  ;;  %v11326_v34 = vld [vmem:[#allocation3 + $0x8a0] ss:$8 sps:$4 sm:$0xff]   ;;  %v11328_v37 = vld [vmem:[#allocation3 + $0x8a4] ss:$8 sps:$4 sm:$0xff]  }
 0x4ce   : > { %4527 = vst.msk [vmem:[#allocation3 + $0x888] sm:$0xff] %vm13133_vm5, %v4431_v13  ;;  %4089 = vst.msk [vmem:[#allocation3 + $0x870] sm:$0xff] %vm13133_vm5, %v3993_v9  ;;  %v5583_v41 = vpop.permute.xlu1 %5582  ;;  %v5577_v46 = vpop.permute.xlu0 %5576  ;;  %8738 = vmatprep.subr.bf16.mxu0 %v11328_v37  ;;  %8436 = vmatmul.mubr.bf16.vlgmr.msra.gmra.mxu1 %v11336_v6 }
 0x4cf   : > { %v5647_v61 = vrot.slane %v5583_v41, 4  ;;  %v5644_v20 = vrot.slane %v5577_v46, 4  ;;  %8739 = vmatpush2.bf16.msra.mxu0 %v11326_v34  ;;  %8445 = vmatprep.mubr.bf16.mxu1 %v10555_v45 }
 0x4d0   : > { %4770 = vrot.lane.b32.xlu1 %v4637_v44, %s11774_s29  ;;  %4329 = vrot.lane.b32.xlu0 %v4197_v0, %s11775_s30 }
 0x4d1   : > { %v5696_v38 = vsel %vm5664_vm2, %v5583_v41, %v5647_v61  ;;  %v5693_v26 = vsel %vm5664_vm2, %v5577_v46, %v5644_v20  ;;  %v11329_v49 = vld [vmem:[#allocation3 + $0x890] ss:$8 sps:$4 sm:$0xff]   ;;  %v11331_v7 = vld [vmem:[#allocation3 + $0x894] ss:$8 sps:$4 sm:$0xff]   ;;  %v15377_v41 = vld [vmem:[#allocation2 + $0x140] sm:$0xff] }
 0x4d2   : > { %5792 = vst.msk [vmem:[#allocation3 + $0x8f8] sm:$0xff] %vm13133_vm5, %v5696_v38  ;;  %5789 = vst.msk [vmem:[#allocation3 + $0x8e0] sm:$0xff] %vm13133_vm5, %v5693_v26  ;;  %v3881_v12 = vpop.permute.xlu1 %3880  ;;  %v3875_v14 = vpop.permute.xlu0 %3874  ;;  %8740 = vmatprep.subr.bf16.mxu0 %v11331_v7  ;;  %v11355_v46 = vld [vmem:[%s13629_s27 + $0x104] ss:$12 sps:$4 sm:$0xff]   ;;  %v3377_v26 = vmul.bf16 %v13463_v2, %v15377_v41 }
 0x4d3   : > { %v3945_v28 = vrot.slane %v3881_v12, 4  ;;  %v3942_v5 = vrot.slane %v3875_v14, 4  ;;  %8741 = vmatpush2.bf16.msra.mxu0 %v11329_v49 }
 0x4d4   : > { %4335 = vrot.lane.b32.xlu1 %v4200_v3, %s11775_s30  ;;  %5596 = vrot.lane.b32.xlu0 %v5462_v16, %s11771_s22  ;;  %v11363_v3 = vld [vmem:[%s13629_s27 + $0xfc] ss:$12 sps:$4 sm:$0xff]  }
 0x4d5   : > { %v3994_v4 = vsel %vm3962_vm9, %v3881_v12, %v3945_v28  ;;  %v3991_v25 = vsel %vm3962_vm9, %v3875_v14, %v3942_v5  ;;  %v11333_v18 = vld [vmem:[#allocation3 + $0x880] ss:$8 sps:$4 sm:$0xff]   ;;  %v11335_v24 = vld [vmem:[#allocation3 + $0x884] ss:$8 sps:$4 sm:$0xff]   ;;  %v15390_v12 = vld [vmem:[#allocation2 + $0x158] sm:$0xff] }
 0x4d6   : > { %4090 = vst.msk [vmem:[#allocation3 + $0x878] sm:$0xff] %vm13133_vm5, %v3994_v4  ;;  %4087 = vst.msk [vmem:[#allocation3 + $0x860] sm:$0xff] %vm13133_vm5, %v3991_v25  ;;  %v5579_v30 = vpop.permute.xlu1 %5578  ;;  %v3502_v33 = vpop.permute.xlu0 %3501  ;;  %8742 = vmatprep.subr.bf16.mxu0 %v11335_v24  ;;  %8446 = vmatmul.mubr.bf16.gmra.mxu1 %v10554_v56  ;;  %v15393_v14 = vld [vmem:[%s13629_s27 + $0x114] sm:$0xff]  ;;  %v2940_v24 = vmul.bf16 %v15361_v47, %v13493_v52 }
 0x4d7   : > { %v5645_v43 = vrot.slane %v5579_v30, 4  ;;  %v3563_v27 = vrot.slane %v3502_v33, 4  ;;  %8743 = vmatpush2.bf16.msra.mxu0 %v11333_v18  ;;  %8799 = vmatprep.mubr.bf16.mxu1 %v16232_v53  ;;  %v3380_v18 = vmul.bf16 %v13463_v2, %v15390_v12  ;;  %v10599_v56 = vcombine.high %v15393_v14, %v15393_v14 }
 0x4d8   : > { %4331 = vrot.lane.b32.xlu1 %v4198_v36, %s11775_s30  ;;  %3894 = vrot.lane.b32.xlu0 %v15051_v1, %s11776_s6  ;;  %v5460_v1 = vmul.bf16 %v13480_v8, %v15077_v63  ;;  %v15413_v36 = vld [vmem:[#allocation2 + $0x148] sm:$0xff] }
 0x4d9   : > { %v5694_v57 = vsel %vm5664_vm2, %v5579_v30, %v5645_v43  ;;  %v3612_v17 = vsel %vm3577_vm1, %v3502_v33, %v3563_v27  ;;  %v11339_v23 = vld [vmem:[#allocation3 + $0x8f0] ss:$8 sps:$4 sm:$0xff]   ;;  %v11341_v35 = vld [vmem:[#allocation3 + $0x8f4] ss:$8 sps:$4 sm:$0xff]   ;;  %v7195_v43 = vpop.f32.mrf.mxu1  ;;  %v7246_v27 = vpop.f32.mrf.mxu0 }
 0x4da   : > { %5790 = vst.msk [vmem:[#allocation3 + $0x8e8] sm:$0xff] %vm13133_vm5, %v5694_v57  ;;  %3708 = vst.msk [vmem:[#allocation3 + $0x970] sm:$0xff] %vm13133_vm5, %v3612_v17  ;;  %v3877_v10 = vpop.permute.xlu1 %3876  ;;  %v3498_v15 = vpop.permute.xlu0 %3497  ;;  %8779 = vmatprep.subr.bf16.mxu1 %v11341_v35  ;;  %v7247_v57 = vadd.f32 %v7246_v27, %v7195_v43 }
 0x4db   : > { %v3943_v40 = vrot.slane %v3877_v10, 4  ;;  %v3561_v50 = vrot.slane %v3498_v15, 4  ;;  %8780 = vmatpush1.bf16.msra.mxu1 %v11339_v23 }
 0x4dc   : > { %5598 = vrot.lane.b32.xlu1 %v5463_v29, %s11771_s22  ;;  %5592 = vrot.lane.b32.xlu0 %v5460_v1, %s11771_s22  ;;  %v7248_v29 = vpop.f32.mrf.mxu0  ;;  %10086 = vst [vmem:[%s14955_s9 + $0x80] sm:$0xff] %v7247_v57 }
 0x4dd   : > { %v3992_v60 = vsel %vm3962_vm9, %v3877_v10, %v3943_v40  ;;  %v3610_v32 = vsel %vm3577_vm1, %v3498_v15, %v3561_v50  ;;  %v11342_v42 = vld [vmem:[#allocation3 + $0x870] ss:$8 sps:$4 sm:$0xff]   ;;  %v11344_v59 = vld [vmem:[#allocation3 + $0x874] ss:$8 sps:$4 sm:$0xff]   ;;  %v7197_v15 = vpop.f32.mrf.mxu1  ;;  %v3378_v50 = vmul.bf16 %v13463_v2, %v15413_v36 }
 0x4de   : > { %4088 = vst.msk [vmem:[#allocation3 + $0x868] sm:$0xff] %vm13133_vm5, %v3992_v60  ;;  %3706 = vst.msk [vmem:[#allocation3 + $0x960] sm:$0xff] %vm13133_vm5, %v3610_v32  ;;  %v3504_v51 = vpop.permute.xlu1 %3503  ;;  %v3063_v48 = vpop.permute.xlu0 %3062  ;;  %8744 = vmatprep.subr.bf16.mxu0 %v11344_v59  ;;  %v5466_v60 = vmul.bf16 %v13480_v8, %v15361_v47  ;;  %v11450_v32 = vld [vmem:[%s13629_s27 + $0x11c] ss:$0 sps:$4 sm:$0xff]  }
 0x4df   : > { %v3564_v31 = vrot.slane %v3504_v51, 4  ;;  %v3124_v58 = vrot.slane %v3063_v48, 4  ;;  %8745 = vmatpush2.bf16.msra.mxu0 %v11342_v42  ;;  %v7249_v42 = vadd.f32 %v7248_v29, %v7197_v15  ;;  %v2939_v15 = vmul.bf16 %v15413_v36, %v13493_v52 }
 0x4e0   : > { %3896 = vrot.lane.b32.xlu1 %v15075_v11, %s11776_s6  ;;  %3890 = vrot.lane.b32.xlu0 %v15077_v63, %s11776_s6  ;;  %v5461_v11 = vmul.bf16 %v13480_v8, %v15107_v22  ;;  %v3379_v63 = vmul.bf16 %v13463_v2, %v15361_v47 }
 0x4e1   : > { %v3613_v54 = vsel %vm3577_vm1, %v3504_v51, %v3564_v31  ;;  %v3173_v21 = vsel %vm3138_vm3, %v3063_v48, %v3124_v58  ;;  %v11346_v19 = vld [vmem:[#allocation3 + $0x8e0] ss:$8 sps:$4 sm:$0xff]   ;;  %v11348_v6 = vld [vmem:[#allocation3 + $0x8e4] ss:$8 sps:$4 sm:$0xff]   ;;  %v7199_v31 = vpop.f32.mrf.mxu1  ;;  %v7250_v58 = vpop.f32.mrf.mxu0  ;;  %10087 = vst.msk [vmem:[%s14955_s9 + $0x88] sm:$0xff] %vm381_vm0, %v7249_v42 }
 0x4e2   : > { %3709 = vst.msk [vmem:[#allocation3 + $0x978] sm:$0xff] %vm13133_vm5, %v3613_v54  ;;  %3269 = vst.msk [vmem:[#allocation3 + $0x950] sm:$0xff] %vm13133_vm5, %v3173_v21  ;;  %v3500_v13 = vpop.permute.xlu1 %3499  ;;  %v5589_v9 = vpop.permute.xlu0 %5588  ;;  %8781 = vmatprep.subr.bf16.mxu1 %v11348_v6  ;;  %v11459_v48 = vld [vmem:[%s13629_s27 + $0x124] ss:$12 sps:$4 sm:$0xff]  }
 0x4e3   : > { %v3562_v34 = vrot.slane %v3500_v13, 4  ;;  %v5650_v37 = vrot.slane %v5589_v9, 4  ;;  %8782 = vmatpush1.bf16.msra.mxu1 %v11346_v19 }
 0x4e4   : > { %5594 = vrot.lane.b32.xlu1 %v5461_v11, %s11771_s22  ;;  %3517 = vrot.lane.b32.xlu0 %v3379_v63, %s11770_s19  ;;  %v7251_v11 = vpop.f32.mrf.mxu0 }
 0x4e5   : > { %v3611_v44 = vsel %vm3577_vm1, %v3500_v13, %v3562_v34  ;;  %v5699_v0 = vsel %vm5664_vm2, %v5589_v9, %v5650_v37  ;;  %v11349_v45 = vld [vmem:[#allocation3 + $0x860] ss:$8 sps:$4 sm:$0xff]   ;;  %v11351_v61 = vld [vmem:[#allocation3 + $0x864] ss:$8 sps:$4 sm:$0xff]   ;;  %v10598_v13 = vcombine.low %v15393_v14, %v15393_v14  ;;  %v7200_v9 = vpop.f32.mrf.mxu1  ;;  %v2941_v37 = vmul.bf16 %v15390_v12, %v13493_v52 }
 0x4e6   : > { %3707 = vst.msk [vmem:[#allocation3 + $0x968] sm:$0xff] %vm13133_vm5, %v3611_v44  ;;  %5795 = vst.msk [vmem:[#allocation3 + $0xa10] sm:$0xff] %vm13133_vm5, %v5699_v0  ;;  %v3065_v20 = vpop.permute.xlu1 %3064  ;;  %v3059_v38 = vpop.permute.xlu0 %3058  ;;  %8746 = vmatprep.subr.bf16.mxu0 %v11351_v61  ;;  %10637 = vmatmul.mubr.msk.bf16.vlgmr.msra.gmra.mxu1 %vm6518_vm6, %v11355_v46  ;;  %v2938_v46 = vmul.bf16 %v15377_v41, %v13493_v52 }
 0x4e7   : > { %v3125_v49 = vrot.slane %v3065_v20, 4  ;;  %v3122_v7 = vrot.slane %v3059_v38, 4  ;;  %8747 = vmatpush2.bf16.msra.mxu0 %v11349_v45  ;;  %8809 = vmatprep.mubr.bf16.mxu1 %v16232_v53  ;;  %v7498_v45 = vpop.f32.mrf.mxu0  ;;  %v7549_v61 = vpop.f32.mrf.mxu1 }
 0x4e8   : > { %3892 = vrot.lane.b32.xlu1 %v15107_v22, %s11776_s6  ;;  %3513 = vrot.lane.b32.xlu0 %v3377_v26, %s11770_s19 }
 0x4e9   : > { %v3174_v16 = vsel %vm3138_vm3, %v3065_v20, %v3125_v49  ;;  %v3171_v28 = vsel %vm3138_vm3, %v3059_v38, %v3122_v7  ;;  %v11352_v5 = vld [vmem:[#allocation3 + $0x970] ss:$8 sps:$4 sm:$0xff]   ;;  %v11354_v4 = vld [vmem:[#allocation3 + $0x974] ss:$8 sps:$4 sm:$0xff]   ;;  %v7550_v20 = vadd.f32 %v7549_v61, %v7498_v45  ;;  %v7500_v14 = vpop.f32.mrf.mxu0 }
 0x4ea   : > { %3270 = vst.msk [vmem:[#allocation3 + $0x958] sm:$0xff] %vm13133_vm5, %v3174_v16  ;;  %3267 = vst.msk [vmem:[#allocation3 + $0x940] sm:$0xff] %vm13133_vm5, %v3171_v28  ;;  %v5591_v25 = vpop.permute.xlu1 %5590  ;;  %v5585_v22 = vpop.permute.xlu0 %5584  ;;  %9029 = vmatprep.subr.bf16.mxu1 %v11354_v4  ;;  %8749 = vmatmul.mubr.bf16.vlgmr.msra.gmra.mxu0 %v11363_v3  ;;  %v5464_v4 = vmul.bf16 %v13480_v8, %v15377_v41 }
 0x4eb   : > { %v5651_v30 = vrot.slane %v5591_v25, 4  ;;  %v5648_v33 = vrot.slane %v5585_v22, 4  ;;  %9030 = vmatpush1.bf16.msra.mxu1 %v11352_v5  ;;  %8758 = vmatprep.mubr.bf16.mxu0 %v10599_v56  ;;  %v7551_v3 = vpop.f32.mrf.mxu1  ;;  %v5467_v5 = vmul.bf16 %v13480_v8, %v15390_v12  ;;  %10088 = vst [vmem:[%s14955_s9 + $0x90] sm:$0xff] %v7550_v20 }
 0x4ec   : > { %3519 = vrot.lane.b32.xlu1 %v3380_v18, %s11770_s19  ;;  %3078 = vrot.lane.b32.xlu0 %v2940_v24, %s11772_s23  ;;  %v7502_v24 = vpop.f32.mrf.mxu0 }
 0x4ed   : > { %v5700_v17 = vsel %vm5664_vm2, %v5591_v25, %v5651_v30  ;;  %v5697_v23 = vsel %vm5664_vm2, %v5585_v22, %v5648_v33  ;;  %v11356_v35 = vld [vmem:[#allocation3 + $0x960] ss:$8 sps:$4 sm:$0xff]   ;;  %v11358_v10 = vld [vmem:[#allocation3 + $0x964] ss:$8 sps:$4 sm:$0xff]   ;;  %v7552_v25 = vadd.f32 %v7551_v3, %v7500_v14  ;;  %v7553_v56 = vpop.f32.mrf.mxu1  ;;  %v15503_v3 = vld [vmem:[#allocation2 + $0x178] sm:$0xff] }
 0x4ee   : > { %5796 = vst.msk [vmem:[#allocation3 + $0xa18] sm:$0xff] %vm13133_vm5, %v5700_v17  ;;  %5793 = vst.msk [vmem:[#allocation3 + $0xa00] sm:$0xff] %vm13133_vm5, %v5697_v23  ;;  %v3061_v1 = vpop.permute.xlu1 %3060  ;;  %v2582_v40 = vpop.permute.xlu0 %2581  ;;  %9031 = vmatprep.subr.bf16.mxu1 %v11358_v10  ;;  %10638 = vmatmul.mubr.msk.bf16.gmra.mxu1 %vm6518_vm6, %v11450_v32  ;;  %v7554_v30 = vadd.f32 %v7553_v56, %v7502_v24  ;;  %v3384_v24 = vmul.bf16 %v13463_v2, %v15503_v3 }
 0x4ef   : > { %v3123_v59 = vrot.slane %v3061_v1, 4  ;;  %v2643_v51 = vrot.slane %v2582_v40, 4  ;;  %9032 = vmatpush1.bf16.msra.mxu1 %v11356_v35  ;;  %9061 = vmatprep.mubr.bf16.mxu1 %v11459_v48  ;;  %10089 = vst.msk [vmem:[%s14955_s9 + $0x98] sm:$0xff] %vm381_vm0, %v7552_v25  ;;  %v7504_v17 = vpop.f32.mrf.mxu0  ;;  %v7555_v23 = vpop.f32.mrf.mxu1 }
 0x4f0   : > { %3515 = vrot.lane.b32.xlu1 %v3378_v50, %s11770_s19  ;;  %5604 = vrot.lane.b32.xlu0 %v5466_v60, %s11771_s22  ;;  %10090 = vst [vmem:[%s14955_s9 + $0xa0] sm:$0xff] %v7554_v30  ;;  %v7556_v29 = vadd.f32 %v7555_v23, %v7504_v17  ;;  %v15474_v50 = vld [vmem:[#allocation2 + $0x170] sm:$0xff] }
 0x4f1   : > { %v3172_v54 = vsel %vm3138_vm3, %v3061_v1, %v3123_v59  ;;  %v2692_v21 = vsel %vm2657_vm14, %v2582_v40, %v2643_v51  ;;  %v11360_v19 = vld [vmem:[#allocation3 + $0x950] ss:$8 sps:$4 sm:$0xff]   ;;  %v11362_v6 = vld [vmem:[#allocation3 + $0x954] ss:$8 sps:$4 sm:$0xff]   ;;  %v7508_v60 = vpop.f32.mrf.mxu0  ;;  %v7559_v32 = vpop.f32.mrf.mxu1 }
 0x4f2   : > { %3268 = vst.msk [vmem:[#allocation3 + $0x948] sm:$0xff] %vm13133_vm5, %v3172_v54  ;;  %2788 = vst.msk [vmem:[#allocation3 + $0x930] sm:$0xff] %vm13133_vm5, %v2692_v21  ;;  %v5587_v63 = vpop.permute.xlu1 %5586  ;;  %v3510_v34 = vpop.permute.xlu0 %3509  ;;  %9033 = vmatprep.subr.bf16.mxu1 %v11362_v6  ;;  %8759 = vmatmul.mubr.bf16.gmra.mxu0 %v10598_v13  ;;  %v7560_v42 = vadd.f32 %v7559_v32, %v7508_v60  ;;  %v5465_v6 = vmul.bf16 %v13480_v8, %v15413_v36  ;;  %v15535_v32 = vld [vmem:[#allocation2 + $0x168] sm:$0xff] }
 0x4f3   : > { %v5649_v44 = vrot.slane %v5587_v63, 4  ;;  %v3567_v0 = vrot.slane %v3510_v34, 4  ;;  %9034 = vmatpush1.bf16.msra.mxu1 %v11360_v19  ;;  %9112 = vmatprep.mubr.bf16.mxu0 %v16232_v53  ;;  %10091 = vst.msk [vmem:[%s14955_s9 + $0xa8] sm:$0xff] %vm381_vm0, %v7556_v29  ;;  %v7510_v58 = vpop.f32.mrf.mxu0  ;;  %v7561_v54 = vpop.f32.mrf.mxu1  ;;  %v3383_v13 = vmul.bf16 %v13463_v2, %v15474_v50  ;;  %v2944_v29 = vmul.bf16 %v15474_v50, %v13493_v52 }
 0x4f4   : > { %3080 = vrot.lane.b32.xlu1 %v2941_v37, %s11772_s23  ;;  %3074 = vrot.lane.b32.xlu0 %v2938_v46, %s11772_s23  ;;  %10092 = vst [vmem:[%s14955_s9 + $0xb0] sm:$0xff] %v7560_v42  ;;  %v7562_v9 = vadd.f32 %v7561_v54, %v7510_v58  ;;  %v11383_v46 = vld [vmem:[%s13629_s27 + $0x128] ss:$12 sps:$4 sm:$0xff]  }
 0x4f5   : > { %v5698_v38 = vsel %vm5664_vm2, %v5587_v63, %v5649_v44  ;;  %v3616_v26 = vsel %vm3577_vm1, %v3510_v34, %v3567_v0  ;;  %v11366_v49 = vld [vmem:[#allocation3 + $0xa10] ss:$8 sps:$4 sm:$0xff]   ;;  %v11368_v7 = vld [vmem:[#allocation3 + $0xa14] ss:$8 sps:$4 sm:$0xff]   ;;  %v7512_v34 = vpop.f32.mrf.mxu0  ;;  %v7563_v37 = vpop.f32.mrf.mxu1 }
 0x4f6   : > { %5794 = vst.msk [vmem:[#allocation3 + $0xa08] sm:$0xff] %vm13133_vm5, %v5698_v38  ;;  %3712 = vst.msk [vmem:[#allocation3 + $0xa90] sm:$0xff] %vm13133_vm5, %v3616_v26  ;;  %v2584_v16 = vpop.permute.xlu1 %2583  ;;  %v2578_v28 = vpop.permute.xlu0 %2577  ;;  %9092 = vmatprep.subr.bf16.mxu0 %v11368_v7  ;;  %v11389_v42 = vld [vmem:[#allocation3 + $0x914] ss:$8 sps:$4 sm:$0xff]  }
 0x4f7   : > { %v2644_v22 = vrot.slane %v2584_v16, 4  ;;  %v2641_v18 = vrot.slane %v2578_v28, 4  ;;  %9093 = vmatpush1.bf16.msra.mxu0 %v11366_v49  ;;  %10093 = vst.msk [vmem:[%s14955_s9 + $0xb8] sm:$0xff] %vm381_vm0, %v7562_v9  ;;  %v7513_v20 = vpop.f32.mrf.mxu0  ;;  %v7564_v38 = vpop.f32.mrf.mxu1  ;;  %v11387_v9 = vld [vmem:[#allocation3 + $0x910] ss:$8 sps:$4 sm:$0xff]  }
 0x4f8   : > { %5606 = vrot.lane.b32.xlu1 %v5467_v5, %s11771_s22  ;;  %5600 = vrot.lane.b32.xlu0 %v5464_v4, %s11771_s22  ;;  %v2945_v20 = vmul.bf16 %v15503_v3, %v13493_v52 }
 0x4f9   : > { %v2693_v33 = vsel %vm2657_vm14, %v2584_v16, %v2644_v22  ;;  %v2690_v43 = vsel %vm2657_vm14, %v2578_v28, %v2641_v18  ;;  %v11369_v27 = vld [vmem:[#allocation3 + $0x940] ss:$8 sps:$4 sm:$0xff]   ;;  %v11371_v57 = vld [vmem:[#allocation3 + $0x944] ss:$8 sps:$4 sm:$0xff]  }
 0x4fa   : > { %2789 = vst.msk [vmem:[#allocation3 + $0x938] sm:$0xff] %vm13133_vm5, %v2693_v33  ;;  %2786 = vst.msk [vmem:[#allocation3 + $0x920] sm:$0xff] %vm13133_vm5, %v2690_v43  ;;  %v3512_v35 = vpop.permute.xlu1 %3511  ;;  %v3506_v10 = vpop.permute.xlu0 %3505  ;;  %9035 = vmatprep.subr.bf16.mxu1 %v11371_v57  ;;  %v15505_v16 = vld [vmem:[#allocation2 + $0x160] sm:$0xff] }
 0x4fb   : > { %v3568_v1 = vrot.slane %v3512_v35, 4  ;;  %v3565_v40 = vrot.slane %v3506_v10, 4  ;;  %9036 = vmatpush1.bf16.msra.mxu1 %v11369_v27  ;;  %v3381_v56 = vmul.bf16 %v13463_v2, %v15505_v16  ;;  %v11481_v43 = vld [vmem:[%s13629_s27 + $0x140] ss:$0 sps:$4 sm:$0xff]  }
 0x4fc   : > { %3076 = vrot.lane.b32.xlu1 %v2939_v15, %s11772_s23  ;;  %2597 = vrot.lane.b32.xlu0 %v15361_v47, %s11769_s17 }
 0x4fd   : > { %v3617_v59 = vsel %vm3577_vm1, %v3512_v35, %v3568_v1  ;;  %v3614_v51 = vsel %vm3577_vm1, %v3506_v10, %v3565_v40  ;;  %v11373_v48 = vld [vmem:[#allocation3 + $0xa00] ss:$8 sps:$4 sm:$0xff]   ;;  %v11375_v31 = vld [vmem:[#allocation3 + $0xa04] ss:$8 sps:$4 sm:$0xff]   ;;  %v7862_v35 = vpop.f32.mrf.mxu0 }
 0x4fe   : > { %3713 = vst.msk [vmem:[#allocation3 + $0xa98] sm:$0xff] %vm13133_vm5, %v3617_v59  ;;  %3710 = vst.msk [vmem:[#allocation3 + $0xa80] sm:$0xff] %vm13133_vm5, %v3614_v51  ;;  %v2580_v21 = vpop.permute.xlu1 %2579  ;;  %v3071_v19 = vpop.permute.xlu0 %3070  ;;  %9094 = vmatprep.subr.bf16.mxu0 %v11375_v31  ;;  %v11487_v1 = vld [vmem:[%s13629_s27 + $0x148] ss:$12 sps:$4 sm:$0xff]  }
 0x4ff   : > { %v2642_v11 = vrot.slane %v2580_v21, 4  ;;  %v3128_v63 = vrot.slane %v3071_v19, 4  ;;  %9095 = vmatpush1.bf16.msra.mxu0 %v11373_v48  ;;  %v7864_v58 = vpop.f32.mrf.mxu0 }
 0x500   : > { %5602 = vrot.lane.b32.xlu1 %v5465_v6, %s11771_s22  ;;  %3525 = vrot.lane.b32.xlu0 %v3383_v13, %s11770_s19  ;;  %v2942_v6 = vmul.bf16 %v15505_v16, %v13493_v52 }
 0x501   : > { %v2691_v44 = vsel %vm2657_vm14, %v2580_v21, %v2642_v11  ;;  %v3177_v0 = vsel %vm3138_vm3, %v3071_v19, %v3128_v63  ;;  %v11377_v45 = vld [vmem:[#allocation3 + $0x930] ss:$8 sps:$4 sm:$0xff]   ;;  %v11379_v61 = vld [vmem:[#allocation3 + $0x934] ss:$8 sps:$4 sm:$0xff]   ;;  %v3382_v19 = vmul.bf16 %v13463_v2, %v15535_v32  ;;  %v11395_v63 = vld [vmem:[#allocation3 + $0x904] ss:$8 sps:$4 sm:$0xff]  }
 0x502   : > { %2787 = vst.msk [vmem:[#allocation3 + $0x928] sm:$0xff] %vm13133_vm5, %v2691_v44  ;;  %3273 = vst.msk [vmem:[#allocation3 + $0xa70] sm:$0xff] %vm13133_vm5, %v3177_v0  ;;  %v3508_v26 = vpop.permute.xlu1 %3507  ;;  %v3067_v49 = vpop.permute.xlu0 %3066  ;;  %9037 = vmatprep.subr.bf16.mxu1 %v11379_v61  ;;  %10681 = vmatmul.mubr.msk.bf16.vlgmr.msra.gmra.mxu0 %vm6518_vm6, %v11383_v46 }
 0x503   : > { %v3566_v7 = vrot.slane %v3508_v26, 4  ;;  %v3126_v14 = vrot.slane %v3067_v49, 4  ;;  %9038 = vmatpush1.bf16.msra.mxu1 %v11377_v45  ;;  %9122 = vmatprep.mubr.bf16.mxu0 %v16232_v53  ;;  %v7866_v0 = vpop.f32.mrf.mxu0 }
 0x504   : > { %2599 = vrot.lane.b32.xlu1 %v15390_v12, %s11769_s17  ;;  %2593 = vrot.lane.b32.xlu0 %v15377_v41, %s11769_s17 }
 0x505   : > { %v3615_v28 = vsel %vm3577_vm1, %v3508_v26, %v3566_v7  ;;  %v3175_v5 = vsel %vm3138_vm3, %v3067_v49, %v3126_v14  ;;  %v11380_v4 = vld [vmem:[#allocation3 + $0xa90] ss:$8 sps:$4 sm:$0xff]   ;;  %v11382_v25 = vld [vmem:[#allocation3 + $0xa94] ss:$8 sps:$4 sm:$0xff]   ;;  %v11393_v49 = vld [vmem:[#allocation3 + $0x900] ss:$8 sps:$4 sm:$0xff]  }
 0x506   : > { %3711 = vst.msk [vmem:[#allocation3 + $0xa88] sm:$0xff] %vm13133_vm5, %v3615_v28  ;;  %3271 = vst.msk [vmem:[#allocation3 + $0xa60] sm:$0xff] %vm13133_vm5, %v3175_v5  ;;  %v3073_v22 = vpop.permute.xlu1 %3072  ;;  %v2590_v18 = vpop.permute.xlu0 %2589  ;;  %9342 = vmatprep.subr.bf16.mxu0 %v11382_v25 }
 0x507   : > { %v3129_v30 = vrot.slane %v3073_v22, 4  ;;  %v2647_v33 = vrot.slane %v2590_v18, 4  ;;  %9343 = vmatpush1.bf16.msra.mxu0 %v11380_v4 }
 0x508   : > { %3527 = vrot.lane.b32.xlu1 %v3384_v24, %s11770_s19  ;;  %3521 = vrot.lane.b32.xlu0 %v3381_v56, %s11770_s19  ;;  %v7868_v24 = vpop.f32.mrf.mxu0 }
 0x509   : > { %v3178_v27 = vsel %vm3138_vm3, %v3073_v22, %v3129_v30  ;;  %v2696_v57 = vsel %vm2657_vm14, %v2590_v18, %v2647_v33  ;;  %v11384_v17 = vld [vmem:[#allocation3 + $0x920] ss:$8 sps:$4 sm:$0xff]   ;;  %v11386_v23 = vld [vmem:[#allocation3 + $0x924] ss:$8 sps:$4 sm:$0xff]   ;;  %v2943_v33 = vmul.bf16 %v15535_v32, %v13493_v52 }
 0x50a   : > { %3274 = vst.msk [vmem:[#allocation3 + $0xa78] sm:$0xff] %vm13133_vm5, %v3178_v27  ;;  %2792 = vst.msk [vmem:[#allocation3 + $0xa50] sm:$0xff] %vm13133_vm5, %v2696_v57  ;;  %v3069_v10 = vpop.permute.xlu1 %3068  ;;  %v5150_v15 = vpop.permute.xlu0 %5149  ;;  %9039 = vmatprep.subr.bf16.mxu1 %v11386_v23  ;;  %10682 = vmatmul.mubr.msk.bf16.gmra.mxu0 %vm6518_vm6, %v11481_v43 }
 0x50b   : > { %v3127_v40 = vrot.slane %v3069_v10, 4  ;;  %v5211_v60 = vrot.slane %v5150_v15, 4  ;;  %9040 = vmatpush1.bf16.msra.mxu1 %v11384_v17  ;;  %9374 = vmatprep.mubr.bf16.mxu0 %v11487_v1 }
 0x50c   : > { %2595 = vrot.lane.b32.xlu1 %v15413_v36, %s11769_s17  ;;  %3086 = vrot.lane.b32.xlu0 %v2944_v29, %s11772_s23 }
 0x50d   : > { %v3176_v59 = vsel %vm3138_vm3, %v3069_v10, %v3127_v40  ;;  %v5260_v51 = vsel %vm5225_vm4, %v5150_v15, %v5211_v60  ;;  %v11390_v48 = vld [vmem:[#allocation3 + $0xa80] ss:$8 sps:$4 sm:$0xff]   ;;  %v11392_v31 = vld [vmem:[#allocation3 + $0xa84] ss:$8 sps:$4 sm:$0xff]   ;;  %9041 = vmatprep.subr.bf16.mxu1 %v11389_v42 }
 0x50e   : > { %3272 = vst.msk [vmem:[#allocation3 + $0xa68] sm:$0xff] %vm13133_vm5, %v3176_v59  ;;  %5356 = vst.msk [vmem:[#allocation3 + $0x9f0] sm:$0xff] %vm13133_vm5, %v5260_v51  ;;  %v2592_v54 = vpop.permute.xlu1 %2591  ;;  %v2586_v21 = vpop.permute.xlu0 %2585  ;;  %9344 = vmatprep.subr.bf16.mxu0 %v11392_v31 }
 0x50f   : > { %v2648_v13 = vrot.slane %v2592_v54, 4  ;;  %v2645_v11 = vrot.slane %v2586_v21, 4  ;;  %9042 = vmatpush1.bf16.msra.mxu1 %v11387_v9  ;;  %9345 = vmatpush1.bf16.msra.mxu0 %v11390_v48  ;;  %v7811_v44 = vpop.f32.mrf.mxu1 }
 0x510   : > { %3523 = vrot.lane.b32.xlu1 %v3382_v19, %s11770_s19  ;;  %3082 = vrot.lane.b32.xlu0 %v2942_v6, %s11772_s23  ;;  %v7863_v38 = vadd.f32 %v7862_v35, %v7811_v44 }
 0x511   : > { %v2697_v34 = vsel %vm2657_vm14, %v2592_v54, %v2648_v13  ;;  %v2694_v37 = vsel %vm2657_vm14, %v2586_v21, %v2645_v11  ;;  %v11396_v2 = vld [vmem:[#allocation3 + $0xa70] ss:$8 sps:$4 sm:$0xff]   ;;  %v11398_v46 = vld [vmem:[#allocation3 + $0xa74] ss:$8 sps:$4 sm:$0xff]   ;;  %9043 = vmatprep.subr.bf16.mxu1 %v11395_v63  ;;  %v7813_v14 = vpop.f32.mrf.mxu1 }
 0x512   : > { %2793 = vst.msk [vmem:[#allocation3 + $0xa58] sm:$0xff] %vm13133_vm5, %v2697_v34  ;;  %2790 = vst.msk [vmem:[#allocation3 + $0xa40] sm:$0xff] %vm13133_vm5, %v2694_v37  ;;  %v5152_v45 = vpop.permute.xlu1 %5151  ;;  %v5146_v61 = vpop.permute.xlu0 %5145  ;;  %9346 = vmatprep.subr.bf16.mxu0 %v11398_v46  ;;  %v7865_v28 = vadd.f32 %v7864_v58, %v7813_v14  ;;  %v4642_v34 = vmul.bf16 %v13649_v39, %v15361_v47  ;;  %v11413_v46 = vld [vmem:[#allocation3 + $0xa34] ss:$8 sps:$4 sm:$0xff]  }
 0x513   : > { %v5212_v26 = vrot.slane %v5152_v45, 4  ;;  %v5209_v7 = vrot.slane %v5146_v61, 4  ;;  %10094 = vst [vmem:[%s14955_s9 + $0xc0] sm:$0xff] %v7863_v38  ;;  %9044 = vmatpush1.bf16.msra.mxu1 %v11393_v49  ;;  %9347 = vmatpush1.bf16.msra.mxu0 %v11396_v2  ;;  %v7815_v18 = vpop.f32.mrf.mxu1 }
 0x514   : > { %3088 = vrot.lane.b32.xlu1 %v2945_v20, %s11772_s23  ;;  %2605 = vrot.lane.b32.xlu0 %v15474_v50, %s11769_s17  ;;  %10095 = vst.msk [vmem:[%s14955_s9 + $0xc8] sm:$0xff] %vm381_vm0, %v7865_v28  ;;  %v7867_v43 = vadd.f32 %v7866_v0, %v7815_v18  ;;  %v11419_v28 = vld [vmem:[#allocation3 + $0xa24] ss:$8 sps:$4 sm:$0xff]  }
 0x515   : > { %v5261_v5 = vsel %vm5225_vm4, %v5152_v45, %v5212_v26  ;;  %v5258_v4 = vsel %vm5225_vm4, %v5146_v61, %v5209_v7  ;;  %v11399_v25 = vld [vmem:[#allocation3 + $0xa60] ss:$8 sps:$4 sm:$0xff]   ;;  %v11401_v22 = vld [vmem:[#allocation3 + $0xa64] ss:$8 sps:$4 sm:$0xff]   ;;  %v7817_v17 = vpop.f32.mrf.mxu1  ;;  %v4640_v26 = vmul.bf16 %v13649_v39, %v15377_v41  ;;  %v11411_v7 = vld [vmem:[#allocation3 + $0xa30] ss:$8 sps:$4 sm:$0xff]  }
 0x516   : > { %5357 = vst.msk [vmem:[#allocation3 + $0x9f8] sm:$0xff] %vm13133_vm5, %v5261_v5  ;;  %5354 = vst.msk [vmem:[#allocation3 + $0x9e0] sm:$0xff] %vm13133_vm5, %v5258_v4  ;;  %v2588_v56 = vpop.permute.xlu1 %2587  ;;  %v4765_v30 = vpop.permute.xlu0 %4764  ;;  %9348 = vmatprep.subr.bf16.mxu0 %v11401_v22  ;;  %v7869_v23 = vadd.f32 %v7868_v24, %v7817_v17 }
 0x517   : > { %v2646_v27 = vrot.slane %v2588_v56, 4  ;;  %v4826_v57 = vrot.slane %v4765_v30, 4  ;;  %10096 = vst [vmem:[%s14955_s9 + $0xd0] sm:$0xff] %v7867_v43  ;;  %9349 = vmatpush1.bf16.msra.mxu0 %v11399_v25  ;;  %v11417_v43 = vld [vmem:[#allocation3 + $0xa20] ss:$8 sps:$4 sm:$0xff]  }
 0x518   : > { %3084 = vrot.lane.b32.xlu1 %v2943_v33, %s11772_s23  ;;  %5165 = vrot.lane.b32.xlu0 %v15361_v47, %s11773_s28  ;;  %10097 = vst.msk [vmem:[%s14955_s9 + $0xd8] sm:$0xff] %vm381_vm0, %v7869_v23 }
 0x519   : > { %v2695_v35 = vsel %vm2657_vm14, %v2588_v56, %v2646_v27  ;;  %v4875_v10 = vsel %vm4840_vm7, %v4765_v30, %v4826_v57  ;;  %v11402_v52 = vld [vmem:[#allocation3 + $0xa50] ss:$8 sps:$4 sm:$0xff]   ;;  %v11404_v15 = vld [vmem:[#allocation3 + $0xa54] ss:$8 sps:$4 sm:$0xff]   ;;  %v4643_v56 = vmul.bf16 %v13649_v39, %v15390_v12  ;;  %v4203_v30 = vmul.bf16 %v13679_v62, %v15361_v47 }
 0x51a   : > { %2791 = vst.msk [vmem:[#allocation3 + $0xa48] sm:$0xff] %vm13133_vm5, %v2695_v35  ;;  %4971 = vst.msk [vmem:[#allocation3 + $0x9d0] sm:$0xff] %vm13133_vm5, %v4875_v10  ;;  %v5148_v29 = vpop.permute.xlu1 %5147  ;;  %v4761_v1 = vpop.permute.xlu0 %4760  ;;  %9350 = vmatprep.subr.bf16.mxu0 %v11404_v15 }
 0x51b   : > { %v5210_v40 = vrot.slane %v5148_v29, 4  ;;  %v4824_v60 = vrot.slane %v4761_v1, 4  ;;  %9351 = vmatpush1.bf16.msra.mxu0 %v11402_v52  ;;  %v4641_v52 = vmul.bf16 %v13649_v39, %v15413_v36 }
 0x51c   : > { %2607 = vrot.lane.b32.xlu1 %v15503_v3, %s11769_s17  ;;  %2601 = vrot.lane.b32.xlu0 %v15505_v16, %s11769_s17 }
 0x51d   : > { %v5259_v42 = vsel %vm5225_vm4, %v5148_v29, %v5210_v40  ;;  %v4873_v59 = vsel %vm4840_vm7, %v4761_v1, %v4824_v60  ;;  %v11405_v51 = vld [vmem:[#allocation3 + $0x9f0] ss:$8 sps:$4 sm:$0xff]   ;;  %v11407_v48 = vld [vmem:[#allocation3 + $0x9f4] ss:$8 sps:$4 sm:$0xff]  }
 0x51e   : > { %5355 = vst.msk [vmem:[#allocation3 + $0x9e8] sm:$0xff] %vm13133_vm5, %v5259_v42  ;;  %4969 = vst.msk [vmem:[#allocation3 + $0x9c0] sm:$0xff] %vm13133_vm5, %v4873_v59  ;;  %v4767_v31 = vpop.permute.xlu1 %4766  ;;  %v4326_v58 = vpop.permute.xlu0 %4325  ;;  %9045 = vmatprep.subr.bf16.mxu1 %v11407_v48  ;;  %v4204_v48 = vmul.bf16 %v13679_v62, %v15390_v12 }
 0x51f   : > { %v4827_v54 = vrot.slane %v4767_v31, 4  ;;  %v4387_v21 = vrot.slane %v4326_v58, 4  ;;  %9046 = vmatpush2.bf16.msra.mxu1 %v11405_v51 }
 0x520   : > { %5167 = vrot.lane.b32.xlu1 %v15390_v12, %s11773_s28  ;;  %5161 = vrot.lane.b32.xlu0 %v15377_v41, %s11773_s28 }
 0x521   : > { %v4876_v19 = vsel %vm4840_vm7, %v4767_v31, %v4827_v54  ;;  %v4436_v6 = vsel %vm4401_vm8, %v4326_v58, %v4387_v21  ;;  %v11408_v13 = vld [vmem:[#allocation3 + $0xa40] ss:$8 sps:$4 sm:$0xff]   ;;  %v11410_v9 = vld [vmem:[#allocation3 + $0xa44] ss:$8 sps:$4 sm:$0xff]   ;;  %v4201_v31 = vmul.bf16 %v13679_v62, %v15377_v41 }
 0x522   : > { %4972 = vst.msk [vmem:[#allocation3 + $0x9d8] sm:$0xff] %vm13133_vm5, %v4876_v19  ;;  %4532 = vst.msk [vmem:[#allocation3 + $0x9b0] sm:$0xff] %vm13133_vm5, %v4436_v6  ;;  %v4763_v11 = vpop.permute.xlu1 %4762  ;;  %v5158_v63 = vpop.permute.xlu0 %5157  ;;  %9352 = vmatprep.subr.bf16.mxu0 %v11410_v9 }
 0x523   : > { %v4825_v37 = vrot.slane %v4763_v11, 4  ;;  %v5215_v2 = vrot.slane %v5158_v63, 4  ;;  %9353 = vmatpush1.bf16.msra.mxu0 %v11408_v13 }
 0x524   : > { %2603 = vrot.lane.b32.xlu1 %v15535_v32, %s11769_s17  ;;  %4780 = vrot.lane.b32.xlu0 %v4642_v34, %s11774_s29  ;;  %v7872_v34 = vpop.f32.mrf.mxu0 }
 0x525   : > { %v4874_v44 = vsel %vm4840_vm7, %v4763_v11, %v4825_v37  ;;  %v5264_v0 = vsel %vm5225_vm4, %v5158_v63, %v5215_v2  ;;  %v11414_v45 = vld [vmem:[#allocation3 + $0x9e0] ss:$8 sps:$4 sm:$0xff]   ;;  %v11416_v61 = vld [vmem:[#allocation3 + $0x9e4] ss:$8 sps:$4 sm:$0xff]   ;;  %9354 = vmatprep.subr.bf16.mxu0 %v11413_v46  ;;  %v7821_v63 = vpop.f32.mrf.mxu1 }
 0x526   : > { %4970 = vst.msk [vmem:[#allocation3 + $0x9c8] sm:$0xff] %vm13133_vm5, %v4874_v44  ;;  %5360 = vst.msk [vmem:[#allocation3 + $0xb10] sm:$0xff] %vm13133_vm5, %v5264_v0  ;;  %v4328_v20 = vpop.permute.xlu1 %4327  ;;  %v4322_v38 = vpop.permute.xlu0 %4321  ;;  %9047 = vmatprep.subr.bf16.mxu1 %v11416_v61  ;;  %v7873_v37 = vadd.f32 %v7872_v34, %v7821_v63 }
 0x527   : > { %v4388_v49 = vrot.slane %v4328_v20, 4  ;;  %v4385_v14 = vrot.slane %v4322_v38, 4  ;;  %9048 = vmatpush2.bf16.msra.mxu1 %v11414_v45  ;;  %9355 = vmatpush1.bf16.msra.mxu0 %v11411_v7  ;;  %v7823_v7 = vpop.f32.mrf.mxu1 }
 0x528   : > { %5163 = vrot.lane.b32.xlu1 %v15413_v36, %s11773_s28  ;;  %4776 = vrot.lane.b32.xlu0 %v4640_v26, %s11774_s29  ;;  %10098 = vst [vmem:[%s14955_s9 + $0xe0] sm:$0xff] %v7873_v37 }
 0x529   : > { %v4437_v5 = vsel %vm4401_vm8, %v4328_v20, %v4388_v49  ;;  %v4434_v4 = vsel %vm4401_vm8, %v4322_v38, %v4385_v14  ;;  %v11420_v25 = vld [vmem:[#allocation3 + $0x9d0] ss:$8 sps:$4 sm:$0xff]   ;;  %v11422_v22 = vld [vmem:[#allocation3 + $0x9d4] ss:$8 sps:$4 sm:$0xff]   ;;  %9356 = vmatprep.subr.bf16.mxu0 %v11419_v28  ;;  %v4202_v20 = vmul.bf16 %v13679_v62, %v15413_v36  ;;  %v7874_v14 = vpop.f32.mrf.mxu0 }
 0x52a   : > { %4533 = vst.msk [vmem:[#allocation3 + $0x9b8] sm:$0xff] %vm13133_vm5, %v4437_v5  ;;  %4530 = vst.msk [vmem:[#allocation3 + $0x9a0] sm:$0xff] %vm13133_vm5, %v4434_v4  ;;  %v5160_v18 = vpop.permute.xlu1 %5159  ;;  %v5154_v24 = vpop.permute.xlu0 %5153  ;;  %9049 = vmatprep.subr.bf16.mxu1 %v11422_v22  ;;  %v3764_v49 = vld [vmem:[#allocation2 + $0x150] sm:$0xff]  ;;  %v7875_v28 = vadd.f32 %v7874_v14, %v7823_v7  ;;  %v4207_v14 = vmul.bf16 %v13679_v62, %v15474_v50 }
 0x52b   : > { %v5216_v33 = vrot.slane %v5160_v18, 4  ;;  %v5213_v27 = vrot.slane %v5154_v24, 4  ;;  %9050 = vmatpush2.bf16.msra.mxu1 %v11420_v25  ;;  %9357 = vmatpush1.bf16.msra.mxu0 %v11417_v43  ;;  %v7825_v22 = vpop.f32.mrf.mxu1 }
 0x52c   : > { %4782 = vrot.lane.b32.xlu1 %v4643_v56, %s11774_s29  ;;  %4341 = vrot.lane.b32.xlu0 %v4203_v30, %s11775_s30  ;;  %v4646_v30 = vmul.bf16 %v13649_v39, %v15474_v50  ;;  %10099 = vst.msk [vmem:[%s14955_s9 + $0xe8] sm:$0xff] %vm381_vm0, %v7875_v28 }
 0x52d   : > { %v5265_v57 = vsel %vm5225_vm4, %v5160_v18, %v5216_v33  ;;  %v5262_v17 = vsel %vm5225_vm4, %v5154_v24, %v5213_v27  ;;  %v11423_v23 = vld [vmem:[#allocation3 + $0x9c0] ss:$8 sps:$4 sm:$0xff]   ;;  %v11425_v35 = vld [vmem:[#allocation3 + $0x9c4] ss:$8 sps:$4 sm:$0xff]   ;;  %v7876_v18 = vpop.f32.mrf.mxu0  ;;  %v7826_v27 = vpop.f32.mrf.mxu1 }
 0x52e   : > { %5361 = vst.msk [vmem:[#allocation3 + $0xb18] sm:$0xff] %vm13133_vm5, %v5265_v57  ;;  %5358 = vst.msk [vmem:[#allocation3 + $0xb00] sm:$0xff] %vm13133_vm5, %v5262_v17  ;;  %v4324_v47 = vpop.permute.xlu1 %4323  ;;  %v3887_v10 = vpop.permute.xlu0 %3886  ;;  %9051 = vmatprep.subr.bf16.mxu1 %v11425_v35 }
 0x52f   : > { %v4386_v15 = vrot.slane %v4324_v47, 4  ;;  %v3948_v29 = vrot.slane %v3887_v10, 4  ;;  %9052 = vmatpush2.bf16.msra.mxu1 %v11423_v23  ;;  %v7877_v57 = vpop.f32.mrf.mxu0 }
 0x530   : > { %4778 = vrot.lane.b32.xlu1 %v4641_v52, %s11774_s29  ;;  %5173 = vrot.lane.b32.xlu0 %v15474_v50, %s11773_s28  ;;  %v8175_v52 = vpop.f32.mrf.mxu1 }
 0x531   : > { %v4435_v1 = vsel %vm4401_vm8, %v4324_v47, %v4386_v15  ;;  %v3997_v40 = vsel %vm3962_vm9, %v3887_v10, %v3948_v29  ;;  %v11426_v60 = vld [vmem:[#allocation3 + $0x9b0] ss:$8 sps:$4 sm:$0xff]   ;;  %v11428_v42 = vld [vmem:[#allocation3 + $0x9b4] ss:$8 sps:$4 sm:$0xff]   ;;  %v8124_v10 = vpop.f32.mrf.mxu0 }
 0x532   : > { %4531 = vst.msk [vmem:[#allocation3 + $0x9a8] sm:$0xff] %vm13133_vm5, %v4435_v1  ;;  %4093 = vst.msk [vmem:[#allocation3 + $0x990] sm:$0xff] %vm13133_vm5, %v3997_v40  ;;  %v5156_v59 = vpop.permute.xlu1 %5155  ;;  %v4773_v51 = vpop.permute.xlu0 %4772  ;;  %9053 = vmatprep.subr.bf16.mxu1 %v11428_v42  ;;  %v8176_v1 = vadd.f32 %v8175_v52, %v8124_v10  ;;  %v3762_v42 = vld [vmem:[#allocation2 + $0x140] sm:$0xff]  ;;  %v4205_v10 = vmul.bf16 %v13679_v62, %v15505_v16 }
 0x533   : > { %v5214_v58 = vrot.slane %v5156_v59, 4  ;;  %v4830_v54 = vrot.slane %v4773_v51, 4  ;;  %9054 = vmatpush2.bf16.msra.mxu1 %v11426_v60 }
 0x534   : > { %4343 = vrot.lane.b32.xlu1 %v4204_v48, %s11775_s30  ;;  %4337 = vrot.lane.b32.xlu0 %v4201_v31, %s11775_s30  ;;  %v11751_v48 = vld [vmem:[#allocation2 + $0x158] sm:$0xff]  ;;  %10100 = vst [vmem:[%s14955_s9 + $0xf0] sm:$0xff] %v8176_v1 }
 0x535   : > { %v5263_v21 = vsel %vm5225_vm4, %v5156_v59, %v5214_v58  ;;  %v4879_v19 = vsel %vm4840_vm7, %v4773_v51, %v4830_v54  ;;  %v11429_v6 = vld [vmem:[#allocation3 + $0xb10] ss:$8 sps:$4 sm:$0xff]   ;;  %v11431_v13 = vld [vmem:[#allocation3 + $0xb14] ss:$8 sps:$4 sm:$0xff]   ;;  %v8126_v59 = vpop.f32.mrf.mxu0  ;;  %v8177_v51 = vpop.f32.mrf.mxu1 }
 0x536   : > { %5359 = vst.msk [vmem:[#allocation3 + $0xb08] sm:$0xff] %vm13133_vm5, %v5263_v21  ;;  %4975 = vst.msk [vmem:[#allocation3 + $0xaf0] sm:$0xff] %vm13133_vm5, %v4879_v19  ;;  %v3889_v41 = vpop.permute.xlu1 %3888  ;;  %v3883_v12 = vpop.permute.xlu0 %3882  ;;  %9358 = vmatprep.subr.bf16.mxu0 %v11431_v13  ;;  %v8178_v31 = vadd.f32 %v8177_v51, %v8126_v59 }
 0x537   : > { %v3949_v9 = vrot.slane %v3889_v41, 4  ;;  %v3946_v11 = vrot.slane %v3883_v12, 4  ;;  %9359 = vmatpush2.bf16.msra.mxu0 %v11429_v6  ;;  %v8128_v6 = vpop.f32.mrf.mxu0  ;;  %v8179_v13 = vpop.f32.mrf.mxu1 }
 0x538   : > { %5175 = vrot.lane.b32.xlu1 %v15503_v3, %s11773_s28  ;;  %5169 = vrot.lane.b32.xlu0 %v15505_v16, %s11773_s28  ;;  %10101 = vst.msk [vmem:[%s14955_s9 + $0xf8] sm:$0xff] %vm381_vm0, %v8178_v31  ;;  %v8180_v63 = vadd.f32 %v8179_v13, %v8128_v6  ;;  %v4208_v31 = vmul.bf16 %v13679_v62, %v15503_v3 }
 0x539   : > { %v3998_v2 = vsel %vm3962_vm9, %v3889_v41, %v3949_v9  ;;  %v3995_v46 = vsel %vm3962_vm9, %v3883_v12, %v3946_v11  ;;  %v11432_v44 = vld [vmem:[#allocation3 + $0x9a0] ss:$8 sps:$4 sm:$0xff]   ;;  %v11434_v0 = vld [vmem:[#allocation3 + $0x9a4] ss:$8 sps:$4 sm:$0xff]   ;;  %v4647_v9 = vmul.bf16 %v13649_v39, %v15503_v3  ;;  %v4644_v11 = vmul.bf16 %v13649_v39, %v15505_v16 }
 0x53a   : > { %4094 = vst.msk [vmem:[#allocation3 + $0x998] sm:$0xff] %vm13133_vm5, %v3998_v2  ;;  %4091 = vst.msk [vmem:[#allocation3 + $0x980] sm:$0xff] %vm13133_vm5, %v3995_v46  ;;  %v4775_v45 = vpop.permute.xlu1 %4774  ;;  %v4769_v61 = vpop.permute.xlu0 %4768  ;;  %9055 = vmatprep.subr.bf16.mxu1 %v11434_v0 }
 0x53b   : > { %v4831_v38 = vrot.slane %v4775_v45, 4  ;;  %v4828_v26 = vrot.slane %v4769_v61, 4  ;;  %9056 = vmatpush2.bf16.msra.mxu1 %v11432_v44  ;;  %v8130_v2 = vpop.f32.mrf.mxu0  ;;  %v8181_v46 = vpop.f32.mrf.mxu1  ;;  %10102 = vst [vmem:[%s14955_s9 + $0x100] sm:$0xff] %v8180_v63 }
 0x53c   : > { %4339 = vrot.lane.b32.xlu1 %v4202_v20, %s11775_s30  ;;  %3902 = vrot.lane.b32.xlu0 %v3764_v49, %s11776_s6  ;;  %v8182_v44 = vadd.f32 %v8181_v46, %v8130_v2 }
 0x53d   : > { %v4880_v5 = vsel %vm4840_vm7, %v4775_v45, %v4831_v38  ;;  %v4877_v4 = vsel %vm4840_vm7, %v4769_v61, %v4828_v26  ;;  %v11435_v25 = vld [vmem:[#allocation3 + $0xb00] ss:$8 sps:$4 sm:$0xff]   ;;  %v11437_v36 = vld [vmem:[#allocation3 + $0xb04] ss:$8 sps:$4 sm:$0xff]   ;;  %v8134_v38 = vpop.f32.mrf.mxu0  ;;  %v8185_v26 = vpop.f32.mrf.mxu1 }
 0x53e   : > { %4976 = vst.msk [vmem:[#allocation3 + $0xaf8] sm:$0xff] %vm13133_vm5, %v4880_v5  ;;  %4973 = vst.msk [vmem:[#allocation3 + $0xae0] sm:$0xff] %vm13133_vm5, %v4877_v4  ;;  %v3885_v24 = vpop.permute.xlu1 %3884  ;;  %v4334_v56 = vpop.permute.xlu0 %4333  ;;  %9360 = vmatprep.subr.bf16.mxu0 %v11437_v36  ;;  %v8186_v28 = vadd.f32 %v8185_v26, %v8134_v38  ;;  %v15727_v36 = vld [vmem:[%s13629_s27 + $0x138] sm:$0xff]  ;;  %v5414_v38 = vld [vmem:[#allocation2 + $0x160] sm:$0xff] }
 0x53f   : > { %v3947_v33 = vrot.slane %v3885_v24, 4  ;;  %v4391_v43 = vrot.slane %v4334_v56, 4  ;;  %9361 = vmatpush2.bf16.msra.mxu0 %v11435_v25  ;;  %10103 = vst.msk [vmem:[%s14955_s9 + $0x108] sm:$0xff] %vm381_vm0, %v8182_v44  ;;  %v3763_v25 = vld [vmem:[#allocation2 + $0x148] sm:$0xff]  ;;  %v8136_v22 = vpop.f32.mrf.mxu0  ;;  %v8187_v18 = vpop.f32.mrf.mxu1  ;;  %v10643_v52 = vcombine.high %v15727_v36, %v15727_v36 }
 0x540   : > { %5171 = vrot.lane.b32.xlu1 %v15535_v32, %s11773_s28  ;;  %4788 = vrot.lane.b32.xlu0 %v4646_v30, %s11774_s29  ;;  %10104 = vst [vmem:[%s14955_s9 + $0x110] sm:$0xff] %v8186_v28 }
 0x541   : > { %v3996_v17 = vsel %vm3962_vm9, %v3885_v24, %v3947_v33  ;;  %v4440_v23 = vsel %vm4401_vm8, %v4334_v56, %v4391_v43  ;;  %v11438_v35 = vld [vmem:[#allocation3 + $0x990] ss:$8 sps:$4 sm:$0xff]   ;;  %v11440_v47 = vld [vmem:[#allocation3 + $0x994] ss:$8 sps:$4 sm:$0xff]   ;;  %v11457_v24 = vld [vmem:[%s13629_s27 + $0x120] ss:$12 sps:$4 sm:$0xff]   ;;  %v8188_v56 = vadd.f32 %v8187_v18, %v8136_v22  ;;  %v8138_v57 = vpop.f32.mrf.mxu0 }
 0x542   : > { %4092 = vst.msk [vmem:[#allocation3 + $0x988] sm:$0xff] %vm13133_vm5, %v3996_v17  ;;  %4536 = vst.msk [vmem:[#allocation3 + $0xad0] sm:$0xff] %vm13133_vm5, %v4440_v23  ;;  %v4771_v15 = vpop.permute.xlu1 %4770  ;;  %v4330_v29 = vpop.permute.xlu0 %4329  ;;  %9057 = vmatprep.subr.bf16.mxu1 %v11440_v47  ;;  %v4645_v47 = vmul.bf16 %v13649_v39, %v15535_v32  ;;  %v5415_v57 = vld [vmem:[#allocation2 + $0x168] sm:$0xff] }
 0x543   : > { %v4829_v40 = vrot.slane %v4771_v15, 4  ;;  %v4389_v60 = vrot.slane %v4330_v29, 4  ;;  %9058 = vmatpush2.bf16.msra.mxu1 %v11438_v35  ;;  %v8189_v17 = vpop.f32.mrf.mxu1  ;;  %10105 = vst.msk [vmem:[%s14955_s9 + $0x118] sm:$0xff] %vm381_vm0, %v8188_v56  ;;  %v8139_v1 = vpop.f32.mrf.mxu0 }
 0x544   : > { %3904 = vrot.lane.b32.xlu1 %v11751_v48, %s11776_s6  ;;  %3898 = vrot.lane.b32.xlu0 %v3762_v42, %s11776_s6  ;;  %v11477_v17 = vld [vmem:[%s13629_s27 + $0x14c] ss:$12 sps:$4 sm:$0xff]   ;;  %v5469_v1 = vmul.bf16 %v13480_v8, %v5415_v57 }
 0x545   : > { %v4878_v58 = vsel %vm4840_vm7, %v4771_v15, %v4829_v40  ;;  %v4438_v54 = vsel %vm4401_vm8, %v4330_v29, %v4389_v60  ;;  %v11441_v21 = vld [vmem:[#allocation3 + $0xaf0] ss:$8 sps:$4 sm:$0xff]   ;;  %v11443_v19 = vld [vmem:[#allocation3 + $0xaf4] ss:$8 sps:$4 sm:$0xff]   ;;  %v8190_v40 = vpop.f32.mrf.mxu1 }
 0x546   : > { %4974 = vst.msk [vmem:[#allocation3 + $0xae8] sm:$0xff] %vm13133_vm5, %v4878_v58  ;;  %4534 = vst.msk [vmem:[#allocation3 + $0xac0] sm:$0xff] %vm13133_vm5, %v4438_v54  ;;  %v4336_v41 = vpop.permute.xlu1 %4335  ;;  %v5597_v12 = vpop.permute.xlu0 %5596  ;;  %9362 = vmatprep.subr.bf16.mxu0 %v11443_v19 }
 0x547   : > { %v4392_v34 = vrot.slane %v4336_v41, 4  ;;  %v5654_v37 = vrot.slane %v5597_v12, 4  ;;  %9363 = vmatpush2.bf16.msra.mxu0 %v11441_v21  ;;  %v5416_v21 = vld [vmem:[#allocation2 + $0x170] sm:$0xff] }
 0x548   : > { %4790 = vrot.lane.b32.xlu1 %v4647_v9, %s11774_s29  ;;  %4784 = vrot.lane.b32.xlu0 %v4644_v11, %s11774_s29  ;;  %v5470_v63 = vmul.bf16 %v13480_v8, %v5416_v21 }
 0x549   : > { %v4441_v0 = vsel %vm4401_vm8, %v4336_v41, %v4392_v34  ;;  %v5703_v45 = vsel %vm5664_vm2, %v5597_v12, %v5654_v37  ;;  %v11444_v61 = vld [vmem:[#allocation3 + $0x980] ss:$8 sps:$4 sm:$0xff]   ;;  %v11446_v20 = vld [vmem:[#allocation3 + $0x984] ss:$8 sps:$4 sm:$0xff]   ;;  %v10642_v12 = vcombine.low %v15727_v36, %v15727_v36 }
 0x54a   : > { %4537 = vst.msk [vmem:[#allocation3 + $0xad8] sm:$0xff] %vm13133_vm5, %v4441_v0  ;;  %5799 = vst.msk [vmem:[#allocation3 + $0xb30] sm:$0xff] %vm13133_vm5, %v5703_v45  ;;  %v4332_v49 = vpop.permute.xlu1 %4331  ;;  %v3895_v7 = vpop.permute.xlu0 %3894  ;;  %9059 = vmatprep.subr.bf16.mxu1 %v11446_v20 }
 0x54b   : > { %v4390_v5 = vrot.slane %v4332_v49, 4  ;;  %v3952_v4 = vrot.slane %v3895_v7, 4  ;;  %9060 = vmatpush2.bf16.msra.mxu1 %v11444_v61 }
 0x54c   : > { %3900 = vrot.lane.b32.xlu1 %v3763_v25, %s11776_s6  ;;  %4349 = vrot.lane.b32.xlu0 %v4207_v14, %s11775_s30 }
 0x54d   : > { %v4439_v30 = vsel %vm4401_vm8, %v4332_v49, %v4390_v5  ;;  %v4001_v33 = vsel %vm3962_vm9, %v3895_v7, %v3952_v4  ;;  %v11447_v43 = vld [vmem:[#allocation3 + $0xae0] ss:$8 sps:$4 sm:$0xff]   ;;  %v11449_v27 = vld [vmem:[#allocation3 + $0xae4] ss:$8 sps:$4 sm:$0xff]   ;;  %v11752_v4 = vld [vmem:[#allocation2 + $0x178] sm:$0xff] }
 0x54e   : > { %4535 = vst.msk [vmem:[#allocation3 + $0xac8] sm:$0xff] %vm13133_vm5, %v4439_v30  ;;  %4097 = vst.msk [vmem:[#allocation3 + $0xab0] sm:$0xff] %vm13133_vm5, %v4001_v33  ;;  %v5599_v23 = vpop.permute.xlu1 %5598  ;;  %v5593_v35 = vpop.permute.xlu0 %5592  ;;  %9364 = vmatprep.subr.bf16.mxu0 %v11449_v27  ;;  %9062 = vmatmul.mubr.bf16.vlgmr.msra.gmra.mxu1 %v11457_v24 }
 0x54f   : > { %v5655_v15 = vrot.slane %v5599_v23, 4  ;;  %v5652_v29 = vrot.slane %v5593_v35, 4  ;;  %9365 = vmatpush2.bf16.msra.mxu0 %v11447_v43  ;;  %9071 = vmatprep.mubr.bf16.mxu1 %v10643_v52 }
 0x550   : > { %4786 = vrot.lane.b32.xlu1 %v4645_v47, %s11774_s29  ;;  %4345 = vrot.lane.b32.xlu0 %v4205_v10, %s11775_s30 }
 0x551   : > { %v5704_v60 = vsel %vm5664_vm2, %v5599_v23, %v5655_v15  ;;  %v5701_v39 = vsel %vm5664_vm2, %v5593_v35, %v5652_v29  ;;  %v11451_v42 = vld [vmem:[#allocation3 + $0xad0] ss:$8 sps:$4 sm:$0xff]   ;;  %v11453_v59 = vld [vmem:[#allocation3 + $0xad4] ss:$8 sps:$4 sm:$0xff]   ;;  %v15808_v15 = vpop.f32.mrf.mxu0 }
 0x552   : > { %5800 = vst.msk [vmem:[#allocation3 + $0xb38] sm:$0xff] %vm13133_vm5, %v5704_v60  ;;  %5797 = vst.msk [vmem:[#allocation3 + $0xb20] sm:$0xff] %vm13133_vm5, %v5701_v39  ;;  %v3897_v51 = vpop.permute.xlu1 %3896  ;;  %v3891_v48 = vpop.permute.xlu0 %3890  ;;  %9366 = vmatprep.subr.bf16.mxu0 %v11453_v59  ;;  %v15804_v23 = vld [vmem:[%s13629_s27 + $0x15c] sm:$0xff]  ;;  %v11485_v39 = vld [vmem:[%s13629_s27 + $0x144] ss:$12 sps:$4 sm:$0xff]  }
 0x553   : > { %v3953_v58 = vrot.slane %v3897_v51, 4  ;;  %v3950_v54 = vrot.slane %v3891_v48, 4  ;;  %9367 = vmatpush2.bf16.msra.mxu0 %v11451_v42  ;;  %v10687_v42 = vcombine.high %v15804_v23, %v15804_v23 }
 0x554   : > { %4351 = vrot.lane.b32.xlu1 %v4208_v31, %s11775_s30  ;;  %3910 = vrot.lane.b32.xlu0 %v15474_v50, %s11776_s6  ;;  %v4206_v50 = vmul.bf16 %v13679_v62, %v15535_v32  ;;  %v15823_v31 = vpop.f32.mrf.mxu0 }
 0x555   : > { %v4002_v19 = vsel %vm3962_vm9, %v3897_v51, %v3953_v58  ;;  %v3999_v6 = vsel %vm3962_vm9, %v3891_v48, %v3950_v54  ;;  %v11454_v13 = vld [vmem:[#allocation3 + $0xac0] ss:$8 sps:$4 sm:$0xff]   ;;  %v11456_v41 = vld [vmem:[#allocation3 + $0xac4] ss:$8 sps:$4 sm:$0xff]  }
 0x556   : > { %4098 = vst.msk [vmem:[#allocation3 + $0xab8] sm:$0xff] %vm13133_vm5, %v4002_v19  ;;  %4095 = vst.msk [vmem:[#allocation3 + $0xaa0] sm:$0xff] %vm13133_vm5, %v3999_v6  ;;  %v5595_v9 = vpop.permute.xlu1 %5594  ;;  %v3518_v11 = vpop.permute.xlu0 %3517  ;;  %9368 = vmatprep.subr.bf16.mxu0 %v11456_v41  ;;  %9072 = vmatmul.mubr.bf16.gmra.mxu1 %v10642_v12  ;;  %v11536_v6 = vld [vmem:[%s13629_s27 + $0x164] ss:$0 sps:$4 sm:$0xff]  }
 0x557   : > { %v5653_v34 = vrot.slane %v5595_v9, 4  ;;  %v3571_v37 = vrot.slane %v3518_v11, 4  ;;  %9369 = vmatpush2.bf16.msra.mxu0 %v11454_v13  ;;  %9425 = vmatprep.mubr.bf16.mxu1 %v16232_v53  ;;  %v11572_v13 = vld [vmem:[%s13629_s27 + $0x16c] ss:$12 sps:$4 sm:$0xff]  }
 0x558   : > { %4347 = vrot.lane.b32.xlu1 %v4206_v50, %s11775_s30  ;;  %5612 = vrot.lane.b32.xlu0 %v5470_v63, %s11771_s22  ;;  %v15833_v50 = vpop.f32.mrf.mxu0 }
 0x559   : > { %v5702_v2 = vsel %vm5664_vm2, %v5595_v9, %v5653_v34  ;;  %v3620_v46 = vsel %vm3577_vm1, %v3518_v11, %v3571_v37  ;;  %v11460_v44 = vld [vmem:[#allocation3 + $0xb30] ss:$8 sps:$4 sm:$0xff]   ;;  %v11462_v0 = vld [vmem:[#allocation3 + $0xb34] ss:$8 sps:$4 sm:$0xff]  }
 0x55a   : > { %5798 = vst.msk [vmem:[#allocation3 + $0xb28] sm:$0xff] %vm13133_vm5, %v5702_v2  ;;  %3716 = vst.msk [vmem:[#allocation3 + $0xbb0] sm:$0xff] %vm13133_vm5, %v3620_v46  ;;  %v3893_v62 = vpop.permute.xlu1 %3892  ;;  %v3514_v45 = vpop.permute.xlu0 %3513  ;;  %9405 = vmatprep.subr.bf16.mxu1 %v11462_v0  ;;  %v10686_v46 = vcombine.low %v15804_v23, %v15804_v23 }
 0x55b   : > { %v3951_v61 = vrot.slane %v3893_v62, 4  ;;  %v3569_v20 = vrot.slane %v3514_v45, 4  ;;  %9406 = vmatpush1.bf16.msra.mxu1 %v11460_v44 }
 0x55c   : > { %3912 = vrot.lane.b32.xlu1 %v15503_v3, %s11776_s6  ;;  %3906 = vrot.lane.b32.xlu0 %v15505_v16, %s11776_s6  ;;  %v5471_v3 = vmul.bf16 %v11752_v4, %v13480_v8  ;;  %v5468_v16 = vmul.bf16 %v13480_v8, %v5414_v38 }
 0x55d   : > { %v4000_v26 = vsel %vm3962_vm9, %v3893_v62, %v3951_v61  ;;  %v3618_v49 = vsel %vm3577_vm1, %v3514_v45, %v3569_v20  ;;  %v11463_v7 = vld [vmem:[#allocation3 + $0xab0] ss:$8 sps:$4 sm:$0xff]   ;;  %v11465_v14 = vld [vmem:[#allocation3 + $0xab4] ss:$8 sps:$4 sm:$0xff]   ;;  %v15844_v61 = vpop.f32.mrf.mxu0 }
 0x55e   : > { %4096 = vst.msk [vmem:[#allocation3 + $0xaa8] sm:$0xff] %vm13133_vm5, %v4000_v26  ;;  %3714 = vst.msk [vmem:[#allocation3 + $0xba0] sm:$0xff] %vm13133_vm5, %v3618_v49  ;;  %v3520_v28 = vpop.permute.xlu1 %3519  ;;  %v3079_v5 = vpop.permute.xlu0 %3078  ;;  %9370 = vmatprep.subr.bf16.mxu0 %v11465_v14 }
 0x55f   : > { %v3572_v25 = vrot.slane %v3520_v28, 4  ;;  %v3132_v36 = vrot.slane %v3079_v5, 4  ;;  %9371 = vmatpush2.bf16.msra.mxu0 %v11463_v7  ;;  %v15850_v7 = vpop.f32.mrf.mxu0 }
 0x560   : > { %5614 = vrot.lane.b32.xlu1 %v5471_v3, %s11771_s22  ;;  %5608 = vrot.lane.b32.xlu0 %v5468_v16, %s11771_s22 }
 0x561   : > { %v3621_v22 = vsel %vm3577_vm1, %v3520_v28, %v3572_v25  ;;  %v3181_v18 = vsel %vm3138_vm3, %v3079_v5, %v3132_v36  ;;  %v11467_v24 = vld [vmem:[#allocation3 + $0xb20] ss:$8 sps:$4 sm:$0xff]   ;;  %v11469_v56 = vld [vmem:[#allocation3 + $0xb24] ss:$8 sps:$4 sm:$0xff]   ;;  %v15855_v3 = vpop.f32.mrf.mxu0 }
 0x562   : > { %3717 = vst.msk [vmem:[#allocation3 + $0xbb8] sm:$0xff] %vm13133_vm5, %v3621_v22  ;;  %3277 = vst.msk [vmem:[#allocation3 + $0xb90] sm:$0xff] %vm13133_vm5, %v3181_v18  ;;  %v3516_v30 = vpop.permute.xlu1 %3515  ;;  %v5605_v33 = vpop.permute.xlu0 %5604  ;;  %9407 = vmatprep.subr.bf16.mxu1 %v11469_v56 }
 0x563   : > { %v3570_v43 = vrot.slane %v3516_v30, 4  ;;  %v5658_v27 = vrot.slane %v5605_v33, 4  ;;  %9408 = vmatpush1.bf16.msra.mxu1 %v11467_v24  ;;  %v8502_v18 = vpop.f32.mrf.mxu0 }
 0x564   : > { %3908 = vrot.lane.b32.xlu1 %v15535_v32, %s11776_s6 }
 0x565   : > { %v3619_v35 = vsel %vm3577_vm1, %v3516_v30, %v3570_v43  ;;  %v5707_v47 = vsel %vm5664_vm2, %v5605_v33, %v5658_v27  ;;  %v11471_v10 = vld [vmem:[#allocation3 + $0xaa0] ss:$8 sps:$4 sm:$0xff]   ;;  %v11473_v52 = vld [vmem:[#allocation3 + $0xaa4] ss:$8 sps:$4 sm:$0xff]   ;;  %v8503_v43 = vpop.f32.mrf.mxu0 }
 0x566   : > { %3715 = vst.msk [vmem:[#allocation3 + $0xba8] sm:$0xff] %vm13133_vm5, %v3619_v35  ;;  %5803 = vst.msk [vmem:[#allocation3 + $0xc50] sm:$0xff] %vm13133_vm5, %v5707_v47  ;;  %v3081_v29 = vpop.permute.xlu1 %3080  ;;  %v3075_v32 = vpop.permute.xlu0 %3074  ;;  %9372 = vmatprep.subr.bf16.mxu0 %v11473_v52  ;;  %10725 = vmatmul.mubr.msk.bf16.vlgmr.msra.gmra.mxu1 %vm6518_vm6, %v11477_v17 }
 0x567   : > { %v3133_v40 = vrot.slane %v3081_v29, 4  ;;  %v3130_v60 = vrot.slane %v3075_v32, 4  ;;  %9373 = vmatpush2.bf16.msra.mxu0 %v11471_v10  ;;  %9435 = vmatprep.mubr.bf16.mxu1 %v16232_v53 }
 0x568   : > { %5610 = vrot.lane.b32.xlu1 %v5469_v1, %s11771_s22 }
 0x569   : > { %v3182_v59 = vsel %vm3138_vm3, %v3081_v29, %v3133_v40  ;;  %v3179_v51 = vsel %vm3138_vm3, %v3075_v32, %v3130_v60  ;;  %v11474_v48 = vld [vmem:[#allocation3 + $0xbb0] ss:$8 sps:$4 sm:$0xff]   ;;  %v11476_v8 = vld [vmem:[#allocation3 + $0xbb4] ss:$8 sps:$4 sm:$0xff]  }
 0x56a   : > { %3278 = vst.msk [vmem:[#allocation3 + $0xb98] sm:$0xff] %vm13133_vm5, %v3182_v59  ;;  %3275 = vst.msk [vmem:[#allocation3 + $0xb80] sm:$0xff] %vm13133_vm5, %v3179_v51  ;;  %v5607_v58 = vpop.permute.xlu1 %5606  ;;  %v5601_v54 = vpop.permute.xlu0 %5600  ;;  %9655 = vmatprep.subr.bf16.mxu1 %v11476_v8  ;;  %9375 = vmatmul.mubr.bf16.vlgmr.msra.gmra.mxu0 %v11485_v39  ;;  %v11505_v60 = vld [vmem:[%s13629_s27 + $0x170] ss:$12 sps:$4 sm:$0xff]  }
 0x56b   : > { %v5659_v21 = vrot.slane %v5607_v58, 4  ;;  %v5656_v19 = vrot.slane %v5601_v54, 4  ;;  %9656 = vmatpush1.bf16.msra.mxu1 %v11474_v48  ;;  %9384 = vmatprep.mubr.bf16.mxu0 %v10687_v42 }
 0x56d   : > { %v5708_v41 = vsel %vm5664_vm2, %v5607_v58, %v5659_v21  ;;  %v5705_v12 = vsel %vm5664_vm2, %v5601_v54, %v5656_v19  ;;  %v11478_v9 = vld [vmem:[#allocation3 + $0xba0] ss:$8 sps:$4 sm:$0xff]   ;;  %v11480_v11 = vld [vmem:[#allocation3 + $0xba4] ss:$8 sps:$4 sm:$0xff]  }
 0x56e   : > { %5804 = vst.msk [vmem:[#allocation3 + $0xc58] sm:$0xff] %vm13133_vm5, %v5708_v41  ;;  %5801 = vst.msk [vmem:[#allocation3 + $0xc40] sm:$0xff] %vm13133_vm5, %v5705_v12  ;;  %v3077_v63 = vpop.permute.xlu1 %3076  ;;  %v2598_v34 = vpop.permute.xlu0 %2597  ;;  %9657 = vmatprep.subr.bf16.mxu1 %v11480_v11  ;;  %10726 = vmatmul.mubr.msk.bf16.gmra.mxu1 %vm6518_vm6, %v11536_v6 }
 0x56f   : > { %v3131_v37 = vrot.slane %v3077_v63, 4  ;;  %v2651_v2 = vrot.slane %v2598_v34, 4  ;;  %9658 = vmatpush1.bf16.msra.mxu1 %v11478_v9  ;;  %9687 = vmatprep.mubr.bf16.mxu1 %v11572_v13 }
 0x571   : > { %v3180_v44 = vsel %vm3138_vm3, %v3077_v63, %v3131_v37  ;;  %v2700_v0 = vsel %vm2657_vm14, %v2598_v34, %v2651_v2  ;;  %v11482_v62 = vld [vmem:[#allocation3 + $0xb90] ss:$8 sps:$4 sm:$0xff]   ;;  %v11484_v45 = vld [vmem:[#allocation3 + $0xb94] ss:$8 sps:$4 sm:$0xff]   ;;  %v11590_v63 = vld [vmem:[%s13629_s27 + $0x188] ss:$0 sps:$4 sm:$0xff]  }
 0x572   : > { %3276 = vst.msk [vmem:[#allocation3 + $0xb88] sm:$0xff] %vm13133_vm5, %v3180_v44  ;;  %2796 = vst.msk [vmem:[#allocation3 + $0xb70] sm:$0xff] %vm13133_vm5, %v2700_v0  ;;  %v5603_v20 = vpop.permute.xlu1 %5602  ;;  %v3526_v38 = vpop.permute.xlu0 %3525  ;;  %9659 = vmatprep.subr.bf16.mxu1 %v11484_v45  ;;  %9385 = vmatmul.mubr.bf16.gmra.mxu0 %v10686_v46  ;;  %v11599_v34 = vld [vmem:[%s13629_s27 + $0x190] ss:$12 sps:$4 sm:$0xff]  }
 0x573   : > { %v5657_v26 = vrot.slane %v5603_v20, 4  ;;  %v3575_v49 = vrot.slane %v3526_v38, 4  ;;  %9660 = vmatpush1.bf16.msra.mxu1 %v11482_v62  ;;  %9738 = vmatprep.mubr.bf16.mxu0 %v16232_v53 }
 0x575   : > { %v5706_v14 = vsel %vm5664_vm2, %v5603_v20, %v5657_v26  ;;  %v3624_v28 = vsel %vm3577_vm1, %v3526_v38, %v3575_v49  ;;  %v11488_v5 = vld [vmem:[#allocation3 + $0xc50] ss:$8 sps:$4 sm:$0xff]   ;;  %v11490_v4 = vld [vmem:[#allocation3 + $0xc54] ss:$8 sps:$4 sm:$0xff]  }
 0x576   : > { %5802 = vst.msk [vmem:[#allocation3 + $0xc48] sm:$0xff] %vm13133_vm5, %v5706_v14  ;;  %3720 = vst.msk [vmem:[#allocation3 + $0xcd0] sm:$0xff] %vm13133_vm5, %v3624_v28  ;;  %v2600_v16 = vpop.permute.xlu1 %2599  ;;  %v2594_v25 = vpop.permute.xlu0 %2593  ;;  %9718 = vmatprep.subr.bf16.mxu0 %v11490_v4  ;;  %v11511_v38 = vld [vmem:[#allocation3 + $0xb54] ss:$8 sps:$4 sm:$0xff]   ;;  %v11509_v4 = vld [vmem:[#allocation3 + $0xb50] ss:$8 sps:$4 sm:$0xff]  }
 0x577   : > { %v2652_v36 = vrot.slane %v2600_v16, 4  ;;  %v2649_v22 = vrot.slane %v2594_v25, 4  ;;  %9719 = vmatpush1.bf16.msra.mxu0 %v11488_v5 }
 0x579   : > { %v2701_v24 = vsel %vm2657_vm14, %v2600_v16, %v2652_v36  ;;  %v2698_v56 = vsel %vm2657_vm14, %v2594_v25, %v2649_v22  ;;  %v11491_v30 = vld [vmem:[#allocation3 + $0xb80] ss:$8 sps:$4 sm:$0xff]   ;;  %v11493_v33 = vld [vmem:[#allocation3 + $0xb84] ss:$8 sps:$4 sm:$0xff]  }
 0x57a   : > { %2797 = vst.msk [vmem:[#allocation3 + $0xb78] sm:$0xff] %vm13133_vm5, %v2701_v24  ;;  %2794 = vst.msk [vmem:[#allocation3 + $0xb60] sm:$0xff] %vm13133_vm5, %v2698_v56  ;;  %v3528_v27 = vpop.permute.xlu1 %3527  ;;  %v3522_v57 = vpop.permute.xlu0 %3521  ;;  %9661 = vmatprep.subr.bf16.mxu1 %v11493_v33  ;;  %v11517_v22 = vld [vmem:[#allocation3 + $0xb44] ss:$8 sps:$4 sm:$0xff]  }
 0x57b   : > { %v3576_v17 = vrot.slane %v3528_v27, 4  ;;  %v3573_v23 = vrot.slane %v3522_v57, 4  ;;  %9662 = vmatpush1.bf16.msra.mxu1 %v11491_v30 }
 0x57d   : > { %v3625_v35 = vsel %vm3577_vm1, %v3528_v27, %v3576_v17  ;;  %v3622_v47 = vsel %vm3577_vm1, %v3522_v57, %v3573_v23  ;;  %v11495_v10 = vld [vmem:[#allocation3 + $0xc40] ss:$8 sps:$4 sm:$0xff]   ;;  %v11497_v52 = vld [vmem:[#allocation3 + $0xc44] ss:$8 sps:$4 sm:$0xff]  }
 0x57e   : > { %3721 = vst.msk [vmem:[#allocation3 + $0xcd8] sm:$0xff] %vm13133_vm5, %v3625_v35  ;;  %3718 = vst.msk [vmem:[#allocation3 + $0xcc0] sm:$0xff] %vm13133_vm5, %v3622_v47  ;;  %v2596_v29 = vpop.permute.xlu1 %2595  ;;  %v3087_v32 = vpop.permute.xlu0 %3086  ;;  %9720 = vmatprep.subr.bf16.mxu0 %v11497_v52  ;;  %v11515_v27 = vld [vmem:[#allocation3 + $0xb40] ss:$8 sps:$4 sm:$0xff]  }
 0x57f   : > { %v2650_v1 = vrot.slane %v2596_v29, 4  ;;  %v3136_v40 = vrot.slane %v3087_v32, 4  ;;  %9721 = vmatpush1.bf16.msra.mxu0 %v11495_v10 }
 0x581   : > { %v2699_v39 = vsel %vm2657_vm14, %v2596_v29, %v2650_v1  ;;  %v3185_v42 = vsel %vm3138_vm3, %v3087_v32, %v3136_v40  ;;  %v11499_v59 = vld [vmem:[#allocation3 + $0xb70] ss:$8 sps:$4 sm:$0xff]   ;;  %v11501_v51 = vld [vmem:[#allocation3 + $0xb74] ss:$8 sps:$4 sm:$0xff]  }
 0x582   : > { %2795 = vst.msk [vmem:[#allocation3 + $0xb68] sm:$0xff] %vm13133_vm5, %v2699_v39  ;;  %3281 = vst.msk [vmem:[#allocation3 + $0xcb0] sm:$0xff] %vm13133_vm5, %v3185_v42  ;;  %v3524_v48 = vpop.permute.xlu1 %3523  ;;  %v3083_v8 = vpop.permute.xlu0 %3082  ;;  %9663 = vmatprep.subr.bf16.mxu1 %v11501_v51  ;;  %10769 = vmatmul.mubr.msk.bf16.vlgmr.msra.gmra.mxu0 %vm6518_vm6, %v11505_v60 }
 0x583   : > { %v3574_v58 = vrot.slane %v3524_v48, 4  ;;  %v3134_v54 = vrot.slane %v3083_v8, 4  ;;  %9664 = vmatpush1.bf16.msra.mxu1 %v11499_v59  ;;  %9748 = vmatprep.mubr.bf16.mxu0 %v16232_v53 }
 0x585   : > { %v3623_v21 = vsel %vm3577_vm1, %v3524_v48, %v3574_v58  ;;  %v3183_v19 = vsel %vm3138_vm3, %v3083_v8, %v3134_v54  ;;  %v11502_v6 = vld [vmem:[#allocation3 + $0xcd0] ss:$8 sps:$4 sm:$0xff]   ;;  %v11504_v13 = vld [vmem:[#allocation3 + $0xcd4] ss:$8 sps:$4 sm:$0xff]  }
 0x586   : > { %3719 = vst.msk [vmem:[#allocation3 + $0xcc8] sm:$0xff] %vm13133_vm5, %v3623_v21  ;;  %3279 = vst.msk [vmem:[#allocation3 + $0xca0] sm:$0xff] %vm13133_vm5, %v3183_v19  ;;  %v3089_v41 = vpop.permute.xlu1 %3088  ;;  %v2606_v12 = vpop.permute.xlu0 %2605  ;;  %9968 = vmatprep.subr.bf16.mxu0 %v11504_v13 }
 0x587   : > { %v3137_v9 = vrot.slane %v3089_v41, 4  ;;  %v2655_v11 = vrot.slane %v2606_v12, 4  ;;  %9969 = vmatpush1.bf16.msra.mxu0 %v11502_v6 }
 0x589   : > { %v3186_v37 = vsel %vm3138_vm3, %v3089_v41, %v3137_v9  ;;  %v2704_v2 = vsel %vm2657_vm14, %v2606_v12, %v2655_v11  ;;  %v11506_v46 = vld [vmem:[#allocation3 + $0xb60] ss:$8 sps:$4 sm:$0xff]   ;;  %v11508_v44 = vld [vmem:[#allocation3 + $0xb64] ss:$8 sps:$4 sm:$0xff]  }
 0x58a   : > { %3282 = vst.msk [vmem:[#allocation3 + $0xcb8] sm:$0xff] %vm13133_vm5, %v3186_v37  ;;  %2800 = vst.msk [vmem:[#allocation3 + $0xc90] sm:$0xff] %vm13133_vm5, %v2704_v2  ;;  %v3085_v0 = vpop.permute.xlu1 %3084  ;;  %v5166_v62 = vpop.permute.xlu0 %5165  ;;  %9665 = vmatprep.subr.bf16.mxu1 %v11508_v44  ;;  %10770 = vmatmul.mubr.msk.bf16.gmra.mxu0 %vm6518_vm6, %v11590_v63 }
 0x58b   : > { %v3135_v45 = vrot.slane %v3085_v0, 4  ;;  %v5219_v20 = vrot.slane %v5166_v62, 4  ;;  %9666 = vmatpush1.bf16.msra.mxu1 %v11506_v46  ;;  %10000 = vmatprep.mubr.bf16.mxu0 %v11599_v34 }
 0x58c   : > { %9667 = vmatprep.subr.bf16.mxu1 %v11511_v38 }
 0x58d   : > { %v3184_v26 = vsel %vm3138_vm3, %v3085_v0, %v3135_v45  ;;  %v5268_v49 = vsel %vm5225_vm4, %v5166_v62, %v5219_v20  ;;  %v11512_v14 = vld [vmem:[#allocation3 + $0xcc0] ss:$8 sps:$4 sm:$0xff]   ;;  %v11514_v28 = vld [vmem:[#allocation3 + $0xcc4] ss:$8 sps:$4 sm:$0xff]  }
 0x58e   : > { %3280 = vst.msk [vmem:[#allocation3 + $0xca8] sm:$0xff] %vm13133_vm5, %v3184_v26  ;;  %5364 = vst.msk [vmem:[#allocation3 + $0xc30] sm:$0xff] %vm13133_vm5, %v5268_v49  ;;  %v2608_v5 = vpop.permute.xlu1 %2607  ;;  %v2602_v16 = vpop.permute.xlu0 %2601  ;;  %9970 = vmatprep.subr.bf16.mxu0 %v11514_v28  ;;  %v11535_v28 = vld [vmem:[#allocation3 + $0xc74] ss:$8 sps:$4 sm:$0xff]  }
 0x58f   : > { %v2656_v25 = vrot.slane %v2608_v5, 4  ;;  %v2653_v36 = vrot.slane %v2602_v16, 4  ;;  %9668 = vmatpush1.bf16.msra.mxu1 %v11509_v4  ;;  %9971 = vmatpush1.bf16.msra.mxu0 %v11512_v14  ;;  %v8437_v33 = vpop.f32.mrf.mxu1 }
 0x590   : > { %9669 = vmatprep.subr.bf16.mxu1 %v11517_v22  ;;  %v8489_v17 = vadd.f32 %v15808_v15, %v8437_v33  ;;  %v11533_v22 = vld [vmem:[#allocation3 + $0xc70] ss:$8 sps:$4 sm:$0xff]  }
 0x591   : > { %v2705_v18 = vsel %vm2657_vm14, %v2608_v5, %v2656_v25  ;;  %v2702_v24 = vsel %vm2657_vm14, %v2602_v16, %v2653_v36  ;;  %v11518_v56 = vld [vmem:[#allocation3 + $0xcb0] ss:$8 sps:$4 sm:$0xff]   ;;  %v11520_v30 = vld [vmem:[#allocation3 + $0xcb4] ss:$8 sps:$4 sm:$0xff]   ;;  %v8439_v47 = vpop.f32.mrf.mxu1 }
 0x592   : > { %2801 = vst.msk [vmem:[#allocation3 + $0xc98] sm:$0xff] %vm13133_vm5, %v2705_v18  ;;  %2798 = vst.msk [vmem:[#allocation3 + $0xc80] sm:$0xff] %vm13133_vm5, %v2702_v24  ;;  %v5168_v43 = vpop.permute.xlu1 %5167  ;;  %v5162_v57 = vpop.permute.xlu0 %5161  ;;  %9972 = vmatprep.subr.bf16.mxu0 %v11520_v30  ;;  %v8491_v10 = vadd.f32 %v15823_v31, %v8439_v47  ;;  %v11542_v30 = vld [vmem:[#allocation3 + $0xc64] ss:$8 sps:$4 sm:$0xff]  }
 0x593   : > { %v5220_v23 = vrot.slane %v5168_v43, 4  ;;  %v5217_v35 = vrot.slane %v5162_v57, 4  ;;  %9670 = vmatpush1.bf16.msra.mxu1 %v11515_v27  ;;  %9973 = vmatpush1.bf16.msra.mxu0 %v11518_v56  ;;  %10106 = vst [vmem:[%s14955_s9 + $0x120] sm:$0xff] %v8489_v17  ;;  %v8441_v40 = vpop.f32.mrf.mxu1 }
 0x594   : > { %10107 = vst.msk [vmem:[%s14955_s9 + $0x128] sm:$0xff] %vm381_vm0, %v8491_v10  ;;  %v8493_v31 = vadd.f32 %v15833_v50, %v8441_v40 }
 0x595   : > { %v5269_v52 = vsel %vm5225_vm4, %v5168_v43, %v5220_v23  ;;  %v5266_v29 = vsel %vm5225_vm4, %v5162_v57, %v5217_v35  ;;  %v11521_v32 = vld [vmem:[#allocation3 + $0xca0] ss:$8 sps:$4 sm:$0xff]   ;;  %v11523_v1 = vld [vmem:[#allocation3 + $0xca4] ss:$8 sps:$4 sm:$0xff]   ;;  %v8443_v59 = vpop.f32.mrf.mxu1 }
 0x596   : > { %5365 = vst.msk [vmem:[#allocation3 + $0xc38] sm:$0xff] %vm13133_vm5, %v5269_v52  ;;  %5362 = vst.msk [vmem:[#allocation3 + $0xc20] sm:$0xff] %vm13133_vm5, %v5266_v29  ;;  %v2604_v15 = vpop.permute.xlu1 %2603  ;;  %v4781_v60 = vpop.permute.xlu0 %4780  ;;  %9974 = vmatprep.subr.bf16.mxu0 %v11523_v1  ;;  %v8495_v51 = vadd.f32 %v15844_v61, %v8443_v59  ;;  %v11540_v35 = vld [vmem:[#allocation3 + $0xc60] ss:$8 sps:$4 sm:$0xff]  }
 0x597   : > { %v2654_v39 = vrot.slane %v2604_v15, 4  ;;  %v4834_v42 = vrot.slane %v4781_v60, 4  ;;  %9975 = vmatpush1.bf16.msra.mxu0 %v11521_v32  ;;  %10108 = vst [vmem:[%s14955_s9 + $0x130] sm:$0xff] %v8493_v31  ;;  %v8447_v21 = vpop.f32.mrf.mxu1 }
 0x598   : > { %10109 = vst.msk [vmem:[%s14955_s9 + $0x138] sm:$0xff] %vm381_vm0, %v8495_v51  ;;  %v8499_v61 = vadd.f32 %v15850_v7, %v8447_v21 }
 0x599   : > { %v2703_v48 = vsel %vm2657_vm14, %v2604_v15, %v2654_v39  ;;  %v4883_v8 = vsel %vm4840_vm7, %v4781_v60, %v4834_v42  ;;  %v11524_v58 = vld [vmem:[#allocation3 + $0xc90] ss:$8 sps:$4 sm:$0xff]   ;;  %v11526_v54 = vld [vmem:[#allocation3 + $0xc94] ss:$8 sps:$4 sm:$0xff]   ;;  %v8449_v41 = vpop.f32.mrf.mxu1 }
 0x59a   : > { %2799 = vst.msk [vmem:[#allocation3 + $0xc88] sm:$0xff] %vm13133_vm5, %v2703_v48  ;;  %4979 = vst.msk [vmem:[#allocation3 + $0xc10] sm:$0xff] %vm13133_vm5, %v4883_v8  ;;  %v5164_v50 = vpop.permute.xlu1 %5163  ;;  %v4777_v19 = vpop.permute.xlu0 %4776  ;;  %9976 = vmatprep.subr.bf16.mxu0 %v11526_v54  ;;  %v8501_v12 = vadd.f32 %v15855_v3, %v8449_v41 }
 0x59b   : > { %v5218_v6 = vrot.slane %v5164_v50, 4  ;;  %v4832_v13 = vrot.slane %v4777_v19, 4  ;;  %9977 = vmatpush1.bf16.msra.mxu0 %v11524_v58  ;;  %10110 = vst [vmem:[%s14955_s9 + $0x140] sm:$0xff] %v8499_v61  ;;  %v8451_v37 = vpop.f32.mrf.mxu1 }
 0x59c   : > { %10111 = vst.msk [vmem:[%s14955_s9 + $0x148] sm:$0xff] %vm381_vm0, %v8501_v12 }
 0x59d   : > { %v5267_v9 = vsel %vm5225_vm4, %v5164_v50, %v5218_v6  ;;  %v4881_v11 = vsel %vm4840_vm7, %v4777_v19, %v4832_v13  ;;  %v11527_v63 = vld [vmem:[#allocation3 + $0xc30] ss:$8 sps:$4 sm:$0xff]   ;;  %v11529_v34 = vld [vmem:[#allocation3 + $0xc34] ss:$8 sps:$4 sm:$0xff]   ;;  %v8452_v3 = vpop.f32.mrf.mxu1 }
 0x59e   : > { %5363 = vst.msk [vmem:[#allocation3 + $0xc28] sm:$0xff] %vm13133_vm5, %v5267_v9  ;;  %4977 = vst.msk [vmem:[#allocation3 + $0xc00] sm:$0xff] %vm13133_vm5, %v4881_v11  ;;  %v4783_v7 = vpop.permute.xlu1 %4782  ;;  %v4342_v2 = vpop.permute.xlu0 %4341  ;;  %9671 = vmatprep.subr.bf16.mxu1 %v11529_v34 }
 0x59f   : > { %v4835_v46 = vrot.slane %v4783_v7, 4  ;;  %v4395_v44 = vrot.slane %v4342_v2, 4  ;;  %9672 = vmatpush2.bf16.msra.mxu1 %v11527_v63 }
 0x5a1   : > { %v4884_v0 = vsel %vm4840_vm7, %v4783_v7, %v4835_v46  ;;  %v4444_v62 = vsel %vm4401_vm8, %v4342_v2, %v4395_v44  ;;  %v11530_v45 = vld [vmem:[#allocation3 + $0xc80] ss:$8 sps:$4 sm:$0xff]   ;;  %v11532_v20 = vld [vmem:[#allocation3 + $0xc84] ss:$8 sps:$4 sm:$0xff]  }
 0x5a2   : > { %4980 = vst.msk [vmem:[#allocation3 + $0xc18] sm:$0xff] %vm13133_vm5, %v4884_v0  ;;  %4540 = vst.msk [vmem:[#allocation3 + $0xbf0] sm:$0xff] %vm13133_vm5, %v4444_v62  ;;  %v4779_v38 = vpop.permute.xlu1 %4778  ;;  %v5174_v26 = vpop.permute.xlu0 %5173  ;;  %9978 = vmatprep.subr.bf16.mxu0 %v11532_v20 }
 0x5a3   : > { %v4833_v49 = vrot.slane %v4779_v38, 4  ;;  %v5223_v14 = vrot.slane %v5174_v26, 4  ;;  %9979 = vmatpush1.bf16.msra.mxu0 %v11530_v45 }
 0x5a4   : > { %9980 = vmatprep.subr.bf16.mxu0 %v11535_v28 }
 0x5a5   : > { %v4882_v5 = vsel %vm4840_vm7, %v4779_v38, %v4833_v49  ;;  %v5272_v4 = vsel %vm5225_vm4, %v5174_v26, %v5223_v14  ;;  %v11537_v16 = vld [vmem:[#allocation3 + $0xc20] ss:$8 sps:$4 sm:$0xff]   ;;  %v11539_v25 = vld [vmem:[#allocation3 + $0xc24] ss:$8 sps:$4 sm:$0xff]  }
 0x5a6   : > { %4978 = vst.msk [vmem:[#allocation3 + $0xc08] sm:$0xff] %vm13133_vm5, %v4882_v5  ;;  %5368 = vst.msk [vmem:[#allocation3 + $0xd50] sm:$0xff] %vm13133_vm5, %v5272_v4  ;;  %v4344_v36 = vpop.permute.xlu1 %4343  ;;  %v4338_v18 = vpop.permute.xlu0 %4337  ;;  %9673 = vmatprep.subr.bf16.mxu1 %v11539_v25 }
 0x5a7   : > { %v4396_v24 = vrot.slane %v4344_v36, 4  ;;  %v4393_v56 = vrot.slane %v4338_v18, 4  ;;  %9674 = vmatpush2.bf16.msra.mxu1 %v11537_v16  ;;  %9981 = vmatpush1.bf16.msra.mxu0 %v11533_v22  ;;  %v8801_v17 = vpop.f32.mrf.mxu1 }
 0x5a8   : > { %9982 = vmatprep.subr.bf16.mxu0 %v11542_v30 }
 0x5a9   : > { %v4445_v33 = vsel %vm4401_vm8, %v4344_v36, %v4396_v24  ;;  %v4442_v43 = vsel %vm4401_vm8, %v4338_v18, %v4393_v56  ;;  %v11543_v27 = vld [vmem:[#allocation3 + $0xc10] ss:$8 sps:$4 sm:$0xff]   ;;  %v11545_v57 = vld [vmem:[#allocation3 + $0xc14] ss:$8 sps:$4 sm:$0xff]   ;;  %v8803_v29 = vpop.f32.mrf.mxu1 }
 0x5aa   : > { %4541 = vst.msk [vmem:[#allocation3 + $0xbf8] sm:$0xff] %vm13133_vm5, %v4445_v33  ;;  %4538 = vst.msk [vmem:[#allocation3 + $0xbe0] sm:$0xff] %vm13133_vm5, %v4442_v43  ;;  %v5176_v23 = vpop.permute.xlu1 %5175  ;;  %v5170_v47 = vpop.permute.xlu0 %5169  ;;  %9675 = vmatprep.subr.bf16.mxu1 %v11545_v57 }
 0x5ab   : > { %v5224_v10 = vrot.slane %v5176_v23, 4  ;;  %v5221_v52 = vrot.slane %v5170_v47, 4  ;;  %9676 = vmatpush2.bf16.msra.mxu1 %v11543_v27  ;;  %9983 = vmatpush1.bf16.msra.mxu0 %v11540_v35  ;;  %v8750_v60 = vpop.f32.mrf.mxu0  ;;  %v8805_v31 = vpop.f32.mrf.mxu1 }
 0x5ac   : > { %v8802_v59 = vadd.f32 %v8801_v17, %v8750_v60 }
 0x5ad   : > { %v5273_v32 = vsel %vm5225_vm4, %v5176_v23, %v5224_v10  ;;  %v5270_v1 = vsel %vm5225_vm4, %v5170_v47, %v5221_v52  ;;  %v11546_v40 = vld [vmem:[#allocation3 + $0xc00] ss:$8 sps:$4 sm:$0xff]   ;;  %v11548_v15 = vld [vmem:[#allocation3 + $0xc04] ss:$8 sps:$4 sm:$0xff]   ;;  %v8752_v8 = vpop.f32.mrf.mxu0  ;;  %v8807_v58 = vpop.f32.mrf.mxu1 }
 0x5ae   : > { %5369 = vst.msk [vmem:[#allocation3 + $0xd58] sm:$0xff] %vm13133_vm5, %v5273_v32  ;;  %5366 = vst.msk [vmem:[#allocation3 + $0xd40] sm:$0xff] %vm13133_vm5, %v5270_v1  ;;  %v4340_v39 = vpop.permute.xlu1 %4339  ;;  %v3903_v42 = vpop.permute.xlu0 %3902  ;;  %9677 = vmatprep.subr.bf16.mxu1 %v11548_v15  ;;  %v8804_v54 = vadd.f32 %v8803_v29, %v8752_v8 }
 0x5af   : > { %v4394_v51 = vrot.slane %v4340_v39, 4  ;;  %v3956_v48 = vrot.slane %v3903_v42, 4  ;;  %9678 = vmatpush2.bf16.msra.mxu1 %v11546_v40  ;;  %10112 = vst [vmem:[%s14955_s9 + $0x150] sm:$0xff] %v8802_v59  ;;  %v8754_v6 = vpop.f32.mrf.mxu0  ;;  %v8811_v34 = vpop.f32.mrf.mxu1 }
 0x5b0   : > { %10113 = vst.msk [vmem:[%s14955_s9 + $0x158] sm:$0xff] %vm381_vm0, %v8804_v54  ;;  %v8806_v12 = vadd.f32 %v8805_v31, %v8754_v6 }
 0x5b1   : > { %v4443_v21 = vsel %vm4401_vm8, %v4340_v39, %v4394_v51  ;;  %v4005_v50 = vsel %vm3962_vm9, %v3903_v42, %v3956_v48  ;;  %v11549_v19 = vld [vmem:[#allocation3 + $0xbf0] ss:$8 sps:$4 sm:$0xff]   ;;  %v11551_v61 = vld [vmem:[#allocation3 + $0xbf4] ss:$8 sps:$4 sm:$0xff]   ;;  %v8756_v63 = vpop.f32.mrf.mxu0  ;;  %v8813_v0 = vpop.f32.mrf.mxu1 }
 0x5b2   : > { %4539 = vst.msk [vmem:[#allocation3 + $0xbe8] sm:$0xff] %vm13133_vm5, %v4443_v21  ;;  %4101 = vst.msk [vmem:[#allocation3 + $0xbd0] sm:$0xff] %vm13133_vm5, %v4005_v50  ;;  %v5172_v13 = vpop.permute.xlu1 %5171  ;;  %v4789_v41 = vpop.permute.xlu0 %4788  ;;  %9679 = vmatprep.subr.bf16.mxu1 %v11551_v61  ;;  %v8808_v37 = vadd.f32 %v8807_v58, %v8756_v63 }
 0x5b3   : > { %v5222_v9 = vrot.slane %v5172_v13, 4  ;;  %v4838_v11 = vrot.slane %v4789_v41, 4  ;;  %9680 = vmatpush2.bf16.msra.mxu1 %v11549_v19  ;;  %10114 = vst [vmem:[%s14955_s9 + $0x160] sm:$0xff] %v8806_v12  ;;  %v8760_v3 = vpop.f32.mrf.mxu0  ;;  %v8815_v14 = vpop.f32.mrf.mxu1  ;;  %v5873_v19 = vld [vmem:[%s13629_s27 + $0x180] sm:$0xff] }
 0x5b4   : > { %10115 = vst.msk [vmem:[%s14955_s9 + $0x168] sm:$0xff] %vm381_vm0, %v8808_v37  ;;  %v8812_v20 = vadd.f32 %v8811_v34, %v8760_v3  ;;  %v11570_v37 = vld [vmem:[%s13629_s27 + $0x168] ss:$12 sps:$4 sm:$0xff]  }
 0x5b5   : > { %v5271_v7 = vsel %vm5225_vm4, %v5172_v13, %v5222_v9  ;;  %v4887_v2 = vsel %vm4840_vm7, %v4789_v41, %v4838_v11  ;;  %v11552_v46 = vld [vmem:[#allocation3 + $0xd50] ss:$8 sps:$4 sm:$0xff]   ;;  %v11554_v44 = vld [vmem:[#allocation3 + $0xd54] ss:$8 sps:$4 sm:$0xff]   ;;  %v8762_v49 = vpop.f32.mrf.mxu0  ;;  %v8816_v22 = vpop.f32.mrf.mxu1 }
 0x5b6   : > { %5367 = vst.msk [vmem:[#allocation3 + $0xd48] sm:$0xff] %vm13133_vm5, %v5271_v7  ;;  %4983 = vst.msk [vmem:[#allocation3 + $0xd30] sm:$0xff] %vm13133_vm5, %v4887_v2  ;;  %v3905_v62 = vpop.permute.xlu1 %3904  ;;  %v3899_v45 = vpop.permute.xlu0 %3898  ;;  %9984 = vmatprep.subr.bf16.mxu0 %v11554_v44  ;;  %v8814_v28 = vadd.f32 %v8813_v0, %v8762_v49  ;;  %v10731_v2 = vcombine.high %v5873_v19, %v5873_v19 }
 0x5b7   : > { %v3957_v38 = vrot.slane %v3905_v62, 4  ;;  %v3954_v26 = vrot.slane %v3899_v45, 4  ;;  %9985 = vmatpush2.bf16.msra.mxu0 %v11552_v46  ;;  %10116 = vst [vmem:[%s14955_s9 + $0x170] sm:$0xff] %v8812_v20  ;;  %v8764_v36 = vpop.f32.mrf.mxu0 }
 0x5b8   : > { %10117 = vst.msk [vmem:[%s14955_s9 + $0x178] sm:$0xff] %vm381_vm0, %v8814_v28 }
 0x5b9   : > { %v4006_v5 = vsel %vm3962_vm9, %v3905_v62, %v3957_v38  ;;  %v4003_v4 = vsel %vm3962_vm9, %v3899_v45, %v3954_v26  ;;  %v11555_v16 = vld [vmem:[#allocation3 + $0xbe0] ss:$8 sps:$4 sm:$0xff]   ;;  %v11557_v25 = vld [vmem:[#allocation3 + $0xbe4] ss:$8 sps:$4 sm:$0xff]   ;;  %v8765_v33 = vpop.f32.mrf.mxu0 }
 0x5ba   : > { %4102 = vst.msk [vmem:[#allocation3 + $0xbd8] sm:$0xff] %vm13133_vm5, %v4006_v5  ;;  %4099 = vst.msk [vmem:[#allocation3 + $0xbc0] sm:$0xff] %vm13133_vm5, %v4003_v4  ;;  %v4791_v18 = vpop.permute.xlu1 %4790  ;;  %v4785_v24 = vpop.permute.xlu0 %4784  ;;  %9681 = vmatprep.subr.bf16.mxu1 %v11557_v25 }
 0x5bb   : > { %v4839_v56 = vrot.slane %v4791_v18, 4  ;;  %v4836_v30 = vrot.slane %v4785_v24, 4  ;;  %9682 = vmatpush2.bf16.msra.mxu1 %v11555_v16 }
 0x5bd   : > { %v4888_v43 = vsel %vm4840_vm7, %v4791_v18, %v4839_v56  ;;  %v4885_v27 = vsel %vm4840_vm7, %v4785_v24, %v4836_v30  ;;  %v11558_v57 = vld [vmem:[#allocation3 + $0xd40] ss:$8 sps:$4 sm:$0xff]   ;;  %v11560_v17 = vld [vmem:[#allocation3 + $0xd44] ss:$8 sps:$4 sm:$0xff]   ;;  %v10730_v24 = vcombine.low %v5873_v19, %v5873_v19 }
 0x5be   : > { %4984 = vst.msk [vmem:[#allocation3 + $0xd38] sm:$0xff] %vm13133_vm5, %v4888_v43  ;;  %4981 = vst.msk [vmem:[#allocation3 + $0xd20] sm:$0xff] %vm13133_vm5, %v4885_v27  ;;  %v3901_v23 = vpop.permute.xlu1 %3900  ;;  %v4350_v35 = vpop.permute.xlu0 %4349  ;;  %9986 = vmatprep.subr.bf16.mxu0 %v11560_v17 }
 0x5bf   : > { %v3955_v47 = vrot.slane %v3901_v23, 4  ;;  %v4399_v10 = vrot.slane %v4350_v35, 4  ;;  %9987 = vmatpush2.bf16.msra.mxu0 %v11558_v57 }
 0x5c1   : > { %v4004_v52 = vsel %vm3962_vm9, %v3901_v23, %v3955_v47  ;;  %v4448_v29 = vsel %vm4401_vm8, %v4350_v35, %v4399_v10  ;;  %v11561_v32 = vld [vmem:[#allocation3 + $0xbd0] ss:$8 sps:$4 sm:$0xff]   ;;  %v11563_v1 = vld [vmem:[#allocation3 + $0xbd4] ss:$8 sps:$4 sm:$0xff]  }
 0x5c2   : > { %4100 = vst.msk [vmem:[#allocation3 + $0xbc8] sm:$0xff] %vm13133_vm5, %v4004_v52  ;;  %4544 = vst.msk [vmem:[#allocation3 + $0xd10] sm:$0xff] %vm13133_vm5, %v4448_v29  ;;  %v4787_v40 = vpop.permute.xlu1 %4786  ;;  %v4346_v15 = vpop.permute.xlu0 %4345  ;;  %9683 = vmatprep.subr.bf16.mxu1 %v11563_v1 }
 0x5c3   : > { %v4837_v60 = vrot.slane %v4787_v40, 4  ;;  %v4397_v31 = vrot.slane %v4346_v15, 4  ;;  %9684 = vmatpush2.bf16.msra.mxu1 %v11561_v32  ;;  %v16007_v48 = vpop.f32.mrf.mxu0 }
 0x5c5   : > { %v4886_v39 = vsel %vm4840_vm7, %v4787_v40, %v4837_v60  ;;  %v4446_v42 = vsel %vm4401_vm8, %v4346_v15, %v4397_v31  ;;  %v11564_v59 = vld [vmem:[#allocation3 + $0xd30] ss:$8 sps:$4 sm:$0xff]   ;;  %v11566_v51 = vld [vmem:[#allocation3 + $0xd34] ss:$8 sps:$4 sm:$0xff]   ;;  %v16013_v50 = vpop.f32.mrf.mxu0  ;;  %v5879_v40 = vld [vmem:[%s13629_s27 + $0x1a4] sm:$0xff] }
 0x5c6   : > { %4982 = vst.msk [vmem:[#allocation3 + $0xd28] sm:$0xff] %vm13133_vm5, %v4886_v39  ;;  %4542 = vst.msk [vmem:[#allocation3 + $0xd00] sm:$0xff] %vm13133_vm5, %v4446_v42  ;;  %v4352_v8 = vpop.permute.xlu1 %4351  ;;  %v3911_v58 = vpop.permute.xlu0 %3910  ;;  %9988 = vmatprep.subr.bf16.mxu0 %v11566_v51  ;;  %v11597_v31 = vld [vmem:[%s13629_s27 + $0x18c] ss:$12 sps:$4 sm:$0xff]   ;;  %v10775_v39 = vcombine.high %v5879_v40, %v5879_v40  ;;  %v11600_v51 = vld [vmem:[%s13629_s27 + $0x194] ss:$12 sps:$4 sm:$0xff]   ;;  %v10774_v55 = vcombine.low %v5879_v40, %v5879_v40 }
 0x5c7   : > { %v4400_v54 = vrot.slane %v4352_v8, 4  ;;  %v3960_v21 = vrot.slane %v3911_v58, 4  ;;  %9989 = vmatpush2.bf16.msra.mxu0 %v11564_v59  ;;  %v16018_v12 = vpop.f32.mrf.mxu0 }
 0x5c9   : > { %v4449_v61 = vsel %vm4401_vm8, %v4352_v8, %v4400_v54  ;;  %v4009_v6 = vsel %vm3962_vm9, %v3911_v58, %v3960_v21  ;;  %v11567_v13 = vld [vmem:[#allocation3 + $0xbc0] ss:$8 sps:$4 sm:$0xff]   ;;  %v11569_v41 = vld [vmem:[#allocation3 + $0xbc4] ss:$8 sps:$4 sm:$0xff]   ;;  %v16025_v7 = vpop.f32.mrf.mxu0 }
 0x5ca   : > { %4545 = vst.msk [vmem:[#allocation3 + $0xd18] sm:$0xff] %vm13133_vm5, %v4449_v61  ;;  %4105 = vst.msk [vmem:[#allocation3 + $0xcf0] sm:$0xff] %vm13133_vm5, %v4009_v6  ;;  %v4348_v9 = vpop.permute.xlu1 %4347  ;;  %v5613_v11 = vpop.permute.xlu0 %5612  ;;  %9685 = vmatprep.subr.bf16.mxu1 %v11569_v41  ;;  %v11603_v8 = vld [vmem:[%s13629_s27 + $0x1ac] ss:$0 sps:$4 sm:$0xff]  }
 0x5cb   : > { %v4398_v63 = vrot.slane %v4348_v9, 4  ;;  %v5662_v34 = vrot.slane %v5613_v11, 4  ;;  %9686 = vmatpush2.bf16.msra.mxu1 %v11567_v13  ;;  %v16029_v62 = vpop.f32.mrf.mxu0 }
 0x5cd   : > { %v4447_v46 = vsel %vm4401_vm8, %v4348_v9, %v4398_v63  ;;  %v5711_v44 = vsel %vm5664_vm2, %v5613_v11, %v5662_v34  ;;  %v11573_v3 = vld [vmem:[#allocation3 + $0xd20] ss:$8 sps:$4 sm:$0xff]   ;;  %v11575_v0 = vld [vmem:[#allocation3 + $0xd24] ss:$8 sps:$4 sm:$0xff]   ;;  %v16035_v49 = vpop.f32.mrf.mxu0 }
 0x5ce   : > { %4543 = vst.msk [vmem:[#allocation3 + $0xd08] sm:$0xff] %vm13133_vm5, %v4447_v46  ;;  %5807 = vst.msk [vmem:[#allocation3 + $0xd70] sm:$0xff] %vm13133_vm5, %v5711_v44  ;;  %v3913_v45 = vpop.permute.xlu1 %3912  ;;  %v3907_v20 = vpop.permute.xlu0 %3906  ;;  %9688 = vmatmul.mubr.bf16.vlgmr.msra.gmra.mxu1 %v11570_v37  ;;  %9990 = vmatprep.subr.bf16.mxu0 %v11575_v0 }
 0x5cf   : > { %v3961_v38 = vrot.slane %v3913_v45, 4  ;;  %v3958_v26 = vrot.slane %v3907_v20, 4  ;;  %9991 = vmatpush2.bf16.msra.mxu0 %v11573_v3  ;;  %9697 = vmatprep.mubr.bf16.mxu1 %v10731_v2  ;;  %v9128_v16 = vpop.f32.mrf.mxu0 }
 0x5d1   : > { %v4010_v14 = vsel %vm3962_vm9, %v3913_v45, %v3961_v38  ;;  %v4007_v28 = vsel %vm3962_vm9, %v3907_v20, %v3958_v26  ;;  %v11576_v5 = vld [vmem:[#allocation3 + $0xd10] ss:$8 sps:$4 sm:$0xff]   ;;  %v11578_v4 = vld [vmem:[#allocation3 + $0xd14] ss:$8 sps:$4 sm:$0xff]   ;;  %v9129_v56 = vpop.f32.mrf.mxu0 }
 0x5d2   : > { %4106 = vst.msk [vmem:[#allocation3 + $0xcf8] sm:$0xff] %vm13133_vm5, %v4010_v14  ;;  %4103 = vst.msk [vmem:[#allocation3 + $0xce0] sm:$0xff] %vm13133_vm5, %v4007_v28  ;;  %v5615_v25 = vpop.permute.xlu1 %5614  ;;  %v5609_v36 = vpop.permute.xlu0 %5608  ;;  %9992 = vmatprep.subr.bf16.mxu0 %v11578_v4 }
 0x5d3   : > { %v5663_v22 = vrot.slane %v5615_v25, 4  ;;  %v5660_v18 = vrot.slane %v5609_v36, 4  ;;  %9993 = vmatpush2.bf16.msra.mxu0 %v11576_v5 }
 0x5d5   : > { %v5712_v30 = vsel %vm5664_vm2, %v5615_v25, %v5663_v22  ;;  %v5709_v33 = vsel %vm5664_vm2, %v5609_v36, %v5660_v18  ;;  %v11579_v43 = vld [vmem:[#allocation3 + $0xd00] ss:$8 sps:$4 sm:$0xff]   ;;  %v11581_v27 = vld [vmem:[#allocation3 + $0xd04] ss:$8 sps:$4 sm:$0xff]  }
 0x5d6   : > { %5808 = vst.msk [vmem:[#allocation3 + $0xd78] sm:$0xff] %vm13133_vm5, %v5712_v30  ;;  %5805 = vst.msk [vmem:[#allocation3 + $0xd60] sm:$0xff] %vm13133_vm5, %v5709_v33  ;;  %v3909_v57 = vpop.permute.xlu1 %3908  ;;  %9994 = vmatprep.subr.bf16.mxu0 %v11581_v27  ;;  %9698 = vmatmul.mubr.bf16.gmra.mxu1 %v10730_v24 }
 0x5d7   : > { %v3959_v17 = vrot.slane %v3909_v57, 4  ;;  %9995 = vmatpush2.bf16.msra.mxu0 %v11579_v43  ;;  %10051 = vmatprep.mubr.bf16.mxu1 %v16232_v53 }
 0x5d9   : > { %v4008_v23 = vsel %vm3962_vm9, %v3909_v57, %v3959_v17  ;;  %v11582_v35 = vld [vmem:[#allocation3 + $0xcf0] ss:$8 sps:$4 sm:$0xff]   ;;  %v11584_v47 = vld [vmem:[#allocation3 + $0xcf4] ss:$8 sps:$4 sm:$0xff]  }
 0x5da   : > { %4104 = vst.msk [vmem:[#allocation3 + $0xce8] sm:$0xff] %vm13133_vm5, %v4008_v23  ;;  %v5611_v10 = vpop.permute.xlu1 %5610  ;;  %9996 = vmatprep.subr.bf16.mxu0 %v11584_v47 }
 0x5db   : > { %v5661_v52 = vrot.slane %v5611_v10, 4  ;;  %9997 = vmatpush2.bf16.msra.mxu0 %v11582_v35 }
 0x5dd   : > { %v5710_v29 = vsel %vm5664_vm2, %v5611_v10, %v5661_v52  ;;  %v11585_v32 = vld [vmem:[#allocation3 + $0xd70] ss:$8 sps:$4 sm:$0xff]   ;;  %v11587_v1 = vld [vmem:[#allocation3 + $0xd74] ss:$8 sps:$4 sm:$0xff]  }
 0x5de   : > { %5806 = vst.msk [vmem:[#allocation3 + $0xd68] sm:$0xff] %vm13133_vm5, %v5710_v29  ;;  %10031 = vmatprep.subr.bf16.mxu1 %v11587_v1 }
 0x5df   : > { %10032 = vmatpush1.bf16.msra.mxu1 %v11585_v32 }
 0x5e1   : > { %v11591_v15 = vld [vmem:[#allocation3 + $0xce0] ss:$8 sps:$4 sm:$0xff]   ;;  %v11593_v60 = vld [vmem:[#allocation3 + $0xce4] ss:$8 sps:$4 sm:$0xff]  }
 0x5e2   : > { %9998 = vmatprep.subr.bf16.mxu0 %v11593_v60 }
 0x5e3   : > { %9999 = vmatpush2.bf16.msra.mxu0 %v11591_v15 }
 0x5e5   : > { %v11594_v42 = vld [vmem:[#allocation3 + $0xd60] ss:$8 sps:$4 sm:$0xff]   ;;  %v11596_v59 = vld [vmem:[#allocation3 + $0xd64] ss:$8 sps:$4 sm:$0xff]  }
 0x5e6   : > { %10033 = vmatprep.subr.bf16.mxu1 %v11596_v59  ;;  %10001 = vmatmul.mubr.bf16.vlgmr.msra.gmra.mxu0 %v11597_v31 }
 0x5e7   : > { %10034 = vmatpush1.bf16.msra.mxu1 %v11594_v42  ;;  %10010 = vmatprep.mubr.bf16.mxu0 %v10775_v39 }
 0x5ea   : > { %10813 = vmatmul.mubr.msk.bf16.vlgmr.msra.gmra.mxu1 %vm6518_vm6, %v11600_v51 }
 0x5eb   : > { %10061 = vmatprep.mubr.bf16.mxu1 %v16232_v53 }
 0x5ee   : > { %10011 = vmatmul.mubr.bf16.gmra.mxu0 %v10774_v55 }
 0x5f2   : > { %10814 = vmatmul.mubr.msk.bf16.gmra.mxu1 %vm6518_vm6, %v11603_v8 }
 0x60e   : > { %v9063_v58 = vpop.f32.mrf.mxu1 }
 0x60f   : > { %v9115_v54 = vadd.f32 %v16007_v48, %v9063_v58 }
 0x610   : > { %v9065_v21 = vpop.f32.mrf.mxu1 }
 0x611   : > { %10118 = vst [vmem:[%s14955_s9 + $0x180] sm:$0xff] %v9115_v54  ;;  %v9117_v19 = vadd.f32 %v16013_v50, %v9065_v21 }
 0x612   : > { %v9067_v61 = vpop.f32.mrf.mxu1 }
 0x613   : > { %10119 = vst.msk [vmem:[%s14955_s9 + $0x188] sm:$0xff] %vm381_vm0, %v9117_v19  ;;  %v9119_v6 = vadd.f32 %v16018_v12, %v9067_v61 }
 0x614   : > { %v9069_v53 = vpop.f32.mrf.mxu1 }
 0x615   : > { %10120 = vst [vmem:[%s14955_s9 + $0x190] sm:$0xff] %v9119_v6  ;;  %v9121_v13 = vadd.f32 %v16025_v7, %v9069_v53 }
 0x616   : > { %v9073_v41 = vpop.f32.mrf.mxu1 }
 0x617   : > { %10121 = vst.msk [vmem:[%s14955_s9 + $0x198] sm:$0xff] %vm381_vm0, %v9121_v13  ;;  %v9125_v48 = vadd.f32 %v16029_v62, %v9073_v41 }
 0x618   : > { %v9075_v9 = vpop.f32.mrf.mxu1 }
 0x619   : > { %10122 = vst [vmem:[%s14955_s9 + $0x1a0] sm:$0xff] %v9125_v48  ;;  %v9127_v50 = vadd.f32 %v16035_v49, %v9075_v9 }
 0x61a   : > { %v9077_v11 = vpop.f32.mrf.mxu1 }
 0x61b   : > { %10123 = vst.msk [vmem:[%s14955_s9 + $0x1a8] sm:$0xff] %vm381_vm0, %v9127_v50 }
 0x61c   : > { %v9078_v63 = vpop.f32.mrf.mxu1 }
 0x626   : > { %v9427_v12 = vpop.f32.mrf.mxu1 }
 0x628   : > { %v9429_v34 = vpop.f32.mrf.mxu1 }
 0x62a   : > { %v9376_v37 = vpop.f32.mrf.mxu0  ;;  %v9431_v7 = vpop.f32.mrf.mxu1 }
 0x62b   : > { %v9428_v2 = vadd.f32 %v9427_v12, %v9376_v37 }
 0x62c   : > { %v9378_v46 = vpop.f32.mrf.mxu0  ;;  %v9433_v44 = vpop.f32.mrf.mxu1 }
 0x62d   : > { %10124 = vst [vmem:[%s14955_s9 + $0x1b0] sm:$0xff] %v9428_v2  ;;  %v9430_v3 = vadd.f32 %v9429_v34, %v9378_v46 }
 0x62e   : > { %v9380_v0 = vpop.f32.mrf.mxu0  ;;  %v9437_v62 = vpop.f32.mrf.mxu1 }
 0x62f   : > { %10125 = vst.msk [vmem:[%s14955_s9 + $0x1b8] sm:$0xff] %vm381_vm0, %v9430_v3  ;;  %v9432_v45 = vadd.f32 %v9431_v7, %v9380_v0 }
 0x630   : > { %v9382_v20 = vpop.f32.mrf.mxu0  ;;  %v9439_v38 = vpop.f32.mrf.mxu1 }
 0x631   : > { %10126 = vst [vmem:[%s14955_s9 + $0x1c0] sm:$0xff] %v9432_v45  ;;  %v9434_v26 = vadd.f32 %v9433_v44, %v9382_v20 }
 0x632   : > { %v9386_v49 = vpop.f32.mrf.mxu0  ;;  %v9441_v14 = vpop.f32.mrf.mxu1 }
 0x633   : > { %10127 = vst.msk [vmem:[%s14955_s9 + $0x1c8] sm:$0xff] %vm381_vm0, %v9434_v26  ;;  %v9438_v28 = vadd.f32 %v9437_v62, %v9386_v49 }
 0x634   : > { %v9388_v5 = vpop.f32.mrf.mxu0  ;;  %v9442_v4 = vpop.f32.mrf.mxu1 }
 0x635   : > { %10128 = vst [vmem:[%s14955_s9 + $0x1d0] sm:$0xff] %v9438_v28  ;;  %v9440_v16 = vadd.f32 %v9439_v38, %v9388_v5 }
 0x636   : > { %v9390_v25 = vpop.f32.mrf.mxu0 }
 0x637   : > { %10129 = vst.msk [vmem:[%s14955_s9 + $0x1d8] sm:$0xff] %vm381_vm0, %v9440_v16 }
 0x638   : > { %v9391_v36 = vpop.f32.mrf.mxu0 }
 0x642   : > { %v9740_v22 = vpop.f32.mrf.mxu0 }
 0x644   : > { %v9742_v18 = vpop.f32.mrf.mxu0 }
 0x646   : > { %v9744_v24 = vpop.f32.mrf.mxu0 }
 0x648   : > { %v9746_v56 = vpop.f32.mrf.mxu0 }
 0x64a   : > { %v9750_v30 = vpop.f32.mrf.mxu0 }
 0x64c   : > { %v9752_v33 = vpop.f32.mrf.mxu0 }
 0x64e   : > { %v9754_v43 = vpop.f32.mrf.mxu0 }
 0x650   : > { %v9755_v27 = vpop.f32.mrf.mxu0 }
 0x68e   : > { %v9689_v57 = vpop.f32.mrf.mxu1 }
 0x68f   : > { %v9741_v17 = vadd.f32 %v9740_v22, %v9689_v57 }
 0x690   : > { %v9691_v23 = vpop.f32.mrf.mxu1 }
 0x691   : > { %10130 = vst [vmem:[%s14955_s9 + $0x1e0] sm:$0xff] %v9741_v17  ;;  %v9743_v35 = vadd.f32 %v9742_v18, %v9691_v23 }
 0x692   : > { %v9693_v47 = vpop.f32.mrf.mxu1 }
 0x693   : > { %10131 = vst.msk [vmem:[%s14955_s9 + $0x1e8] sm:$0xff] %vm381_vm0, %v9743_v35  ;;  %v9745_v10 = vadd.f32 %v9744_v24, %v9693_v47 }
 0x694   : > { %v9695_v52 = vpop.f32.mrf.mxu1 }
 0x695   : > { %10132 = vst [vmem:[%s14955_s9 + $0x1f0] sm:$0xff] %v9745_v10  ;;  %v9747_v29 = vadd.f32 %v9746_v56, %v9695_v52 }
 0x696   : > { %v9699_v32 = vpop.f32.mrf.mxu1 }
 0x697   : > { %10133 = vst.msk [vmem:[%s14955_s9 + $0x1f8] sm:$0xff] %vm381_vm0, %v9747_v29  ;;  %v9751_v1 = vadd.f32 %v9750_v30, %v9699_v32 }
 0x698   : > { %v9701_v40 = vpop.f32.mrf.mxu1 }
 0x699   : > { %10134 = vst [vmem:[%s14955_s9 + $0x200] sm:$0xff] %v9751_v1  ;;  %v9753_v15 = vadd.f32 %v9752_v33, %v9701_v40 }
 0x69a   : > { %v9703_v60 = vpop.f32.mrf.mxu1 }
 0x69b   : > { %10135 = vst.msk [vmem:[%s14955_s9 + $0x208] sm:$0xff] %vm381_vm0, %v9753_v15 }
 0x69c   : > { %v9704_v31 = vpop.f32.mrf.mxu1 }
 0x6a6   : > { %v10002_v39 = vpop.f32.mrf.mxu0 }
 0x6a8   : > { %v10004_v42 = vpop.f32.mrf.mxu0 }
 0x6aa   : > { %v10053_v59 = vpop.f32.mrf.mxu1  ;;  %v10006_v51 = vpop.f32.mrf.mxu0 }
 0x6ab   : > { %v10054_v55 = vadd.f32 %v10053_v59, %v10002_v39 }
 0x6ac   : > { %v10055_v8 = vpop.f32.mrf.mxu1  ;;  %v10008_v58 = vpop.f32.mrf.mxu0 }
 0x6ad   : > { %10136 = vst [vmem:[%s14955_s9 + $0x210] sm:$0xff] %v10054_v55  ;;  %v10056_v54 = vadd.f32 %v10055_v8, %v10004_v42 }
 0x6ae   : > { %v10057_v21 = vpop.f32.mrf.mxu1  ;;  %v10012_v19 = vpop.f32.mrf.mxu0 }
 0x6af   : > { %10137 = vst.msk [vmem:[%s14955_s9 + $0x218] sm:$0xff] %vm381_vm0, %v10056_v54  ;;  %v10058_v61 = vadd.f32 %v10057_v21, %v10006_v51 }
 0x6b0   : > { %v10059_v6 = vpop.f32.mrf.mxu1  ;;  %v10014_v53 = vpop.f32.mrf.mxu0 }
 0x6b1   : > { %10138 = vst [vmem:[%s14955_s9 + $0x220] sm:$0xff] %v10058_v61  ;;  %v10060_v13 = vadd.f32 %v10059_v6, %v10008_v58 }
 0x6b2   : > { %v10063_v41 = vpop.f32.mrf.mxu1  ;;  %v10016_v48 = vpop.f32.mrf.mxu0 }
 0x6b3   : > { %10139 = vst.msk [vmem:[%s14955_s9 + $0x228] sm:$0xff] %vm381_vm0, %v10060_v13  ;;  %v10064_v9 = vadd.f32 %v10063_v41, %v10012_v19 }
 0x6b4   : > { %v10065_v50 = vpop.f32.mrf.mxu1  ;;  %v10017_v11 = vpop.f32.mrf.mxu0 }
 0x6b5   : > { %10140 = vst [vmem:[%s14955_s9 + $0x230] sm:$0xff] %v10064_v9  ;;  %v10066_v63 = vadd.f32 %v10065_v50, %v10014_v53 }
 0x6b6   : > { %v10067_v12 = vpop.f32.mrf.mxu1 }
 0x6b7   : > { %10141 = vst.msk [vmem:[%s14955_s9 + $0x238] sm:$0xff] %vm381_vm0, %v10066_v63 }
 0x6b8   : > { %v10068_v34 = vpop.f32.mrf.mxu1 }
 0x6b9 PF: > { %s15_s18 = sadd.s32 1, %s11759_s18  }
 0x6ba   : > { %p12_p4 = scmp.ge.s32.totalorder %s15_s18, 4  }
 0x6bc   :  { %14 = sbr.rel (!%p12_p4) target bundleno = 1 (0x1), region = 80 }

</bundles_post_ra>
